<compile_context>
chip_gen: v6e
topology: v6e:2x2x1
jax: 0.10.0
libtpu: 0.0.40
codegen_flags: <defaults>
</compile_context>

<pallas_src>
import functools

import jax
import jax.numpy as jnp
from jax.experimental import pallas as pl
from jax.experimental.pallas import tpu as pltpu


def _round_up(x, m):
    return (x + m - 1) // m * m


_MOSAIC_PARAMS = pltpu.CompilerParams(
    dimension_semantics=("parallel",),
    vmem_limit_bytes=32 * 1024 * 1024,
)


# ----------------------------------------------------------------------------
# Fused conv (valid, stride 1) + bias + ReLU (+ optional 2x2 max-pool)
# ----------------------------------------------------------------------------
def _conv_kernel(x_ref, w_ref, b_ref, o_ref, acc_ref, *, kh, kw, W, Ho, Wo, pool):
    """One grid step processes a block of `nb` images.

    x_ref  : (nb, H*W, Cin)         bf16  flattened NHWC images (row q = h*W+w)
    w_ref  : (kh*kw*Cin, Cout)      bf16  row = (i*kw + j)*Cin + c
    b_ref  : (1, Cout)              f32
    o_ref  : (nb, Hp*Wp, Cout)      bf16  pooled   (row = hp*Wp + wp)  if pool
             (nb, Ho*Wo, Cout)      bf16  unpooled (row = ho*Wo + wo)  else
    acc_ref: (nb*Lq8 + slack, Cout) f32   VMEM matmul-result scratch
    """
    nb, _, Cin = x_ref.shape
    Lq = (Ho - 1) * W + Wo           # flattened rows covering all valid (ho, wo)
    Lq8 = _round_up(Lq, 8)           # per-image row stride inside acc_ref

    # ---- im2col: fold the kh*kw taps into the contraction dim K ------------
    # Row q = ho*W + wo of the patch matrix is [x[ho+i, wo+j, :] for all taps],
    # read as sublane-shifted views of the flattened image held in VMEM.  Rows
    # with wo >= Wo are seam garbage and never reach the output.
    def image_cols(b):
        return jnp.concatenate(
            [x_ref[b, pl.ds(i * W + j, Lq), :]
             for i in range(kh) for j in range(kw)],
            axis=1)                                       # (Lq, kh*kw*Cin) bf16

    if nb * Lq <= 256:
        # Tiny conv (conv3): also fold the batch into the matmul M dimension.
        cols = jnp.concatenate([image_cols(b) for b in range(nb)], axis=0)
        res = jnp.dot(cols, w_ref[...], preferred_element_type=jnp.float32)
        for b in range(nb):
            acc_ref[pl.ds(b * Lq8, Lq), :] = res[b * Lq:(b + 1) * Lq, :]
    else:
        for b in range(nb):
            acc_ref[pl.ds(b * Lq8, Lq), :] = jnp.dot(
                image_cols(b), w_ref[...], preferred_element_type=jnp.float32)

    # ---- f32 epilogue: (max-pool) + bias + ReLU + seam removal --------------
    bias = b_ref[...]                                      # (1, Cout) f32
    if pool:
        Hp, Wp = Ho // 2, Wo // 2
        for b in range(nb):
            base = b * Lq8
            p = None
            for dh in range(2):
                for dw in range(2):
                    # Row (hp*W + wp) of this stride-2 view is the conv output
                    # at spatial position (2*hp + dh, 2*wp + dw).
                    v = acc_ref[pl.ds(base + dh * W + dw, Hp * W, stride=2), :]
                    p = v if p is None else jnp.maximum(p, v)
            p = jnp.maximum(p + bias, 0.0).astype(o_ref.dtype)  # (Hp*W, Cout)
            for hp in range(Hp):                # drop the wp >= Wp seam columns
                o_ref[b, pl.ds(hp * Wp, Wp), :] = p[hp * W:hp * W + Wp, :]
    else:
        for b in range(nb):
            base = b * Lq8
            for ho in range(Ho):                # drop the wo >= Wo seam columns
                v = acc_ref[pl.ds(base + ho * W, Wo), :]
                o_ref[b, pl.ds(ho * Wo, Wo), :] = (
                    jnp.maximum(v + bias, 0.0).astype(o_ref.dtype))


def conv2d_relu(x, w, b, *, H, W, Cout, kh=3, kw=3, pool, max_nb=8):
    """x: (N, H*W, Cin) bf16; w: (kh*kw*Cin, Cout) bf16; b: (Cout,) f32.

    Returns flattened-NHWC bf16: (N, Hp*Wp, Cout) if pool else (N, Ho*Wo, Cout),
    directly consumable as the next stage's (N, H'*W', Cin') input.
    """
    N = x.shape[0]
    Cin = x.shape[2]
    assert x.shape[1] == H * W
    Ho, Wo = H - kh + 1, W - kw + 1
    Hp, Wp = Ho // 2, Wo // 2
    out_rows = Hp * Wp if pool else Ho * Wo
    Lq = (Ho - 1) * W + Wo
    Lq8 = _round_up(Lq, 8)

    # Images per grid step: large enough to amortize the ~0.35us/step overhead,
    # small enough that the grid keeps >= 2 steps (v7x has 2 TensorCores).
    nb = min(max_nb, max(1, (N + 1) // 2))
    Np = _round_up(N, nb)
    if Np != N:
        x = jnp.pad(x, ((0, Np - N), (0, 0), (0, 0)))

    # Tail slack so the strided pooling reads of the last image stay in bounds.
    slack = max(0, (2 * Hp + 1) * W - Lq8) if pool else 0

    out = pl.pallas_call(
        functools.partial(_conv_kernel, kh=kh, kw=kw, W=W, Ho=Ho, Wo=Wo,
                          pool=pool),
        grid=(Np // nb,),
        out_shape=jax.ShapeDtypeStruct((Np, out_rows, Cout), jnp.bfloat16),
        in_specs=[
            pl.BlockSpec((nb, H * W, Cin), lambda g: (g, 0, 0)),
            pl.BlockSpec((kh * kw * Cin, Cout), lambda g: (0, 0)),
            pl.BlockSpec((1, Cout), lambda g: (0, 0)),
        ],
        out_specs=pl.BlockSpec((nb, out_rows, Cout), lambda g: (g, 0, 0)),
        scratch_shapes=[pltpu.VMEM((nb * Lq8 + slack, Cout), jnp.float32)],
        compiler_params=_MOSAIC_PARAMS,
    )(x, w, b.reshape(1, Cout))
    return out[:N] if Np != N else out


# ----------------------------------------------------------------------------
# Fused FC head: relu(x @ w1 + b1) @ w2 + b2, tiled over rows
# ----------------------------------------------------------------------------
def _fc_kernel(x_ref, w1_ref, b1_ref, w2_ref, b2_ref, o_ref):
    h = jnp.dot(x_ref[...], w1_ref[...], preferred_element_type=jnp.float32)
    h = jnp.maximum(h + b1_ref[...], 0.0).astype(x_ref.dtype)   # stays in VMEM
    y = jnp.dot(h, w2_ref[...], preferred_element_type=jnp.float32)
    o_ref[...] = (y + b2_ref[...]).astype(o_ref.dtype)


def fc_head(x, w1, b1, w2, b2, *, tm_max=256):
    """x: (M, K) bf16; w1: (K, Nh) bf16; w2: (Nh, No) bf16 -> (M, No) f32."""
    M, K = x.shape
    Nh, No = w1.shape[1], w2.shape[1]
    Mp = _round_up(M, 8)
    tm = min(tm_max, Mp)
    if Mp > 8 and Mp // tm < 2:        # keep >= 2 grid steps for v7x's 2 TCs
        tm = _round_up((Mp + 1) // 2, 8)
    Mp = _round_up(Mp, tm)
    if Mp != M:
        x = jnp.pad(x, ((0, Mp - M), (0, 0)))
    out = pl.pallas_call(
        _fc_kernel,
        grid=(Mp // tm,),
        out_shape=jax.ShapeDtypeStruct((Mp, No), jnp.float32),
        in_specs=[
            pl.BlockSpec((tm, K), lambda i: (i, 0)),
            pl.BlockSpec((K, Nh), lambda i: (0, 0)),
            pl.BlockSpec((1, Nh), lambda i: (0, 0)),
            pl.BlockSpec((Nh, No), lambda i: (0, 0)),
            pl.BlockSpec((1, No), lambda i: (0, 0)),
        ],
        out_specs=pl.BlockSpec((tm, No), lambda i: (i, 0)),
        compiler_params=_MOSAIC_PARAMS,
    )(x, w1, b1.reshape(1, Nh), w2, b2.reshape(1, No))
    return out[:M] if Mp != M else out


# ----------------------------------------------------------------------------
# Parameters (PyTorch layout + default init) and one-time layout preparation
# ----------------------------------------------------------------------------
def init_params(key):
    def uniform(k, shape, fan_in):
        bound = 1.0 / float(fan_in) ** 0.5   # PyTorch default init bound
        return jax.random.uniform(k, shape, jnp.float32, -bound, bound)

    ks = jax.random.split(key, 10)
    return {
        "conv1_w": uniform(ks[0], (32, 3, 3, 3), 3 * 3 * 3),
        "conv1_b": uniform(ks[1], (32,), 3 * 3 * 3),
        "conv2_w": uniform(ks[2], (64, 32, 3, 3), 32 * 3 * 3),
        "conv2_b": uniform(ks[3], (64,), 32 * 3 * 3),
        "conv3_w": uniform(ks[4], (64, 64, 3, 3), 64 * 3 * 3),
        "conv3_b": uniform(ks[5], (64,), 64 * 3 * 3),
        "fc1_w": uniform(ks[6], (64, 64 * 4 * 4), 64 * 4 * 4),  # (out, in=(C,H,W))
        "fc1_b": uniform(ks[7], (64,), 64 * 4 * 4),
        "fc2_w": uniform(ks[8], (10, 64), 64),
        "fc2_b": uniform(ks[9], (10,), 64),
    }


def prepare_params(p):
    """One-time conversion of PyTorch-layout params to kernel-friendly layout."""
    def conv_w(w):   # (Cout,Cin,kh,kw) -> (kh*kw*Cin, Cout) bf16, im2col order
        Cout, Cin, kh, kw = w.shape
        return (jnp.transpose(w, (2, 3, 1, 0))
                .reshape(kh * kw * Cin, Cout).astype(jnp.bfloat16))

    # fc1 columns are a flattened NCHW (C=64,H=4,W=4) vector; our activations
    # flatten as (H,W,C), so permute columns and pre-transpose to (K, out).
    fc1 = p["fc1_w"].reshape(64, 64, 4, 4)                 # (out, C, H, W)
    fc1 = jnp.transpose(fc1, (2, 3, 1, 0)).reshape(4 * 4 * 64, 64)

    return {
        "conv1_w": conv_w(p["conv1_w"]), "conv1_b": p["conv1_b"],
        "conv2_w": conv_w(p["conv2_w"]), "conv2_b": p["conv2_b"],
        "conv3_w": conv_w(p["conv3_w"]), "conv3_b": p["conv3_b"],
        "fc1_w": fc1.astype(jnp.bfloat16), "fc1_b": p["fc1_b"],
        "fc2_w": p["fc2_w"].T.astype(jnp.bfloat16), "fc2_b": p["fc2_b"],
    }


def convnet_forward(params, x):
    """x: (N, 3, 32, 32) float32 (PyTorch NCHW).  Returns (N, 10) float32."""
    N = x.shape[0]
    x = jnp.transpose(x, (0, 2, 3, 1)).astype(jnp.bfloat16)        # NHWC bf16
    x = x.reshape(N, 32 * 32, 3)
    # TODO(synk): conv1's 3-channel input block still DMAs 6-byte row segments;
    # a lane-dense (H, W*Cin) presentation would require an in-kernel relayout.
    x = conv2d_relu(x, params["conv1_w"], params["conv1_b"],
                    H=32, W=32, Cout=32, pool=True)                # (N, 225, 32)
    x = conv2d_relu(x, params["conv2_w"], params["conv2_b"],
                    H=15, W=15, Cout=64, pool=True)                # (N, 36, 64)
    x = conv2d_relu(x, params["conv3_w"], params["conv3_b"],
                    H=6, W=6, Cout=64, pool=False)                 # (N, 16, 64)
    x = x.reshape(N, 16 * 64)                                      # (H,W,C) flatten
    return fc_head(x, params["fc1_w"], params["fc1_b"],
                   params["fc2_w"], params["fc2_b"])               # (N, 10) f32


# ----------------------------------------------------------------------------
# Pure-JAX float32 reference (PyTorch semantics), for a loose sanity check
# ----------------------------------------------------------------------------
def convnet_reference(raw, x):
    y = jnp.transpose(x, (0, 2, 3, 1))                             # NHWC f32

    def conv(y, wk, bk):
        k = jnp.transpose(raw[wk], (2, 3, 1, 0))                   # HWIO
        y = jax.lax.conv_general_dilated(
            y, k, (1, 1), "VALID", dimension_numbers=("NHWC", "HWIO", "NHWC"))
        return jax.nn.relu(y + raw[bk])

    def pool(y):
        return jax.lax.reduce_window(y, -jnp.inf, jax.lax.max,
                                     (1, 2, 2, 1), (1, 2, 2, 1), "VALID")

    y = pool(conv(y, "conv1_w", "conv1_b"))
    y = pool(conv(y, "conv2_w", "conv2_b"))
    y = conv(y, "conv3_w", "conv3_b")
    y = jnp.transpose(y, (0, 3, 1, 2)).reshape(y.shape[0], -1)     # NCHW flatten
    y = jax.nn.relu(y @ raw["fc1_w"].T + raw["fc1_b"])
    return y @ raw["fc2_w"].T + raw["fc2_b"]


if __name__ == "__main__":
    key = jax.random.PRNGKey(0)
    k_params, k_x = jax.random.split(key)
    raw = init_params(k_params)
    params = prepare_params(raw)
    # fc1 expects 64*4*4 features -> spatial input must be 32x32; batch = 2.
    x = jax.random.normal(k_x, (2, 3, 32, 32), dtype=jnp.float32)

    fwd = jax.jit(convnet_forward)
    out = jax.block_until_ready(fwd(params, x))
    assert out.shape == (2, 10) and out.dtype == jnp.float32
    assert bool(jnp.all(jnp.isfinite(out)))

    # Loose tolerance: kernel path is bf16 activations/weights vs f32 reference.
    ref = convnet_reference(raw, x)
    err = float(jnp.max(jnp.abs(out - ref)))
    scale = float(jnp.max(jnp.abs(ref)))
    assert err <= 0.1 + 0.05 * scale, (err, scale)
    print("KERNEL_OK")
</pallas_src>

<mosaic_0001>
module attributes {stable_mosaic.version = 11 : i64} {
  func.func @_conv_kernel(%arg0: i32, %arg1: memref<1x1024x3xbf16, #tpu.memory_space<vmem>>, %arg2: memref<27x32xbf16, #tpu.memory_space<vmem>>, %arg3: memref<1x32xf32, #tpu.memory_space<vmem>>, %arg4: memref<1x225x32xbf16, #tpu.memory_space<vmem>>, %arg5: memref<992x32xf32, #tpu.memory_space<vmem>>) attributes {dimension_semantics = [#tpu.dimension_semantics<parallel>], iteration_bounds = array<i64: 2>, scalar_prefetch = 0 : i64, scratch_operands = 1 : i64, tpu.core_type = #tpu.core_type<tc>, window_params = [{transform_indices = @transform_0, window_bounds = array<i64: 1, 1024, 3>}, {pipeline_mode = #tpu.pipeline_mode<synchronous>, transform_indices = @transform_1, window_bounds = array<i64: 27, 32>}, {pipeline_mode = #tpu.pipeline_mode<synchronous>, transform_indices = @transform_2, window_bounds = array<i64: 1, 32>}, {transform_indices = @transform_3, window_bounds = array<i64: 1, 225, 32>}]} {
    %c0 = arith.constant 0 : index
    %c0_0 = arith.constant 0 : index
    %c0_1 = arith.constant 0 : index
    %0 = vector.load %arg1[%c0, %c0_0, %c0_1] : memref<1x1024x3xbf16, #tpu.memory_space<vmem>>, vector<1x958x3xbf16>
    %1 = vector.shape_cast %0 : vector<1x958x3xbf16> to vector<958x3xbf16>
    %c0_2 = arith.constant 0 : index
    %c1 = arith.constant 1 : index
    %c0_3 = arith.constant 0 : index
    %2 = vector.load %arg1[%c0_2, %c1, %c0_3] : memref<1x1024x3xbf16, #tpu.memory_space<vmem>>, vector<1x958x3xbf16>
    %3 = vector.shape_cast %2 : vector<1x958x3xbf16> to vector<958x3xbf16>
    %c0_4 = arith.constant 0 : index
    %c2 = arith.constant 2 : index
    %c0_5 = arith.constant 0 : index
    %4 = vector.load %arg1[%c0_4, %c2, %c0_5] : memref<1x1024x3xbf16, #tpu.memory_space<vmem>>, vector<1x958x3xbf16>
    %5 = vector.shape_cast %4 : vector<1x958x3xbf16> to vector<958x3xbf16>
    %c0_6 = arith.constant 0 : index
    %c32 = arith.constant 32 : index
    %c0_7 = arith.constant 0 : index
    %6 = vector.load %arg1[%c0_6, %c32, %c0_7] : memref<1x1024x3xbf16, #tpu.memory_space<vmem>>, vector<1x958x3xbf16>
    %7 = vector.shape_cast %6 : vector<1x958x3xbf16> to vector<958x3xbf16>
    %c0_8 = arith.constant 0 : index
    %c33 = arith.constant 33 : index
    %c0_9 = arith.constant 0 : index
    %8 = vector.load %arg1[%c0_8, %c33, %c0_9] : memref<1x1024x3xbf16, #tpu.memory_space<vmem>>, vector<1x958x3xbf16>
    %9 = vector.shape_cast %8 : vector<1x958x3xbf16> to vector<958x3xbf16>
    %c0_10 = arith.constant 0 : index
    %c34 = arith.constant 34 : index
    %c0_11 = arith.constant 0 : index
    %10 = vector.load %arg1[%c0_10, %c34, %c0_11] : memref<1x1024x3xbf16, #tpu.memory_space<vmem>>, vector<1x958x3xbf16>
    %11 = vector.shape_cast %10 : vector<1x958x3xbf16> to vector<958x3xbf16>
    %c0_12 = arith.constant 0 : index
    %c64 = arith.constant 64 : index
    %c0_13 = arith.constant 0 : index
    %12 = vector.load %arg1[%c0_12, %c64, %c0_13] : memref<1x1024x3xbf16, #tpu.memory_space<vmem>>, vector<1x958x3xbf16>
    %13 = vector.shape_cast %12 : vector<1x958x3xbf16> to vector<958x3xbf16>
    %c0_14 = arith.constant 0 : index
    %c65 = arith.constant 65 : index
    %c0_15 = arith.constant 0 : index
    %14 = vector.load %arg1[%c0_14, %c65, %c0_15] : memref<1x1024x3xbf16, #tpu.memory_space<vmem>>, vector<1x958x3xbf16>
    %15 = vector.shape_cast %14 : vector<1x958x3xbf16> to vector<958x3xbf16>
    %c0_16 = arith.constant 0 : index
    %c66 = arith.constant 66 : index
    %c0_17 = arith.constant 0 : index
    %16 = vector.load %arg1[%c0_16, %c66, %c0_17] : memref<1x1024x3xbf16, #tpu.memory_space<vmem>>, vector<1x958x3xbf16>
    %17 = vector.shape_cast %16 : vector<1x958x3xbf16> to vector<958x3xbf16>
    %18 = tpu.concatenate %1, %3, %5, %7, %9, %11, %13, %15, %17 in 1 : vector<958x3xbf16>, vector<958x3xbf16>, vector<958x3xbf16>, vector<958x3xbf16>, vector<958x3xbf16>, vector<958x3xbf16>, vector<958x3xbf16>, vector<958x3xbf16>, vector<958x3xbf16> -> vector<958x27xbf16>
    %c0_18 = arith.constant 0 : index
    %c0_19 = arith.constant 0 : index
    %19 = vector.load %arg2[%c0_18, %c0_19] : memref<27x32xbf16, #tpu.memory_space<vmem>>, vector<27x32xbf16>
    %cst = arith.constant dense<0.000000e+00> : vector<958x32xf32>
    %20 = tpu.matmul %18, %19, %cst {dimension_numbers = #tpu.dot_dimension_numbers<[1], [0], [0], [1], [0, 0, 1, 1], [], []>} : vector<958x27xbf16>, vector<27x32xbf16>, vector<958x32xf32> -> vector<958x32xf32>
    %c0_20 = arith.constant 0 : index
    %c0_21 = arith.constant 0 : index
    %21 = vector.load %arg5[%c0_20, %c0_21] : memref<992x32xf32, #tpu.memory_space<vmem>>, vector<958x32xf32>
    tpu.vector_store %arg5[%c0_20, %c0_21], %20 {strides = array<i32>} : memref<992x32xf32, #tpu.memory_space<vmem>>, vector<958x32xf32>,
    %c0_22 = arith.constant 0 : index
    %c0_23 = arith.constant 0 : index
    %22 = vector.load %arg3[%c0_22, %c0_23] : memref<1x32xf32, #tpu.memory_space<vmem>>, vector<1x32xf32>
    %c0_24 = arith.constant 0 : index
    %c0_25 = arith.constant 0 : index
    %23 = tpu.strided_load %arg5[%c0_24, %c0_25] {strides = array<i32: 2, 1>} : memref<992x32xf32, #tpu.memory_space<vmem>>, vector<480x32xf32>
    %c1_26 = arith.constant 1 : index
    %c0_27 = arith.constant 0 : index
    %24 = tpu.strided_load %arg5[%c1_26, %c0_27] {strides = array<i32: 2, 1>} : memref<992x32xf32, #tpu.memory_space<vmem>>, vector<480x32xf32>
    %25 = arith.maximumf %23, %24 : vector<480x32xf32>
    %c32_28 = arith.constant 32 : index
    %c0_29 = arith.constant 0 : index
    %26 = tpu.strided_load %arg5[%c32_28, %c0_29] {strides = array<i32: 2, 1>} : memref<992x32xf32, #tpu.memory_space<vmem>>, vector<480x32xf32>
    %27 = arith.maximumf %25, %26 : vector<480x32xf32>
    %c33_30 = arith.constant 33 : index
    %c0_31 = arith.constant 0 : index
    %28 = tpu.strided_load %arg5[%c33_30, %c0_31] {strides = array<i32: 2, 1>} : memref<992x32xf32, #tpu.memory_space<vmem>>, vector<480x32xf32>
    %29 = arith.maximumf %27, %28 : vector<480x32xf32>
    %30 = vector.broadcast %22 : vector<1x32xf32> to vector<480x32xf32>
    %31 = arith.addf %29, %30 : vector<480x32xf32>
    %cst_32 = arith.constant 0.000000e+00 : f32
    %32 = vector.broadcast %cst_32 : f32 to vector<480x32xf32>
    %33 = arith.maximumf %31, %32 : vector<480x32xf32>
    %34 = arith.truncf %33 : vector<480x32xf32> to vector<480x32xbf16>
    %35 = vector.extract_strided_slice %34 {offsets = [0, 0], sizes = [15, 32], strides = [1, 1]} : vector<480x32xbf16> to vector<15x32xbf16>
    %c0_33 = arith.constant 0 : index
    %c0_34 = arith.constant 0 : index
    %c0_35 = arith.constant 0 : index
    %36 = vector.load %arg4[%c0_33, %c0_34, %c0_35] : memref<1x225x32xbf16, #tpu.memory_space<vmem>>, vector<1x15x32xbf16>
    %37 = vector.shape_cast %36 : vector<1x15x32xbf16> to vector<15x32xbf16>
    %38 = vector.shape_cast %35 : vector<15x32xbf16> to vector<1x15x32xbf16>
    tpu.vector_store %arg4[%c0_33, %c0_34, %c0_35], %38 {strides = array<i32>} : memref<1x225x32xbf16, #tpu.memory_space<vmem>>, vector<1x15x32xbf16>,
    %39 = vector.extract_strided_slice %34 {offsets = [32, 0], sizes = [15, 32], strides = [1, 1]} : vector<480x32xbf16> to vector<15x32xbf16>
    %c0_36 = arith.constant 0 : index
    %c15 = arith.constant 15 : index
    %c0_37 = arith.constant 0 : index
    %40 = vector.load %arg4[%c0_36, %c15, %c0_37] : memref<1x225x32xbf16, #tpu.memory_space<vmem>>, vector<1x15x32xbf16>
    %41 = vector.shape_cast %40 : vector<1x15x32xbf16> to vector<15x32xbf16>
    %42 = vector.shape_cast %39 : vector<15x32xbf16> to vector<1x15x32xbf16>
    tpu.vector_store %arg4[%c0_36, %c15, %c0_37], %42 {strides = array<i32>} : memref<1x225x32xbf16, #tpu.memory_space<vmem>>, vector<1x15x32xbf16>,
    %43 = vector.extract_strided_slice %34 {offsets = [64, 0], sizes = [15, 32], strides = [1, 1]} : vector<480x32xbf16> to vector<15x32xbf16>
    %c0_38 = arith.constant 0 : index
    %c30 = arith.constant 30 : index
    %c0_39 = arith.constant 0 : index
    %44 = vector.load %arg4[%c0_38, %c30, %c0_39] : memref<1x225x32xbf16, #tpu.memory_space<vmem>>, vector<1x15x32xbf16>
    %45 = vector.shape_cast %44 : vector<1x15x32xbf16> to vector<15x32xbf16>
    %46 = vector.shape_cast %43 : vector<15x32xbf16> to vector<1x15x32xbf16>
    tpu.vector_store %arg4[%c0_38, %c30, %c0_39], %46 {strides = array<i32>} : memref<1x225x32xbf16, #tpu.memory_space<vmem>>, vector<1x15x32xbf16>,
    %47 = vector.extract_strided_slice %34 {offsets = [96, 0], sizes = [15, 32], strides = [1, 1]} : vector<480x32xbf16> to vector<15x32xbf16>
    %c0_40 = arith.constant 0 : index
    %c45 = arith.constant 45 : index
    %c0_41 = arith.constant 0 : index
    %48 = vector.load %arg4[%c0_40, %c45, %c0_41] : memref<1x225x32xbf16, #tpu.memory_space<vmem>>, vector<1x15x32xbf16>
    %49 = vector.shape_cast %48 : vector<1x15x32xbf16> to vector<15x32xbf16>
    %50 = vector.shape_cast %47 : vector<15x32xbf16> to vector<1x15x32xbf16>
    tpu.vector_store %arg4[%c0_40, %c45, %c0_41], %50 {strides = array<i32>} : memref<1x225x32xbf16, #tpu.memory_space<vmem>>, vector<1x15x32xbf16>,
    %51 = vector.extract_strided_slice %34 {offsets = [128, 0], sizes = [15, 32], strides = [1, 1]} : vector<480x32xbf16> to vector<15x32xbf16>
    %c0_42 = arith.constant 0 : index
    %c60 = arith.constant 60 : index
    %c0_43 = arith.constant 0 : index
    %52 = vector.load %arg4[%c0_42, %c60, %c0_43] : memref<1x225x32xbf16, #tpu.memory_space<vmem>>, vector<1x15x32xbf16>
    %53 = vector.shape_cast %52 : vector<1x15x32xbf16> to vector<15x32xbf16>
    %54 = vector.shape_cast %51 : vector<15x32xbf16> to vector<1x15x32xbf16>
    tpu.vector_store %arg4[%c0_42, %c60, %c0_43], %54 {strides = array<i32>} : memref<1x225x32xbf16, #tpu.memory_space<vmem>>, vector<1x15x32xbf16>,
    %55 = vector.extract_strided_slice %34 {offsets = [160, 0], sizes = [15, 32], strides = [1, 1]} : vector<480x32xbf16> to vector<15x32xbf16>
    %c0_44 = arith.constant 0 : index
    %c75 = arith.constant 75 : index
    %c0_45 = arith.constant 0 : index
    %56 = vector.load %arg4[%c0_44, %c75, %c0_45] : memref<1x225x32xbf16, #tpu.memory_space<vmem>>, vector<1x15x32xbf16>
    %57 = vector.shape_cast %56 : vector<1x15x32xbf16> to vector<15x32xbf16>
    %58 = vector.shape_cast %55 : vector<15x32xbf16> to vector<1x15x32xbf16>
    tpu.vector_store %arg4[%c0_44, %c75, %c0_45], %58 {strides = array<i32>} : memref<1x225x32xbf16, #tpu.memory_space<vmem>>, vector<1x15x32xbf16>,
    %59 = vector.extract_strided_slice %34 {offsets = [192, 0], sizes = [15, 32], strides = [1, 1]} : vector<480x32xbf16> to vector<15x32xbf16>
    %c0_46 = arith.constant 0 : index
    %c90 = arith.constant 90 : index
    %c0_47 = arith.constant 0 : index
    %60 = vector.load %arg4[%c0_46, %c90, %c0_47] : memref<1x225x32xbf16, #tpu.memory_space<vmem>>, vector<1x15x32xbf16>
    %61 = vector.shape_cast %60 : vector<1x15x32xbf16> to vector<15x32xbf16>
    %62 = vector.shape_cast %59 : vector<15x32xbf16> to vector<1x15x32xbf16>
    tpu.vector_store %arg4[%c0_46, %c90, %c0_47], %62 {strides = array<i32>} : memref<1x225x32xbf16, #tpu.memory_space<vmem>>, vector<1x15x32xbf16>,
    %63 = vector.extract_strided_slice %34 {offsets = [224, 0], sizes = [15, 32], strides = [1, 1]} : vector<480x32xbf16> to vector<15x32xbf16>
    %c0_48 = arith.constant 0 : index
    %c105 = arith.constant 105 : index
    %c0_49 = arith.constant 0 : index
    %64 = vector.load %arg4[%c0_48, %c105, %c0_49] : memref<1x225x32xbf16, #tpu.memory_space<vmem>>, vector<1x15x32xbf16>
    %65 = vector.shape_cast %64 : vector<1x15x32xbf16> to vector<15x32xbf16>
    %66 = vector.shape_cast %63 : vector<15x32xbf16> to vector<1x15x32xbf16>
    tpu.vector_store %arg4[%c0_48, %c105, %c0_49], %66 {strides = array<i32>} : memref<1x225x32xbf16, #tpu.memory_space<vmem>>, vector<1x15x32xbf16>,
    %67 = vector.extract_strided_slice %34 {offsets = [256, 0], sizes = [15, 32], strides = [1, 1]} : vector<480x32xbf16> to vector<15x32xbf16>
    %c0_50 = arith.constant 0 : index
    %c120 = arith.constant 120 : index
    %c0_51 = arith.constant 0 : index
    %68 = vector.load %arg4[%c0_50, %c120, %c0_51] : memref<1x225x32xbf16, #tpu.memory_space<vmem>>, vector<1x15x32xbf16>
    %69 = vector.shape_cast %68 : vector<1x15x32xbf16> to vector<15x32xbf16>
    %70 = vector.shape_cast %67 : vector<15x32xbf16> to vector<1x15x32xbf16>
    tpu.vector_store %arg4[%c0_50, %c120, %c0_51], %70 {strides = array<i32>} : memref<1x225x32xbf16, #tpu.memory_space<vmem>>, vector<1x15x32xbf16>,
    %71 = vector.extract_strided_slice %34 {offsets = [288, 0], sizes = [15, 32], strides = [1, 1]} : vector<480x32xbf16> to vector<15x32xbf16>
    %c0_52 = arith.constant 0 : index
    %c135 = arith.constant 135 : index
    %c0_53 = arith.constant 0 : index
    %72 = vector.load %arg4[%c0_52, %c135, %c0_53] : memref<1x225x32xbf16, #tpu.memory_space<vmem>>, vector<1x15x32xbf16>
    %73 = vector.shape_cast %72 : vector<1x15x32xbf16> to vector<15x32xbf16>
    %74 = vector.shape_cast %71 : vector<15x32xbf16> to vector<1x15x32xbf16>
    tpu.vector_store %arg4[%c0_52, %c135, %c0_53], %74 {strides = array<i32>} : memref<1x225x32xbf16, #tpu.memory_space<vmem>>, vector<1x15x32xbf16>,
    %75 = vector.extract_strided_slice %34 {offsets = [320, 0], sizes = [15, 32], strides = [1, 1]} : vector<480x32xbf16> to vector<15x32xbf16>
    %c0_54 = arith.constant 0 : index
    %c150 = arith.constant 150 : index
    %c0_55 = arith.constant 0 : index
    %76 = vector.load %arg4[%c0_54, %c150, %c0_55] : memref<1x225x32xbf16, #tpu.memory_space<vmem>>, vector<1x15x32xbf16>
    %77 = vector.shape_cast %76 : vector<1x15x32xbf16> to vector<15x32xbf16>
    %78 = vector.shape_cast %75 : vector<15x32xbf16> to vector<1x15x32xbf16>
    tpu.vector_store %arg4[%c0_54, %c150, %c0_55], %78 {strides = array<i32>} : memref<1x225x32xbf16, #tpu.memory_space<vmem>>, vector<1x15x32xbf16>,
    %79 = vector.extract_strided_slice %34 {offsets = [352, 0], sizes = [15, 32], strides = [1, 1]} : vector<480x32xbf16> to vector<15x32xbf16>
    %c0_56 = arith.constant 0 : index
    %c165 = arith.constant 165 : index
    %c0_57 = arith.constant 0 : index
    %80 = vector.load %arg4[%c0_56, %c165, %c0_57] : memref<1x225x32xbf16, #tpu.memory_space<vmem>>, vector<1x15x32xbf16>
    %81 = vector.shape_cast %80 : vector<1x15x32xbf16> to vector<15x32xbf16>
    %82 = vector.shape_cast %79 : vector<15x32xbf16> to vector<1x15x32xbf16>
    tpu.vector_store %arg4[%c0_56, %c165, %c0_57], %82 {strides = array<i32>} : memref<1x225x32xbf16, #tpu.memory_space<vmem>>, vector<1x15x32xbf16>,
    %83 = vector.extract_strided_slice %34 {offsets = [384, 0], sizes = [15, 32], strides = [1, 1]} : vector<480x32xbf16> to vector<15x32xbf16>
    %c0_58 = arith.constant 0 : index
    %c180 = arith.constant 180 : index
    %c0_59 = arith.constant 0 : index
    %84 = vector.load %arg4[%c0_58, %c180, %c0_59] : memref<1x225x32xbf16, #tpu.memory_space<vmem>>, vector<1x15x32xbf16>
    %85 = vector.shape_cast %84 : vector<1x15x32xbf16> to vector<15x32xbf16>
    %86 = vector.shape_cast %83 : vector<15x32xbf16> to vector<1x15x32xbf16>
    tpu.vector_store %arg4[%c0_58, %c180, %c0_59], %86 {strides = array<i32>} : memref<1x225x32xbf16, #tpu.memory_space<vmem>>, vector<1x15x32xbf16>,
    %87 = vector.extract_strided_slice %34 {offsets = [416, 0], sizes = [15, 32], strides = [1, 1]} : vector<480x32xbf16> to vector<15x32xbf16>
    %c0_60 = arith.constant 0 : index
    %c195 = arith.constant 195 : index
    %c0_61 = arith.constant 0 : index
    %88 = vector.load %arg4[%c0_60, %c195, %c0_61] : memref<1x225x32xbf16, #tpu.memory_space<vmem>>, vector<1x15x32xbf16>
    %89 = vector.shape_cast %88 : vector<1x15x32xbf16> to vector<15x32xbf16>
    %90 = vector.shape_cast %87 : vector<15x32xbf16> to vector<1x15x32xbf16>
    tpu.vector_store %arg4[%c0_60, %c195, %c0_61], %90 {strides = array<i32>} : memref<1x225x32xbf16, #tpu.memory_space<vmem>>, vector<1x15x32xbf16>,
    %91 = vector.extract_strided_slice %34 {offsets = [448, 0], sizes = [15, 32], strides = [1, 1]} : vector<480x32xbf16> to vector<15x32xbf16>
    %c0_62 = arith.constant 0 : index
    %c210 = arith.constant 210 : index
    %c0_63 = arith.constant 0 : index
    %92 = vector.load %arg4[%c0_62, %c210, %c0_63] : memref<1x225x32xbf16, #tpu.memory_space<vmem>>, vector<1x15x32xbf16>
    %93 = vector.shape_cast %92 : vector<1x15x32xbf16> to vector<15x32xbf16>
    %94 = vector.shape_cast %91 : vector<15x32xbf16> to vector<1x15x32xbf16>
    tpu.vector_store %arg4[%c0_62, %c210, %c0_63], %94 {strides = array<i32>} : memref<1x225x32xbf16, #tpu.memory_space<vmem>>, vector<1x15x32xbf16>,
    return
  }
  func.func @transform_0(%arg0: i32) -> (i32, i32, i32) {
    %c0_i32 = arith.constant 0 : i32
    %c0_i32_0 = arith.constant 0 : i32
    %c0_i32_1 = arith.constant 0 : i32
    return %arg0, %c0_i32, %c0_i32_0 : i32, i32, i32
  }
  func.func @transform_1(%arg0: i32) -> (i32, i32) {
    %c0_i32 = arith.constant 0 : i32
    %c0_i32_0 = arith.constant 0 : i32
    %c0_i32_1 = arith.constant 0 : i32
    return %c0_i32, %c0_i32_0 : i32, i32
  }
  func.func @transform_2(%arg0: i32) -> (i32, i32) {
    %c0_i32 = arith.constant 0 : i32
    %c0_i32_0 = arith.constant 0 : i32
    %c0_i32_1 = arith.constant 0 : i32
    return %c0_i32, %c0_i32_0 : i32, i32
  }
  func.func @transform_3(%arg0: i32) -> (i32, i32, i32) {
    %c0_i32 = arith.constant 0 : i32
    %c0_i32_0 = arith.constant 0 : i32
    %c0_i32_1 = arith.constant 0 : i32
    return %arg0, %c0_i32, %c0_i32_0 : i32, i32, i32
  }
}

module attributes {stable_mosaic.version = 11 : i64} {
  func.func @_conv_kernel(%arg0: i32, %arg1: memref<1x225x32xbf16, #tpu.memory_space<vmem>>, %arg2: memref<288x64xbf16, #tpu.memory_space<vmem>>, %arg3: memref<1x64xf32, #tpu.memory_space<vmem>>, %arg4: memref<1x36x64xbf16, #tpu.memory_space<vmem>>, %arg5: memref<200x64xf32, #tpu.memory_space<vmem>>) attributes {dimension_semantics = [#tpu.dimension_semantics<parallel>], iteration_bounds = array<i64: 2>, scalar_prefetch = 0 : i64, scratch_operands = 1 : i64, tpu.core_type = #tpu.core_type<tc>, window_params = [{transform_indices = @transform_0, window_bounds = array<i64: 1, 225, 32>}, {pipeline_mode = #tpu.pipeline_mode<synchronous>, transform_indices = @transform_1, window_bounds = array<i64: 288, 64>}, {pipeline_mode = #tpu.pipeline_mode<synchronous>, transform_indices = @transform_2, window_bounds = array<i64: 1, 64>}, {transform_indices = @transform_3, window_bounds = array<i64: 1, 36, 64>}]} {
    %c0 = arith.constant 0 : index
    %c0_0 = arith.constant 0 : index
    %c0_1 = arith.constant 0 : index
    %0 = vector.load %arg1[%c0, %c0_0, %c0_1] : memref<1x225x32xbf16, #tpu.memory_space<vmem>>, vector<1x193x32xbf16>
    %1 = vector.shape_cast %0 : vector<1x193x32xbf16> to vector<193x32xbf16>
    %c0_2 = arith.constant 0 : index
    %c1 = arith.constant 1 : index
    %c0_3 = arith.constant 0 : index
    %2 = vector.load %arg1[%c0_2, %c1, %c0_3] : memref<1x225x32xbf16, #tpu.memory_space<vmem>>, vector<1x193x32xbf16>
    %3 = vector.shape_cast %2 : vector<1x193x32xbf16> to vector<193x32xbf16>
    %c0_4 = arith.constant 0 : index
    %c2 = arith.constant 2 : index
    %c0_5 = arith.constant 0 : index
    %4 = vector.load %arg1[%c0_4, %c2, %c0_5] : memref<1x225x32xbf16, #tpu.memory_space<vmem>>, vector<1x193x32xbf16>
    %5 = vector.shape_cast %4 : vector<1x193x32xbf16> to vector<193x32xbf16>
    %c0_6 = arith.constant 0 : index
    %c15 = arith.constant 15 : index
    %c0_7 = arith.constant 0 : index
    %6 = vector.load %arg1[%c0_6, %c15, %c0_7] : memref<1x225x32xbf16, #tpu.memory_space<vmem>>, vector<1x193x32xbf16>
    %7 = vector.shape_cast %6 : vector<1x193x32xbf16> to vector<193x32xbf16>
    %c0_8 = arith.constant 0 : index
    %c16 = arith.constant 16 : index
    %c0_9 = arith.constant 0 : index
    %8 = vector.load %arg1[%c0_8, %c16, %c0_9] : memref<1x225x32xbf16, #tpu.memory_space<vmem>>, vector<1x193x32xbf16>
    %9 = vector.shape_cast %8 : vector<1x193x32xbf16> to vector<193x32xbf16>
    %c0_10 = arith.constant 0 : index
    %c17 = arith.constant 17 : index
    %c0_11 = arith.constant 0 : index
    %10 = vector.load %arg1[%c0_10, %c17, %c0_11] : memref<1x225x32xbf16, #tpu.memory_space<vmem>>, vector<1x193x32xbf16>
    %11 = vector.shape_cast %10 : vector<1x193x32xbf16> to vector<193x32xbf16>
    %c0_12 = arith.constant 0 : index
    %c30 = arith.constant 30 : index
    %c0_13 = arith.constant 0 : index
    %12 = vector.load %arg1[%c0_12, %c30, %c0_13] : memref<1x225x32xbf16, #tpu.memory_space<vmem>>, vector<1x193x32xbf16>
    %13 = vector.shape_cast %12 : vector<1x193x32xbf16> to vector<193x32xbf16>
    %c0_14 = arith.constant 0 : index
    %c31 = arith.constant 31 : index
    %c0_15 = arith.constant 0 : index
    %14 = vector.load %arg1[%c0_14, %c31, %c0_15] : memref<1x225x32xbf16, #tpu.memory_space<vmem>>, vector<1x193x32xbf16>
    %15 = vector.shape_cast %14 : vector<1x193x32xbf16> to vector<193x32xbf16>
    %c0_16 = arith.constant 0 : index
    %c32 = arith.constant 32 : index
    %c0_17 = arith.constant 0 : index
    %16 = vector.load %arg1[%c0_16, %c32, %c0_17] : memref<1x225x32xbf16, #tpu.memory_space<vmem>>, vector<1x193x32xbf16>
    %17 = vector.shape_cast %16 : vector<1x193x32xbf16> to vector<193x32xbf16>
    %18 = tpu.concatenate %1, %3, %5, %7, %9, %11, %13, %15, %17 in 1 : vector<193x32xbf16>, vector<193x32xbf16>, vector<193x32xbf16>, vector<193x32xbf16>, vector<193x32xbf16>, vector<193x32xbf16>, vector<193x32xbf16>, vector<193x32xbf16>, vector<193x32xbf16> -> vector<193x288xbf16>
    %c0_18 = arith.constant 0 : index
    %c0_19 = arith.constant 0 : index
    %19 = vector.load %arg2[%c0_18, %c0_19] : memref<288x64xbf16, #tpu.memory_space<vmem>>, vector<288x64xbf16>
    %cst = arith.constant dense<0.000000e+00> : vector<193x64xf32>
    %20 = tpu.matmul %18, %19, %cst {dimension_numbers = #tpu.dot_dimension_numbers<[1], [0], [0], [1], [0, 0, 1, 1], [], []>} : vector<193x288xbf16>, vector<288x64xbf16>, vector<193x64xf32> -> vector<193x64xf32>
    %c0_20 = arith.constant 0 : index
    %c0_21 = arith.constant 0 : index
    %21 = vector.load %arg5[%c0_20, %c0_21] : memref<200x64xf32, #tpu.memory_space<vmem>>, vector<193x64xf32>
    tpu.vector_store %arg5[%c0_20, %c0_21], %20 {strides = array<i32>} : memref<200x64xf32, #tpu.memory_space<vmem>>, vector<193x64xf32>,
    %c0_22 = arith.constant 0 : index
    %c0_23 = arith.constant 0 : index
    %22 = vector.load %arg3[%c0_22, %c0_23] : memref<1x64xf32, #tpu.memory_space<vmem>>, vector<1x64xf32>
    %c0_24 = arith.constant 0 : index
    %c0_25 = arith.constant 0 : index
    %23 = tpu.strided_load %arg5[%c0_24, %c0_25] {strides = array<i32: 2, 1>} : memref<200x64xf32, #tpu.memory_space<vmem>>, vector<90x64xf32>
    %c1_26 = arith.constant 1 : index
    %c0_27 = arith.constant 0 : index
    %24 = tpu.strided_load %arg5[%c1_26, %c0_27] {strides = array<i32: 2, 1>} : memref<200x64xf32, #tpu.memory_space<vmem>>, vector<90x64xf32>
    %25 = arith.maximumf %23, %24 : vector<90x64xf32>
    %c15_28 = arith.constant 15 : index
    %c0_29 = arith.constant 0 : index
    %26 = tpu.strided_load %arg5[%c15_28, %c0_29] {strides = array<i32: 2, 1>} : memref<200x64xf32, #tpu.memory_space<vmem>>, vector<90x64xf32>
    %27 = arith.maximumf %25, %26 : vector<90x64xf32>
    %c16_30 = arith.constant 16 : index
    %c0_31 = arith.constant 0 : index
    %28 = tpu.strided_load %arg5[%c16_30, %c0_31] {strides = array<i32: 2, 1>} : memref<200x64xf32, #tpu.memory_space<vmem>>, vector<90x64xf32>
    %29 = arith.maximumf %27, %28 : vector<90x64xf32>
    %30 = vector.broadcast %22 : vector<1x64xf32> to vector<90x64xf32>
    %31 = arith.addf %29, %30 : vector<90x64xf32>
    %cst_32 = arith.constant 0.000000e+00 : f32
    %32 = vector.broadcast %cst_32 : f32 to vector<90x64xf32>
    %33 = arith.maximumf %31, %32 : vector<90x64xf32>
    %34 = arith.truncf %33 : vector<90x64xf32> to vector<90x64xbf16>
    %35 = vector.extract_strided_slice %34 {offsets = [0, 0], sizes = [6, 64], strides = [1, 1]} : vector<90x64xbf16> to vector<6x64xbf16>
    %c0_33 = arith.constant 0 : index
    %c0_34 = arith.constant 0 : index
    %c0_35 = arith.constant 0 : index
    %36 = vector.load %arg4[%c0_33, %c0_34, %c0_35] : memref<1x36x64xbf16, #tpu.memory_space<vmem>>, vector<1x6x64xbf16>
    %37 = vector.shape_cast %36 : vector<1x6x64xbf16> to vector<6x64xbf16>
    %38 = vector.shape_cast %35 : vector<6x64xbf16> to vector<1x6x64xbf16>
    tpu.vector_store %arg4[%c0_33, %c0_34, %c0_35], %38 {strides = array<i32>} : memref<1x36x64xbf16, #tpu.memory_space<vmem>>, vector<1x6x64xbf16>,
    %39 = vector.extract_strided_slice %34 {offsets = [15, 0], sizes = [6, 64], strides = [1, 1]} : vector<90x64xbf16> to vector<6x64xbf16>
    %c0_36 = arith.constant 0 : index
    %c6 = arith.constant 6 : index
    %c0_37 = arith.constant 0 : index
    %40 = vector.load %arg4[%c0_36, %c6, %c0_37] : memref<1x36x64xbf16, #tpu.memory_space<vmem>>, vector<1x6x64xbf16>
    %41 = vector.shape_cast %40 : vector<1x6x64xbf16> to vector<6x64xbf16>
    %42 = vector.shape_cast %39 : vector<6x64xbf16> to vector<1x6x64xbf16>
    tpu.vector_store %arg4[%c0_36, %c6, %c0_37], %42 {strides = array<i32>} : memref<1x36x64xbf16, #tpu.memory_space<vmem>>, vector<1x6x64xbf16>,
    %43 = vector.extract_strided_slice %34 {offsets = [30, 0], sizes = [6, 64], strides = [1, 1]} : vector<90x64xbf16> to vector<6x64xbf16>
    %c0_38 = arith.constant 0 : index
    %c12 = arith.constant 12 : index
    %c0_39 = arith.constant 0 : index
    %44 = vector.load %arg4[%c0_38, %c12, %c0_39] : memref<1x36x64xbf16, #tpu.memory_space<vmem>>, vector<1x6x64xbf16>
    %45 = vector.shape_cast %44 : vector<1x6x64xbf16> to vector<6x64xbf16>
    %46 = vector.shape_cast %43 : vector<6x64xbf16> to vector<1x6x64xbf16>
    tpu.vector_store %arg4[%c0_38, %c12, %c0_39], %46 {strides = array<i32>} : memref<1x36x64xbf16, #tpu.memory_space<vmem>>, vector<1x6x64xbf16>,
    %47 = vector.extract_strided_slice %34 {offsets = [45, 0], sizes = [6, 64], strides = [1, 1]} : vector<90x64xbf16> to vector<6x64xbf16>
    %c0_40 = arith.constant 0 : index
    %c18 = arith.constant 18 : index
    %c0_41 = arith.constant 0 : index
    %48 = vector.load %arg4[%c0_40, %c18, %c0_41] : memref<1x36x64xbf16, #tpu.memory_space<vmem>>, vector<1x6x64xbf16>
    %49 = vector.shape_cast %48 : vector<1x6x64xbf16> to vector<6x64xbf16>
    %50 = vector.shape_cast %47 : vector<6x64xbf16> to vector<1x6x64xbf16>
    tpu.vector_store %arg4[%c0_40, %c18, %c0_41], %50 {strides = array<i32>} : memref<1x36x64xbf16, #tpu.memory_space<vmem>>, vector<1x6x64xbf16>,
    %51 = vector.extract_strided_slice %34 {offsets = [60, 0], sizes = [6, 64], strides = [1, 1]} : vector<90x64xbf16> to vector<6x64xbf16>
    %c0_42 = arith.constant 0 : index
    %c24 = arith.constant 24 : index
    %c0_43 = arith.constant 0 : index
    %52 = vector.load %arg4[%c0_42, %c24, %c0_43] : memref<1x36x64xbf16, #tpu.memory_space<vmem>>, vector<1x6x64xbf16>
    %53 = vector.shape_cast %52 : vector<1x6x64xbf16> to vector<6x64xbf16>
    %54 = vector.shape_cast %51 : vector<6x64xbf16> to vector<1x6x64xbf16>
    tpu.vector_store %arg4[%c0_42, %c24, %c0_43], %54 {strides = array<i32>} : memref<1x36x64xbf16, #tpu.memory_space<vmem>>, vector<1x6x64xbf16>,
    %55 = vector.extract_strided_slice %34 {offsets = [75, 0], sizes = [6, 64], strides = [1, 1]} : vector<90x64xbf16> to vector<6x64xbf16>
    %c0_44 = arith.constant 0 : index
    %c30_45 = arith.constant 30 : index
    %c0_46 = arith.constant 0 : index
    %56 = vector.load %arg4[%c0_44, %c30_45, %c0_46] : memref<1x36x64xbf16, #tpu.memory_space<vmem>>, vector<1x6x64xbf16>
    %57 = vector.shape_cast %56 : vector<1x6x64xbf16> to vector<6x64xbf16>
    %58 = vector.shape_cast %55 : vector<6x64xbf16> to vector<1x6x64xbf16>
    tpu.vector_store %arg4[%c0_44, %c30_45, %c0_46], %58 {strides = array<i32>} : memref<1x36x64xbf16, #tpu.memory_space<vmem>>, vector<1x6x64xbf16>,
    return
  }
  func.func @transform_0(%arg0: i32) -> (i32, i32, i32) {
    %c0_i32 = arith.constant 0 : i32
    %c0_i32_0 = arith.constant 0 : i32
    %c0_i32_1 = arith.constant 0 : i32
    return %arg0, %c0_i32, %c0_i32_0 : i32, i32, i32
  }
  func.func @transform_1(%arg0: i32) -> (i32, i32) {
    %c0_i32 = arith.constant 0 : i32
    %c0_i32_0 = arith.constant 0 : i32
    %c0_i32_1 = arith.constant 0 : i32
    return %c0_i32, %c0_i32_0 : i32, i32
  }
  func.func @transform_2(%arg0: i32) -> (i32, i32) {
    %c0_i32 = arith.constant 0 : i32
    %c0_i32_0 = arith.constant 0 : i32
    %c0_i32_1 = arith.constant 0 : i32
    return %c0_i32, %c0_i32_0 : i32, i32
  }
  func.func @transform_3(%arg0: i32) -> (i32, i32, i32) {
    %c0_i32 = arith.constant 0 : i32
    %c0_i32_0 = arith.constant 0 : i32
    %c0_i32_1 = arith.constant 0 : i32
    return %arg0, %c0_i32, %c0_i32_0 : i32, i32, i32
  }
}

module attributes {stable_mosaic.version = 11 : i64} {
  func.func @_conv_kernel(%arg0: i32, %arg1: memref<1x36x64xbf16, #tpu.memory_space<vmem>>, %arg2: memref<576x64xbf16, #tpu.memory_space<vmem>>, %arg3: memref<1x64xf32, #tpu.memory_space<vmem>>, %arg4: memref<1x16x64xbf16, #tpu.memory_space<vmem>>, %arg5: memref<24x64xf32, #tpu.memory_space<vmem>>) attributes {dimension_semantics = [#tpu.dimension_semantics<parallel>], iteration_bounds = array<i64: 2>, scalar_prefetch = 0 : i64, scratch_operands = 1 : i64, tpu.core_type = #tpu.core_type<tc>, window_params = [{transform_indices = @transform_0, window_bounds = array<i64: 1, 36, 64>}, {pipeline_mode = #tpu.pipeline_mode<synchronous>, transform_indices = @transform_1, window_bounds = array<i64: 576, 64>}, {pipeline_mode = #tpu.pipeline_mode<synchronous>, transform_indices = @transform_2, window_bounds = array<i64: 1, 64>}, {transform_indices = @transform_3, window_bounds = array<i64: 1, 16, 64>}]} {
    %c0 = arith.constant 0 : index
    %c0_0 = arith.constant 0 : index
    %c0_1 = arith.constant 0 : index
    %0 = vector.load %arg1[%c0, %c0_0, %c0_1] : memref<1x36x64xbf16, #tpu.memory_space<vmem>>, vector<1x22x64xbf16>
    %1 = vector.shape_cast %0 : vector<1x22x64xbf16> to vector<22x64xbf16>
    %c0_2 = arith.constant 0 : index
    %c1 = arith.constant 1 : index
    %c0_3 = arith.constant 0 : index
    %2 = vector.load %arg1[%c0_2, %c1, %c0_3] : memref<1x36x64xbf16, #tpu.memory_space<vmem>>, vector<1x22x64xbf16>
    %3 = vector.shape_cast %2 : vector<1x22x64xbf16> to vector<22x64xbf16>
    %c0_4 = arith.constant 0 : index
    %c2 = arith.constant 2 : index
    %c0_5 = arith.constant 0 : index
    %4 = vector.load %arg1[%c0_4, %c2, %c0_5] : memref<1x36x64xbf16, #tpu.memory_space<vmem>>, vector<1x22x64xbf16>
    %5 = vector.shape_cast %4 : vector<1x22x64xbf16> to vector<22x64xbf16>
    %c0_6 = arith.constant 0 : index
    %c6 = arith.constant 6 : index
    %c0_7 = arith.constant 0 : index
    %6 = vector.load %arg1[%c0_6, %c6, %c0_7] : memref<1x36x64xbf16, #tpu.memory_space<vmem>>, vector<1x22x64xbf16>
    %7 = vector.shape_cast %6 : vector<1x22x64xbf16> to vector<22x64xbf16>
    %c0_8 = arith.constant 0 : index
    %c7 = arith.constant 7 : index
    %c0_9 = arith.constant 0 : index
    %8 = vector.load %arg1[%c0_8, %c7, %c0_9] : memref<1x36x64xbf16, #tpu.memory_space<vmem>>, vector<1x22x64xbf16>
    %9 = vector.shape_cast %8 : vector<1x22x64xbf16> to vector<22x64xbf16>
    %c0_10 = arith.constant 0 : index
    %c8 = arith.constant 8 : index
    %c0_11 = arith.constant 0 : index
    %10 = vector.load %arg1[%c0_10, %c8, %c0_11] : memref<1x36x64xbf16, #tpu.memory_space<vmem>>, vector<1x22x64xbf16>
    %11 = vector.shape_cast %10 : vector<1x22x64xbf16> to vector<22x64xbf16>
    %c0_12 = arith.constant 0 : index
    %c12 = arith.constant 12 : index
    %c0_13 = arith.constant 0 : index
    %12 = vector.load %arg1[%c0_12, %c12, %c0_13] : memref<1x36x64xbf16, #tpu.memory_space<vmem>>, vector<1x22x64xbf16>
    %13 = vector.shape_cast %12 : vector<1x22x64xbf16> to vector<22x64xbf16>
    %c0_14 = arith.constant 0 : index
    %c13 = arith.constant 13 : index
    %c0_15 = arith.constant 0 : index
    %14 = vector.load %arg1[%c0_14, %c13, %c0_15] : memref<1x36x64xbf16, #tpu.memory_space<vmem>>, vector<1x22x64xbf16>
    %15 = vector.shape_cast %14 : vector<1x22x64xbf16> to vector<22x64xbf16>
    %c0_16 = arith.constant 0 : index
    %c14 = arith.constant 14 : index
    %c0_17 = arith.constant 0 : index
    %16 = vector.load %arg1[%c0_16, %c14, %c0_17] : memref<1x36x64xbf16, #tpu.memory_space<vmem>>, vector<1x22x64xbf16>
    %17 = vector.shape_cast %16 : vector<1x22x64xbf16> to vector<22x64xbf16>
    %18 = tpu.concatenate %1, %3, %5, %7, %9, %11, %13, %15, %17 in 1 : vector<22x64xbf16>, vector<22x64xbf16>, vector<22x64xbf16>, vector<22x64xbf16>, vector<22x64xbf16>, vector<22x64xbf16>, vector<22x64xbf16>, vector<22x64xbf16>, vector<22x64xbf16> -> vector<22x576xbf16>
    %c0_18 = arith.constant 0 : index
    %c0_19 = arith.constant 0 : index
    %19 = vector.load %arg2[%c0_18, %c0_19] : memref<576x64xbf16, #tpu.memory_space<vmem>>, vector<576x64xbf16>
    %cst = arith.constant dense<0.000000e+00> : vector<22x64xf32>
    %20 = tpu.matmul %18, %19, %cst {dimension_numbers = #tpu.dot_dimension_numbers<[1], [0], [0], [1], [0, 0, 1, 1], [], []>} : vector<22x576xbf16>, vector<576x64xbf16>, vector<22x64xf32> -> vector<22x64xf32>
    %c0_20 = arith.constant 0 : index
    %c0_21 = arith.constant 0 : index
    %21 = vector.load %arg5[%c0_20, %c0_21] : memref<24x64xf32, #tpu.memory_space<vmem>>, vector<22x64xf32>
    tpu.vector_store %arg5[%c0_20, %c0_21], %20 {strides = array<i32>} : memref<24x64xf32, #tpu.memory_space<vmem>>, vector<22x64xf32>,
    %c0_22 = arith.constant 0 : index
    %c0_23 = arith.constant 0 : index
    %22 = vector.load %arg3[%c0_22, %c0_23] : memref<1x64xf32, #tpu.memory_space<vmem>>, vector<1x64xf32>
    %c0_24 = arith.constant 0 : index
    %c0_25 = arith.constant 0 : index
    %23 = vector.load %arg5[%c0_24, %c0_25] : memref<24x64xf32, #tpu.memory_space<vmem>>, vector<4x64xf32>
    %24 = vector.broadcast %22 : vector<1x64xf32> to vector<4x64xf32>
    %25 = arith.addf %23, %24 : vector<4x64xf32>
    %cst_26 = arith.constant 0.000000e+00 : f32
    %26 = vector.broadcast %cst_26 : f32 to vector<4x64xf32>
    %27 = arith.maximumf %25, %26 : vector<4x64xf32>
    %28 = arith.truncf %27 : vector<4x64xf32> to vector<4x64xbf16>
    %c0_27 = arith.constant 0 : index
    %c0_28 = arith.constant 0 : index
    %c0_29 = arith.constant 0 : index
    %29 = vector.load %arg4[%c0_27, %c0_28, %c0_29] : memref<1x16x64xbf16, #tpu.memory_space<vmem>>, vector<1x4x64xbf16>
    %30 = vector.shape_cast %29 : vector<1x4x64xbf16> to vector<4x64xbf16>
    %31 = vector.shape_cast %28 : vector<4x64xbf16> to vector<1x4x64xbf16>
    tpu.vector_store %arg4[%c0_27, %c0_28, %c0_29], %31 {strides = array<i32>} : memref<1x16x64xbf16, #tpu.memory_space<vmem>>, vector<1x4x64xbf16>,
    %c6_30 = arith.constant 6 : index
    %c0_31 = arith.constant 0 : index
    %32 = vector.load %arg5[%c6_30, %c0_31] : memref<24x64xf32, #tpu.memory_space<vmem>>, vector<4x64xf32>
    %33 = vector.broadcast %22 : vector<1x64xf32> to vector<4x64xf32>
    %34 = arith.addf %32, %33 : vector<4x64xf32>
    %cst_32 = arith.constant 0.000000e+00 : f32
    %35 = vector.broadcast %cst_32 : f32 to vector<4x64xf32>
    %36 = arith.maximumf %34, %35 : vector<4x64xf32>
    %37 = arith.truncf %36 : vector<4x64xf32> to vector<4x64xbf16>
    %c0_33 = arith.constant 0 : index
    %c4 = arith.constant 4 : index
    %c0_34 = arith.constant 0 : index
    %38 = vector.load %arg4[%c0_33, %c4, %c0_34] : memref<1x16x64xbf16, #tpu.memory_space<vmem>>, vector<1x4x64xbf16>
    %39 = vector.shape_cast %38 : vector<1x4x64xbf16> to vector<4x64xbf16>
    %40 = vector.shape_cast %37 : vector<4x64xbf16> to vector<1x4x64xbf16>
    tpu.vector_store %arg4[%c0_33, %c4, %c0_34], %40 {strides = array<i32>} : memref<1x16x64xbf16, #tpu.memory_space<vmem>>, vector<1x4x64xbf16>,
    %c12_35 = arith.constant 12 : index
    %c0_36 = arith.constant 0 : index
    %41 = vector.load %arg5[%c12_35, %c0_36] : memref<24x64xf32, #tpu.memory_space<vmem>>, vector<4x64xf32>
    %42 = vector.broadcast %22 : vector<1x64xf32> to vector<4x64xf32>
    %43 = arith.addf %41, %42 : vector<4x64xf32>
    %cst_37 = arith.constant 0.000000e+00 : f32
    %44 = vector.broadcast %cst_37 : f32 to vector<4x64xf32>
    %45 = arith.maximumf %43, %44 : vector<4x64xf32>
    %46 = arith.truncf %45 : vector<4x64xf32> to vector<4x64xbf16>
    %c0_38 = arith.constant 0 : index
    %c8_39 = arith.constant 8 : index
    %c0_40 = arith.constant 0 : index
    %47 = vector.load %arg4[%c0_38, %c8_39, %c0_40] : memref<1x16x64xbf16, #tpu.memory_space<vmem>>, vector<1x4x64xbf16>
    %48 = vector.shape_cast %47 : vector<1x4x64xbf16> to vector<4x64xbf16>
    %49 = vector.shape_cast %46 : vector<4x64xbf16> to vector<1x4x64xbf16>
    tpu.vector_store %arg4[%c0_38, %c8_39, %c0_40], %49 {strides = array<i32>} : memref<1x16x64xbf16, #tpu.memory_space<vmem>>, vector<1x4x64xbf16>,
    %c18 = arith.constant 18 : index
    %c0_41 = arith.constant 0 : index
    %50 = vector.load %arg5[%c18, %c0_41] : memref<24x64xf32, #tpu.memory_space<vmem>>, vector<4x64xf32>
    %51 = vector.broadcast %22 : vector<1x64xf32> to vector<4x64xf32>
    %52 = arith.addf %50, %51 : vector<4x64xf32>
    %cst_42 = arith.constant 0.000000e+00 : f32
    %53 = vector.broadcast %cst_42 : f32 to vector<4x64xf32>
    %54 = arith.maximumf %52, %53 : vector<4x64xf32>
    %55 = arith.truncf %54 : vector<4x64xf32> to vector<4x64xbf16>
    %c0_43 = arith.constant 0 : index
    %c12_44 = arith.constant 12 : index
    %c0_45 = arith.constant 0 : index
    %56 = vector.load %arg4[%c0_43, %c12_44, %c0_45] : memref<1x16x64xbf16, #tpu.memory_space<vmem>>, vector<1x4x64xbf16>
    %57 = vector.shape_cast %56 : vector<1x4x64xbf16> to vector<4x64xbf16>
    %58 = vector.shape_cast %55 : vector<4x64xbf16> to vector<1x4x64xbf16>
    tpu.vector_store %arg4[%c0_43, %c12_44, %c0_45], %58 {strides = array<i32>} : memref<1x16x64xbf16, #tpu.memory_space<vmem>>, vector<1x4x64xbf16>,
    return
  }
  func.func @transform_0(%arg0: i32) -> (i32, i32, i32) {
    %c0_i32 = arith.constant 0 : i32
    %c0_i32_0 = arith.constant 0 : i32
    %c0_i32_1 = arith.constant 0 : i32
    return %arg0, %c0_i32, %c0_i32_0 : i32, i32, i32
  }
  func.func @transform_1(%arg0: i32) -> (i32, i32) {
    %c0_i32 = arith.constant 0 : i32
    %c0_i32_0 = arith.constant 0 : i32
    %c0_i32_1 = arith.constant 0 : i32
    return %c0_i32, %c0_i32_0 : i32, i32
  }
  func.func @transform_2(%arg0: i32) -> (i32, i32) {
    %c0_i32 = arith.constant 0 : i32
    %c0_i32_0 = arith.constant 0 : i32
    %c0_i32_1 = arith.constant 0 : i32
    return %c0_i32, %c0_i32_0 : i32, i32
  }
  func.func @transform_3(%arg0: i32) -> (i32, i32, i32) {
    %c0_i32 = arith.constant 0 : i32
    %c0_i32_0 = arith.constant 0 : i32
    %c0_i32_1 = arith.constant 0 : i32
    return %arg0, %c0_i32, %c0_i32_0 : i32, i32, i32
  }
}

module attributes {stable_mosaic.version = 11 : i64} {
  func.func @_fc_kernel(%arg0: i32, %arg1: memref<8x1024xbf16, #tpu.memory_space<vmem>>, %arg2: memref<1024x64xbf16, #tpu.memory_space<vmem>>, %arg3: memref<1x64xf32, #tpu.memory_space<vmem>>, %arg4: memref<64x10xbf16, #tpu.memory_space<vmem>>, %arg5: memref<1x10xf32, #tpu.memory_space<vmem>>, %arg6: memref<8x10xf32, #tpu.memory_space<vmem>>) attributes {dimension_semantics = [#tpu.dimension_semantics<parallel>], iteration_bounds = array<i64: 1>, scalar_prefetch = 0 : i64, scratch_operands = 0 : i64, tpu.core_type = #tpu.core_type<tc>, window_params = [{transform_indices = @transform_0, window_bounds = array<i64: 8, 1024>}, {pipeline_mode = #tpu.pipeline_mode<synchronous>, transform_indices = @transform_1, window_bounds = array<i64: 1024, 64>}, {pipeline_mode = #tpu.pipeline_mode<synchronous>, transform_indices = @transform_2, window_bounds = array<i64: 1, 64>}, {pipeline_mode = #tpu.pipeline_mode<synchronous>, transform_indices = @transform_3, window_bounds = array<i64: 64, 10>}, {pipeline_mode = #tpu.pipeline_mode<synchronous>, transform_indices = @transform_4, window_bounds = array<i64: 1, 10>}, {transform_indices = @transform_5, window_bounds = array<i64: 8, 10>}]} {
    %c0 = arith.constant 0 : index
    %c0_0 = arith.constant 0 : index
    %0 = vector.load %arg1[%c0, %c0_0] : memref<8x1024xbf16, #tpu.memory_space<vmem>>, vector<8x1024xbf16>
    %c0_1 = arith.constant 0 : index
    %c0_2 = arith.constant 0 : index
    %1 = vector.load %arg2[%c0_1, %c0_2] : memref<1024x64xbf16, #tpu.memory_space<vmem>>, vector<1024x64xbf16>
    %cst = arith.constant dense<0.000000e+00> : vector<8x64xf32>
    %2 = tpu.matmul %0, %1, %cst {dimension_numbers = #tpu.dot_dimension_numbers<[1], [0], [0], [1], [0, 0, 1, 1], [], []>} : vector<8x1024xbf16>, vector<1024x64xbf16>, vector<8x64xf32> -> vector<8x64xf32>
    %c0_3 = arith.constant 0 : index
    %c0_4 = arith.constant 0 : index
    %3 = vector.load %arg3[%c0_3, %c0_4] : memref<1x64xf32, #tpu.memory_space<vmem>>, vector<1x64xf32>
    %4 = vector.broadcast %3 : vector<1x64xf32> to vector<8x64xf32>
    %5 = arith.addf %2, %4 : vector<8x64xf32>
    %cst_5 = arith.constant 0.000000e+00 : f32
    %6 = vector.broadcast %cst_5 : f32 to vector<8x64xf32>
    %7 = arith.maximumf %5, %6 : vector<8x64xf32>
    %8 = arith.truncf %7 : vector<8x64xf32> to vector<8x64xbf16>
    %c0_6 = arith.constant 0 : index
    %c0_7 = arith.constant 0 : index
    %9 = vector.load %arg4[%c0_6, %c0_7] : memref<64x10xbf16, #tpu.memory_space<vmem>>, vector<64x10xbf16>
    %cst_8 = arith.constant dense<0.000000e+00> : vector<8x10xf32>
    %10 = tpu.matmul %8, %9, %cst_8 {dimension_numbers = #tpu.dot_dimension_numbers<[1], [0], [0], [1], [0, 0, 1, 1], [], []>} : vector<8x64xbf16>, vector<64x10xbf16>, vector<8x10xf32> -> vector<8x10xf32>
    %c0_9 = arith.constant 0 : index
    %c0_10 = arith.constant 0 : index
    %11 = vector.load %arg5[%c0_9, %c0_10] : memref<1x10xf32, #tpu.memory_space<vmem>>, vector<1x10xf32>
    %12 = vector.broadcast %11 : vector<1x10xf32> to vector<8x10xf32>
    %13 = arith.addf %10, %12 : vector<8x10xf32>
    %c0_11 = arith.constant 0 : index
    %c0_12 = arith.constant 0 : index
    %14 = vector.load %arg6[%c0_11, %c0_12] : memref<8x10xf32, #tpu.memory_space<vmem>>, vector<8x10xf32>
    tpu.vector_store %arg6[%c0_11, %c0_12], %13 {strides = array<i32>} : memref<8x10xf32, #tpu.memory_space<vmem>>, vector<8x10xf32>,
    return
  }
  func.func @transform_0(%arg0: i32) -> (i32, i32) {
    %c0_i32 = arith.constant 0 : i32
    %c0_i32_0 = arith.constant 0 : i32
    return %arg0, %c0_i32 : i32, i32
  }
  func.func @transform_1(%arg0: i32) -> (i32, i32) {
    %c0_i32 = arith.constant 0 : i32
    %c0_i32_0 = arith.constant 0 : i32
    %c0_i32_1 = arith.constant 0 : i32
    return %c0_i32, %c0_i32_0 : i32, i32
  }
  func.func @transform_2(%arg0: i32) -> (i32, i32) {
    %c0_i32 = arith.constant 0 : i32
    %c0_i32_0 = arith.constant 0 : i32
    %c0_i32_1 = arith.constant 0 : i32
    return %c0_i32, %c0_i32_0 : i32, i32
  }
  func.func @transform_3(%arg0: i32) -> (i32, i32) {
    %c0_i32 = arith.constant 0 : i32
    %c0_i32_0 = arith.constant 0 : i32
    %c0_i32_1 = arith.constant 0 : i32
    return %c0_i32, %c0_i32_0 : i32, i32
  }
  func.func @transform_4(%arg0: i32) -> (i32, i32) {
    %c0_i32 = arith.constant 0 : i32
    %c0_i32_0 = arith.constant 0 : i32
    %c0_i32_1 = arith.constant 0 : i32
    return %c0_i32, %c0_i32_0 : i32, i32
  }
  func.func @transform_5(%arg0: i32) -> (i32, i32) {
    %c0_i32 = arith.constant 0 : i32
    %c0_i32_0 = arith.constant 0 : i32
    return %arg0, %c0_i32 : i32, i32
  }
}

</mosaic_0001>

<bundles_post_ra>
// kernel: convnet_forward.6
= control target key start
LH: loop header
LB: loop body
LE: loop exit
PB: predicated region body
PF: predicated region fallthrough
CT: control target
= control target key end

     0   :  { %s1104_s12 = smov 0   ;;  %s1333_s0 = inlined_call_operand.vmem [shape: bf16[2,36,64], index: 0, kind: input, shape index: {}]   ;;  %s1334_s1 = inlined_call_operand.vmem [shape: bf16[576,64], index: 1, kind: input, shape index: {}]   ;;  %s1335_s2 = inlined_call_operand.vmem [shape: f32[1,64], index: 2, kind: input, shape index: {}]   ;;  %s1336_s3 = inlined_call_operand.vmem [shape: bf16[2,16,64], index: 3, kind: output, shape index: {}]  }
   0x1 LB: > { %s875_s13 = sadd.s32 4294967295, %s1081_s12   ;;  %p879_p0 = scmp.ge.s32.totalorder %s1081_s12, 1  ;;  %s1081_s12 = sphi %s1104_s12, %s13_s12  }
   0x2   : > { %p137_p1 = scmp.lt.s32.totalorder %s1081_s12, 3 }
   0x4   : > { %p138_p2 = pnand %p879_p0, %p137_p1 }
   0x5   : > { %p161_p3 = scmp.lt.s32.totalorder (!%p138_p2), %s875_s13, 1  ;;  %s1083_s7 = smov (!%p138_p2), 64  }
   0x6   : > { %141 = sbr.rel (%p138_p2) target bundleno = 377 (0x179), region = 32 }
   0xb   : > { %v1035_v0 = vld [vmem:[%s1334_s1 + $0x78] sm:$0xff]   ;;  %s1338_s13 = smov (!%p161_p3, %s875_s13), 1  ;;  %v1037_v2 = vld [vmem:[%s1334_s1 + $0x70] sm:$0xff]   ;;  %vm229_vm0 = vcmask 1044480   ;;  %vm279_vm1 = vsmask.f32 5376 }
   0xc   : > { %942 = vmatprep.subr.bf16.mxu0 %v1035_v0  ;;  %v1036_v1 = vld [vmem:[%s1334_s1 + $0x38] sm:$0xff]   ;;  %s1016_s20 = smul.u32 20, %s1338_s13  ;;  %v1038_v3 = vld [vmem:[%s1334_s1 + $0x30] sm:$0xff]   ;;  %vm196_vm2 = vsmask.f32 7424  ;;  %v1041_v27 = vld [vmem:[%s1334_s1 + $0x68] sm:$0xff]  }
   0xd   : > { %943 = vmatpush3.bf16.msra.mxu0 %v1036_v1  ;;  %v1039_v4 = vld [vmem:[%s1334_s1 + $0xf8] sm:$0xff]   ;;  %v1042_v28 = vld [vmem:[%s1334_s1 + $0x28] sm:$0xff]   ;;  %v1043_v37 = vld [vmem:[%s1334_s1 + $0xf0] sm:$0xff]   ;;  %vm240_vm3 = vsmask.f32 4352  ;;  %vm219_vm4 = vcmask 1046528  }
   0xe   : > { %944 = vmatprep.subr.bf16.mxu0 %v1037_v2  ;;  %s1133_s27 = scalar_lea.vmem %s1333_s0, %s1016_s20  ;;  %v1040_v5 = vld [vmem:[%s1334_s1 + $0xb8] sm:$0xff]   ;;  %970 = vmatprep.subr.bf16.mxu1 %v1039_v4  ;;  %v1044_v42 = vld [vmem:[%s1334_s1 + $0xb0] sm:$0xff]   ;;  %v1045_v48 = vld [vmem:[%s1334_s1 + $0x60] sm:$0xff]   ;;  %vm272_vm5 = vcmask 1045504   ;;  %vm307_vm6 = vcmask 523264   ;;  %vm779_vm7 = vcmask 521216  }
   0xf   : > { %v1139_v6 = vld [vmem:[%s1133_s27 + $0x8] sm:$0xf]  ;;  %v178_v7 = vld [vmem:[%s1133_s27 + $0xc] sm:$0x3]  ;;  %v1143_v8 = vld [vmem:[%s1133_s27 + $0x4] sm:$0xf]  ;;  %971 = vmatpush3.bf16.msra.mxu1 %v1040_v5 }
  0x10   : > { %v888_v9 = vcombine.low %v1139_v6, %v178_v7  ;;  %v177_v10 = vld [vmem:[%s1133_s27] sm:$0x8]  ;;  %v180_v11 = vld [vmem:[%s1133_s27 + $0x4] sm:$0xc]  ;;  %v1149_v12 = vld [vmem:[%s1133_s27 + $0xc] sm:$0xf]  ;;  %v1153_v13 = vcombine.low %v1139_v6, %v1139_v6  ;;  %972 = vmatprep.subr.bf16.mxu1 %v1043_v37  ;;  %v890_v53 = vcombine.low %v1143_v8, %v1139_v6 }
  0x11   : > { %945 = vmatpush3.bf16.msra.mxu0 %v1038_v3  ;;  %v1156_v14 = vcombine.low %v177_v10, %v1143_v8  ;;  %v183_v15 = vld [vmem:[%s1133_s27 + $0x10] sm:$0x3]  ;;  %v1160_v16 = vcombine.low %v180_v11, %v1139_v6  ;;  %v172_v17 = vld [vmem:[%s1133_s27] sm:$0xf]  ;;  %v1175_v26 = vld [vmem:[%s1133_s27 + $0xc] sm:$0x7] }
  0x12   : > { %v231_v18 = vrot.slane %v888_v9, 3  ;;  %v1164_v19 = vcombine.low %v1149_v12, %v183_v15  ;;  %v1167_v20 = vcombine.low %v172_v17, %v1143_v8  ;;  %v205_v21 = vshll.u32 %v1153_v13, 16  ;;  %946 = vmatprep.subr.bf16.mxu0 %v1041_v27  ;;  %v1046_v51 = vld [vmem:[%s1334_s1 + $0x20] sm:$0xff]   ;;  %v1047_v52 = vld [vmem:[%s1334_s1 + $0xe8] sm:$0xff]   ;;  %v1049_v59 = vld [vmem:[%s1334_s1 + $0x58] sm:$0xff]   ;;  %s939_s19 = sshll.u32 %s1338_s13, 3 }
  0x13   : > { %v230_v22 = vrot.slane %v1156_v14, 3  ;;  %v281_v23 = vshrl.u32 %v1160_v16, 16  ;;  %v284_v24 = vshll.u32 %v1160_v16, 16  ;;  %v209_v25 = vshrl.u32 %v1153_v13, 16  ;;  %973 = vmatpush3.bf16.msra.mxu1 %v1044_v42  ;;  %v1048_v57 = vld [vmem:[%s1334_s1 + $0xa8] sm:$0xff]   ;;  %v1050_v61 = vld [vmem:[%s1334_s1 + $0x18] sm:$0xff]   ;;  %s170_s22 = scalar_lea.vmem %s1336_s3, %s939_s19 }
  0x14   : > { %235 = vrot.lane.b32.xlu1 %v231_v18, %s1083_s7  ;;  %v289_v29 = vshrl.u32 %v1164_v19, 16  ;;  %v292_v30 = vshll.u32 %v1164_v19, 16  ;;  %v198_v31 = vshrl.u32 %v1167_v20, 16  ;;  %v200_v32 = vshll.u32 %v1167_v20, 16  ;;  %974 = vmatprep.subr.bf16.mxu1 %v1047_v52  ;;  %v1051_v0 = vld [vmem:[%s1334_s1 + $0xe0] sm:$0xff]   ;;  %v1053_v4 = vld [vmem:[%s1334_s1 + $0x50] sm:$0xff]  }
  0x15   : > { %v232_v33 = vsel %vm229_vm0, %v230_v22, %v231_v18  ;;  %v283_v34 = vrot.slane %v281_v23, 2  ;;  %v286_v35 = vrot.slane %v284_v24, 3  ;;  %v207_v36 = vrot.slane %v205_v21, 1  ;;  %947 = vmatpush3.bf16.msra.mxu0 %v1042_v28  ;;  %v1052_v3 = vld [vmem:[%s1334_s1 + $0xa0] sm:$0xff]   ;;  %v1054_v7 = vld [vmem:[%s1334_s1 + $0x10] sm:$0xff]   ;;  %v1055_v10 = vld [vmem:[%s1334_s1 + $0xd8] sm:$0xff]  }
  0x16   : > { %233 = vrot.lane.b32.xlu0 %v232_v33, %s1083_s7  ;;  %v291_v38 = vrot.slane %v289_v29, 2  ;;  %v294_v39 = vrot.slane %v292_v30, 3  ;;  %v202_v40 = vrot.slane %v200_v32, 1  ;;  %v889_v41 = vcombine.low %v1139_v6, %v1175_v26  ;;  %948 = vmatprep.subr.bf16.mxu0 %v1045_v48  ;;  %v1056_v11 = vld [vmem:[%s1334_s1 + $0x98] sm:$0xff]   ;;  %v1058_v15 = vld [vmem:[%s1334_s1 + $0x8] sm:$0xff]   ;;  %v1059_v17 = vld [vmem:[%s1334_s1 + $0xd0] sm:$0xff]  }
  0x17   : > { %v287_v43 = vor.u32 %v286_v35, %v283_v34  ;;  %v211_v54 = vor.u32 %v209_v25, %v207_v36  ;;  %v242_v58 = vshrl.u32 %v1156_v14, 16  ;;  %v245_v60 = vshll.u32 %v1156_v14, 16  ;;  %975 = vmatpush3.bf16.msra.mxu1 %v1048_v57  ;;  %v1057_v14 = vld [vmem:[%s1334_s1 + $0x48] sm:$0xff]   ;;  %v1060_v18 = vld [vmem:[%s1334_s1 + $0x90] sm:$0xff]   ;;  %v1061_v21 = vld [vmem:[%s1334_s1 + $0x40] sm:$0xff]  }
  0x18   : > { %v295_v44 = vor.u32 %v294_v39, %v291_v38  ;;  %v203_v45 = vor.u32 %v202_v40, %v198_v31  ;;  %v250_v46 = vshrl.u32 %v889_v41, 16  ;;  %v253_v47 = vshll.u32 %v889_v41, 16  ;;  %976 = vmatprep.subr.bf16.mxu1 %v1051_v0  ;;  %v1062_v22 = vld [vmem:[%s1334_s1] sm:$0xff]   ;;  %v1065_v27 = vld [vmem:[%s1334_s1 + $0x88] sm:$0xff]   ;;  %v1066_v29 = vld [vmem:[%s1334_s1 + $0x118] sm:$0xff]  }
  0x19   : > { %949 = vmatpush3.bf16.msra.mxu0 %v1046_v51  ;;  %v244_v62 = vrot.slane %v242_v58, 3  ;;  %v891_v63 = vcombine.low %v1175_v26, %v1175_v26  ;;  %v247_v1 = vrot.slane %v245_v60, 4  ;;  %v176_v23 = vld [vmem:[%s1133_s27] sm:$0xe]  ;;  %v221_v25 = vrot.slane %v1153_v13, 1  ;;  %v1064_v26 = vld [vmem:[%s1334_s1 + $0xc8] sm:$0xff]  }
  0x1a   : > { %v296_v49 = vsel %vm279_vm1, %v287_v43, %v295_v44  ;;  %v208_v50 = vsel %vm196_vm2, %v203_v45, %v207_v36  ;;  %v252_v55 = vrot.slane %v250_v46, 3  ;;  %v255_v56 = vrot.slane %v253_v47, 4  ;;  %950 = vmatprep.subr.bf16.mxu0 %v1049_v59  ;;  %v1068_v30 = vld [vmem:[%s1334_s1 + $0x80] sm:$0xff]   ;;  %v182_v31 = vld [vmem:[%s1133_s27 + $0x10] sm:$0x1] }
  0x1b   : > { %297 = vrot.lane.b32.xlu1 %v296_v49, %s1083_s7  ;;  %212 = vrot.lane.b32.xlu0 %v208_v50, %s1083_s7  ;;  %v248_v5 = vor.u32 %v247_v1, %v244_v62  ;;  %v886_v24 = vcombine.low %v176_v23, %v1143_v8  ;;  %v1067_v8 = vld [vmem:[%s1334_s1 + $0xc0] sm:$0xff]   ;;  %v893_v32 = vcombine.low %v1149_v12, %v182_v31  ;;  %v273_v33 = vrot.slane %v1160_v16, 2  ;;  %v1072_v46 = vld [vmem:[%s1133_s27 + $0x8] ss:$0 sps:$4 sm:$0x77]  }
  0x1c   : > { %v1231_v2 = vor.u32 %v255_v56, %v252_v55  ;;  %977 = vmatpush3.bf16.msra.mxu1 %v1052_v3  ;;  %v184_v36 = vld [vmem:[%s1133_s27 + $0x4] sm:$0x8]  ;;  %v305_v38 = vrot.slane %v1164_v19, 3  ;;  %v1071_v49 = vld [vmem:[%s1334_s1 + $0x108] sm:$0xff]   ;;  %vm792_vm8 = vcmask 517120   ;;  %vm803_vm9 = vcmask 519170  }
  0x1d   : > { %951 = vmatpush3.bf16.msra.mxu0 %v1050_v61  ;;  %978 = vmatprep.subr.bf16.mxu1 %v1055_v10  ;;  %v220_v28 = vrot.slane %v886_v24, 1  ;;  %v274_v34 = vrot.slane %v893_v32, 2  ;;  %v895_v37 = vcombine.low %v184_v36, %v1139_v6  ;;  %v1070_v6 = vld [vmem:[%s1334_s1 + $0x110] sm:$0xff]  }
  0x1e   : > { %v1245_v9 = vsel %vm240_vm3, %v248_v5, %v1231_v2  ;;  %952 = vmatprep.subr.bf16.mxu0 %v1053_v4 }
  0x1f   : > { %260 = vrot.lane.b32.xlu1 %v890_v53, %s1083_s7  ;;  %214 = vrot.lane.b32.xlu0 %v211_v54, %s1083_s7  ;;  %v222_v13 = vsel %vm219_vm4, %v220_v28, %v221_v25  ;;  %v275_v35 = vsel %vm272_vm5, %v273_v33, %v274_v34  ;;  %v304_v39 = vrot.slane %v895_v37, 3  ;;  %v1073_v53 = vld [vmem:[%s1334_s1 + $0x100] sm:$0xff]  }
  0x20   : > { %979 = vmatpush3.bf16.msra.mxu1 %v1056_v11 }
  0x21   : > { %953 = vmatpush3.bf16.msra.mxu0 %v1054_v7  ;;  %980 = vmatprep.subr.bf16.mxu1 %v1059_v17  ;;  %v306_v40 = vsel %vm229_vm0, %v304_v39, %v305_v38 }
  0x22   : > { %954 = vmatprep.subr.bf16.mxu0 %v1057_v14 }
  0x23   : > { %299 = vrot.lane.b32.xlu0 %v295_v44, %s1083_s7  ;;  %262 = vrot.lane.b32.xlu1 %v891_v63, %s1083_s7 }
  0x24   : > { %981 = vmatpush3.bf16.msra.mxu1 %v1060_v18 }
  0x25   : > { %955 = vmatpush3.bf16.msra.mxu0 %v1058_v15  ;;  %982 = vmatprep.subr.bf16.mxu1 %v1064_v26 }
  0x26   : > { %956 = vmatprep.subr.bf16.mxu0 %v1061_v21 }
  0x28   : > { %983 = vmatpush3.bf16.msra.mxu1 %v1065_v27 }
  0x29   : > { %957 = vmatpush3.bf16.msra.mxu0 %v1062_v22  ;;  %984 = vmatprep.subr.bf16.mxu1 %v1067_v8 }
  0x2a   : > { %1004 = vmatprep.subr.bf16.mxu0 %v1066_v29 }
  0x2c   : > { %985 = vmatpush3.bf16.msra.mxu1 %v1068_v30 }
  0x86   : > { %v236_v41 = vpop.permute.xlu1 %235 }
  0x87   : > { %v321_v44 = vsel %vm307_vm6, %v221_v25, %v236_v41 }
  0x88   : > { %v234_v42 = vpop.permute.xlu0 %233 }
  0x89   : > { %v317_v12 = vsel %vm307_vm6, %v222_v13, %v234_v42  ;;  %v934_v13 = vld [vmem:[%s1335_s2] ss:$0 sm:$0xff] }
  0x8a   : > { %665 = vmatprep.mubr.bf16.mxu0 %v317_v12 }
  0x8d   : > { %v298_v16 = vpop.permute.xlu1 %297  ;;  %v213_v43 = vpop.permute.xlu0 %212 }
  0x8e   : > { %v309_v19 = vsel %vm307_vm6, %v1167_v20, %v213_v43  ;;  %v333_v45 = vsel %vm307_vm6, %v275_v35, %v298_v16 }
  0x8f   : > { %666 = vmatmul.mubr.bf16.vlgmr.msra.gmra.mxu0 %v309_v19  ;;  %713 = vmatprep.mubr.bf16.mxu1 %v333_v45 }
  0x90   : > { %1005 = vmatpush3.bf16.msra.mxu0 %v1066_v29  ;;  %673 = vmatprep.mubr.bf16.mxu0 %v321_v44 }
  0x91   : > { %v261_v47 = vpop.permute.xlu1 %260  ;;  %1006 = vmatprep.subr.bf16.mxu0 %v1070_v6  ;;  %v215_v48 = vpop.permute.xlu0 %214 }
  0x92   : > { %v325_v50 = vsel %vm307_vm6, %v1245_v9, %v261_v47  ;;  %v313_v20 = vsel %vm307_vm6, %v1072_v46, %v215_v48 }
  0x93   : > { %714 = vmatmul.mubr.bf16.vlgmr.msra.gmra.mxu1 %v325_v50 }
  0x94   : > { %1007 = vmatpush3.bf16.msra.mxu0 %v1070_v6 }
  0x95   : > { %1008 = vmatprep.subr.bf16.mxu0 %v1071_v49  ;;  %v300_v51 = vpop.permute.xlu0 %299  ;;  %v263_v52 = vpop.permute.xlu1 %262 }
  0x96   : > { %v337_v54 = vsel %vm307_vm6, %v274_v34, %v300_v51  ;;  %v329_v55 = vsel %vm307_vm6, %v1231_v2, %v263_v52 }
  0x97   : > { %674 = vmatmul.mubr.bf16.gmra.mxu0 %v313_v20  ;;  %721 = vmatprep.mubr.bf16.mxu1 %v337_v54 }
  0x98   : > { %1009 = vmatpush3.bf16.msra.mxu0 %v1071_v49  ;;  %1012 = vmatprep.mubr.msk.bf16.mxu0 %vm307_vm6, %v306_v40 }
  0x99   : > { %1010 = vmatprep.subr.bf16.mxu0 %v1073_v53 }
  0x9b   : > { %722 = vmatmul.mubr.bf16.gmra.mxu1 %v329_v55 }
  0x9c   : > { %1011 = vmatpush3.bf16.msra.mxu0 %v1073_v53 }
  0x9f   : > { %1013 = vmatmul.mubr.msk.bf16.vlgmr.msra.gmra.mxu0 %vm307_vm6, %v305_v38 }
 0x14f   : > { %v958_v56 = vpop.f32.mrf.mxu0 }
 0x151   : > { %v959_v57 = vpop.f32.mrf.mxu0 }
 0x152   : > { %v960_v9 = vadd.f32 %v959_v57, %v958_v56 }
 0x153   : > { %v961_v58 = vpop.f32.mrf.mxu0  ;;  %v986_v59 = vpop.f32.mrf.mxu1 }
 0x155   : > { %v962_v60 = vpop.f32.mrf.mxu0  ;;  %v987_v61 = vpop.f32.mrf.mxu1 }
 0x156   : > { %v988_v2 = vadd.f32 %v987_v61, %v986_v59  ;;  %v963_v24 = vadd.f32 %v962_v60, %v961_v58 }
 0x157   : > { %v964_v62 = vpop.f32.mrf.mxu0  ;;  %v989_v63 = vpop.f32.mrf.mxu1 }
 0x158   : > { %v716_v21 = vadd.f32 %v988_v2, %v960_v9 }
 0x159   : > { %v965_v0 = vpop.f32.mrf.mxu0  ;;  %v990_v1 = vpop.f32.mrf.mxu1 }
 0x15a   : > { %v966_v10 = vadd.f32 %v965_v0, %v964_v62  ;;  %v991_v17 = vadd.f32 %v990_v1, %v989_v63 }
 0x15b   : > { %v967_v3 = vpop.f32.mrf.mxu0  ;;  %v992_v4 = vpop.f32.mrf.mxu1 }
 0x15c   : > { %v719_v28 = vadd.f32 %v991_v17, %v963_v24 }
 0x15d   : > { %v968_v5 = vpop.f32.mrf.mxu0  ;;  %v993_v7 = vpop.f32.mrf.mxu1 }
 0x15e   : > { %v994_v11 = vadd.f32 %v993_v7, %v992_v4 }
 0x15f   : > { %v995_v14 = vpop.f32.mrf.mxu1  ;;  %v1014_v15 = vpop.f32.mrf.mxu0 }
 0x160   : > { %v724_v18 = vadd.f32 %v994_v11, %v966_v10 }
 0x161   : > { %v996_v22 = vpop.f32.mrf.mxu1  ;;  %v763_v23 = vpop.f32.mrf.mxu0 }
 0x162   : > { %v772_v25 = vadd.f32 %v1014_v15, %v724_v18  ;;  %v764_v26 = vadd.f32 %v763_v23, %v716_v21 }
 0x163   : > { %v1015_v27 = vpop.f32.mrf.mxu0 }
 0x164   : > { %780 = vst.msk [vmem:[#allocation2 + $0x10] sm:$0x3f] %vm779_vm7, %v772_v25 }
 0x165   : > { %777 = vst.msk [vmem:[#allocation2] sm:$0xff] %vm307_vm6, %v764_v26  ;;  %v766_v29 = vpop.f32.mrf.mxu0 }
 0x166   : > { %v767_v8 = vadd.f32 %v766_v29, %v719_v28 }
 0x168   : > { %778 = vst.msk [vmem:[#allocation2 + $0x8] sm:$0xff] %vm307_vm6, %v767_v8 }
 0x16b   : > { %v810_v30 = vld [vmem:[#allocation2 + $0x12] sm:$0xf] }
 0x16c   : > { %v782_v31 = vld [vmem:[#allocation2] sm:$0xf]  ;;  %v811_v32 = vadd.f32 %v934_v13, %v810_v30 }
 0x16d   : > { %v789_v33 = vadd.f32 %v934_v13, %v782_v31 }
 0x16e   : > { %v812_v34 = vmax.f32 %v811_v32, 0.0 }
 0x16f   : > { %v790_v35 = vmax.f32 %v789_v33, 0.0  ;;  %v794_v36 = vld [vmem:[#allocation2 + $0x6] sm:$0xf]  ;;  %v805_v37 = vld [vmem:[#allocation2 + $0xc] sm:$0xf] }
 0x170   : > { %v941_v38 = vpack.c.bf16 %v812_v34, %v812_v34  ;;  %v795_v40 = vadd.f32 %v934_v13, %v794_v36  ;;  %v806_v41 = vadd.f32 %v934_v13, %v805_v37 }
 0x171   : > { %v791_v39 = vpack.c.bf16 %v790_v35, %v790_v35 }
 0x172   : > { %v817_v42 = vrot.slane %v941_v38, 6  ;;  %v796_v12 = vmax.f32 %v795_v40, 0.0  ;;  %v807_v16 = vmax.f32 %v806_v41, 0.0 }
 0x173   : > { %793 = vst.msk [vmem:[%s170_s22] sm:$0x3] %vm792_vm8, %v791_v39 }
 0x174   : > { %819 = vst.msk [vmem:[%s170_s22 + $0x4] sm:$0xc] %vm803_vm9, %v817_v42  ;;  %v940_v43 = vpack.c.bf16 %v796_v12, %v796_v12  ;;  %v808_v44 = vpack.c.bf16 %v807_v16, %v807_v16 }
 0x176   : > { %v801_v6 = vrot.slane %v940_v43, 6  ;;  %809 = vst.msk [vmem:[%s170_s22 + $0x4] sm:$0x3] %vm792_vm8, %v808_v44 }
 0x178   : > { %804 = vst.msk [vmem:[%s170_s22] sm:$0xc] %vm803_vm9, %v801_v6 }
 0x179 PF: > { %s13_s12 = sadd.s32 1, %s1081_s12  }
 0x17a   : > { %p10_p4 = scmp.ge.s32.totalorder %s13_s12, 4  }
 0x17c   :  { %12 = sbr.rel (!%p10_p4) target bundleno = 1 (0x1), region = 62 }

// kernel: convnet_forward.5
= control target key start
LH: loop header
LB: loop body
LE: loop exit
PB: predicated region body
PF: predicated region fallthrough
CT: control target
= control target key end

     0   :  { %s2056_s12 = smov 0   ;;  %s2661_s0 = inlined_call_operand.vmem [shape: bf16[2,225,32], index: 0, kind: input, shape index: {}]   ;;  %s2662_s1 = inlined_call_operand.vmem [shape: bf16[288,64], index: 1, kind: input, shape index: {}]   ;;  %s2663_s2 = inlined_call_operand.vmem [shape: f32[1,64], index: 2, kind: input, shape index: {}]   ;;  %s2664_s3 = inlined_call_operand.vmem [shape: bf16[2,36,64], index: 3, kind: output, shape index: {}]  }
   0x1 LB: > { %s1691_s13 = sadd.s32 4294967295, %s2029_s12   ;;  %p1695_p0 = scmp.ge.s32.totalorder %s2029_s12, 1  ;;  %s2029_s12 = sphi %s2056_s12, %s13_s12  }
   0x2   : > { %p137_p1 = scmp.lt.s32.totalorder %s2029_s12, 3 }
   0x4   : > { %p138_p2 = pnand %p1695_p0, %p137_p1 }
   0x5   : > { %p161_p3 = scmp.lt.s32.totalorder (!%p138_p2), %s1691_s13, 1  ;;  %s2032_s7 = smov (!%p138_p2), 64  }
   0x6   : > { %141 = sbr.rel (%p138_p2) target bundleno = 470 (0x1d6), region = 32  ;;  %s2033_s16 = smov (!%p138_p2), 32  }
   0x7   : > { %s2034_s19 = smov (!%p138_p2), 96  }
   0xb   : > { %s2668_s13 = smov (!%p161_p3, %s1691_s13), 1  ;;  %v2001_v0 = vld [vmem:[%s2662_s1 + $0x78] sm:$0xff]   ;;  %vm653_vm0 = vcmask 1044480   ;;  %v2004_v2 = vld [vmem:[%s2662_s1 + $0x70] sm:$0xff]   ;;  %vm405_vm1 = vcmask 1046528   ;;  %v2007_v4 = vld [vmem:[%s2662_s1 + $0x68] sm:$0xff]  }
   0xc   : > { %v2002_v1 = vld [vmem:[%s2662_s1 + $0x38] sm:$0xff]   ;;  %s1955_s18 = smul.u32 116, %s2668_s13  ;;  %1790 = vmatprep.subr.bf16.mxu0 %v2001_v0  ;;  %v2005_v3 = vld [vmem:[%s2662_s1 + $0x30] sm:$0xff]   ;;  %vm270_vm2 = vsmask.f32 7424  ;;  %v2031_v8 = vmov 0.0  }
   0xd   : > { %1791 = vmatpush3.bf16.msra.mxu0 %v2002_v1  ;;  %1899 = vmatprep.subr.bf16.mxu1 %v2031_v8  ;;  %v2008_v24 = vld [vmem:[%s2662_s1 + $0x28] sm:$0xff]   ;;  %v2009_v31 = vld [vmem:[%s2662_s1 + $0x60] sm:$0xff]   ;;  %vm476_vm3 = vsmask.f32 4352  ;;  %v2011_v46 = vld [vmem:[%s2662_s1 + $0x58] sm:$0xff]   ;;  %vm744_vm4 = vcmask 261120  }
   0xe   : > { %s2082_s25 = scalar_lea.vmem %s2661_s0, %s1955_s18  ;;  %1792 = vmatprep.subr.bf16.mxu0 %v2004_v2  ;;  %v2010_v41 = vld [vmem:[%s2662_s1 + $0x20] sm:$0xff]   ;;  %v2012_v59 = vld [vmem:[%s2662_s1 + $0x18] sm:$0xff]   ;;  %v2013_v0 = vld [vmem:[%s2662_s1 + $0x50] sm:$0xff]   ;;  %vm2035_vm5 = vmmov 0   ;;  %vm771_vm6 = vcmask 523264   ;;  %vm798_vm7 = vcmask 785408  }
   0xf   : > { %v176_v5 = vld [vmem:[%s2082_s25 + $0x10] sm:$0xf]  ;;  %v177_v6 = vld [vmem:[%s2082_s25 + $0x14] sm:$0xf]  ;;  %v178_v7 = vld [vmem:[%s2082_s25 + $0x18] sm:$0xf]  ;;  %1903 = vmatprep.mubr.msk.bf16.mxu1 %vm2035_vm5, %v2031_v8 }
  0x10   : > { %v179_v9 = vld [vmem:[%s2082_s25 + $0x1c] sm:$0xf]  ;;  %v203_v10 = vld [vmem:[%s2082_s25 + $0xc] sm:$0x8]  ;;  %v2093_v11 = vcombine.low %v177_v6, %v178_v7  ;;  %v2095_v12 = vcombine.low %v176_v5, %v177_v6  ;;  %v174_v13 = vld [vmem:[%s2082_s25 + $0x8] sm:$0xf] }
  0x11   : > { %v2098_v14 = vcombine.low %v178_v7, %v179_v9  ;;  %v2100_v15 = vcombine.low %v203_v10, %v176_v5  ;;  %v175_v16 = vld [vmem:[%s2082_s25 + $0xc] sm:$0xf]  ;;  %v173_v17 = vld [vmem:[%s2082_s25 + $0x4] sm:$0xf]  ;;  %v197_v18 = vld [vmem:[%s2082_s25] sm:$0xe]  ;;  %1793 = vmatpush3.bf16.msra.mxu0 %v2005_v3 }
  0x12   : > { %v655_v19 = vrot.slane %v2093_v11, 3  ;;  %v2106_v20 = vcombine.low %v174_v13, %v175_v16  ;;  %v409_v21 = vrot.slane %v2095_v12, 1  ;;  %v287_v22 = vshll.u32 %v2095_v12, 16  ;;  %v172_v23 = vld [vmem:[%s2082_s25] sm:$0xf]  ;;  %1794 = vmatprep.subr.bf16.mxu0 %v2007_v4 }
  0x13   : > { %v654_v25 = vrot.slane %v2100_v15, 3  ;;  %v1711_v26 = vcombine.low %v197_v18, %v173_v17  ;;  %v2115_v27 = vcombine.low %v172_v23, %v173_v17  ;;  %v180_v28 = vld [vmem:[%s2082_s25 + $0x20] sm:$0xf]  ;;  %v2119_v29 = vld [vmem:[%s2082_s25 + $0x24] sm:$0xf]  ;;  %v1714_v30 = vcombine.low %v175_v16, %v176_v5 }
  0x14   : > { %v407_v32 = vrot.slane %v2106_v20, 1  ;;  %v279_v33 = vshll.u32 %v2106_v20, 16  ;;  %v283_v34 = vshrl.u32 %v2106_v20, 16  ;;  %v2127_v35 = vrot.slane %v287_v22, 1  ;;  %v199_v36 = vld [vmem:[%s2082_s25 + $0x4] sm:$0x8] }
  0x15   : > { %v656_v37 = vsel %vm653_vm0, %v654_v25, %v655_v19  ;;  %v406_v38 = vrot.slane %v1711_v26, 1  ;;  %v2132_v39 = vcombine.low %v180_v28, %v2119_v29  ;;  %v2134_v40 = vcombine.low %v179_v9, %v180_v28  ;;  %1795 = vmatpush3.bf16.msra.mxu0 %v2008_v24  ;;  %v183_v28 = vld [vmem:[%s2082_s25 + $0x2c] sm:$0xf] }
  0x16   : > { %679 = vrot.lane.b32.xlu1 %v656_v37, %s2032_s7  ;;  %v410_v42 = vsel %vm405_vm1, %v407_v32, %v409_v21  ;;  %v281_v43 = vrot.slane %v279_v33, 1  ;;  %v272_v44 = vshrl.u32 %v2115_v27, 16  ;;  %v274_v45 = vshll.u32 %v2115_v27, 16  ;;  %1796 = vmatprep.subr.bf16.mxu0 %v2009_v31 }
  0x17   : > { %433 = vrot.lane.b32.xlu0 %v410_v42, %s2032_s7  ;;  %v408_v47 = vsel %vm405_vm1, %v406_v38, %v407_v32  ;;  %v657_v48 = vrot.slane %v2134_v40, 3  ;;  %v1713_v49 = vcombine.low %v199_v36, %v174_v13  ;;  %v486_v50 = vshrl.u32 %v1714_v30, 16 }
  0x18   : > { %v285_v51 = vor.u32 %v283_v34, %v281_v43  ;;  %v276_v52 = vrot.slane %v274_v45, 1  ;;  %v489_v53 = vshll.u32 %v1714_v30, 16  ;;  %v495_v54 = vshrl.u32 %v2093_v11, 16  ;;  %v182_v34 = vld [vmem:[%s2082_s25 + $0x28] sm:$0xf] }
  0x19   : > { %v658_v55 = vsel %vm653_vm0, %v655_v19, %v657_v48  ;;  %v478_v56 = vshrl.u32 %v1713_v49, 16  ;;  %v481_v57 = vshll.u32 %v1713_v49, 16  ;;  %v488_v58 = vrot.slane %v486_v50, 3  ;;  %1797 = vmatpush3.bf16.msra.mxu0 %v2010_v41  ;;  %v184_v45 = vld [vmem:[%s2082_s25 + $0x30] sm:$0xf]  ;;  %v2015_v50 = vld [vmem:[%s2662_s1 + $0x48] sm:$0xff]  }
  0x1a   : > { %v290_v60 = vsel %vm270_vm2, %v285_v51, %v2127_v35  ;;  %431 = vrot.lane.b32.xlu1 %v408_v47, %s2032_s7  ;;  %v277_v61 = vor.u32 %v276_v52, %v272_v44  ;;  %v491_v62 = vrot.slane %v489_v53, 4  ;;  %v497_v63 = vrot.slane %v495_v54, 3  ;;  %1798 = vmatprep.subr.bf16.mxu0 %v2011_v46  ;;  %v185_v49 = vld [vmem:[%s2082_s25 + $0x34] sm:$0xf] }
  0x1b   : > { %375 = vrot.lane.b32.xlu0 %v290_v60, %s2033_s16  ;;  %v480_v1 = vrot.slane %v478_v56, 3  ;;  %v483_v2 = vrot.slane %v481_v57, 4  ;;  %v498_v3 = vshll.u32 %v2093_v11, 16  ;;  %v706_v4 = vshrl.u32 %v2100_v15, 16  ;;  %v2014_v11 = vld [vmem:[%s2662_s1 + $0x10] sm:$0xff]   ;;  %v2017_v60 = vld [vmem:[%s2662_s1 + $0x88] sm:$0xff]  }
  0x1c   : > { %v282_v5 = vsel %vm270_vm2, %v277_v61, %v281_v43  ;;  %v492_v6 = vor.u32 %v491_v62, %v488_v58  ;;  %v709_v7 = vshll.u32 %v2100_v15, 16  ;;  %v504_v9 = vshrl.u32 %v2134_v40, 16  ;;  %v2018_v62 = vld [vmem:[%s2662_s1 + $0x40] sm:$0xff]   ;;  %1900 = vmatpush3.bf16.msra.mxu1 %v2017_v60 }
  0x1d   : > { %v484_v10 = vor.u32 %v483_v2, %v480_v1  ;;  %v500_v13 = vrot.slane %v498_v3, 4  ;;  %v708_v16 = vrot.slane %v706_v4, 3  ;;  %v507_v17 = vshll.u32 %v2134_v40, 16  ;;  %1799 = vmatpush3.bf16.msra.mxu0 %v2012_v59  ;;  %v2019_v2 = vld [vmem:[%s2662_s1] sm:$0xff]   ;;  %1901 = vmatprep.subr.bf16.mxu1 %v2031_v8 }
  0x1e   : > { %681 = vrot.lane.b32.xlu1 %v658_v55, %s2032_s7  ;;  %v711_v18 = vrot.slane %v709_v7, 4  ;;  %v506_v19 = vrot.slane %v504_v9, 3  ;;  %v291_v15 = vshrl.u32 %v2095_v12, 16  ;;  %v295_v22 = vshll.u32 %v2098_v14, 16  ;;  %1800 = vmatprep.subr.bf16.mxu0 %v2013_v0  ;;  %v2016_v55 = vld [vmem:[%s2662_s1 + $0x8] sm:$0xff]  }
  0x1f   : > { %373 = vrot.lane.b32.xlu0 %v282_v5, %s2033_s16  ;;  %v493_v23 = vsel %vm476_vm3, %v484_v10, %v492_v6  ;;  %v501_v24 = vor.u32 %v500_v13, %v497_v63  ;;  %v509_v25 = vrot.slane %v507_v17, 4  ;;  %v299_v26 = vshrl.u32 %v2098_v14, 16  ;;  %v186_v7 = vld [vmem:[%s2082_s25 + $0x38] sm:$0xf]  ;;  %v2020_v13 = vld [vmem:[%s2662_s1 + $0x80] sm:$0xff]  }
  0x20   : > { %v712_v30 = vor.u32 %v711_v18, %v708_v16  ;;  %v293_v31 = vor.u32 %v291_v15, %v2127_v35  ;;  %v297_v32 = vrot.slane %v295_v22, 1  ;;  %v303_v33 = vshll.u32 %v2132_v39, 16  ;;  %v187_v18 = vld [vmem:[%s2082_s25 + $0x3c] sm:$0xf]  ;;  %1902 = vmatpush3.bf16.msra.mxu1 %v2020_v13 }
  0x21   : > { %v510_v36 = vor.u32 %v509_v25, %v506_v19  ;;  %1801 = vmatpush3.bf16.msra.mxu0 %v2014_v11  ;;  %v2186_v38 = vcombine.low %v182_v34, %v183_v28  ;;  %v1717_v43 = vcombine.low %v2119_v29, %v182_v34  ;;  %v411_v51 = vrot.slane %v2098_v14, 1 }
  0x22   : > { %593 = vrot.lane.b32.xlu1 %v493_v23, %s2034_s19  ;;  %v713_v37 = vsel %vm476_vm3, %v712_v30, %v501_v24  ;;  %v301_v35 = vor.u32 %v299_v26, %v297_v32  ;;  %v305_v42 = vrot.slane %v303_v33, 1  ;;  %v298_v44 = vsel %vm270_vm2, %v293_v31, %v297_v32  ;;  %1802 = vmatprep.subr.bf16.mxu0 %v2015_v50  ;;  %v188_v31 = vld [vmem:[%s2082_s25 + $0x40] sm:$0xf] }
  0x23   : > { %732 = vrot.lane.b32.xlu0 %v713_v37, %s2034_s19  ;;  %v511_v41 = vsel %vm476_vm3, %v501_v24, %v510_v36  ;;  %v513_v46 = vshrl.u32 %v1717_v43, 16  ;;  %v516_v47 = vshll.u32 %v1717_v43, 16  ;;  %v659_v53 = vrot.slane %v1717_v43, 3  ;;  %v189_v43 = vld [vmem:[%s2082_s25 + $0x44] sm:$0xf]  ;;  %1904 = vmatmul.mubr.msk.bf16.vlgmr.msra.gmra.mxu1 %vm744_vm4, %v2095_v12 }
  0x24   : > { %v306_v52 = vsel %vm270_vm2, %v301_v35, %v305_v42  ;;  %v307_v29 = vshrl.u32 %v2132_v39, 16  ;;  %v311_v54 = vshll.u32 %v2186_v38, 16  ;;  %v502_v56 = vsel %vm476_vm3, %v492_v6, %v501_v24  ;;  %1907 = vmatprep.mubr.msk.bf16.mxu1 %vm2035_vm5, %v2031_v8 }
  0x25   : > { %v515_v57 = vrot.slane %v513_v46, 3  ;;  %v518_v58 = vrot.slane %v516_v47, 4  ;;  %v2207_v59 = vcombine.low %v183_v28, %v184_v45  ;;  %1803 = vmatpush3.bf16.msra.mxu0 %v2016_v55  ;;  %v2213_v61 = vcombine.low %v184_v45, %v185_v49 }
  0x26   : > { %597 = vrot.lane.b32.xlu1 %v511_v41, %s2034_s19  ;;  %v412_v63 = vsel %vm405_vm1, %v409_v21, %v411_v51  ;;  %v309_v0 = vor.u32 %v307_v29, %v305_v42  ;;  %v313_v1 = vrot.slane %v311_v54, 1  ;;  %v660_v3 = vsel %vm653_vm0, %v657_v48, %v659_v53  ;;  %1804 = vmatprep.subr.bf16.mxu0 %v2018_v62  ;;  %v190_v29 = vld [vmem:[%s2082_s25 + $0x48] sm:$0xf] }
  0x27   : > { %377 = vrot.lane.b32.xlu0 %v298_v44, %s2033_s16  ;;  %v519_v4 = vor.u32 %v518_v58, %v515_v57  ;;  %v522_v5 = vshrl.u32 %v2207_v59, 16  ;;  %v525_v6 = vshll.u32 %v2207_v59, 16  ;;  %v413_v21 = vrot.slane %v2132_v39, 1 }
  0x28   : > { %v315_v9 = vshrl.u32 %v2186_v38, 16  ;;  %v319_v40 = vshll.u32 %v2213_v61, 16  ;;  %v314_v48 = vsel %vm270_vm2, %v309_v0, %v313_v1  ;;  %v661_v10 = vrot.slane %v2207_v59, 3 }
  0x29   : > { %1805 = vmatpush3.bf16.msra.mxu0 %v2019_v2  ;;  %v520_v16 = vsel %vm476_vm3, %v510_v36, %v519_v4  ;;  %v524_v17 = vrot.slane %v522_v5, 3  ;;  %v527_v11 = vrot.slane %v525_v6, 4  ;;  %v1719_v19 = vcombine.low %v185_v49, %v186_v7 }
  0x2a   : > { %379 = vrot.lane.b32.xlu1 %v306_v52, %s2033_s16  ;;  %v414_v15 = vsel %vm405_vm1, %v411_v51, %v413_v21  ;;  %v317_v22 = vor.u32 %v315_v9, %v313_v1  ;;  %v321_v23 = vrot.slane %v319_v40, 1  ;;  %v2247_v24 = vcombine.low %v186_v7, %v187_v18  ;;  %v192_v9 = vld [vmem:[%s2082_s25 + $0x50] sm:$0xf] }
  0x2b   : > { %595 = vrot.lane.b32.xlu0 %v502_v56, %s2034_s19  ;;  %v662_v25 = vsel %vm653_vm0, %v659_v53, %v661_v10  ;;  %v528_v26 = vor.u32 %v527_v11, %v524_v17  ;;  %v531_v28 = vshrl.u32 %v1719_v19, 16  ;;  %v534_v30 = vshll.u32 %v1719_v19, 16  ;;  %1908 = vmatmul.mubr.msk.bf16.gmra.mxu1 %vm744_vm4, %v2098_v14 }
  0x2c   : > { %v415_v32 = vrot.slane %v2186_v38, 1  ;;  %v322_v33 = vsel %vm270_vm2, %v317_v22, %v321_v23  ;;  %v663_v34 = vrot.slane %v1719_v19, 3  ;;  %v323_v36 = vshrl.u32 %v2213_v61, 16  ;;  %1911 = vmatprep.mubr.msk.bf16.mxu1 %vm2035_vm5, %v2031_v8 }
  0x2d   : > { %v327_v37 = vshll.u32 %v2247_v24, 16  ;;  %v529_v41 = vsel %vm476_vm3, %v519_v4, %v528_v26  ;;  %v533_v35 = vrot.slane %v531_v28, 3  ;;  %v536_v42 = vrot.slane %v534_v30, 4 }
  0x2e   : > { %435 = vrot.lane.b32.xlu1 %v412_v63, %s2032_s7  ;;  %v1720_v44 = vcombine.low %v187_v18, %v188_v31  ;;  %v416_v45 = vsel %vm405_vm1, %v413_v21, %v415_v32  ;;  %v325_v46 = vor.u32 %v323_v36, %v321_v23  ;;  %v2262_v49 = vcombine.low %v188_v31, %v189_v43  ;;  %v191_v63 = vld [vmem:[%s2082_s25 + $0x4c] sm:$0xf] }
  0x2f   : > { %683 = vrot.lane.b32.xlu0 %v660_v3, %s2032_s7  ;;  %v329_v47 = vrot.slane %v327_v37, 1  ;;  %v664_v50 = vsel %vm653_vm0, %v661_v10, %v663_v34  ;;  %v537_v51 = vor.u32 %v536_v42, %v533_v35  ;;  %v417_v54 = vrot.slane %v2213_v61, 1 }
  0x30   : > { %v540_v52 = vshrl.u32 %v1720_v44, 16  ;;  %v543_v53 = vshll.u32 %v1720_v44, 16  ;;  %v665_v56 = vrot.slane %v1720_v44, 3  ;;  %v331_v57 = vshrl.u32 %v2247_v24, 16 }
  0x31   : > { %v330_v55 = vsel %vm270_vm2, %v325_v46, %v329_v47  ;;  %v335_v58 = vshll.u32 %v2262_v49, 16  ;;  %v538_v59 = vsel %vm476_vm3, %v528_v26, %v537_v51  ;;  %v1721_v0 = vcombine.low %v189_v43, %v190_v29 }
  0x32   : > { %381 = vrot.lane.b32.xlu1 %v314_v48, %s2033_s16  ;;  %v542_v60 = vrot.slane %v540_v52, 3  ;;  %v545_v62 = vrot.slane %v543_v53, 4  ;;  %v418_v1 = vsel %vm405_vm1, %v415_v32, %v417_v54  ;;  %v333_v2 = vor.u32 %v331_v57, %v329_v47 }
  0x33   : > { %599 = vrot.lane.b32.xlu0 %v520_v16, %s2034_s19  ;;  %v337_v3 = vrot.slane %v335_v58, 1  ;;  %v2277_v4 = vcombine.low %v190_v29, %v191_v63  ;;  %v666_v5 = vsel %vm653_vm0, %v663_v34, %v665_v56  ;;  %v549_v7 = vshrl.u32 %v1721_v0, 16  ;;  %1912 = vmatmul.mubr.msk.bf16.gmra.mxu1 %vm744_vm4, %v2132_v39 }
  0x34   : > { %v546_v6 = vor.u32 %v545_v62, %v542_v60  ;;  %v552_v21 = vshll.u32 %v1721_v0, 16  ;;  %v419_v40 = vrot.slane %v2247_v24, 1  ;;  %v339_v10 = vshrl.u32 %v2262_v49, 16  ;;  %1915 = vmatprep.mubr.msk.bf16.mxu1 %vm2035_vm5, %v2031_v8 }
  0x35   : > { %v338_v48 = vsel %vm270_vm2, %v333_v2, %v337_v3  ;;  %v343_v13 = vshll.u32 %v2277_v4, 16  ;;  %v2287_v16 = vcombine.low %v191_v63, %v192_v9  ;;  %v667_v11 = vrot.slane %v1721_v0, 3  ;;  %v201_v2 = vld [vmem:[%s2082_s25 + $0x64] sm:$0xf] }
  0x36   : > { %437 = vrot.lane.b32.xlu1 %v414_v15, %s2032_s7  ;;  %v547_v17 = vsel %vm476_vm3, %v537_v51, %v546_v6  ;;  %v551_v18 = vrot.slane %v549_v7, 3  ;;  %v554_v19 = vrot.slane %v552_v21, 4  ;;  %v193_v15 = vld [vmem:[%s2082_s25 + $0x54] sm:$0xf]  ;;  %v420_v22 = vsel %vm405_vm1, %v417_v54, %v419_v40 }
  0x37   : > { %685 = vrot.lane.b32.xlu0 %v662_v25, %s2032_s7  ;;  %v341_v23 = vor.u32 %v339_v10, %v337_v3  ;;  %v345_v25 = vrot.slane %v343_v13, 1  ;;  %v2294_v26 = vcombine.low %v192_v9, %v193_v15  ;;  %v668_v28 = vsel %vm653_vm0, %v665_v56, %v667_v11  ;;  %v200_v56 = vld [vmem:[%s2082_s25 + $0x60] sm:$0xf]  ;;  %v2341_v13 = vld [vmem:[%s2082_s25 + $0x68] sm:$0xf] }
  0x38   : > { %v555_v30 = vor.u32 %v554_v19, %v551_v18  ;;  %v558_v31 = vshrl.u32 %v2287_v16, 16  ;;  %v561_v32 = vshll.u32 %v2287_v16, 16  ;;  %v421_v34 = vrot.slane %v2262_v49, 1 }
  0x39   : > { %v346_v36 = vsel %vm270_vm2, %v341_v23, %v345_v25  ;;  %v669_v37 = vrot.slane %v2287_v16, 3  ;;  %v351_v35 = vshll.u32 %v2294_v26, 16  ;;  %v423_v57 = vrot.slane %v2277_v4, 1 }
  0x3a   : > { %383 = vrot.lane.b32.xlu1 %v322_v33, %s2033_s16  ;;  %v194_v33 = vld [vmem:[%s2082_s25 + $0x58] sm:$0xf]  ;;  %v556_v42 = vsel %vm476_vm3, %v546_v6, %v555_v30  ;;  %v560_v43 = vrot.slane %v558_v31, 3  ;;  %v563_v44 = vrot.slane %v561_v32, 4  ;;  %v422_v47 = vsel %vm405_vm1, %v419_v40, %v421_v34 }
  0x3b   : > { %601 = vrot.lane.b32.xlu0 %v529_v41, %s2034_s19  ;;  %v347_v41 = vshrl.u32 %v2277_v4, 16  ;;  %v1723_v46 = vcombine.low %v193_v15, %v194_v33  ;;  %v353_v51 = vrot.slane %v351_v35, 1  ;;  %v670_v53 = vsel %vm653_vm0, %v667_v11, %v669_v37  ;;  %v2359_v32 = vld [vmem:[%s2082_s25 + $0x68] ss:$0 sps:$4 sm:$0x11]   ;;  %1916 = vmatmul.mubr.msk.bf16.gmra.mxu1 %vm744_vm4, %v2186_v38 }
  0x3c   : > { %v564_v29 = vor.u32 %v563_v44, %v560_v43  ;;  %v355_v60 = vshrl.u32 %v2294_v26, 16  ;;  %v2337_v21 = vcombine.low %v200_v56, %v201_v2  ;;  %v425_v16 = vrot.slane %v2294_v26, 1  ;;  %1919 = vmatprep.mubr.msk.bf16.mxu1 %vm2035_vm5, %v2031_v8 }
  0x3d   : > { %v567_v54 = vshrl.u32 %v1723_v46, 16  ;;  %v632_v44 = vshll.u32 %v2359_v32, 16  ;;  %vm1517_vm8 = vcmask 518144   ;;  %vm1525_vm9 = vsmask.f32 3328 }
  0x3e   : > { %439 = vrot.lane.b32.xlu1 %v416_v45, %s2032_s7  ;;  %v195_v45 = vld [vmem:[%s2082_s25 + $0x5c] sm:$0xf]  ;;  %v565_v63 = vsel %vm476_vm3, %v555_v30, %v564_v29  ;;  %v357_v6 = vor.u32 %v355_v60, %v353_v51  ;;  %v624_v19 = vshll.u32 %v2337_v21, 16  ;;  %v628_v43 = vshrl.u32 %v2337_v21, 16 }
  0x3f   : > { %687 = vrot.lane.b32.xlu0 %v664_v50, %s2032_s7  ;;  %v349_v50 = vor.u32 %v347_v41, %v345_v25  ;;  %v2318_v52 = vcombine.low %v194_v33, %v195_v45  ;;  %v569_v0 = vrot.slane %v567_v54, 3  ;;  %v1724_v3 = vcombine.low %v195_v45, %v200_v56  ;;  %v2363_v41 = vld [vmem:[%s2082_s25 + $0x6c] sm:$0xf] }
  0x40   : > { %v1729_v25 = vcombine.low %v201_v2, %v2341_v13  ;;  %v626_v31 = vrot.slane %v624_v19, 1  ;;  %v1730_v45 = vcombine.low %v2363_v41, %v2363_v41  ;;  %vm1526_vm10 = vsmask.f32 7440 }
  0x41   : > { %v354_v58 = vsel %vm270_vm2, %v349_v50, %v353_v51  ;;  %v359_v62 = vshll.u32 %v2318_v52, 16  ;;  %v579_v10 = vshll.u32 %v1724_v3, 16  ;;  %v673_v11 = vrot.slane %v1724_v3, 3  ;;  %vm2608_vm11 = vmor %vm1525_vm9, %vm1526_vm10 }
  0x42   : > { %385 = vrot.lane.b32.xlu1 %v330_v55, %s2033_s16  ;;  %v570_v55 = vshll.u32 %v1723_v46, 16  ;;  %v363_v18 = vshrl.u32 %v2318_v52, 16  ;;  %v427_v35 = vrot.slane %v2318_v52, 1  ;;  %v630_v54 = vor.u32 %v628_v43, %v626_v31 }
  0x43   : > { %603 = vrot.lane.b32.xlu0 %v538_v59, %s2034_s19  ;;  %v671_v59 = vrot.slane %v1723_v46, 3  ;;  %v361_v7 = vrot.slane %v359_v62, 1  ;;  %v581_v23 = vrot.slane %v579_v10, 4  ;;  %v724_v56 = vshrl.u32 %v1730_v45, 16  ;;  %1920 = vmatmul.mubr.msk.bf16.gmra.mxu1 %vm744_vm4, %v2213_v61 }
  0x44   : > { %v1725_v62 = vcombine.low %v201_v2, %v201_v2  ;;  %1923 = vmatprep.mubr.msk.bf16.mxu1 %vm2035_vm5, %v2031_v8  ;;  %vm1545_vm12 = vcmask 519171   ;;  %vm1547_vm13 = vcmask 517120   ;;  %vm1554_vm14 = vcmask 1042432  }
  0x45   : > { %v672_v9 = vsel %vm653_vm0, %v669_v37, %v671_v59  ;;  %v365_v30 = vor.u32 %v363_v18, %v361_v7  ;;  %v674_v33 = vsel %vm653_vm0, %v671_v59, %v673_v11  ;;  %v718_v37 = vshll.u32 %v1729_v25, 16 }
  0x46   : > { %441 = vrot.lane.b32.xlu1 %v418_v1, %s2032_s7  ;;  %v572_v1 = vrot.slane %v570_v55, 4  ;;  %v634_v55 = vrot.slane %v632_v44, 1  ;;  %vm1555_vm15 = vcmask 1046532   ;;  %vm1601_vm9 = vcmask 1041408  }
  0x47   : > { %689 = vrot.lane.b32.xlu0 %v666_v5, %s2032_s7  ;;  %v424_v5 = vsel %vm405_vm1, %v421_v34, %v423_v57  ;;  %v720_v51 = vrot.slane %v718_v37, 4  ;;  %vm1602_vm10 = vcmask 1045508  }
  0x48   : > { %v573_v40 = vor.u32 %v572_v1, %v569_v0  ;;  %v677_v0 = vrot.slane %v1730_v45, 3  ;;  %v726_v1 = vrot.slane %v724_v56, 3 }
  0x4a   : > { %387 = vrot.lane.b32.xlu1 %v338_v48, %s2033_s16  ;;  %v576_v48 = vshrl.u32 %v1724_v3, 16  ;;  %v574_v15 = vsel %vm476_vm3, %v564_v29, %v573_v40  ;;  %v428_v29 = vsel %vm405_vm1, %v425_v16, %v427_v35 }
  0x4b   : > { %605 = vrot.lane.b32.xlu0 %v547_v17, %s2034_s19  ;;  %v362_v17 = vsel %vm270_vm2, %v357_v6, %v361_v7  ;;  %v2003_v7 = vld [vmem:[%s2082_s25 + $0x60] ss:$0 sps:$4 sm:$0x33]   ;;  %1924 = vmatmul.mubr.msk.bf16.gmra.mxu1 %vm744_vm4, %v2247_v24 }
  0x4c   : > { %1927 = vmatprep.mubr.msk.bf16.mxu1 %vm2035_vm5, %v2031_v8 }
  0x4e   : > { %443 = vrot.lane.b32.xlu1 %v420_v22, %s2032_s7  ;;  %v578_v22 = vrot.slane %v576_v48, 3 }
  0x4f   : > { %691 = vrot.lane.b32.xlu0 %v668_v28, %s2032_s7  ;;  %v426_v28 = vsel %vm405_vm1, %v423_v57, %v425_v16  ;;  %v727_v57 = vshll.u32 %v1730_v45, 16  ;;  %v429_v16 = vrot.slane %v2003_v7, 1 }
  0x50   : > { %v582_v34 = vor.u32 %v581_v23, %v578_v22  ;;  %v636_v22 = vshrl.u32 %v2359_v32, 16 }
  0x51   : > { %v729_v3 = vrot.slane %v727_v57, 4  ;;  %v430_v19 = vsel %vm405_vm1, %v427_v35, %v429_v16  ;;  %vm1564_vm1 = vcmask 519170  }
  0x52   : > { %389 = vrot.lane.b32.xlu1 %v346_v36, %s2033_s16  ;;  %v715_v36 = vshrl.u32 %v1729_v25, 16  ;;  %v583_v46 = vsel %vm476_vm3, %v573_v40, %v582_v34  ;;  %v588_v40 = vshll.u32 %v1725_v62, 16 }
  0x53   : > { %607 = vrot.lane.b32.xlu0 %v556_v42, %s2034_s19  ;;  %v627_v42 = vsel %vm270_vm2, %v365_v30, %v626_v31  ;;  %v730_v48 = vor.u32 %v729_v3, %v726_v1  ;;  %1928 = vmatmul.mubr.msk.bf16.gmra.mxu1 %vm744_vm4, %v2262_v49 }
  0x54   : > { %v717_v50 = vrot.slane %v715_v36, 3  ;;  %1931 = vmatprep.mubr.msk.bf16.mxu1 %vm2035_vm5, %v2031_v8 }
  0x56   : > { %445 = vrot.lane.b32.xlu1 %v422_v47, %s2032_s7  ;;  %v675_v47 = vrot.slane %v1729_v25, 3  ;;  %v721_v59 = vor.u32 %v720_v51, %v717_v50 }
  0x57   : > { %693 = vrot.lane.b32.xlu0 %v670_v53, %s2032_s7  ;;  %v2375_v53 = vld [vmem:[%s2082_s25 + $0x60] ss:$0 sps:$4 sm:$0x11]  }
  0x58   : > { %v367_v60 = vshll.u32 %v2375_v53, 16  ;;  %v678_v2 = vsel %vm653_vm0, %v675_v47, %v677_v0  ;;  %v731_v18 = vsel %vm476_vm3, %v721_v59, %v730_v48  ;;  %v371_v25 = vshrl.u32 %v2375_v53, 16 }
  0x5a   : > { %391 = vrot.lane.b32.xlu1 %v354_v58, %s2033_s16  ;;  %v676_v58 = vsel %vm653_vm0, %v673_v11, %v675_v47  ;;  %v369_v6 = vrot.slane %v367_v60, 1  ;;  %v590_v11 = vrot.slane %v588_v40, 4  ;;  %vm1556_vm0 = vmor %vm1554_vm14, %vm1555_vm15 }
  0x5b   : > { %609 = vrot.lane.b32.xlu0 %v565_v63, %s2034_s19  ;;  %v635_v63 = vsel %vm270_vm2, %v630_v54, %v634_v55  ;;  %1932 = vmatmul.mubr.msk.bf16.gmra.mxu1 %vm744_vm4, %v2277_v4 }
  0x5c   : > { %v370_v10 = vsel %vm270_vm2, %v365_v30, %v369_v6  ;;  %1935 = vmatprep.mubr.msk.bf16.mxu1 %vm2035_vm5, %v2031_v8  ;;  %vm1368_vm2 = vcmask 516096  }
  0x5e   : > { %447 = vrot.lane.b32.xlu1 %v424_v5, %s2032_s7  ;;  %v722_v5 = vsel %vm476_vm3, %v582_v34, %v721_v59 }
  0x5f   : > { %695 = vrot.lane.b32.xlu0 %v672_v9, %s2032_s7  ;;  %v585_v9 = vshrl.u32 %v1725_v62, 16 }
  0x62   : > { %393 = vrot.lane.b32.xlu1 %v362_v17, %s2033_s16  ;;  %v587_v17 = vrot.slane %v585_v9, 3  ;;  %v2022_v9 = vld [vmem:[%s2082_s25 + $0x70] ss:$0 sps:$4 sm:$0x11]  }
  0x63   : > { %611 = vrot.lane.b32.xlu0 %v574_v15, %s2034_s19  ;;  %1936 = vmatmul.mubr.msk.bf16.gmra.mxu1 %vm744_vm4, %v2294_v26 }
  0x64   : > { %v591_v15 = vor.u32 %v590_v11, %v587_v17  ;;  %1939 = vmatprep.mubr.msk.bf16.mxu1 %vm2035_vm5, %v2031_v8 }
  0x66   : > { %449 = vrot.lane.b32.xlu1 %v426_v28, %s2032_s7  ;;  %v592_v23 = vsel %vm476_vm3, %v582_v34, %v591_v15  ;;  %vm1572_vm3 = vsmask.f32 2304 }
  0x67   : > { %697 = vrot.lane.b32.xlu0 %v674_v33, %s2032_s7 }
  0x6a   : > { %638 = vrot.lane.b32.xlu1 %v627_v42, %s2033_s16 }
  0x6b   : > { %613 = vrot.lane.b32.xlu0 %v583_v46, %s2034_s19  ;;  %1940 = vmatmul.mubr.msk.bf16.gmra.mxu1 %vm744_vm4, %v2318_v52 }
  0x6c   : > { %1943 = vmatprep.mubr.msk.bf16.mxu1 %vm2035_vm5, %v2031_v8 }
  0x6e   : > { %451 = vrot.lane.b32.xlu1 %v428_v29, %s2032_s7 }
  0x6f   : > { %699 = vrot.lane.b32.xlu0 %v676_v58, %s2032_s7 }
  0x72   : > { %640 = vrot.lane.b32.xlu1 %v635_v63, %s2033_s16  ;;  %v1731_v63 = vcombine.low %v2341_v13, %v2363_v41 }
  0x73   : > { %734 = vrot.lane.b32.xlu0 %v722_v5, %s2034_s19  ;;  %1944 = vmatmul.mubr.msk.bf16.gmra.mxu1 %vm744_vm4, %v2337_v21 }
  0x74   : > { %1947 = vmatprep.mubr.msk.bf16.mxu1 %vm2035_vm5, %v2031_v8 }
  0x76   : > { %701 = vrot.lane.b32.xlu1 %v678_v2, %s2032_s7 }
  0x77   : > { %395 = vrot.lane.b32.xlu0 %v370_v10, %s2033_s16 }
  0x7a   : > { %736 = vrot.lane.b32.xlu1 %v731_v18, %s2034_s19 }
  0x7b   : > { %453 = vrot.lane.b32.xlu0 %v430_v19, %s2032_s7  ;;  %1948 = vmatmul.mubr.msk.bf16.gmra.mxu1 %vm744_vm4, %v1731_v63 }
  0x7c   : > { %1951 = vmatprep.mubr.msk.bf16.mxu1 %vm2035_vm5, %v2031_v8 }
  0x7e   : > { %642 = vrot.lane.b32.xlu1 %v636_v22, %s2033_s16 }
  0x7f   : > { %615 = vrot.lane.b32.xlu0 %v592_v23, %s2034_s19 }
  0x82   : > { %703 = vrot.lane.b32.xlu1 %v677_v0, %s2032_s7 }
  0x83   : > { %397 = vrot.lane.b32.xlu0 %v371_v25, %s2033_s16  ;;  %1952 = vmatmul.mubr.msk.bf16.gmra.mxu1 %vm744_vm4, %v2022_v9 }
  0x86   : > { %738 = vrot.lane.b32.xlu1 %v726_v1, %s2034_s19 }
  0x87   : > { %455 = vrot.lane.b32.xlu0 %v429_v16, %s2032_s7  ;;  %s1956_s7 = smul.u32 20, %s2668_s13 }
  0x88   : > { %v680_v28 = vpop.permute.xlu1 %679 }
  0x89   : > { %v434_v30 = vpop.permute.xlu0 %433  ;;  %s2596_s10 = scalar_lea.vmem %s2664_s3, %s1956_s7 }
  0x8b   : > { %617 = vrot.lane.b32.xlu0 %v587_v17, %s2034_s19 }
  0x8c   : > { %v432_v31 = vpop.permute.xlu1 %431 }
  0x8d   : > { %v376_v33 = vpop.permute.xlu0 %375 }
  0x8e   : > { %v748_v37 = vsel %vm744_vm4, %v2106_v20, %v376_v33 }
  0x8f   : > { %v845_v45 = vsel %vm771_vm6, %v748_v37, %v680_v28  ;;  %v775_v56 = vsel %vm771_vm6, %v748_v37, %v434_v30 }
  0x90   : > { %v682_v34 = vpop.permute.xlu1 %681 }
  0x91   : > { %v374_v36 = vpop.permute.xlu0 %373 }
  0x92   : > { %v746_v35 = vsel %vm744_vm4, %v2115_v27, %v374_v36 }
  0x93   : > { %v773_v43 = vsel %vm771_vm6, %v746_v35, %v432_v31 }
  0x94   : > { %v594_v42 = vpop.permute.xlu1 %593 }
  0x95   : > { %v733_v44 = vpop.permute.xlu0 %732  ;;  %v800_v46 = vsel %vm798_vm7, %v773_v43, %v594_v42 }
  0x96   : > { %v871_v47 = vsel %vm798_vm7, %v845_v45, %v733_v44 }
  0x97   : > { %1104 = vmatprep.mubr.bf16.mxu0 %v871_v47 }
  0x98   : > { %1105 = vmatmul.mubr.bf16.vlgmr.msra.gmra.mxu0 %v800_v46  ;;  %v598_v50 = vpop.permute.xlu1 %597 }
  0x99   : > { %v378_v20 = vpop.permute.xlu0 %377 }
  0x9a   : > { %v750_v27 = vsel %vm744_vm4, %v2095_v12, %v378_v20 }
  0x9b   : > { %v847_v51 = vsel %vm771_vm6, %v750_v27, %v682_v34 }
  0x9c   : > { %v380_v29 = vpop.permute.xlu1 %379  ;;  %v873_v54 = vsel %vm798_vm7, %v847_v51, %v598_v50 }
  0x9d   : > { %1112 = vmatprep.mubr.bf16.mxu0 %v873_v54  ;;  %v596_v55 = vpop.permute.xlu0 %595  ;;  %v752_v12 = vsel %vm744_vm4, %v2098_v14, %v380_v29 }
  0x9e   : > { %v803_v57 = vsel %vm798_vm7, %v775_v56, %v596_v55 }
  0xa0   : > { %1113 = vmatmul.mubr.bf16.gmra.mxu0 %v803_v57  ;;  %v436_v58 = vpop.permute.xlu1 %435 }
  0xa1   : > { %v684_v59 = vpop.permute.xlu0 %683  ;;  %v777_v60 = vsel %vm771_vm6, %v750_v27, %v436_v58 }
  0xa2   : > { %v849_v0 = vsel %vm771_vm6, %v752_v12, %v684_v59  ;;  %v806_v5 = vsel %vm798_vm7, %v777_v60, %v598_v50 }
  0xa4   : > { %v382_v62 = vpop.permute.xlu1 %381 }
  0xa5   : > { %v600_v1 = vpop.permute.xlu0 %599  ;;  %v754_v7 = vsel %vm744_vm4, %v2132_v39, %v382_v62 }
  0xa6   : > { %v875_v3 = vsel %vm798_vm7, %v849_v0, %v600_v1 }
  0xa7   : > { %1120 = vmatprep.mubr.bf16.mxu0 %v875_v3 }
  0xa8   : > { %1121 = vmatmul.mubr.bf16.gmra.mxu0 %v806_v5  ;;  %v438_v6 = vpop.permute.xlu1 %437 }
  0xa9   : > { %v686_v14 = vpop.permute.xlu0 %685  ;;  %v779_v13 = vsel %vm771_vm6, %v752_v12, %v438_v6 }
  0xaa   : > { %v851_v40 = vsel %vm771_vm6, %v754_v7, %v686_v14  ;;  %v809_v10 = vsel %vm798_vm7, %v779_v13, %v600_v1 }
  0xac   : > { %v384_v41 = vpop.permute.xlu1 %383 }
  0xad   : > { %v602_v2 = vpop.permute.xlu0 %601  ;;  %v756_v39 = vsel %vm744_vm4, %v2186_v38, %v384_v41 }
  0xae   : > { %v877_v48 = vsel %vm798_vm7, %v851_v40, %v602_v2 }
  0xaf   : > { %1128 = vmatprep.mubr.bf16.mxu0 %v877_v48 }
  0xb0   : > { %1129 = vmatmul.mubr.bf16.gmra.mxu0 %v809_v10  ;;  %v440_v16 = vpop.permute.xlu1 %439 }
  0xb1   : > { %v688_v8 = vpop.permute.xlu0 %687  ;;  %v781_v17 = vsel %vm771_vm6, %v754_v7, %v440_v16 }
  0xb2   : > { %v853_v18 = vsel %vm771_vm6, %v756_v39, %v688_v8  ;;  %v812_v22 = vsel %vm798_vm7, %v781_v17, %v602_v2 }
  0xb4   : > { %v386_v11 = vpop.permute.xlu1 %385 }
  0xb5   : > { %v604_v19 = vpop.permute.xlu0 %603  ;;  %v758_v28 = vsel %vm744_vm4, %v2213_v61, %v386_v11 }
  0xb6   : > { %v879_v15 = vsel %vm798_vm7, %v853_v18, %v604_v19 }
  0xb7   : > { %1136 = vmatprep.mubr.bf16.mxu0 %v879_v15 }
  0xb8   : > { %1137 = vmatmul.mubr.bf16.gmra.mxu0 %v812_v22  ;;  %v442_v23 = vpop.permute.xlu1 %441 }
  0xb9   : > { %v690_v25 = vpop.permute.xlu0 %689  ;;  %v783_v30 = vsel %vm771_vm6, %v756_v39, %v442_v23 }
  0xba   : > { %v855_v31 = vsel %vm771_vm6, %v758_v28, %v690_v25  ;;  %v815_v36 = vsel %vm798_vm7, %v783_v30, %v604_v19 }
  0xbc   : > { %v388_v38 = vpop.permute.xlu1 %387 }
  0xbd   : > { %v606_v33 = vpop.permute.xlu0 %605  ;;  %v760_v42 = vsel %vm744_vm4, %v2247_v24, %v388_v38 }
  0xbe   : > { %v881_v34 = vsel %vm798_vm7, %v855_v31, %v606_v33 }
  0xbf   : > { %1144 = vmatprep.mubr.bf16.mxu0 %v881_v34 }
  0xc0   : > { %1145 = vmatmul.mubr.bf16.gmra.mxu0 %v815_v36  ;;  %v444_v37 = vpop.permute.xlu1 %443 }
  0xc1   : > { %v692_v35 = vpop.permute.xlu0 %691  ;;  %v785_v43 = vsel %vm771_vm6, %v758_v28, %v444_v37 }
  0xc2   : > { %v857_v44 = vsel %vm771_vm6, %v760_v42, %v692_v35  ;;  %v818_v47 = vsel %vm798_vm7, %v785_v43, %v606_v33 }
  0xc4   : > { %v390_v61 = vpop.permute.xlu1 %389 }
  0xc5   : > { %v608_v45 = vpop.permute.xlu0 %607  ;;  %v762_v27 = vsel %vm744_vm4, %v2262_v49, %v390_v61 }
  0xc6   : > { %v883_v46 = vsel %vm798_vm7, %v857_v44, %v608_v45 }
  0xc7   : > { %1152 = vmatprep.mubr.bf16.mxu0 %v883_v46 }
  0xc8   : > { %1153 = vmatmul.mubr.bf16.gmra.mxu0 %v818_v47  ;;  %v446_v50 = vpop.permute.xlu1 %445 }
  0xc9   : > { %v694_v20 = vpop.permute.xlu0 %693  ;;  %v787_v51 = vsel %vm771_vm6, %v760_v42, %v446_v50 }
  0xca   : > { %v859_v29 = vsel %vm771_vm6, %v762_v27, %v694_v20  ;;  %v821_v56 = vsel %vm798_vm7, %v787_v51, %v608_v45 }
  0xcc   : > { %v392_v24 = vpop.permute.xlu1 %391 }
  0xcd   : > { %v610_v54 = vpop.permute.xlu0 %609  ;;  %v764_v59 = vsel %vm744_vm4, %v2277_v4, %v392_v24 }
  0xce   : > { %v885_v55 = vsel %vm798_vm7, %v859_v29, %v610_v54 }
  0xcf   : > { %1160 = vmatprep.mubr.bf16.mxu0 %v885_v55 }
  0xd0   : > { %1161 = vmatmul.mubr.bf16.gmra.mxu0 %v821_v56  ;;  %v448_v57 = vpop.permute.xlu1 %447 }
  0xd1   : > { %v696_v58 = vpop.permute.xlu0 %695  ;;  %v789_v12 = vsel %vm771_vm6, %v762_v27, %v448_v57 }
  0xd2   : > { %v861_v60 = vsel %vm771_vm6, %v764_v59, %v696_v58  ;;  %v824_v0 = vsel %vm798_vm7, %v789_v12, %v610_v54 }
  0xd4   : > { %v394_v49 = vpop.permute.xlu1 %393 }
  0xd5   : > { %v612_v62 = vpop.permute.xlu0 %611  ;;  %v766_v5 = vsel %vm744_vm4, %v2294_v26, %v394_v49 }
  0xd6   : > { %v887_v63 = vsel %vm798_vm7, %v861_v60, %v612_v62 }
  0xd7   : > { %1168 = vmatprep.mubr.bf16.mxu0 %v887_v63 }
  0xd8   : > { %1169 = vmatmul.mubr.bf16.gmra.mxu0 %v824_v0  ;;  %v450_v1 = vpop.permute.xlu1 %449 }
  0xd9   : > { %v698_v3 = vpop.permute.xlu0 %697  ;;  %v791_v6 = vsel %vm771_vm6, %v764_v59, %v450_v1 }
  0xda   : > { %v863_v14 = vsel %vm771_vm6, %v766_v5, %v698_v3  ;;  %v827_v41 = vsel %vm798_vm7, %v791_v6, %v612_v62 }
  0xdc   : > { %v639_v4 = vpop.permute.xlu1 %638 }
  0xdd   : > { %v614_v7 = vpop.permute.xlu0 %613  ;;  %v839_v2 = vsel %vm744_vm4, %v2318_v52, %v639_v4 }
  0xde   : > { %v889_v13 = vsel %vm798_vm7, %v863_v14, %v614_v7 }
  0xdf   : > { %1176 = vmatprep.mubr.bf16.mxu0 %v889_v13 }
  0xe0   : > { %1177 = vmatmul.mubr.bf16.gmra.mxu0 %v827_v41  ;;  %v452_v9 = vpop.permute.xlu1 %451 }
  0xe1   : > { %v700_v40 = vpop.permute.xlu0 %699  ;;  %v793_v48 = vsel %vm771_vm6, %v766_v5, %v452_v9 }
  0xe2   : > { %v865_v10 = vsel %vm771_vm6, %v839_v2, %v700_v40  ;;  %v830_v39 = vsel %vm798_vm7, %v793_v48, %v614_v7 }
  0xe3   : > { %v1242_v45 = vpop.f32.mrf.mxu1 }
  0xe4   : > { %v641_v26 = vpop.permute.xlu1 %640 }
  0xe5   : > { %v735_v16 = vpop.permute.xlu0 %734  ;;  %v841_v11 = vsel %vm744_vm4, %v2337_v21, %v641_v26 }
  0xe6   : > { %v892_v8 = vsel %vm798_vm7, %v865_v10, %v735_v16 }
  0xe7   : > { %1184 = vmatprep.mubr.bf16.mxu0 %v892_v8 }
  0xe8   : > { %1185 = vmatmul.mubr.bf16.gmra.mxu0 %v830_v39  ;;  %v702_v17 = vpop.permute.xlu1 %701 }
  0xe9   : > { %v396_v18 = vpop.permute.xlu0 %395  ;;  %v867_v19 = vsel %vm771_vm6, %v841_v11, %v702_v17 }
  0xea   : > { %v768_v25 = vsel %vm744_vm4, %v2318_v52, %v396_v18 }
  0xec   : > { %v737_v15 = vpop.permute.xlu1 %736 }
  0xed   : > { %v454_v22 = vpop.permute.xlu0 %453  ;;  %v895_v23 = vsel %vm798_vm7, %v867_v19, %v737_v15 }
  0xee   : > { %1192 = vmatprep.mubr.bf16.mxu0 %v895_v23  ;;  %v795_v30 = vsel %vm771_vm6, %v768_v25, %v454_v22 }
  0xf0   : > { %v643_v28 = vpop.permute.xlu1 %642 }
  0xf1   : > { %v616_v38 = vpop.permute.xlu0 %615  ;;  %v843_v21 = vsel %vm744_vm4, %v2359_v32, %v643_v28  ;;  %v1905_v32 = vpop.f32.mrf.mxu1 }
  0xf2   : > { %v833_v31 = vsel %vm798_vm7, %v795_v30, %v616_v38 }
  0xf3   : > { %1193 = vmatmul.mubr.bf16.gmra.mxu0 %v833_v31  ;;  %v1245_v46 = vpop.f32.mrf.mxu1 }
  0xf4   : > { %v704_v33 = vpop.permute.xlu1 %703 }
  0xf5   : > { %v398_v34 = vpop.permute.xlu0 %397  ;;  %v869_v36 = vsel %vm771_vm6, %v843_v21, %v704_v33  ;;  %v1906_v47 = vpop.f32.mrf.mxu1 }
  0xf6   : > { %v770_v37 = vsel %vm744_vm4, %v2375_v53, %v398_v34  ;;  %vm1573_vm4 = vsmask.f32 6416 }
  0xf7   : > { %v1250_v50 = vpop.f32.mrf.mxu1  ;;  %vm1574_vm5 = vmor %vm1572_vm3, %vm1573_vm4 }
  0xf8   : > { %v739_v35 = vpop.permute.xlu1 %738 }
  0xf9   : > { %v456_v42 = vpop.permute.xlu0 %455  ;;  %v898_v52 = vsel %vm798_vm7, %v869_v36, %v739_v35  ;;  %v1909_v20 = vpop.f32.mrf.mxu1 }
  0xfa   : > { %1200 = vmatprep.mubr.bf16.mxu0 %v898_v52  ;;  %v797_v43 = vsel %vm771_vm6, %v770_v37, %v456_v42 }
  0xfb   : > { %v1253_v27 = vpop.f32.mrf.mxu1 }
  0xfd   : > { %v618_v61 = vpop.permute.xlu0 %617  ;;  %v1910_v51 = vpop.f32.mrf.mxu1 }
  0xfe   : > { %v836_v44 = vsel %vm798_vm7, %v797_v43, %v618_v61  ;;  %vm1594_vm7 = vcmask 519169  }
  0xff   : > { %1201 = vmatmul.mubr.bf16.gmra.mxu0 %v836_v44  ;;  %v2530_v53 = vpop.f32.mrf.mxu1 }
 0x101   : > { %v1913_v24 = vpop.f32.mrf.mxu1 }
 0x103   : > { %v2532_v29 = vpop.f32.mrf.mxu1 }
 0x105   : > { %v1914_v54 = vpop.f32.mrf.mxu1 }
 0x107   : > { %v2534_v55 = vpop.f32.mrf.mxu1 }
 0x109   : > { %v1917_v56 = vpop.f32.mrf.mxu1 }
 0x10b   : > { %v2536_v57 = vpop.f32.mrf.mxu1 }
 0x10d   : > { %v1918_v58 = vpop.f32.mrf.mxu1 }
 0x10f   : > { %v2538_v59 = vpop.f32.mrf.mxu1 }
 0x111   : > { %v1921_v12 = vpop.f32.mrf.mxu1 }
 0x113   : > { %v2540_v49 = vpop.f32.mrf.mxu1 }
 0x115   : > { %v1922_v60 = vpop.f32.mrf.mxu1 }
 0x117   : > { %v2542_v62 = vpop.f32.mrf.mxu1 }
 0x119   : > { %v1925_v63 = vpop.f32.mrf.mxu1 }
 0x11b   : > { %v2544_v0 = vpop.f32.mrf.mxu1 }
 0x11d   : > { %v1926_v1 = vpop.f32.mrf.mxu1 }
 0x11f   : > { %v2546_v3 = vpop.f32.mrf.mxu1 }
 0x121   : > { %v1929_v5 = vpop.f32.mrf.mxu1 }
 0x123   : > { %v2548_v6 = vpop.f32.mrf.mxu1 }
 0x125   : > { %v1930_v4 = vpop.f32.mrf.mxu1 }
 0x127   : > { %v2550_v14 = vpop.f32.mrf.mxu1 }
 0x129   : > { %v1933_v7 = vpop.f32.mrf.mxu1 }
 0x12b   : > { %v2552_v13 = vpop.f32.mrf.mxu1 }
 0x12d   : > { %v1934_v41 = vpop.f32.mrf.mxu1 }
 0x12f   : > { %v2554_v9 = vpop.f32.mrf.mxu1 }
 0x131   : > { %v1937_v40 = vpop.f32.mrf.mxu1 }
 0x133   : > { %v2556_v2 = vpop.f32.mrf.mxu1 }
 0x135   : > { %v1938_v48 = vpop.f32.mrf.mxu1 }
 0x137   : > { %v2558_v10 = vpop.f32.mrf.mxu1 }
 0x139   : > { %v1941_v8 = vpop.f32.mrf.mxu1 }
 0x13b   : > { %v2560_v11 = vpop.f32.mrf.mxu1 }
 0x13d   : > { %v1942_v15 = vpop.f32.mrf.mxu1 }
 0x13f   : > { %v2563_v25 = vpop.f32.mrf.mxu1 }
 0x141   : > { %v1945_v38 = vpop.f32.mrf.mxu1 }
 0x143   : > { %v2566_v33 = vpop.f32.mrf.mxu1 }
 0x145   : > { %v1946_v37 = vpop.f32.mrf.mxu1 }
 0x147   : > { %v2569_v52 = vpop.f32.mrf.mxu1 }
 0x149   : > { %v1949_v44 = vpop.f32.mrf.mxu1 }
 0x158   : > { %v1806_v26 = vpop.f32.mrf.mxu0 }
 0x15a   : > { %v1807_v16 = vpop.f32.mrf.mxu0 }
 0x15b   : > { %v1808_v39 = vadd.f32 %v1807_v16, %v1806_v26 }
 0x15c   : > { %v1809_v17 = vpop.f32.mrf.mxu0 }
 0x15d   : > { %v1243_v18 = vadd.f32 %v1808_v39, %v1242_v45 }
 0x15e   : > { %v1810_v19 = vpop.f32.mrf.mxu0 }
 0x15f   : > { %1344 = vst.msk [vmem:[#allocation2] sm:$0xff] %vm771_vm6, %v1243_v18  ;;  %v1811_v22 = vadd.f32 %v1810_v19, %v1809_v17  ;;  %v2584_v19 = vld [vmem:[%s2663_s2] ss:$0 sm:$0xff] }
 0x160   : > { %v1812_v23 = vpop.f32.mrf.mxu0 }
 0x161   : > { %v1246_v28 = vadd.f32 %v1811_v22, %v1245_v46  ;;  %v2572_v46 = vpop.f32.mrf.mxu1 }
 0x162   : > { %v1813_v30 = vpop.f32.mrf.mxu0 }
 0x163   : > { %1345 = vst.msk [vmem:[#allocation2 + $0x8] sm:$0xff] %vm771_vm6, %v1246_v28  ;;  %v1814_v31 = vadd.f32 %v1813_v30, %v1812_v23  ;;  %v1950_v20 = vpop.f32.mrf.mxu1 }
 0x164   : > { %v1815_v21 = vpop.f32.mrf.mxu0 }
 0x165   : > { %v1251_v34 = vadd.f32 %v1814_v31, %v1250_v50  ;;  %v1338_v58 = vpop.f32.mrf.mxu1 }
 0x166   : > { %v1816_v36 = vpop.f32.mrf.mxu0 }
 0x167   : > { %1346 = vst.msk [vmem:[#allocation2 + $0x10] sm:$0xff] %vm771_vm6, %v1251_v34  ;;  %v1817_v35 = vadd.f32 %v1816_v36, %v1815_v21  ;;  %v1953_v63 = vpop.f32.mrf.mxu1 }
 0x168   : > { %v1818_v42 = vpop.f32.mrf.mxu0 }
 0x169   : > { %v1254_v43 = vadd.f32 %v1817_v35, %v1253_v27 }
 0x16a   : > { %v1819_v61 = vpop.f32.mrf.mxu0  ;;  %v1371_v24 = vld [vmem:[#allocation2] ss:$2 sm:$0xff]  ;;  %v1395_v54 = vld [vmem:[#allocation2 + $0x1] ss:$2 sm:$0xff] }
 0x16b   : > { %1347 = vst.msk [vmem:[#allocation2 + $0x18] sm:$0xff] %vm771_vm6, %v1254_v43  ;;  %v1820_v45 = vadd.f32 %v1819_v61, %v1818_v42  ;;  %v1418_v1 = vmax.f32 %v1371_v24, %v1395_v54 }
 0x16c   : > { %v1821_v32 = vpop.f32.mrf.mxu0 }
 0x16d   : > { %v1259_v47 = vadd.f32 %v1820_v45, %v2530_v53  ;;  %v1341_v53 = vpop.f32.mrf.mxu1 }
 0x16e   : > { %v1822_v50 = vpop.f32.mrf.mxu0 }
 0x16f   : > { %1348 = vst.msk [vmem:[#allocation2 + $0x20] sm:$0xff] %vm771_vm6, %v1259_v47  ;;  %v1823_v51 = vadd.f32 %v1822_v50, %v1821_v32  ;;  %v1954_v16 = vpop.f32.mrf.mxu1 }
 0x170   : > { %v1824_v56 = vpop.f32.mrf.mxu0 }
 0x171   : > { %v1262_v27 = vadd.f32 %v1823_v51, %v2532_v29 }
 0x172   : > { %v1431_v12 = vld [vmem:[#allocation2 + $0xf] ss:$2 sm:$0xff]  ;;  %v1825_v60 = vpop.f32.mrf.mxu0  ;;  %v1373_v40 = vld [vmem:[#allocation2 + $0x10] ss:$2 sm:$0xff] }
 0x173   : > { %1349 = vst.msk [vmem:[#allocation2 + $0x28] sm:$0xff] %vm771_vm6, %v1262_v27  ;;  %v1826_v5 = vadd.f32 %v1825_v60, %v1824_v56  ;;  %v1454_v7 = vmax.f32 %v1418_v1, %v1431_v12  ;;  %v1397_v48 = vld [vmem:[#allocation2 + $0x11] ss:$2 sm:$0xff] }
 0x174   : > { %v1827_v4 = vpop.f32.mrf.mxu0  ;;  %v1419_v39 = vmax.f32 %v1373_v40, %v1397_v48 }
 0x175   : > { %v1267_v41 = vadd.f32 %v1826_v5, %v2534_v55  ;;  %v1469_v17 = vmax.f32 %v1454_v7, %v1373_v40 }
 0x176   : > { %v1828_v26 = vpop.f32.mrf.mxu0 }
 0x177   : > { %1350 = vst.msk [vmem:[#allocation2 + $0x30] sm:$0xff] %vm771_vm6, %v1267_v41  ;;  %v1829_v8 = vadd.f32 %v1828_v26, %v1827_v4  ;;  %v1487_v38 = vadd.f32 %v2584_v19, %v1469_v17 }
 0x178   : > { %v1830_v29 = vpop.f32.mrf.mxu0 }
 0x179   : > { %v1270_v18 = vadd.f32 %v1829_v8, %v2536_v57  ;;  %v1499_v42 = vmax.f32 %v1487_v38, 0.0 }
 0x17a   : > { %v1433_v15 = vld [vmem:[#allocation2 + $0x1f] ss:$2 sm:$0xff]  ;;  %v1831_v55 = vpop.f32.mrf.mxu0  ;;  %v1375_v30 = vld [vmem:[#allocation2 + $0x20] ss:$2 sm:$0xff] }
 0x17b   : > { %1351 = vst.msk [vmem:[#allocation2 + $0x38] sm:$0xff] %vm771_vm6, %v1270_v18  ;;  %v1832_v22 = vadd.f32 %v1831_v55, %v1830_v29  ;;  %v1455_v23 = vmax.f32 %v1419_v39, %v1433_v15  ;;  %v1399_v57 = vld [vmem:[#allocation2 + $0x21] ss:$2 sm:$0xff] }
 0x17c   : > { %v1833_v28 = vpop.f32.mrf.mxu0  ;;  %v1420_v61 = vmax.f32 %v1375_v30, %v1399_v57 }
 0x17d   : > { %v1275_v31 = vadd.f32 %v1832_v22, %v2538_v59  ;;  %v1470_v21 = vmax.f32 %v1455_v23, %v1375_v30 }
 0x17e   : > { %v1834_v34 = vpop.f32.mrf.mxu0 }
 0x17f   : > { %1352 = vst.msk [vmem:[#allocation2 + $0x40] sm:$0xff] %vm771_vm6, %v1275_v31  ;;  %v1835_v36 = vadd.f32 %v1834_v34, %v1833_v28  ;;  %v1488_v37 = vadd.f32 %v2584_v19, %v1470_v21 }
 0x180   : > { %v1836_v35 = vpop.f32.mrf.mxu0 }
 0x181   : > { %v1278_v43 = vadd.f32 %v1835_v36, %v2540_v49  ;;  %v1500_v44 = vmax.f32 %v1488_v37, 0.0 }
 0x182   : > { %v1837_v45 = vpop.f32.mrf.mxu0  ;;  %v1435_v59 = vld [vmem:[#allocation2 + $0x2f] ss:$2 sm:$0xff]  ;;  %v1377_v51 = vld [vmem:[#allocation2 + $0x30] ss:$2 sm:$0xff] }
 0x183   : > { %1353 = vst.msk [vmem:[#allocation2 + $0x48] sm:$0xff] %vm771_vm6, %v1278_v43  ;;  %v1838_v32 = vadd.f32 %v1837_v45, %v1836_v35  ;;  %v1456_v47 = vmax.f32 %v1420_v61, %v1435_v59  ;;  %v1511_v50 = vpack.c.bf16 %v1500_v44, %v1499_v42  ;;  %v1401_v56 = vld [vmem:[#allocation2 + $0x31] ss:$2 sm:$0xff]  ;;  %v1780_v7 = vpack.c.bf16 %v1500_v44, %v1500_v44 }
 0x184   : > { %v1839_v20 = vpop.f32.mrf.mxu0  ;;  %v1421_v63 = vmax.f32 %v1377_v51, %v1401_v56 }
 0x185   : > { %v1283_v49 = vadd.f32 %v1838_v32, %v2542_v62  ;;  %v1471_v24 = vmax.f32 %v1456_v47, %v1377_v51  ;;  %1518 = vst.msk [vmem:[%s2596_s10] sm:$0x7] %vm1517_vm8, %v1511_v50  ;;  %v1529_v15 = vshrl.u32 %v1780_v7, 16 }
 0x186   : > { %v1840_v54 = vpop.f32.mrf.mxu0 }
 0x187   : > { %1354 = vst.msk [vmem:[#allocation2 + $0x50] sm:$0xff] %vm771_vm6, %v1283_v49  ;;  %v1841_v58 = vadd.f32 %v1840_v54, %v1839_v20  ;;  %v1489_v27 = vadd.f32 %v2584_v19, %v1471_v24 }
 0x188   : > { %v1842_v12 = vpop.f32.mrf.mxu0 }
 0x189   : > { %v1286_v60 = vadd.f32 %v1841_v58, %v2544_v0  ;;  %v1501_v1 = vmax.f32 %v1489_v27, 0.0 }
 0x18a   : > { %v1843_v5 = vpop.f32.mrf.mxu0  ;;  %v1437_v4 = vld [vmem:[#allocation2 + $0x3f] ss:$2 sm:$0xff]  ;;  %v1379_v48 = vld [vmem:[#allocation2 + $0x40] ss:$2 sm:$0xff] }
 0x18b   : > { %1355 = vst.msk [vmem:[#allocation2 + $0x58] sm:$0xff] %vm771_vm6, %v1286_v60  ;;  %v1844_v62 = vadd.f32 %v1843_v5, %v1842_v12  ;;  %v1457_v53 = vmax.f32 %v1421_v63, %v1437_v4  ;;  %v1781_v41 = vpack.c.bf16 %v1501_v1, %v1501_v1  ;;  %v1403_v16 = vld [vmem:[#allocation2 + $0x41] ss:$2 sm:$0xff] }
 0x18c   : > { %v1845_v40 = vpop.f32.mrf.mxu0 }
 0x18d   : > { %v1291_v26 = vadd.f32 %v1844_v62, %v2546_v3  ;;  %v1472_v8 = vmax.f32 %v1457_v53, %v1379_v48  ;;  %v1534_v29 = vshll.u32 %v1781_v41, 16  ;;  %v1538_v0 = vshrl.u32 %v1781_v41, 16 }
 0x18e   : > { %v1846_v39 = vpop.f32.mrf.mxu0  ;;  %v1422_v3 = vmax.f32 %v1379_v48, %v1403_v16 }
 0x18f   : > { %1356 = vst.msk [vmem:[#allocation2 + $0x60] sm:$0xff] %vm771_vm6, %v1291_v26  ;;  %v1847_v18 = vadd.f32 %v1846_v39, %v1845_v40  ;;  %v1536_v55 = vrot.slane %v1534_v29, 5  ;;  %v1540_v22 = vrot.slane %v1538_v0, 4  ;;  %v1490_v30 = vadd.f32 %v2584_v19, %v1472_v8 }
 0x190   : > { %v1848_v23 = vpop.f32.mrf.mxu0 }
 0x191   : > { %v1294_v28 = vadd.f32 %v1847_v18, %v2548_v6  ;;  %v1537_v38 = vsel %vm2608_vm11, %v1529_v15, %v1536_v55  ;;  %v1541_v31 = vor.u32 %v1540_v22, %v1536_v55  ;;  %v1502_v61 = vmax.f32 %v1490_v30, 0.0  ;;  %vm1603_vm11 = vmor %vm1601_vm9, %vm1602_vm10 }
 0x192   : > { %v1849_v21 = vpop.f32.mrf.mxu0  ;;  %v1439_v34 = vld [vmem:[#allocation2 + $0x4f] ss:$2 sm:$0xff]  ;;  %1546 = vst.msk [vmem:[%s2596_s10] sm:$0x8] %vm1545_vm12, %v1537_v38  ;;  %v1381_v42 = vld [vmem:[#allocation2 + $0x50] ss:$2 sm:$0xff] }
 0x193   : > { %1357 = vst.msk [vmem:[#allocation2 + $0x68] sm:$0xff] %vm771_vm6, %v1294_v28  ;;  %v1850_v57 = vadd.f32 %v1849_v21, %v1848_v23  ;;  %v1458_v36 = vmax.f32 %v1422_v3, %v1439_v34  ;;  %v1542_v37 = vrot.slane %v1541_v31, 4  ;;  %v1405_v45 = vld [vmem:[#allocation2 + $0x51] ss:$2 sm:$0xff]  ;;  %v1782_v49 = vpack.c.bf16 %v1502_v61, %v1502_v61 }
 0x194   : > { %v1851_v35 = vpop.f32.mrf.mxu0  ;;  %v1423_v20 = vmax.f32 %v1381_v42, %v1405_v45 }
 0x195   : > { %v1299_v6 = vadd.f32 %v1850_v57, %v2550_v14  ;;  %v1473_v43 = vmax.f32 %v1458_v36, %v1381_v42  ;;  %1548 = vst.msk [vmem:[%s2596_s10 + $0x4] sm:$0x3] %vm1547_vm13, %v1542_v37 }
 0x196   : > { %v1852_v44 = vpop.f32.mrf.mxu0 }
 0x197   : > { %1358 = vst.msk [vmem:[#allocation2 + $0x70] sm:$0xff] %vm771_vm6, %v1299_v6  ;;  %v1853_v59 = vadd.f32 %v1852_v44, %v1851_v35  ;;  %v1491_v32 = vadd.f32 %v2584_v19, %v1473_v43 }
 0x198   : > { %v1854_v47 = vpop.f32.mrf.mxu0 }
 0x199   : > { %v1302_v50 = vadd.f32 %v1853_v59, %v2552_v13  ;;  %v1503_v51 = vmax.f32 %v1491_v32, 0.0  ;;  %v1770_v13 = vrot.slane %v1782_v49, 9 }
 0x19a   : > { %v1855_v14 = vpop.f32.mrf.mxu0  ;;  %v1441_v24 = vld [vmem:[#allocation2 + $0x5f] ss:$2 sm:$0xff]  ;;  %v1383_v12 = vld [vmem:[#allocation2 + $0x60] ss:$2 sm:$0xff] }
 0x19b   : > { %1359 = vst.msk [vmem:[#allocation2 + $0x78] sm:$0xff] %vm771_vm6, %v1302_v50  ;;  %v1856_v54 = vadd.f32 %v1855_v14, %v1854_v47  ;;  %v1459_v56 = vmax.f32 %v1423_v20, %v1441_v24  ;;  %v1783_v58 = vpack.c.bf16 %v1503_v51, %v1503_v51  ;;  %v1407_v4 = vld [vmem:[#allocation2 + $0x61] ss:$2 sm:$0xff] }
 0x19c   : > { %v1857_v27 = vpop.f32.mrf.mxu0  ;;  %v1424_v26 = vmax.f32 %v1383_v12, %v1407_v4 }
 0x19d   : > { %v1307_v60 = vadd.f32 %v1856_v54, %v2554_v9  ;;  %v1474_v63 = vmax.f32 %v1459_v56, %v1383_v12  ;;  %v1559_v1 = vrot.slane %v1783_v58, 5 }
 0x19e   : > { %v1858_v5 = vpop.f32.mrf.mxu0 }
 0x19f   : > { %1360 = vst.msk [vmem:[#allocation2 + $0x80] sm:$0xff] %vm771_vm6, %v1307_v60  ;;  %v1859_v62 = vadd.f32 %v1858_v5, %v1857_v27  ;;  %v1492_v53 = vadd.f32 %v2584_v19, %v1474_v63  ;;  %v1560_v7 = vsel %vm1556_vm0, %v1770_v13, %v1559_v1  ;;  %v1561_v41 = vrot.slane %v1559_v1, 4 }
 0x1a0   : > { %v1860_v40 = vpop.f32.mrf.mxu0  ;;  %1565 = vst.msk [vmem:[%s2596_s10 + $0x4] sm:$0xc] %vm1564_vm1, %v1560_v7 }
 0x1a1   : > { %v1310_v48 = vadd.f32 %v1859_v62, %v2556_v2  ;;  %v1504_v9 = vmax.f32 %v1492_v53, 0.0  ;;  %1566 = vst.msk [vmem:[%s2596_s10 + $0x8] sm:$0x1] %vm1368_vm2, %v1561_v41 }
 0x1a2   : > { %v1861_v16 = vpop.f32.mrf.mxu0  ;;  %v1443_v8 = vld [vmem:[#allocation2 + $0x6f] ss:$2 sm:$0xff]  ;;  %v1385_v18 = vld [vmem:[#allocation2 + $0x70] ss:$2 sm:$0xff] }
 0x1a3   : > { %1361 = vst.msk [vmem:[#allocation2 + $0x88] sm:$0xff] %vm771_vm6, %v1310_v48  ;;  %v1862_v29 = vadd.f32 %v1861_v16, %v1860_v40  ;;  %v1460_v0 = vmax.f32 %v1424_v26, %v1443_v8  ;;  %v1784_v39 = vpack.c.bf16 %v1504_v9, %v1504_v9  ;;  %v1409_v28 = vld [vmem:[#allocation2 + $0x71] ss:$2 sm:$0xff] }
 0x1a4   : > { %v1863_v17 = vpop.f32.mrf.mxu0  ;;  %v1425_v57 = vmax.f32 %v1385_v18, %v1409_v28 }
 0x1a5   : > { %v1315_v15 = vadd.f32 %v1862_v29, %v2558_v10  ;;  %v1475_v55 = vmax.f32 %v1460_v0, %v1385_v18  ;;  %v1576_v22 = vshrl.u32 %v1784_v39, 16  ;;  %v1579_v23 = vshll.u32 %v1784_v39, 16 }
 0x1a6   : > { %v1864_v3 = vpop.f32.mrf.mxu0 }
 0x1a7   : > { %1362 = vst.msk [vmem:[#allocation2 + $0x90] sm:$0xff] %vm771_vm6, %v1315_v15  ;;  %v1865_v2 = vadd.f32 %v1864_v3, %v1863_v17  ;;  %v1493_v30 = vadd.f32 %v2584_v19, %v1475_v55  ;;  %v1578_v31 = vrot.slane %v1576_v22, 5  ;;  %v1581_v21 = vrot.slane %v1579_v23, 6 }
 0x1a8   : > { %v1866_v38 = vpop.f32.mrf.mxu0 }
 0x1a9   : > { %v1318_v34 = vadd.f32 %v1865_v2, %v2560_v11  ;;  %v1505_v36 = vmax.f32 %v1493_v30, 0.0  ;;  %v1582_v44 = vor.u32 %v1581_v21, %v1578_v31 }
 0x1aa   : > { %v1867_v37 = vpop.f32.mrf.mxu0  ;;  %v1445_v35 = vld [vmem:[#allocation2 + $0x7f] ss:$2 sm:$0xff]  ;;  %v1387_v61 = vld [vmem:[#allocation2 + $0x80] ss:$2 sm:$0xff] }
 0x1ab   : > { %1363 = vst.msk [vmem:[#allocation2 + $0x98] sm:$0xff] %vm771_vm6, %v1318_v34  ;;  %v1868_v10 = vadd.f32 %v1867_v37, %v1866_v38  ;;  %v1461_v42 = vmax.f32 %v1425_v57, %v1445_v35  ;;  %v1785_v6 = vpack.c.bf16 %v1505_v36, %v1505_v36  ;;  %v1411_v45 = vld [vmem:[#allocation2 + $0x81] ss:$2 sm:$0xff]  ;;  %v1583_v56 = vrot.slane %v1582_v44, 4 }
 0x1ac   : > { %v1869_v43 = vpop.f32.mrf.mxu0  ;;  %v1426_v14 = vmax.f32 %v1387_v61, %v1411_v45 }
 0x1ad   : > { %v1323_v59 = vadd.f32 %v1868_v10, %v2563_v25  ;;  %v1476_v32 = vmax.f32 %v1461_v42, %v1387_v61  ;;  %v1585_v47 = vshrl.u32 %v1785_v6, 16  ;;  %v1588_v11 = vshll.u32 %v1785_v6, 16 }
 0x1ae   : > { %v1870_v50 = vpop.f32.mrf.mxu0 }
 0x1af   : > { %1364 = vst.msk [vmem:[#allocation2 + $0xa0] sm:$0xff] %vm771_vm6, %v1323_v59  ;;  %v1871_v20 = vadd.f32 %v1870_v50, %v1869_v43  ;;  %v1587_v51 = vrot.slane %v1585_v47, 5  ;;  %v1590_v49 = vrot.slane %v1588_v11, 6  ;;  %v1494_v54 = vadd.f32 %v2584_v19, %v1476_v32 }
 0x1b1   : > { %v1326_v24 = vadd.f32 %v1871_v20, %v2566_v33  ;;  %v1591_v58 = vor.u32 %v1590_v49, %v1587_v51  ;;  %v1506_v5 = vmax.f32 %v1494_v54, 0.0 }
 0x1b2   : > { %v1447_v25 = vld [vmem:[#allocation2 + $0x8f] ss:$2 sm:$0xff]  ;;  %v1389_v63 = vld [vmem:[#allocation2 + $0x90] ss:$2 sm:$0xff] }
 0x1b3   : > { %1365 = vst.msk [vmem:[#allocation2 + $0xa8] sm:$0xff] %vm771_vm6, %v1326_v24  ;;  %v1872_v27 = vpop.f32.mrf.mxu0  ;;  %v1462_v12 = vmax.f32 %v1426_v14, %v1447_v25  ;;  %v1592_v60 = vsel %vm1574_vm5, %v1583_v56, %v1591_v58  ;;  %v1413_v4 = vld [vmem:[#allocation2 + $0x91] ss:$2 sm:$0xff]  ;;  %v1786_v26 = vpack.c.bf16 %v1506_v5, %v1506_v5 }
 0x1b4   : > { %1595 = vst.msk [vmem:[%s2596_s10 + $0x8] sm:$0xe] %vm1594_vm7, %v1592_v60  ;;  %v1427_v41 = vmax.f32 %v1389_v63, %v1413_v4 }
 0x1b5   : > { %v1873_v13 = vpop.f32.mrf.mxu0  ;;  %v1477_v1 = vmax.f32 %v1462_v12, %v1389_v63  ;;  %v1775_v18 = vrot.slane %v1786_v26, 10 }
 0x1b6   : > { %v1874_v62 = vadd.f32 %v1873_v13, %v1872_v27 }
 0x1b7   : > { %v1875_v53 = vpop.f32.mrf.mxu0  ;;  %v1495_v33 = vadd.f32 %v2584_v19, %v1477_v1 }
 0x1b8   : > { %v1331_v7 = vadd.f32 %v1874_v62, %v2569_v52 }
 0x1b9   : > { %v1876_v40 = vpop.f32.mrf.mxu0  ;;  %v1507_v48 = vmax.f32 %v1495_v33, 0.0 }
 0x1ba   : > { %v1449_v9 = vld [vmem:[#allocation2 + $0x9f] ss:$2 sm:$0xff]  ;;  %1366 = vst.msk [vmem:[#allocation2 + $0xb0] sm:$0xff] %vm771_vm6, %v1331_v7  ;;  %v1877_v16 = vadd.f32 %v1876_v40, %v1875_v53  ;;  %v1391_v0 = vld [vmem:[#allocation2 + $0xa0] ss:$2 sm:$0xff] }
 0x1bb   : > { %v1463_v8 = vmax.f32 %v1427_v41, %v1449_v9  ;;  %v1787_v29 = vpack.c.bf16 %v1507_v48, %v1507_v48  ;;  %v1415_v23 = vld [vmem:[#allocation2 + $0xa1] ss:$2 sm:$0xff] }
 0x1bc   : > { %v1334_v39 = vadd.f32 %v1877_v16, %v2572_v46  ;;  %v1428_v38 = vmax.f32 %v1391_v0, %v1415_v23 }
 0x1bd   : > { %v1478_v17 = vmax.f32 %v1463_v8, %v1391_v0  ;;  %v1606_v52 = vrot.slane %v1787_v29, 6 }
 0x1be   : > { %1367 = vst.msk [vmem:[#allocation2 + $0xb8] sm:$0xff] %vm771_vm6, %v1334_v39  ;;  %vm1615_vm6 = vsmask.f32 1280 }
 0x1bf   : > { %v1496_v15 = vadd.f32 %v2584_v19, %v1478_v17  ;;  %v1878_v55 = vpop.f32.mrf.mxu0  ;;  %v1607_v22 = vsel %vm1603_vm11, %v1775_v18, %v1606_v52 }
 0x1c0   : > { %1609 = vst.msk [vmem:[%s2596_s10 + $0xc] sm:$0x7] %vm1517_vm8, %v1607_v22  ;;  %vm1616_vm8 = vsmask.f32 5392 }
 0x1c1   : > { %v1508_v3 = vmax.f32 %v1496_v15, 0.0  ;;  %v1879_v28 = vpop.f32.mrf.mxu0  ;;  %vm1617_vm14 = vmor %vm1615_vm6, %vm1616_vm8 }
 0x1c3   : > { %v1788_v2 = vpack.c.bf16 %v1508_v3, %v1508_v3  ;;  %v1881_v30 = vpop.f32.mrf.mxu0 }
 0x1c5   : > { %v1619_v46 = vshrl.u32 %v1788_v2, 16  ;;  %v1622_v31 = vshll.u32 %v1788_v2, 16  ;;  %v1451_v21 = vld [vmem:[#allocation2 + $0xaf] ss:$2 sm:$0xff]  ;;  %v1882_v34 = vpop.f32.mrf.mxu0  ;;  %v1466_v35 = vld [vmem:[#allocation2 + $0xb0] ss:$2 sm:$0xff] }
 0x1c6   : > { %v1464_v57 = vmax.f32 %v1428_v38, %v1451_v21 }
 0x1c7   : > { %v1621_v36 = vrot.slane %v1619_v46, 6  ;;  %v1624_v37 = vrot.slane %v1622_v31, 7 }
 0x1c8   : > { %v1479_v10 = vmax.f32 %v1464_v57, %v1466_v35 }
 0x1c9   : > { %v1625_v42 = vor.u32 %v1624_v37, %v1621_v36 }
 0x1ca   : > { %v1497_v6 = vadd.f32 %v2584_v19, %v1479_v10 }
 0x1cb   : > { %1634 = vst.msk [vmem:[%s2596_s10 + $0xc] sm:$0x8] %vm1545_vm12, %v1625_v42  ;;  %v1626_v45 = vrot.slane %v1625_v42, 4 }
 0x1cc   : > { %v1509_v43 = vmax.f32 %v1497_v6, 0.0 }
 0x1ce   : > { %v1789_v61 = vpack.c.bf16 %v1509_v43, %v1509_v43 }
 0x1d0   : > { %v1628_v44 = vshll.u32 %v1789_v61, 16 }
 0x1d2   : > { %v1630_v59 = vrot.slane %v1628_v44, 7 }
 0x1d4   : > { %v1631_v32 = vsel %vm1617_vm14, %v1626_v45, %v1630_v59 }
 0x1d5   : > { %1635 = vst.msk [vmem:[%s2596_s10 + $0x10] sm:$0x3] %vm1547_vm13, %v1631_v32 }
 0x1d6 PF: > { %s13_s12 = sadd.s32 1, %s2029_s12  }
 0x1d7   : > { %p10_p4 = scmp.ge.s32.totalorder %s13_s12, 4  }
 0x1d9   :  { %12 = sbr.rel (!%p10_p4) target bundleno = 1 (0x1), region = 98 }

// kernel: convnet_forward.7
= control target key start
LH: loop header
LB: loop body
LE: loop exit
PB: predicated region body
PF: predicated region fallthrough
CT: control target
= control target key end

     0   :  { %vm1086_vm0 = vmmov 0   ;;  %vm773_vm1 = vcmask 523264   ;;  %vm817_vm2 = vcmask 80896   ;;  %s1342_s1 = inlined_call_operand.vmem [shape: bf16[1024,64], index: 1, kind: input, shape index: {}]   ;;  %s1343_s0 = inlined_call_operand.vmem [shape: bf16[8,1024], index: 0, kind: input, shape index: {}]   ;;  %s1344_s3 = inlined_call_operand.vmem [shape: bf16[64,10], index: 3, kind: input, shape index: {}]   ;;  %s1345_s2 = inlined_call_operand.vmem [shape: f32[1,64], index: 2, kind: input, shape index: {}]   ;;  %s1346_s4 = inlined_call_operand.vmem [shape: f32[1,10], index: 4, kind: input, shape index: {}]   ;;  %s1347_s5 = inlined_call_operand.vmem [shape: f32[8,10], index: 5, kind: output, shape index: {}]  }
   0x1   :  { %v1009_v0 = vld [vmem:[%s1342_s1 + $0x78] sm:$0xff]   ;;  %v1013_v4 = vld [vmem:[%s1342_s1 + $0x70] sm:$0xff]   ;;  %v1017_v8 = vld [vmem:[%s1342_s1 + $0x68] sm:$0xff]  }
   0x2   :  { %v1010_v1 = vld [vmem:[%s1342_s1 + $0xf8] sm:$0xff]   ;;  %902 = vmatprep.subr.bf16.mxu0 %v1009_v0  ;;  %v1014_v5 = vld [vmem:[%s1342_s1 + $0xf0] sm:$0xff]   ;;  %v1018_v9 = vld [vmem:[%s1342_s1 + $0xe8] sm:$0xff]  }
   0x3   :  { %v1011_v2 = vld [vmem:[%s1342_s1 + $0x38] sm:$0xff]   ;;  %924 = vmatprep.subr.bf16.mxu1 %v1010_v1  ;;  %v1015_v6 = vld [vmem:[%s1342_s1 + $0x30] sm:$0xff]   ;;  %v1019_v10 = vld [vmem:[%s1342_s1 + $0x28] sm:$0xff]  }
   0x4   :  { %v1012_v3 = vld [vmem:[%s1342_s1 + $0xb8] sm:$0xff]   ;;  %903 = vmatpush3.bf16.msra.mxu0 %v1011_v2  ;;  %v1016_v7 = vld [vmem:[%s1342_s1 + $0xb0] sm:$0xff]   ;;  %v1020_v11 = vld [vmem:[%s1342_s1 + $0xa8] sm:$0xff]  }
   0x5   :  { %925 = vmatpush3.bf16.msra.mxu1 %v1012_v3  ;;  %904 = vmatprep.subr.bf16.mxu0 %v1013_v4  ;;  %v1021_v12 = vld [vmem:[%s1342_s1 + $0x60] sm:$0xff]   ;;  %v1025_v16 = vld [vmem:[%s1342_s1 + $0x58] sm:$0xff]   ;;  %v1029_v20 = vld [vmem:[%s1342_s1 + $0x50] sm:$0xff]  }
   0x6   :  { %926 = vmatprep.subr.bf16.mxu1 %v1014_v5  ;;  %v1022_v13 = vld [vmem:[%s1342_s1 + $0xe0] sm:$0xff]   ;;  %v1026_v17 = vld [vmem:[%s1342_s1 + $0xd8] sm:$0xff]   ;;  %v1030_v21 = vld [vmem:[%s1342_s1 + $0xd0] sm:$0xff]  }
   0x7   :  { %v1023_v14 = vld [vmem:[%s1342_s1 + $0x20] sm:$0xff]   ;;  %v1027_v18 = vld [vmem:[%s1342_s1 + $0x18] sm:$0xff]   ;;  %v1031_v22 = vld [vmem:[%s1342_s1 + $0x10] sm:$0xff]  }
   0x8   :  { %905 = vmatpush3.bf16.msra.mxu0 %v1015_v6  ;;  %v1024_v15 = vld [vmem:[%s1342_s1 + $0xa0] sm:$0xff]   ;;  %v1028_v19 = vld [vmem:[%s1342_s1 + $0x98] sm:$0xff]   ;;  %v1032_v23 = vld [vmem:[%s1342_s1 + $0x90] sm:$0xff]  }
   0x9   :  { %927 = vmatpush3.bf16.msra.mxu1 %v1016_v7  ;;  %906 = vmatprep.subr.bf16.mxu0 %v1017_v8  ;;  %v1033_v24 = vld [vmem:[%s1342_s1 + $0x48] sm:$0xff]   ;;  %v1037_v28 = vld [vmem:[%s1342_s1 + $0x40] sm:$0xff]   ;;  %v1045_v38 = vld [vmem:[%s1342_s1 + $0x178] sm:$0xff]  }
   0xa   :  { %928 = vmatprep.subr.bf16.mxu1 %v1018_v9  ;;  %v1034_v25 = vld [vmem:[%s1342_s1 + $0xc8] sm:$0xff]   ;;  %v1038_v29 = vld [vmem:[%s1342_s1 + $0xc0] sm:$0xff]   ;;  %v1046_v39 = vld [vmem:[%s1342_s1 + $0x1f8] sm:$0xff]  }
   0xb   :  { %v1035_v26 = vld [vmem:[%s1342_s1 + $0x8] sm:$0xff]   ;;  %v1039_v30 = vld [vmem:[%s1342_s1] sm:$0xff]   ;;  %v1047_v40 = vld [vmem:[%s1342_s1 + $0x138] sm:$0xff]  }
   0xc   :  { %907 = vmatpush3.bf16.msra.mxu0 %v1019_v10  ;;  %v1036_v27 = vld [vmem:[%s1342_s1 + $0x88] sm:$0xff]   ;;  %v1040_v31 = vld [vmem:[%s1342_s1 + $0x80] sm:$0xff]   ;;  %v1048_v41 = vld [vmem:[%s1342_s1 + $0x1b8] sm:$0xff]  }
   0xd   :  { %929 = vmatpush3.bf16.msra.mxu1 %v1020_v11  ;;  %908 = vmatprep.subr.bf16.mxu0 %v1021_v12  ;;  %v21_v32 = vld [vmem:[%s1343_s0] sm:$0xff]  ;;  %v22_v33 = vld [vmem:[%s1343_s0 + $0x8] sm:$0xff]  ;;  %v1049_v42 = vld [vmem:[%s1342_s1 + $0x170] sm:$0xff]   ;;  %v1085_v12 = vmov 0.0  }
   0xe   :  { %930 = vmatprep.subr.bf16.mxu1 %v1022_v13  ;;  %v824_v34 = vcombine.low %v21_v32, %v21_v32  ;;  %v825_v35 = vcombine.high %v21_v32, %v21_v32  ;;  %v826_v36 = vcombine.low %v22_v33, %v22_v33  ;;  %v827_v37 = vcombine.high %v22_v33, %v22_v33  ;;  %v1050_v43 = vld [vmem:[%s1342_s1 + $0x1f0] sm:$0xff]   ;;  %v1053_v46 = vld [vmem:[%s1342_s1 + $0x168] sm:$0xff]   ;;  %v1057_v50 = vld [vmem:[%s1342_s1 + $0x160] sm:$0xff]  }
   0xf   :  { %v1051_v44 = vld [vmem:[%s1342_s1 + $0x130] sm:$0xff]   ;;  %v1054_v47 = vld [vmem:[%s1342_s1 + $0x1e8] sm:$0xff]   ;;  %v1058_v51 = vld [vmem:[%s1342_s1 + $0x1e0] sm:$0xff]  }
  0x10   :  { %909 = vmatpush3.bf16.msra.mxu0 %v1023_v14  ;;  %604 = vmatprep.mubr.bf16.mxu0 %v825_v35  ;;  %v1052_v45 = vld [vmem:[%s1342_s1 + $0x1b0] sm:$0xff]   ;;  %v1055_v48 = vld [vmem:[%s1342_s1 + $0x128] sm:$0xff]   ;;  %v1059_v52 = vld [vmem:[%s1342_s1 + $0x120] sm:$0xff]  }
  0x11   :  { %931 = vmatpush3.bf16.msra.mxu1 %v1024_v15  ;;  %910 = vmatprep.subr.bf16.mxu0 %v1025_v16  ;;  %v1056_v49 = vld [vmem:[%s1342_s1 + $0x1a8] sm:$0xff]   ;;  %v1060_v53 = vld [vmem:[%s1342_s1 + $0x1a0] sm:$0xff]   ;;  %v1061_v54 = vld [vmem:[%s1342_s1 + $0x158] sm:$0xff]  }
  0x12   :  { %932 = vmatprep.subr.bf16.mxu1 %v1026_v17  ;;  %644 = vmatprep.mubr.bf16.mxu1 %v827_v37  ;;  %v1062_v55 = vld [vmem:[%s1342_s1 + $0x1d8] sm:$0xff]   ;;  %v1065_v58 = vld [vmem:[%s1342_s1 + $0x150] sm:$0xff]   ;;  %v1069_v62 = vld [vmem:[%s1342_s1 + $0x148] sm:$0xff]  }
  0x13   :  { %v1063_v56 = vld [vmem:[%s1342_s1 + $0x118] sm:$0xff]   ;;  %v1066_v59 = vld [vmem:[%s1342_s1 + $0x1d0] sm:$0xff]   ;;  %v1070_v63 = vld [vmem:[%s1342_s1 + $0x1c8] sm:$0xff]  }
  0x14   :  { %911 = vmatpush3.bf16.msra.mxu0 %v1027_v18  ;;  %v1064_v57 = vld [vmem:[%s1342_s1 + $0x198] sm:$0xff]   ;;  %v1067_v60 = vld [vmem:[%s1342_s1 + $0x110] sm:$0xff]   ;;  %v1071_v0 = vld [vmem:[%s1342_s1 + $0x108] sm:$0xff]  }
  0x15   :  { %933 = vmatpush3.bf16.msra.mxu1 %v1028_v19  ;;  %912 = vmatprep.subr.bf16.mxu0 %v1029_v20  ;;  %v1068_v61 = vld [vmem:[%s1342_s1 + $0x190] sm:$0xff]   ;;  %v1072_v1 = vld [vmem:[%s1342_s1 + $0x188] sm:$0xff]   ;;  %v1073_v2 = vld [vmem:[%s1342_s1 + $0x140] sm:$0xff]  }
  0x16   :  { %934 = vmatprep.subr.bf16.mxu1 %v1030_v21  ;;  %v1074_v3 = vld [vmem:[%s1342_s1 + $0x1c0] sm:$0xff]   ;;  %v23_v6 = vld [vmem:[%s1343_s0 + $0x10] sm:$0xff]  ;;  %v24_v9 = vld [vmem:[%s1343_s0 + $0x18] sm:$0xff] }
  0x17   :  { %v1075_v4 = vld [vmem:[%s1342_s1 + $0x100] sm:$0xff]   ;;  %v828_v7 = vcombine.low %v23_v6, %v23_v6  ;;  %v829_v8 = vcombine.high %v23_v6, %v23_v6  ;;  %v830_v10 = vcombine.low %v24_v9, %v24_v9  ;;  %v831_v11 = vcombine.high %v24_v9, %v24_v9  ;;  %v1081_v13 = vld [vmem:[%s1344_s3 + $0x18] sm:$0xff]   ;;  %v1082_v14 = vld [vmem:[%s1344_s3 + $0x10] sm:$0xff]  }
  0x18   :  { %913 = vmatpush3.bf16.msra.mxu0 %v1031_v22  ;;  %v1076_v5 = vld [vmem:[%s1342_s1 + $0x180] sm:$0xff]   ;;  %v1083_v15 = vld [vmem:[%s1344_s3 + $0x8] sm:$0xff]  }
  0x19   :  { %935 = vmatpush3.bf16.msra.mxu1 %v1032_v23  ;;  %914 = vmatprep.subr.bf16.mxu0 %v1033_v24  ;;  %v1084_v16 = vld [vmem:[%s1344_s3] sm:$0xff]  }
  0x1a   :  { %936 = vmatprep.subr.bf16.mxu1 %v1034_v25 }
  0x1c   :  { %915 = vmatpush3.bf16.msra.mxu0 %v1035_v26  ;;  %v823_v26 = vld [vmem:[%s1345_s2] ss:$0 sm:$0xff] }
  0x1d   :  { %937 = vmatpush3.bf16.msra.mxu1 %v1036_v27  ;;  %916 = vmatprep.subr.bf16.mxu0 %v1037_v28 }
  0x1e   :  { %938 = vmatprep.subr.bf16.mxu1 %v1038_v29 }
  0x20   :  { %917 = vmatpush3.bf16.msra.mxu0 %v1039_v30 }
  0x21   :  { %939 = vmatpush3.bf16.msra.mxu1 %v1040_v31  ;;  %946 = vmatprep.subr.bf16.mxu0 %v1045_v38 }
  0x22   :  { %968 = vmatprep.subr.bf16.mxu1 %v1046_v39 }
  0x23   :  { %605 = vmatmul.mubr.bf16.vlgmr.msra.gmra.mxu0 %v824_v34 }
  0x24   :  { %645 = vmatmul.mubr.bf16.vlgmr.msra.gmra.mxu1 %v826_v36  ;;  %947 = vmatpush3.bf16.msra.mxu0 %v1047_v40 }
  0x25   :  { %969 = vmatpush3.bf16.msra.mxu1 %v1048_v41  ;;  %948 = vmatprep.subr.bf16.mxu0 %v1049_v42 }
  0x26   :  { %970 = vmatprep.subr.bf16.mxu1 %v1050_v43  ;;  %684 = vmatprep.mubr.bf16.mxu0 %v829_v8 }
  0x27   :  { %724 = vmatprep.mubr.bf16.mxu1 %v831_v11 }
  0x28   :  { %949 = vmatpush3.bf16.msra.mxu0 %v1051_v44  ;;  %v896_v44 = vld [vmem:[%s1346_s4] ss:$0 sm:$0xff] }
  0x29   :  { %971 = vmatpush3.bf16.msra.mxu1 %v1052_v45  ;;  %950 = vmatprep.subr.bf16.mxu0 %v1053_v46 }
  0x2a   :  { %972 = vmatprep.subr.bf16.mxu1 %v1054_v47 }
  0x2c   :  { %951 = vmatpush3.bf16.msra.mxu0 %v1055_v48 }
  0x2d   :  { %973 = vmatpush3.bf16.msra.mxu1 %v1056_v49  ;;  %952 = vmatprep.subr.bf16.mxu0 %v1057_v50 }
  0x2e   :  { %974 = vmatprep.subr.bf16.mxu1 %v1058_v51 }
  0x30   :  { %953 = vmatpush3.bf16.msra.mxu0 %v1059_v52 }
  0x31   :  { %975 = vmatpush3.bf16.msra.mxu1 %v1060_v53  ;;  %954 = vmatprep.subr.bf16.mxu0 %v1061_v54 }
  0x32   :  { %976 = vmatprep.subr.bf16.mxu1 %v1062_v55 }
  0x34   :  { %955 = vmatpush3.bf16.msra.mxu0 %v1063_v56 }
  0x35   :  { %977 = vmatpush3.bf16.msra.mxu1 %v1064_v57  ;;  %956 = vmatprep.subr.bf16.mxu0 %v1065_v58 }
  0x36   :  { %978 = vmatprep.subr.bf16.mxu1 %v1066_v59 }
  0x38   :  { %957 = vmatpush3.bf16.msra.mxu0 %v1067_v60 }
  0x39   :  { %979 = vmatpush3.bf16.msra.mxu1 %v1068_v61  ;;  %958 = vmatprep.subr.bf16.mxu0 %v1069_v62 }
  0x3a   :  { %980 = vmatprep.subr.bf16.mxu1 %v1070_v63 }
  0x3c   :  { %959 = vmatpush3.bf16.msra.mxu0 %v1071_v0 }
  0x3d   :  { %981 = vmatpush3.bf16.msra.mxu1 %v1072_v1  ;;  %960 = vmatprep.subr.bf16.mxu0 %v1073_v2 }
  0x3e   :  { %982 = vmatprep.subr.bf16.mxu1 %v1074_v3 }
  0x40   :  { %961 = vmatpush3.bf16.msra.mxu0 %v1075_v4 }
  0x41   :  { %983 = vmatpush3.bf16.msra.mxu1 %v1076_v5  ;;  %995 = vmatprep.subr.bf16.mxu0 %v1085_v12 }
  0x43   :  { %685 = vmatmul.mubr.bf16.vlgmr.msra.gmra.mxu0 %v828_v7 }
  0x44   :  { %725 = vmatmul.mubr.bf16.vlgmr.msra.gmra.mxu1 %v830_v10  ;;  %996 = vmatpush3.bf16.msra.mxu0 %v1081_v13 }
  0x45   :  { %997 = vmatprep.subr.bf16.mxu0 %v1085_v12  ;;  %1003 = vmatprep.mubr.msk.bf16.mxu0 %vm1086_vm0, %v1085_v12 }
  0x48   :  { %998 = vmatpush3.bf16.msra.mxu0 %v1082_v14 }
  0x49   :  { %999 = vmatprep.subr.bf16.mxu0 %v1085_v12 }
  0x4c   :  { %1000 = vmatpush3.bf16.msra.mxu0 %v1083_v15 }
  0x4d   :  { %1001 = vmatprep.subr.bf16.mxu0 %v1085_v12 }
  0x50   :  { %1002 = vmatpush3.bf16.msra.mxu0 %v1084_v16 }
  0xe3   :  { %v918_v17 = vpop.f32.mrf.mxu0 }
  0xe4   :  { %v940_v18 = vpop.f32.mrf.mxu1 }
  0xe5   :  { %v919_v19 = vpop.f32.mrf.mxu0 }
  0xe6   :  { %v941_v20 = vpop.f32.mrf.mxu1  ;;  %v920_v25 = vadd.f32 %v919_v19, %v918_v17 }
  0xe7   :  { %v921_v21 = vpop.f32.mrf.mxu0  ;;  %v942_v28 = vadd.f32 %v941_v20, %v940_v18 }
  0xe8   :  { %v943_v22 = vpop.f32.mrf.mxu1  ;;  %v607_v27 = vadd.f32 %v920_v25, %v823_v26 }
  0xe9   :  { %v922_v23 = vpop.f32.mrf.mxu0 }
  0xea   :  { %v944_v24 = vpop.f32.mrf.mxu1  ;;  %v647_v33 = vadd.f32 %v942_v28, %v607_v27 }
 0x103   :  { %v962_v29 = vpop.f32.mrf.mxu0 }
 0x104   :  { %v984_v30 = vpop.f32.mrf.mxu1 }
 0x105   :  { %v963_v31 = vpop.f32.mrf.mxu0 }
 0x106   :  { %v985_v32 = vpop.f32.mrf.mxu1  ;;  %v964_v34 = vadd.f32 %v963_v31, %v962_v29 }
 0x107   :  { %v965_v35 = vpop.f32.mrf.mxu0  ;;  %v986_v38 = vadd.f32 %v985_v32, %v984_v30 }
 0x108   :  { %v987_v36 = vpop.f32.mrf.mxu1  ;;  %v687_v37 = vadd.f32 %v964_v34, %v647_v33 }
 0x109   :  { %v966_v39 = vpop.f32.mrf.mxu0 }
 0x10a   :  { %v988_v40 = vpop.f32.mrf.mxu1  ;;  %v727_v41 = vadd.f32 %v986_v38, %v687_v37 }
 0x10c   :  { %v732_v42 = vmax.f32 %v727_v41, 0.0 }
 0x10e   :  { %v733_v43 = vpack.c.bf16 %v732_v42, %v732_v42 }
 0x110   :  { %1004 = vmatmul.mubr.msk.bf16.vlgmr.msra.gmra.mxu0 %vm773_vm1, %v733_v43 }
 0x1d0   :  { %v811_v45 = vpop.f32.mrf.mxu0 }
 0x1d1   :  { %v812_v46 = vadd.f32 %v896_v44, %v811_v45 }
 0x1d2   :  { %v1005_v47 = vpop.f32.mrf.mxu0 }
 0x1d3   :  { %818 = vst.msk [vmem:[%s1347_s5] sm:$0xff] %vm817_vm2, %v812_v46 }
 0x1d4   :  { %v814_v48 = vpop.f32.mrf.mxu0 }
 0x1d6   :  { %v1006_v49 = vpop.f32.mrf.mxu0 }

// kernel: convnet_forward.4
= control target key start
LH: loop header
LB: loop body
LE: loop exit
PB: predicated region body
PF: predicated region fallthrough
CT: control target
= control target key end

     0   :  { %s5495_s12 = smov 0   ;;  %s9190_s0 = inlined_call_operand.vmem [shape: bf16[2,1024,3], index: 0, kind: input, shape index: {}]   ;;  %s9191_s1 = inlined_call_operand.vmem [shape: bf16[27,32], index: 1, kind: input, shape index: {}]   ;;  %s9192_s2 = inlined_call_operand.vmem [shape: f32[1,32], index: 2, kind: input, shape index: {}]   ;;  %s9193_s3 = inlined_call_operand.vmem [shape: bf16[2,225,32], index: 3, kind: output, shape index: {}]  }
   0x1 LB: > { %s4857_s13 = sadd.s32 4294967295, %s5464_s12   ;;  %p4861_p0 = scmp.ge.s32.totalorder %s5464_s12, 1  ;;  %s5464_s12 = sphi %s5495_s12, %s13_s12  }
   0x2   : > { %p137_p1 = scmp.lt.s32.totalorder %s5464_s12, 3 }
   0x4   : > { %p138_p2 = pnand %p4861_p0, %p137_p1 }
   0x6   : > { %141 = sbr.rel (%p138_p2) target bundleno = 1323 (0x52b), region = 32 }
   0xb   : > { %p161_p3 = scmp.lt.s32.totalorder %s4857_s13, 1  ;;  %vm609_vm0 = vsmask.f32 7424  ;;  %s5466_s18 = smov 3   ;;  %vm1212_vm1 = vcmask 1046528   ;;  %vm3353_vm2 = vcmask 1044480  }
   0xc   : > { %s5467_s19 = smov 6   ;;  %s5468_s20 = smov 9   ;;  %vm3354_vm3 = vcmask 1045504   ;;  %vm9420_vm4 = vcmask 23552   ;;  %vm2370_vm5 = vcmask 48128   ;;  %vm2491_vm6 = vcmask 72704  }
   0xd   : > { %s10251_s13 = smov (!%p161_p3, %s4857_s13), 1  ;;  %s5469_s21 = smov 12   ;;  %vm2612_vm7 = vcmask 97280   ;;  %vm2733_vm8 = vcmask 121856   ;;  %vm2854_vm9 = vcmask 146432   ;;  %vm9419_vm10 = vcmask 171008  }
   0xe   : > { %s5030_s14 = sshll.u32 %s10251_s13, 9  ;;  %s5470_s22 = smov 15   ;;  %vm3096_vm11 = vcmask 195584   ;;  %vm3232_vm12 = vcmask 220160   ;;  %vm3873_vm13 = vcmask 261120   ;;  %vm4413_vm14 = vcmask 257024  }
   0xf   : > { %s5509_s17 = scalar_lea.vmem %s9190_s0, %s5030_s14  ;;  %s5472_s27 = smov 18   ;;  %vm4416_vm15 = vsmask.f32 3328 }
  0x10   : > { %v176_v0 = vld [vmem:[%s5509_s17 + $0x10] sm:$0xf]  ;;  %v177_v1 = vld [vmem:[%s5509_s17 + $0x14] sm:$0xf]  ;;  %v5270_v3 = vld [vmem:[%s5509_s17 + $0x18] sm:$0xff]   ;;  %s5473_s28 = smov 21  }
  0x11   : > { %v5513_v2 = vcombine.low %v176_v0, %v177_v1  ;;  %v172_v4 = vld [vmem:[%s5509_s17] sm:$0xf]  ;;  %v173_v5 = vld [vmem:[%s5509_s17 + $0x4] sm:$0xf]  ;;  %v634_v8 = vshll.u32 %v5270_v3, 16  ;;  %v5272_v10 = vld [vmem:[%s5509_s17 + $0x8] sm:$0xff]  }
  0x12   : > { %v5520_v9 = vcombine.low %v172_v4, %v173_v5  ;;  %v180_v11 = vld [vmem:[%s5509_s17 + $0x20] sm:$0xf]  ;;  %v181_v12 = vld [vmem:[%s5509_s17 + $0x24] sm:$0xf]  ;;  %v638_v13 = vshrl.u32 %v5270_v3, 16  ;;  %v5274_v14 = vld [vmem:[%s5509_s17 + $0x28] sm:$0xff]  }
  0x13   : > { %9421 = vst [vmem:[#allocation3_spill] sm:$0xff] %v5513_v2  ;;  %v626_v6 = vshll.u32 %v5513_v2, 16  ;;  %v630_v7 = vshrl.u32 %v5513_v2, 16  ;;  %v636_v16 = vrot.slane %v634_v8, 1  ;;  %v618_v19 = vshll.u32 %v5272_v10, 16  ;;  %v5275_v25 = vld [vmem:[%s5509_s17 + $0x30] sm:$0xff]  }
  0x14   : > { %9422 = vst [vmem:[#allocation4_spill] sm:$0xff] %v5520_v9  ;;  %v611_v17 = vshrl.u32 %v5520_v9, 16  ;;  %v613_v18 = vshll.u32 %v5520_v9, 16  ;;  %v5528_v20 = vcombine.low %v180_v11, %v181_v12  ;;  %v622_v21 = vshrl.u32 %v5272_v10, 16  ;;  %v5276_v27 = vld [vmem:[%s5509_s17 + $0x38] sm:$0xff]   ;;  %v5277_v38 = vld [vmem:[%s5509_s17 + $0x40] sm:$0xff]  }
  0x15   : > { %v628_v15 = vrot.slane %v626_v6, 1  ;;  %v640_v24 = vor.u32 %v638_v13, %v636_v16  ;;  %v650_v26 = vshll.u32 %v5274_v14, 16  ;;  %v620_v28 = vrot.slane %v618_v19, 1  ;;  %v5278_v46 = vld [vmem:[%s5509_s17 + $0x48] sm:$0xff]   ;;  %v5279_v47 = vld [vmem:[%s5509_s17 + $0x50] sm:$0xff]   ;;  %v5554_v58 = vld [vmem:[%s5509_s17 + $0x58] sm:$0xff]  }
  0x16   : > { %v615_v23 = vrot.slane %v613_v18, 1  ;;  %v642_v29 = vshll.u32 %v5528_v20, 16  ;;  %v654_v30 = vshrl.u32 %v5274_v14, 16  ;;  %v646_v31 = vshrl.u32 %v5528_v20, 16  ;;  %v5557_v59 = vld [vmem:[%s5509_s17 + $0x60] sm:$0xff]   ;;  %v5560_v60 = vld [vmem:[%s5509_s17 + $0x68] sm:$0xff]  }
  0x17   : > { %v632_v22 = vor.u32 %v630_v7, %v628_v15  ;;  %v652_v34 = vrot.slane %v650_v26, 1  ;;  %v658_v35 = vshll.u32 %v5275_v25, 16  ;;  %v624_v37 = vor.u32 %v622_v21, %v620_v28  ;;  %v5568_v3 = vld [vmem:[%s5509_s17 + $0x70] sm:$0xff]   ;;  %v5579_v12 = vld [vmem:[%s5509_s17 + $0x78] sm:$0xff]   ;;  %v5591_v19 = vld [vmem:[%s5509_s17 + $0x80] sm:$0xff]   ;;  %s5474_s29 = smov 24  }
  0x18   : > { %v616_v33 = vor.u32 %v615_v23, %v611_v17  ;;  %v644_v36 = vrot.slane %v642_v29, 1  ;;  %v666_v39 = vshll.u32 %v5276_v27, 16  ;;  %v670_v43 = vshrl.u32 %v5276_v27, 16  ;;  %v5603_v27 = vld [vmem:[%s5509_s17 + $0x90] sm:$0xff]   ;;  %s5251_s30 = smul.u32 116, %s10251_s13 }
  0x19   : > { %v5535_v32 = vsel %vm609_vm0, %v632_v22, %v636_v16  ;;  %v656_v41 = vor.u32 %v654_v30, %v652_v34  ;;  %v660_v42 = vrot.slane %v658_v35, 1  ;;  %v629_v48 = vsel %vm609_vm0, %v624_v37, %v628_v15  ;;  %v5610_v30 = vld [vmem:[%s5509_s17 + $0x98] sm:$0xff]  }
  0x1a   : > { %9423 = vst [vmem:[#allocation5_spill] sm:$0xff] %v5535_v32  ;;  %1093 = vrot.lane.b32.xlu1 %v5535_v32, %s5466_s18  ;;  %v621_v40 = vsel %vm609_vm0, %v616_v33, %v620_v28  ;;  %v5543_v44 = vsel %vm609_vm0, %v640_v24, %v644_v36  ;;  %v668_v45 = vrot.slane %v666_v39, 1  ;;  %v648_v49 = vor.u32 %v646_v31, %v644_v36  ;;  %s8444_s8 = scalar_lea.vmem %s9193_s3, %s5251_s30 }
  0x1b   : > { %1089 = vrot.lane.b32.xlu0 %v621_v40, %s5466_s18  ;;  %9424 = vst [vmem:[#allocation6_spill] sm:$0xff] %v5543_v44  ;;  %v674_v50 = vshll.u32 %v5277_v38, 16  ;;  %v662_v51 = vshrl.u32 %v5275_v25, 16  ;;  %v5551_v52 = vsel %vm609_vm0, %v656_v41, %v660_v42  ;;  %v682_v53 = vshll.u32 %v5278_v46, 16  ;;  %v5598_v25 = vld [vmem:[%s5509_s17 + $0x88] sm:$0xff]  }
  0x1c   : > { %9425 = vst [vmem:[#allocation7_spill] sm:$0xff] %v5551_v52  ;;  %v672_v54 = vor.u32 %v670_v43, %v668_v45  ;;  %v686_v56 = vshrl.u32 %v5278_v46, 16  ;;  %v690_v57 = vshll.u32 %v5279_v47, 16  ;;  %v678_v62 = vshrl.u32 %v5277_v38, 16  ;;  %v5628_v43 = vld [vmem:[%s5509_s17 + $0xa0] sm:$0xff]   ;;  %v5632_v46 = vld [vmem:[%s5509_s17 + $0xa8] sm:$0xff]  }
  0x1d   : > { %v676_v55 = vrot.slane %v674_v50, 1  ;;  %v684_v61 = vrot.slane %v682_v53, 1  ;;  %v5564_v63 = vsel %vm609_vm0, %v648_v49, %v652_v34  ;;  %v664_v0 = vor.u32 %v662_v51, %v660_v42 }
  0x1e   : > { %1095 = vrot.lane.b32.xlu1 %v5543_v44, %s5466_s18  ;;  %9426 = vst [vmem:[#allocation8_spill] sm:$0xff] %v5564_v63  ;;  %v698_v1 = vshll.u32 %v5554_v58, 16  ;;  %v692_v4 = vrot.slane %v690_v57, 1  ;;  %v702_v5 = vshrl.u32 %v5554_v58, 16  ;;  %v706_v6 = vshll.u32 %v5557_v59, 16  ;;  %v5950_v44 = vld [vmem:[%s5509_s17 + $0x1a8] sm:$0xff]  }
  0x1f   : > { %1091 = vrot.lane.b32.xlu0 %v629_v48, %s5466_s18  ;;  %v714_v7 = vshll.u32 %v5560_v60, 16  ;;  %v5576_v8 = vsel %vm609_vm0, %v672_v54, %v676_v55  ;;  %v688_v10 = vor.u32 %v686_v56, %v684_v61  ;;  %v694_v13 = vshrl.u32 %v5279_v47, 16  ;;  %9472 = vst [vmem:[#allocation54_spill] sm:$0xff] %v5950_v44 }
  0x20   : > { %9427 = vst [vmem:[#allocation9_spill] sm:$0xff] %v5576_v8  ;;  %v700_v11 = vrot.slane %v698_v1, 1  ;;  %v5584_v14 = vsel %vm609_vm0, %v664_v0, %v668_v45  ;;  %v680_v15 = vor.u32 %v678_v62, %v676_v55  ;;  %v718_v17 = vshrl.u32 %v5560_v60, 16  ;;  %v5652_v1 = vld [vmem:[%s5509_s17 + $0xb0] sm:$0xff]  }
  0x21   : > { %9428 = vst [vmem:[#allocation10_spill] sm:$0xff] %v5584_v14  ;;  %v716_v16 = vrot.slane %v714_v7, 1  ;;  %v722_v18 = vshll.u32 %v5568_v3, 16  ;;  %v5594_v21 = vsel %vm609_vm0, %v688_v10, %v692_v4  ;;  %v708_v23 = vrot.slane %v706_v6, 1 }
  0x22   : > { %1099 = vrot.lane.b32.xlu1 %v5551_v52, %s5466_s18  ;;  %9429 = vst [vmem:[#allocation11_spill] sm:$0xff] %v5594_v21  ;;  %v704_v22 = vor.u32 %v702_v5, %v700_v11  ;;  %v730_v24 = vshll.u32 %v5579_v12, 16  ;;  %v696_v26 = vor.u32 %v694_v13, %v692_v4  ;;  %v5606_v28 = vsel %vm609_vm0, %v680_v15, %v684_v61  ;;  %v5655_v4 = vld [vmem:[%s5509_s17 + $0xb8] sm:$0xff]  }
  0x23   : > { %1097 = vrot.lane.b32.xlu0 %v5564_v63, %s5466_s18  ;;  %9430 = vst [vmem:[#allocation12_spill] sm:$0xff] %v5606_v28  ;;  %v710_v29 = vshrl.u32 %v5557_v59, 16  ;;  %v720_v31 = vor.u32 %v718_v17, %v716_v16  ;;  %v724_v33 = vrot.slane %v722_v18, 1  ;;  %v734_v34 = vshrl.u32 %v5579_v12, 16 }
  0x24   : > { %v738_v35 = vshll.u32 %v5591_v19, 16  ;;  %v5617_v36 = vsel %vm609_vm0, %v704_v22, %v708_v23  ;;  %v732_v37 = vrot.slane %v730_v24, 1  ;;  %v746_v38 = vshll.u32 %v5598_v25, 16  ;;  %v5675_v24 = vld [vmem:[%s5509_s17 + $0xc0] sm:$0xff]  }
  0x25   : > { %9431 = vst [vmem:[#allocation13_spill] sm:$0xff] %v5617_v36  ;;  %v5623_v39 = vsel %vm609_vm0, %v696_v26, %v700_v11  ;;  %v712_v40 = vor.u32 %v710_v29, %v708_v23  ;;  %v726_v41 = vshrl.u32 %v5568_v3, 16  ;;  %v754_v42 = vshll.u32 %v5603_v27, 16  ;;  %v5678_v26 = vld [vmem:[%s5509_s17 + $0xc8] sm:$0xff]  }
  0x26   : > { %1103 = vrot.lane.b32.xlu1 %v5576_v8, %s5466_s18  ;;  %9432 = vst [vmem:[#allocation14_spill] sm:$0xff] %v5623_v39  ;;  %v762_v45 = vshll.u32 %v5610_v30, 16  ;;  %v5637_v47 = vsel %vm609_vm0, %v720_v31, %v724_v33  ;;  %v736_v48 = vor.u32 %v734_v34, %v732_v37  ;;  %v740_v49 = vrot.slane %v738_v35, 1  ;;  %v5687_v34 = vld [vmem:[%s5509_s17 + $0xd0] sm:$0xff]   ;;  %v5917_v8 = vld [vmem:[%s5509_s17 + $0x188] sm:$0xff]  }
  0x27   : > { %1101 = vrot.lane.b32.xlu0 %v5584_v14, %s5466_s18  ;;  %9433 = vst [vmem:[#allocation15_spill] sm:$0xff] %v5637_v47  ;;  %v748_v50 = vrot.slane %v746_v38, 1  ;;  %v750_v51 = vshrl.u32 %v5598_v25, 16  ;;  %v742_v53 = vshrl.u32 %v5591_v19, 16  ;;  %v766_v54 = vshrl.u32 %v5610_v30, 16  ;;  %9466 = vst [vmem:[#allocation48_spill] sm:$0xff] %v5917_v8 }
  0x28   : > { %v5645_v55 = vsel %vm609_vm0, %v712_v40, %v716_v16  ;;  %v728_v56 = vor.u32 %v726_v41, %v724_v33  ;;  %v756_v57 = vrot.slane %v754_v42, 1  ;;  %v778_v61 = vshll.u32 %v5632_v46, 16  ;;  %v5693_v41 = vld [vmem:[%s5509_s17 + $0xd8] sm:$0xff]  }
  0x29   : > { %9434 = vst [vmem:[#allocation16_spill] sm:$0xff] %v5645_v55  ;;  %v764_v62 = vrot.slane %v762_v45, 1  ;;  %v770_v0 = vshll.u32 %v5628_v43, 16  ;;  %v5658_v5 = vsel %vm609_vm0, %v736_v48, %v740_v49  ;;  %v752_v6 = vor.u32 %v750_v51, %v748_v50 }
  0x2a   : > { %1107 = vrot.lane.b32.xlu1 %v5594_v21, %s5466_s18  ;;  %9435 = vst [vmem:[#allocation17_spill] sm:$0xff] %v5658_v5  ;;  %v758_v7 = vshrl.u32 %v5603_v27, 16  ;;  %v5664_v10 = vsel %vm609_vm0, %v728_v56, %v732_v37  ;;  %v744_v11 = vor.u32 %v742_v53, %v740_v49  ;;  %v780_v13 = vrot.slane %v778_v61, 1  ;;  %v5717_v61 = vld [vmem:[%s5509_s17 + $0xe8] sm:$0xff]  }
  0x2b   : > { %1105 = vrot.lane.b32.xlu0 %v5606_v28, %s5466_s18  ;;  %9436 = vst [vmem:[#allocation18_spill] sm:$0xff] %v5664_v10  ;;  %v782_v15 = vshrl.u32 %v5632_v46, 16  ;;  %v786_v16 = vshll.u32 %v5652_v1, 16  ;;  %v794_v17 = vshll.u32 %v5655_v4, 16  ;;  %v5672_v18 = vsel %vm609_vm0, %v752_v6, %v756_v57  ;;  %v5871_v28 = vld [vmem:[%s5509_s17 + $0x160] sm:$0xff]  }
  0x2c   : > { %9437 = vst [vmem:[#allocation19_spill] sm:$0xff] %v5672_v18  ;;  %v768_v22 = vor.u32 %v766_v54, %v764_v62  ;;  %v772_v23 = vrot.slane %v770_v0, 1  ;;  %v5683_v29 = vsel %vm609_vm0, %v744_v11, %v748_v50  ;;  %v760_v31 = vor.u32 %v758_v7, %v756_v57  ;;  %v5708_v54 = vld [vmem:[%s5509_s17 + $0xe0] sm:$0xff]  }
  0x2d   : > { %9438 = vst [vmem:[#allocation20_spill] sm:$0xff] %v5683_v29  ;;  %v774_v33 = vshrl.u32 %v5628_v43, 16  ;;  %v784_v35 = vor.u32 %v782_v15, %v780_v13  ;;  %v788_v37 = vrot.slane %v786_v16, 1  ;;  %v796_v38 = vrot.slane %v794_v17, 1 }
  0x2e   : > { %1111 = vrot.lane.b32.xlu1 %v5617_v36, %s5466_s18  ;;  %v798_v40 = vshrl.u32 %v5655_v4, 16  ;;  %v5696_v42 = vsel %vm609_vm0, %v768_v22, %v772_v23  ;;  %v802_v45 = vshll.u32 %v5675_v24, 16  ;;  %v810_v48 = vshll.u32 %v5678_v26, 16 }
  0x2f   : > { %1109 = vrot.lane.b32.xlu0 %v5623_v39, %s5466_s18  ;;  %9439 = vst [vmem:[#allocation21_spill] sm:$0xff] %v5696_v42  ;;  %v790_v49 = vshrl.u32 %v5652_v1, 16  ;;  %v5704_v50 = vsel %vm609_vm0, %v760_v31, %v764_v62  ;;  %v776_v51 = vor.u32 %v774_v33, %v772_v23  ;;  %v818_v53 = vshll.u32 %v5687_v34, 16  ;;  %v5731_v33 = vld [vmem:[%s5509_s17 + $0xf0] sm:$0xff]  }
  0x30   : > { %9440 = vst [vmem:[#allocation22_spill] sm:$0xff] %v5704_v50  ;;  %v5713_v56 = vsel %vm609_vm0, %v784_v35, %v788_v37  ;;  %v826_v57 = vshll.u32 %v5693_v41, 16  ;;  %v800_v0 = vor.u32 %v798_v40, %v796_v38  ;;  %v804_v62 = vrot.slane %v802_v45, 1 }
  0x31   : > { %9441 = vst [vmem:[#allocation23_spill] sm:$0xff] %v5713_v56  ;;  %v812_v6 = vrot.slane %v810_v48, 1  ;;  %v814_v7 = vshrl.u32 %v5678_v26, 16  ;;  %v5723_v11 = vsel %vm609_vm0, %v776_v51, %v780_v13  ;;  %v792_v15 = vor.u32 %v790_v49, %v788_v37  ;;  %v5735_v13 = vld [vmem:[%s5509_s17 + $0xf8] sm:$0xff]  }
  0x32   : > { %1115 = vrot.lane.b32.xlu1 %v5637_v47, %s5466_s18  ;;  %9442 = vst [vmem:[#allocation24_spill] sm:$0xff] %v5723_v11  ;;  %v820_v16 = vrot.slane %v818_v53, 1  ;;  %v806_v17 = vshrl.u32 %v5675_v24, 16  ;;  %v828_v22 = vrot.slane %v826_v57, 1  ;;  %v830_v23 = vshrl.u32 %v5693_v41, 16 }
  0x33   : > { %1113 = vrot.lane.b32.xlu0 %v5645_v55, %s5466_s18  ;;  %v834_v31 = vshll.u32 %v5708_v54, 16  ;;  %v842_v35 = vshll.u32 %v5717_v61, 16  ;;  %v5738_v37 = vsel %vm609_vm0, %v800_v0, %v804_v62  ;;  %v816_v40 = vor.u32 %v814_v7, %v812_v6  ;;  %v5751_v0 = vld [vmem:[%s5509_s17 + $0x108] sm:$0xff]   ;;  %v5851_v55 = vld [vmem:[%s5509_s17 + $0x150] sm:$0xff]  }
  0x34   : > { %9443 = vst [vmem:[#allocation25_spill] sm:$0xff] %v5738_v37  ;;  %v5743_v45 = vsel %vm609_vm0, %v792_v15, %v796_v38  ;;  %v808_v48 = vor.u32 %v806_v17, %v804_v62  ;;  %v822_v49 = vshrl.u32 %v5687_v34, 16  ;;  %v846_v53 = vshrl.u32 %v5717_v61, 16  ;;  %v5757_v62 = vld [vmem:[%s5509_s17 + $0x100] sm:$0xff]  }
  0x35   : > { %9444 = vst [vmem:[#allocation26_spill] sm:$0xff] %v5743_v45  ;;  %v836_v51 = vrot.slane %v834_v31, 1  ;;  %v850_v57 = vshll.u32 %v5731_v33, 16  ;;  %v5754_v7 = vsel %vm609_vm0, %v816_v40, %v820_v16  ;;  %v832_v38 = vor.u32 %v830_v23, %v828_v22 }
  0x36   : > { %1119 = vrot.lane.b32.xlu1 %v5658_v5, %s5466_s18  ;;  %9445 = vst [vmem:[#allocation27_spill] sm:$0xff] %v5754_v7  ;;  %v844_v15 = vrot.slane %v842_v35, 1  ;;  %v858_v17 = vshll.u32 %v5735_v13, 16  ;;  %v5763_v31 = vsel %vm609_vm0, %v808_v48, %v812_v6  ;;  %v824_v9 = vor.u32 %v822_v49, %v820_v16  ;;  %v5770_v35 = vld [vmem:[%s5509_s17 + $0x110] sm:$0xff]   ;;  %v5783_v49 = vld [vmem:[%s5509_s17 + $0x120] sm:$0xff]   ;;  %v5836_v5 = vld [vmem:[%s5509_s17 + $0x148] sm:$0xff]  }
  0x37   : > { %1117 = vrot.lane.b32.xlu0 %v5664_v10, %s5466_s18  ;;  %9446 = vst [vmem:[#allocation28_spill] sm:$0xff] %v5763_v31  ;;  %v852_v23 = vrot.slane %v850_v57, 1  ;;  %v874_v40 = vshll.u32 %v5751_v0, 16  ;;  %v866_v48 = vshll.u32 %v5757_v62, 16  ;;  %v5811_v10 = vld [vmem:[%s5509_s17 + $0x138] sm:$0xff]   ;;  %v938_v47 = vshll.u32 %v5836_v5, 16 }
  0x38   : > { %v848_v6 = vor.u32 %v846_v53, %v844_v15  ;;  %v860_v16 = vrot.slane %v858_v17, 1  ;;  %v5786_v57 = vsel %vm609_vm0, %v824_v9, %v828_v22  ;;  %v878_v53 = vshrl.u32 %v5751_v0, 16 }
  0x39   : > { %9448 = vst [vmem:[#allocation30_spill] sm:$0xff] %v5786_v57  ;;  %v882_v17 = vshll.u32 %v5770_v35, 16  ;;  %v868_v22 = vrot.slane %v866_v48, 1  ;;  %v946_v36 = vshll.u32 %v5851_v55, 16  ;;  %v1006_v32 = vshrl.u32 %v5917_v8, 16 }
  0x3a   : > { %1123 = vrot.lane.b32.xlu1 %v5672_v18, %s5466_s18 }
  0x3b   : > { %1121 = vrot.lane.b32.xlu0 %v5683_v29, %s5466_s18  ;;  %v870_v29 = vshrl.u32 %v5757_v62, 16 }
  0x3e   : > { %1127 = vrot.lane.b32.xlu1 %v5696_v42, %s5466_s18 }
  0x3f   : > { %1125 = vrot.lane.b32.xlu0 %v5704_v50, %s5466_s18  ;;  %v854_v50 = vshrl.u32 %v5731_v33, 16 }
  0x42   : > { %1131 = vrot.lane.b32.xlu1 %v5713_v56, %s5466_s18  ;;  %v5774_v56 = vld [vmem:[%s5509_s17 + $0x118] sm:$0xff]  }
  0x43   : > { %1129 = vrot.lane.b32.xlu0 %v5723_v11, %s5466_s18  ;;  %v862_v11 = vshrl.u32 %v5735_v13, 16  ;;  %v890_v42 = vshll.u32 %v5774_v56, 16  ;;  %v894_v18 = vshrl.u32 %v5774_v56, 16 }
  0x45   : > { %v864_v9 = vor.u32 %v862_v11, %v860_v16  ;;  %v884_v11 = vrot.slane %v882_v17, 1  ;;  %v892_v48 = vrot.slane %v890_v42, 1  ;;  %v886_v42 = vshrl.u32 %v5770_v35, 16  ;;  %v5827_v17 = vld [vmem:[%s5509_s17 + $0x140] sm:$0xff]  }
  0x46   : > { %1135 = vrot.lane.b32.xlu1 %v5738_v37, %s5466_s18  ;;  %v838_v37 = vshrl.u32 %v5708_v54, 16 }
  0x47   : > { %1133 = vrot.lane.b32.xlu0 %v5743_v45, %s5466_s18  ;;  %v5777_v45 = vsel %vm609_vm0, %v832_v38, %v836_v51  ;;  %v876_v38 = vrot.slane %v874_v40, 1 }
  0x48   : > { %9447 = vst [vmem:[#allocation29_spill] sm:$0xff] %v5777_v45 }
  0x4a   : > { %1139 = vrot.lane.b32.xlu1 %v5754_v7, %s5466_s18  ;;  %v840_v7 = vor.u32 %v838_v37, %v836_v51  ;;  %v5798_v37 = vld [vmem:[%s5509_s17 + $0x128] sm:$0xff]   ;;  %v898_v51 = vshll.u32 %v5783_v49, 16 }
  0x4b   : > { %1137 = vrot.lane.b32.xlu0 %v5763_v31, %s5466_s18  ;;  %v5795_v31 = vsel %vm609_vm0, %v848_v6, %v852_v23  ;;  %v880_v6 = vor.u32 %v878_v53, %v876_v38  ;;  %v872_v53 = vor.u32 %v870_v29, %v868_v22  ;;  %v910_v29 = vshrl.u32 %v5798_v37, 16 }
  0x4c   : > { %9449 = vst [vmem:[#allocation31_spill] sm:$0xff] %v5795_v31  ;;  %v5804_v40 = vsel %vm609_vm0, %v840_v7, %v844_v15  ;;  %v5817_v7 = vld [vmem:[%s5509_s17 + $0x130] sm:$0xff]   ;;  %v900_v15 = vrot.slane %v898_v51, 1  ;;  %v896_v51 = vor.u32 %v894_v18, %v892_v48 }
  0x4d   : > { %9450 = vst [vmem:[#allocation32_spill] sm:$0xff] %v5804_v40  ;;  %v918_v39 = vshrl.u32 %v5817_v7, 16 }
  0x4e   : > { %1143 = vrot.lane.b32.xlu1 %v5777_v45, %s5466_s18  ;;  %v856_v45 = vor.u32 %v854_v50, %v852_v23  ;;  %v906_v50 = vshll.u32 %v5798_v37, 16 }
  0x4f   : > { %1141 = vrot.lane.b32.xlu0 %v5786_v57, %s5466_s18  ;;  %v5814_v57 = vsel %vm609_vm0, %v864_v9, %v868_v22  ;;  %v5832_v9 = vsel %vm609_vm0, %v880_v6, %v884_v11  ;;  %v888_v22 = vor.u32 %v886_v42, %v884_v11  ;;  %v902_v6 = vshrl.u32 %v5783_v49, 16 }
  0x50   : > { %9451 = vst [vmem:[#allocation33_spill] sm:$0xff] %v5814_v57  ;;  %v5823_v23 = vsel %vm609_vm0, %v856_v45, %v860_v16  ;;  %9453 = vst [vmem:[#allocation35_spill] sm:$0xff] %v5832_v9  ;;  %v914_v45 = vshll.u32 %v5817_v7, 16  ;;  %v5843_v16 = vsel %vm609_vm0, %v872_v53, %v876_v38  ;;  %v5858_v53 = vld [vmem:[%s5509_s17 + $0x158] sm:$0xff]  }
  0x51   : > { %9452 = vst [vmem:[#allocation34_spill] sm:$0xff] %v5823_v23  ;;  %9454 = vst [vmem:[#allocation36_spill] sm:$0xff] %v5843_v16  ;;  %v904_v42 = vor.u32 %v902_v6, %v900_v15  ;;  %v934_v6 = vshrl.u32 %v5827_v17, 16 }
  0x52   : > { %1147 = vrot.lane.b32.xlu1 %v5795_v31, %s5466_s18  ;;  %v922_v31 = vshll.u32 %v5811_v10, 16  ;;  %v916_v11 = vrot.slane %v914_v45, 1  ;;  %v942_v45 = vshrl.u32 %v5836_v5, 16 }
  0x53   : > { %1145 = vrot.lane.b32.xlu0 %v5804_v40, %s5466_s18  ;;  %v908_v40 = vrot.slane %v906_v50, 1  ;;  %v926_v50 = vshrl.u32 %v5811_v10, 16 }
  0x54   : > { %v924_v18 = vrot.slane %v922_v31, 1  ;;  %v5863_v31 = vsel %vm609_vm0, %v888_v22, %v892_v48 }
  0x55   : > { %v912_v38 = vor.u32 %v910_v29, %v908_v40  ;;  %9456 = vst [vmem:[#allocation38_spill] sm:$0xff] %v5863_v31  ;;  %v940_v29 = vrot.slane %v938_v47, 1  ;;  %v5883_v22 = vsel %vm609_vm0, %v904_v42, %v908_v40  ;;  %v920_v47 = vor.u32 %v918_v39, %v916_v11  ;;  %v5897_v39 = vld [vmem:[%s5509_s17 + $0x170] sm:$0xff]  }
  0x56   : > { %1151 = vrot.lane.b32.xlu1 %v5814_v57, %s5466_s18  ;;  %v930_v57 = vshll.u32 %v5827_v17, 16  ;;  %9459 = vst [vmem:[#allocation41_spill] sm:$0xff] %v5883_v22  ;;  %v962_v40 = vshll.u32 %v5871_v28, 16  ;;  %9462 = vst [vmem:[#allocation44_spill] sm:$0xff] %v5897_v39 }
  0x57   : > { %1149 = vrot.lane.b32.xlu0 %v5823_v23, %s5466_s18  ;;  %v5855_v23 = vsel %vm609_vm0, %v896_v51, %v900_v15  ;;  %v928_v51 = vor.u32 %v926_v50, %v924_v18  ;;  %v5874_v48 = vsel %vm609_vm0, %v912_v38, %v916_v11  ;;  %v5878_v15 = vld [vmem:[%s5509_s17 + $0x168] sm:$0xff]   ;;  %v944_v38 = vor.u32 %v942_v45, %v940_v29 }
  0x58   : > { %9455 = vst [vmem:[#allocation37_spill] sm:$0xff] %v5855_v23  ;;  %9457 = vst [vmem:[#allocation39_spill] sm:$0xff] %v5874_v48  ;;  %v970_v11 = vshll.u32 %v5878_v15, 16  ;;  %v5903_v42 = vsel %vm609_vm0, %v920_v47, %v924_v18  ;;  %v964_v18 = vrot.slane %v962_v40, 1  ;;  %v978_v47 = vshll.u32 %v5897_v39, 16 }
  0x59   : > { %9458 = vst [vmem:[#allocation40_spill] sm:$0xff] %v5878_v15  ;;  %9463 = vst [vmem:[#allocation45_spill] sm:$0xff] %v5903_v42 }
  0x5a   : > { %1155 = vrot.lane.b32.xlu1 %v5832_v9, %s5466_s18  ;;  %v932_v9 = vrot.slane %v930_v57, 1  ;;  %v954_v57 = vshll.u32 %v5858_v53, 16 }
  0x5b   : > { %1153 = vrot.lane.b32.xlu0 %v5843_v16, %s5466_s18  ;;  %v5892_v16 = vld [vmem:[%s5509_s17 + $0x178] sm:$0xff]  }
  0x5c   : > { %v5889_v50 = vsel %vm609_vm0, %v928_v51, %v932_v9  ;;  %9461 = vst [vmem:[#allocation43_spill] sm:$0xff] %v5892_v16  ;;  %v956_v21 = vrot.slane %v954_v57, 1  ;;  %v936_v51 = vor.u32 %v934_v6, %v932_v9  ;;  %v974_v57 = vshrl.u32 %v5878_v15, 16 }
  0x5d   : > { %9460 = vst [vmem:[#allocation42_spill] sm:$0xff] %v5889_v50  ;;  %v986_v14 = vshll.u32 %v5892_v16, 16  ;;  %v972_v9 = vrot.slane %v970_v11, 1  ;;  %v1002_v11 = vshll.u32 %v5917_v8, 16 }
  0x5e   : > { %1159 = vrot.lane.b32.xlu1 %v5855_v23, %s5466_s18  ;;  %v948_v23 = vrot.slane %v946_v36, 1  ;;  %v950_v36 = vshrl.u32 %v5851_v55, 16  ;;  %v5923_v6 = vsel %vm609_vm0, %v936_v51, %v940_v29  ;;  %v980_v29 = vrot.slane %v978_v47, 1  ;;  %v5938_v51 = vld [vmem:[%s5509_s17 + $0x198] sm:$0xff]  }
  0x5f   : > { %1157 = vrot.lane.b32.xlu0 %v5863_v31, %s5466_s18  ;;  %v958_v31 = vshrl.u32 %v5858_v53, 16  ;;  %9467 = vst [vmem:[#allocation49_spill] sm:$0xff] %v5923_v6  ;;  %v988_v63 = vrot.slane %v986_v14, 1  ;;  %9470 = vst [vmem:[#allocation52_spill] sm:$0xff] %v5938_v51  ;;  %v1004_v47 = vrot.slane %v1002_v11, 1 }
  0x60   : > { %v5909_v45 = vsel %vm609_vm0, %v944_v38, %v948_v23  ;;  %v952_v38 = vor.u32 %v950_v36, %v948_v23  ;;  %v5935_v23 = vld [vmem:[%s5509_s17 + $0x190] sm:$0xff]  }
  0x61   : > { %9464 = vst [vmem:[#allocation46_spill] sm:$0xff] %v5909_v45  ;;  %9469 = vst [vmem:[#allocation51_spill] sm:$0xff] %v5935_v23  ;;  %v1008_v11 = vor.u32 %v1006_v32, %v1004_v47 }
  0x62   : > { %1163 = vrot.lane.b32.xlu1 %v5874_v48, %s5466_s18  ;;  %v5913_v48 = vld [vmem:[%s5509_s17 + $0x180] sm:$0xff]   ;;  %v5943_v14 = vsel %vm609_vm0, %v952_v38, %v956_v21 }
  0x63   : > { %1161 = vrot.lane.b32.xlu0 %v5883_v22, %s5466_s18  ;;  %9465 = vst [vmem:[#allocation47_spill] sm:$0xff] %v5913_v48  ;;  %v960_v22 = vor.u32 %v958_v31, %v956_v21  ;;  %v990_v31 = vshrl.u32 %v5892_v16, 16  ;;  %v994_v40 = vshll.u32 %v5913_v48, 16  ;;  %9471 = vst [vmem:[#allocation53_spill] sm:$0xff] %v5943_v14  ;;  %v1010_v21 = vshll.u32 %v5935_v23, 16 }
  0x65   : > { %v5932_v52 = vsel %vm609_vm0, %v960_v22, %v964_v18  ;;  %v992_v22 = vor.u32 %v990_v31, %v988_v63  ;;  %v1012_v8 = vrot.slane %v1010_v21, 1 }
  0x66   : > { %1167 = vrot.lane.b32.xlu1 %v5889_v50, %s5466_s18  ;;  %v966_v50 = vshrl.u32 %v5871_v28, 16  ;;  %9468 = vst [vmem:[#allocation50_spill] sm:$0xff] %v5932_v52 }
  0x67   : > { %1165 = vrot.lane.b32.xlu0 %v5903_v42, %s5466_s18  ;;  %v976_v42 = vor.u32 %v974_v57, %v972_v9  ;;  %v996_v57 = vrot.slane %v994_v40, 1  ;;  %v998_v40 = vshrl.u32 %v5913_v48, 16  ;;  %v5994_v48 = vsel %vm609_vm0, %v1008_v11, %v1012_v8 }
  0x68   : > { %v968_v36 = vor.u32 %v966_v50, %v964_v18  ;;  %v5957_v50 = vld [vmem:[%s5509_s17 + $0x1a0] sm:$0xff]   ;;  %v1018_v18 = vshll.u32 %v5938_v51, 16  ;;  %9479 = vst [vmem:[#allocation61_spill] sm:$0xff] %v5994_v48 }
  0x69   : > { %v5953_v16 = vsel %vm609_vm0, %v976_v42, %v980_v29  ;;  %9474 = vst [vmem:[#allocation56_spill] sm:$0xff] %v5957_v50  ;;  %v5969_v42 = vsel %vm609_vm0, %v992_v22, %v996_v57  ;;  %v1000_v32 = vor.u32 %v998_v40, %v996_v57  ;;  %v1014_v22 = vshrl.u32 %v5935_v23, 16  ;;  %v6011_v23 = vld [vmem:[%s5509_s17 + $0x1d0] sm:$0xff]  }
  0x6a   : > { %1171 = vrot.lane.b32.xlu1 %v5909_v45, %s5466_s18  ;;  %v982_v45 = vshrl.u32 %v5897_v39, 16  ;;  %9473 = vst [vmem:[#allocation55_spill] sm:$0xff] %v5953_v16  ;;  %v5963_v38 = vsel %vm609_vm0, %v968_v36, %v972_v9  ;;  %9476 = vst [vmem:[#allocation58_spill] sm:$0xff] %v5969_v42  ;;  %v1022_v9 = vshrl.u32 %v5938_v51, 16  ;;  %v5991_v51 = vld [vmem:[%s5509_s17 + $0x1c0] sm:$0xff]  }
  0x6b   : > { %1169 = vrot.lane.b32.xlu0 %v5923_v6, %s5466_s18  ;;  %9475 = vst [vmem:[#allocation57_spill] sm:$0xff] %v5963_v38  ;;  %v1034_v6 = vshll.u32 %v5950_v44, 16  ;;  %v1016_v40 = vor.u32 %v1014_v22, %v1012_v8  ;;  %v290_v8 = vld [vmem:[%s5509_s17 + $0x1d8] sm:$0xf] }
  0x6c   : > { %v984_v31 = vor.u32 %v982_v45, %v980_v29  ;;  %v1026_v45 = vshll.u32 %v5957_v50, 16  ;;  %v5978_v29 = vld [vmem:[%s5509_s17 + $0x1b8] sm:$0xff]  }
  0x6d   : > { %9477 = vst [vmem:[#allocation59_spill] sm:$0xff] %v5978_v29  ;;  %v1036_v21 = vrot.slane %v1034_v6, 1  ;;  %v1050_v57 = vshll.u32 %v5978_v29, 16  ;;  %v6003_v6 = vsel %vm609_vm0, %v1000_v32, %v1004_v47  ;;  %v292_v32 = vld [vmem:[%s5509_s17 + $0x1dc] sm:$0xf] }
  0x6e   : > { %1175 = vrot.lane.b32.xlu1 %v5932_v52, %s5466_s18  ;;  %v5972_v52 = vld [vmem:[%s5509_s17 + $0x1b0] sm:$0xff]   ;;  %v5983_v36 = vsel %vm609_vm0, %v984_v31, %v988_v63  ;;  %v1028_v63 = vrot.slane %v1026_v45, 1  ;;  %v5998_v31 = vld [vmem:[%s5509_s17 + $0x1c8] sm:$0xff]   ;;  %9480 = vst [vmem:[#allocation62_spill] sm:$0xff] %v6003_v6  ;;  %v1054_v45 = vshrl.u32 %v5978_v29, 16 }
  0x6f   : > { %1173 = vrot.lane.b32.xlu0 %v5943_v14, %s5466_s18  ;;  %v1020_v14 = vrot.slane %v1018_v18, 1  ;;  %9478 = vst [vmem:[#allocation60_spill] sm:$0xff] %v5983_v36  ;;  %v1038_v18 = vshrl.u32 %v5950_v44, 16  ;;  %v1058_v44 = vshll.u32 %v5991_v51, 16  ;;  %v1066_v47 = vshll.u32 %v5998_v31, 16 }
  0x70   : > { %v1070_v15 = vshrl.u32 %v5998_v31, 16 }
  0x71   : > { %v1040_v11 = vor.u32 %v1038_v18, %v1036_v21  ;;  %v6022_v22 = vsel %vm609_vm0, %v1016_v40, %v1020_v14  ;;  %v1046_v18 = vshrl.u32 %v5972_v52, 16 }
  0x72   : > { %1179 = vrot.lane.b32.xlu1 %v5953_v16, %s5466_s18  ;;  %v1042_v16 = vshll.u32 %v5972_v52, 16  ;;  %9482 = vst [vmem:[#allocation64_spill] sm:$0xff] %v6022_v22 }
  0x73   : > { %1177 = vrot.lane.b32.xlu0 %v5963_v38, %s5466_s18  ;;  %v1024_v38 = vor.u32 %v1022_v9, %v1020_v14 }
  0x74   : > { %v1044_v9 = vrot.slane %v1042_v16, 1 }
  0x75   : > { %v6014_v39 = vsel %vm609_vm0, %v1024_v38, %v1028_v63 }
  0x76   : > { %1183 = vrot.lane.b32.xlu1 %v5969_v42, %s5466_s18  ;;  %v1030_v42 = vshrl.u32 %v5957_v50, 16  ;;  %9481 = vst [vmem:[#allocation63_spill] sm:$0xff] %v6014_v39  ;;  %v6028_v38 = vsel %vm609_vm0, %v1040_v11, %v1044_v9  ;;  %v1068_v50 = vrot.slane %v1066_v47, 1  ;;  %v1078_v47 = vshrl.u32 %v6011_v23, 16 }
  0x77   : > { %1181 = vrot.lane.b32.xlu0 %v5983_v36, %s5466_s18  ;;  %v1052_v36 = vrot.slane %v1050_v57, 1  ;;  %9483 = vst [vmem:[#allocation65_spill] sm:$0xff] %v6028_v38  ;;  %v1060_v57 = vrot.slane %v1058_v44, 1 }
  0x78   : > { %v1032_v16 = vor.u32 %v1030_v42, %v1028_v63  ;;  %v1048_v42 = vor.u32 %v1046_v18, %v1044_v9  ;;  %v1062_v63 = vshrl.u32 %v5991_v51, 16  ;;  %v1072_v11 = vor.u32 %v1070_v15, %v1068_v50 }
  0x79   : > { %v1056_v29 = vor.u32 %v1054_v45, %v1052_v36 }
  0x7a   : > { %1187 = vrot.lane.b32.xlu1 %v5994_v48, %s5466_s18  ;;  %v6030_v48 = vcombine.low %v290_v8, %v292_v32  ;;  %v6037_v14 = vsel %vm609_vm0, %v1032_v16, %v1036_v21  ;;  %v6049_v21 = vsel %vm609_vm0, %v1048_v42, %v1052_v36  ;;  %v1064_v9 = vor.u32 %v1062_v63, %v1060_v57  ;;  %v5341_v16 = vld [vmem:[%s5509_s17 + $0x4] sm:$0xf]  ;;  %v5342_v42 = vld [vmem:[%s5509_s17 + $0x8] sm:$0xff]  }
  0x7b   : > { %1185 = vrot.lane.b32.xlu0 %v6003_v6, %s5466_s18  ;;  %v1074_v6 = vshll.u32 %v6011_v23, 16  ;;  %9485 = vst [vmem:[#allocation67_spill] sm:$0xff] %v6037_v14  ;;  %v6044_v40 = vsel %vm609_vm0, %v1056_v29, %v1060_v57  ;;  %9487 = vst [vmem:[#allocation69_spill] sm:$0xff] %v6049_v21  ;;  %v293_v29 = vld [vmem:[%s5509_s17] sm:$0xe]  ;;  %v1214_v63 = vrot.slane %v5342_v42, 1 }
  0x7c   : > { %9484 = vst [vmem:[#allocation66_spill] sm:$0xff] %v6030_v48  ;;  %v1082_v44 = vshll.u32 %v6030_v48, 16  ;;  %9486 = vst [vmem:[#allocation68_spill] sm:$0xff] %v6044_v40  ;;  %v1086_v32 = vshrl.u32 %v6030_v48, 16  ;;  %v4926_v18 = vcombine.low %v293_v29, %v5341_v16  ;;  %v1220_v16 = vrot.slane %v5528_v20, 1 }
  0x7d   : > { %v1076_v45 = vrot.slane %v1074_v6, 1  ;;  %v6062_v6 = vsel %vm609_vm0, %v1064_v9, %v1068_v50 }
  0x7e   : > { %1191 = vrot.lane.b32.xlu1 %v6014_v39, %s5466_s18  ;;  %v1084_v8 = vrot.slane %v1082_v44, 1  ;;  %9489 = vst [vmem:[#allocation71_spill] sm:$0xff] %v6062_v6  ;;  %v1216_v44 = vrot.slane %v5513_v2, 1 }
  0x7f   : > { %1189 = vrot.lane.b32.xlu0 %v6022_v22, %s5466_s18  ;;  %v6057_v15 = vsel %vm609_vm0, %v1072_v11, %v1076_v45  ;;  %v1080_v36 = vor.u32 %v1078_v47, %v1076_v45  ;;  %v1213_v45 = vrot.slane %v4926_v18, 1 }
  0x80   : > { %9488 = vst [vmem:[#allocation70_spill] sm:$0xff] %v6057_v15  ;;  %v6067_v57 = vor.u32 %v1086_v32, %v1084_v8  ;;  %v1217_v47 = vsel %vm1212_vm1, %v1214_v63, %v1216_v44  ;;  %v6084_v32 = vld [vmem:[%s5509_s17 + $0x18] sm:$0xff]  }
  0x81   : > { %v6076_v50 = vsel %vm609_vm0, %v1080_v36, %v1084_v8  ;;  %v6087_v29 = vrot.slane %v6084_v32, 1  ;;  %v1215_v36 = vsel %vm1212_vm1, %v1213_v45, %v1214_v63 }
  0x82   : > { %1195 = vrot.lane.b32.xlu1 %v6028_v38, %s5466_s18  ;;  %9490 = vst [vmem:[#allocation72_spill] sm:$0xff] %v6067_v57  ;;  %9492 = vst [vmem:[#allocation74_spill] sm:$0xff] %v6076_v50 }
  0x83   : > { %1193 = vrot.lane.b32.xlu0 %v6037_v14, %s5466_s18  ;;  %9494 = vst [vmem:[#allocation76_spill] sm:$0xff] %v6087_v29  ;;  %v6100_v42 = vsel %vm1212_vm1, %v6087_v29, %v1220_v16  ;;  %v1219_v45 = vsel %vm1212_vm1, %v1216_v44, %v6087_v29  ;;  %v1236_v14 = vrot.slane %v5557_v59, 1  ;;  %v1240_v59 = vrot.slane %v5568_v3, 1 }
  0x84   : > { %9497 = vst [vmem:[#allocation79_spill] sm:$0xff] %v6100_v42  ;;  %v1244_v3 = vrot.slane %v5591_v19, 1  ;;  %v1248_v19 = vrot.slane %v5603_v27, 1  ;;  %v1252_v27 = vrot.slane %v5628_v43, 1  ;;  %v1256_v43 = vrot.slane %v5652_v1, 1 }
  0x85   : > { %v1260_v1 = vrot.slane %v5675_v24, 1  ;;  %v1264_v24 = vrot.slane %v5687_v34, 1  ;;  %v1268_v34 = vrot.slane %v5708_v54, 1  ;;  %v1272_v54 = vrot.slane %v5731_v33, 1 }
  0x86   : > { %1199 = vrot.lane.b32.xlu1 %v6044_v40, %s5466_s18  ;;  %v6152_v40 = vld [vmem:[%s5509_s17 + $0x50] sm:$0xff]   ;;  %v1276_v33 = vrot.slane %v5757_v62, 1  ;;  %v1280_v62 = vrot.slane %v5770_v35, 1  ;;  %v1284_v35 = vrot.slane %v5783_v49, 1  ;;  %v1288_v49 = vrot.slane %v5817_v7, 1 }
  0x87   : > { %1197 = vrot.lane.b32.xlu0 %v6049_v21, %s5466_s18  ;;  %v1292_v7 = vrot.slane %v5827_v17, 1  ;;  %v1296_v17 = vrot.slane %v5851_v55, 1 }
  0x8a   : > { %1203 = vrot.lane.b32.xlu1 %v6057_v15, %s5466_s18  ;;  %v6148_v15 = vld [vmem:[%s5509_s17 + $0x48] sm:$0xff]  }
  0x8b   : > { %1201 = vrot.lane.b32.xlu0 %v6062_v6, %s5466_s18  ;;  %v6126_v6 = vld [vmem:[%s5509_s17 + $0x38] sm:$0xff]   ;;  %v1230_v21 = vrot.slane %v6148_v15, 1 }
  0x8c   : > { %v6073_v11 = vpop.permute.xlu1 %1093 }
  0x8d   : > { %9491 = vst [vmem:[#allocation73_spill] sm:$0xff] %v6073_v11  ;;  %v6078_v9 = vpop.permute.xlu0 %1089  ;;  %v6103_v11 = vld [vmem:[%s5509_s17 + $0x28] sm:$0xff]  }
  0x8e   : > { %9493 = vst [vmem:[#allocation75_spill] sm:$0xff] %v6078_v9  ;;  %1207 = vrot.lane.b32.xlu1 %v6067_v57, %s5466_s18  ;;  %v6106_v9 = vrot.slane %v6103_v11, 1  ;;  %v6130_v57 = vld [vmem:[%s5509_s17 + $0x40] sm:$0xff]  }
  0x8f   : > { %1205 = vrot.lane.b32.xlu0 %v6076_v50, %s5466_s18  ;;  %v6109_v50 = vld [vmem:[%s5509_s17 + $0x30] sm:$0xff]  }
  0x90   : > { %v6092_v8 = vpop.permute.xlu1 %1095  ;;  %9498 = vst [vmem:[#allocation80_spill] sm:$0xff] %v6106_v9 }
  0x91   : > { %9495 = vst [vmem:[#allocation77_spill] sm:$0xff] %v6092_v8  ;;  %v6095_v18 = vpop.permute.xlu0 %1091  ;;  %v1224_v8 = vrot.slane %v6109_v50, 1 }
  0x92   : > { %9496 = vst [vmem:[#allocation78_spill] sm:$0xff] %v6095_v18  ;;  %1334 = vrot.lane.b32.xlu1 %v1217_v47, %s5467_s19 }
  0x93   : > { %1332 = vrot.lane.b32.xlu0 %v1215_v36, %s5467_s19  ;;  %v6123_v18 = vsel %vm1212_vm1, %v6106_v9, %v1224_v8  ;;  %v1226_v36 = vrot.slane %v6126_v6, 1 }
  0x94   : > { %v6113_v63 = vpop.permute.xlu1 %1099  ;;  %9501 = vst [vmem:[#allocation83_spill] sm:$0xff] %v6123_v18 }
  0x95   : > { %9499 = vst [vmem:[#allocation81_spill] sm:$0xff] %v6113_v63  ;;  %v6117_v47 = vpop.permute.xlu0 %1097  ;;  %v1228_v63 = vrot.slane %v6130_v57, 1 }
  0x96   : > { %9500 = vst [vmem:[#allocation82_spill] sm:$0xff] %v6117_v47  ;;  %1338 = vrot.lane.b32.xlu1 %v6100_v42, %s5467_s19  ;;  %v6138_v47 = vsel %vm1212_vm1, %v1220_v16, %v6106_v9 }
  0x97   : > { %1336 = vrot.lane.b32.xlu0 %v1219_v45, %s5467_s19  ;;  %9503 = vst [vmem:[#allocation85_spill] sm:$0xff] %v6138_v47  ;;  %v6145_v29 = vsel %vm1212_vm1, %v1226_v36, %v1228_v63  ;;  %v1232_v45 = vrot.slane %v6152_v40, 1 }
  0x98   : > { %v6134_v44 = vpop.permute.xlu1 %1103 }
  0x99   : > { %9502 = vst [vmem:[#allocation84_spill] sm:$0xff] %v6134_v44  ;;  %v6140_v42 = vpop.permute.xlu0 %1101  ;;  %v6167_v9 = vsel %vm1212_vm1, %v1230_v21, %v1232_v45 }
  0x9a   : > { %9504 = vst [vmem:[#allocation86_spill] sm:$0xff] %v6140_v42  ;;  %1342 = vrot.lane.b32.xlu1 %v6123_v18, %s5467_s19  ;;  %v6160_v42 = vsel %vm1212_vm1, %v1224_v8, %v1226_v36  ;;  %v1234_v18 = vrot.slane %v5554_v58, 1  ;;  %v6176_v8 = vsel %vm1212_vm1, %v1228_v63, %v1230_v21  ;;  %v1238_v58 = vrot.slane %v5560_v60, 1 }
  0x9b   : > { %1340 = vrot.lane.b32.xlu0 %v6138_v47, %s5467_s19  ;;  %v1242_v60 = vrot.slane %v5579_v12, 1  ;;  %v1246_v12 = vrot.slane %v5598_v25, 1  ;;  %v1250_v25 = vrot.slane %v5610_v30, 1  ;;  %v1254_v30 = vrot.slane %v5632_v46, 1 }
  0x9c   : > { %v6157_v16 = vpop.permute.xlu1 %1107  ;;  %v6192_v21 = vsel %vm1212_vm1, %v1232_v45, %v1234_v18  ;;  %v1258_v46 = vrot.slane %v5655_v4, 1  ;;  %v1262_v4 = vrot.slane %v5678_v26, 1  ;;  %v1266_v26 = vrot.slane %v5693_v41, 1 }
  0x9d   : > { %9505 = vst [vmem:[#allocation87_spill] sm:$0xff] %v6157_v16  ;;  %v6162_v44 = vpop.permute.xlu0 %1105  ;;  %v1270_v41 = vrot.slane %v5717_v61, 1  ;;  %v1274_v61 = vrot.slane %v5735_v13, 1  ;;  %v1278_v13 = vrot.slane %v5751_v0, 1  ;;  %v1282_v0 = vrot.slane %v5774_v56, 1 }
  0x9e   : > { %9506 = vst [vmem:[#allocation88_spill] sm:$0xff] %v6162_v44  ;;  %1346 = vrot.lane.b32.xlu1 %v6145_v29, %s5467_s19  ;;  %v6183_v44 = vsel %vm1212_vm1, %v1234_v18, %v1236_v14  ;;  %v6208_v18 = vsel %vm1212_vm1, %v1236_v14, %v1238_v58  ;;  %v6224_v14 = vsel %vm1212_vm1, %v1240_v59, %v1242_v60  ;;  %v1286_v56 = vrot.slane %v5798_v37, 1 }
  0x9f   : > { %1344 = vrot.lane.b32.xlu0 %v6160_v42, %s5467_s19  ;;  %v1290_v37 = vrot.slane %v5811_v10, 1  ;;  %v1294_v10 = vrot.slane %v5836_v5, 1 }
  0xa0   : > { %v6173_v47 = vpop.permute.xlu1 %1111 }
  0xa1   : > { %9507 = vst [vmem:[#allocation89_spill] sm:$0xff] %v6173_v47  ;;  %v6178_v36 = vpop.permute.xlu0 %1109  ;;  %v6199_v47 = vsel %vm1212_vm1, %v1238_v58, %v1240_v59  ;;  %v6240_v59 = vsel %vm1212_vm1, %v1244_v3, %v1246_v12 }
  0xa2   : > { %9508 = vst [vmem:[#allocation90_spill] sm:$0xff] %v6178_v36  ;;  %1350 = vrot.lane.b32.xlu1 %v6167_v9, %s5467_s19  ;;  %9517 = vst [vmem:[#allocation99_spill] sm:$0xff] %v6240_v59 }
  0xa3   : > { %1348 = vrot.lane.b32.xlu0 %v6176_v8, %s5467_s19 }
  0xa4   : > { %v6189_v16 = vpop.permute.xlu1 %1115 }
  0xa5   : > { %9509 = vst [vmem:[#allocation91_spill] sm:$0xff] %v6189_v16  ;;  %v6194_v63 = vpop.permute.xlu0 %1113  ;;  %v6215_v16 = vsel %vm1212_vm1, %v1242_v60, %v1244_v3  ;;  %v6256_v3 = vsel %vm1212_vm1, %v1248_v19, %v1250_v25 }
  0xa6   : > { %9510 = vst [vmem:[#allocation92_spill] sm:$0xff] %v6194_v63  ;;  %1354 = vrot.lane.b32.xlu1 %v6183_v44, %s5467_s19  ;;  %9521 = vst [vmem:[#allocation103_spill] sm:$0xff] %v6256_v3 }
  0xa7   : > { %1352 = vrot.lane.b32.xlu0 %v6192_v21, %s5467_s19 }
  0xa8   : > { %v6205_v36 = vpop.permute.xlu1 %1119 }
  0xa9   : > { %9511 = vst [vmem:[#allocation93_spill] sm:$0xff] %v6205_v36  ;;  %v6210_v45 = vpop.permute.xlu0 %1117  ;;  %v6231_v36 = vsel %vm1212_vm1, %v1246_v12, %v1248_v19  ;;  %v6272_v19 = vsel %vm1212_vm1, %v1252_v27, %v1254_v30 }
  0xaa   : > { %9512 = vst [vmem:[#allocation94_spill] sm:$0xff] %v6210_v45  ;;  %1358 = vrot.lane.b32.xlu1 %v6199_v47, %s5467_s19  ;;  %9515 = vst [vmem:[#allocation97_spill] sm:$0xff] %v6231_v36 }
  0xab   : > { %1356 = vrot.lane.b32.xlu0 %v6208_v18, %s5467_s19  ;;  %9525 = vst [vmem:[#allocation107_spill] sm:$0xff] %v6272_v19 }
  0xac   : > { %v6221_v63 = vpop.permute.xlu1 %1123 }
  0xad   : > { %9513 = vst [vmem:[#allocation95_spill] sm:$0xff] %v6221_v63  ;;  %v6226_v58 = vpop.permute.xlu0 %1121  ;;  %v6247_v63 = vsel %vm1212_vm1, %v1250_v25, %v1252_v27  ;;  %v6288_v27 = vsel %vm1212_vm1, %v1256_v43, %v1258_v46 }
  0xae   : > { %9514 = vst [vmem:[#allocation96_spill] sm:$0xff] %v6226_v58  ;;  %1362 = vrot.lane.b32.xlu1 %v6215_v16, %s5467_s19  ;;  %9519 = vst [vmem:[#allocation101_spill] sm:$0xff] %v6247_v63 }
  0xaf   : > { %1360 = vrot.lane.b32.xlu0 %v6224_v14, %s5467_s19  ;;  %9529 = vst [vmem:[#allocation111_spill] sm:$0xff] %v6288_v27 }
  0xb0   : > { %v6237_v45 = vpop.permute.xlu1 %1127 }
  0xb1   : > { %9516 = vst [vmem:[#allocation98_spill] sm:$0xff] %v6237_v45  ;;  %v6242_v60 = vpop.permute.xlu0 %1125  ;;  %v6263_v45 = vsel %vm1212_vm1, %v1254_v30, %v1256_v43  ;;  %v6304_v43 = vsel %vm1212_vm1, %v1260_v1, %v1262_v4 }
  0xb2   : > { %9518 = vst [vmem:[#allocation100_spill] sm:$0xff] %v6242_v60  ;;  %1366 = vrot.lane.b32.xlu1 %v6231_v36, %s5467_s19  ;;  %9523 = vst [vmem:[#allocation105_spill] sm:$0xff] %v6263_v45 }
  0xb3   : > { %1364 = vrot.lane.b32.xlu0 %v6240_v59, %s5467_s19  ;;  %9533 = vst [vmem:[#allocation115_spill] sm:$0xff] %v6304_v43 }
  0xb4   : > { %v6253_v58 = vpop.permute.xlu1 %1131 }
  0xb5   : > { %9520 = vst [vmem:[#allocation102_spill] sm:$0xff] %v6253_v58  ;;  %v6258_v12 = vpop.permute.xlu0 %1129  ;;  %v6279_v58 = vsel %vm1212_vm1, %v1258_v46, %v1260_v1  ;;  %v6320_v1 = vsel %vm1212_vm1, %v1264_v24, %v1266_v26 }
  0xb6   : > { %9522 = vst [vmem:[#allocation104_spill] sm:$0xff] %v6258_v12  ;;  %1370 = vrot.lane.b32.xlu1 %v6247_v63, %s5467_s19  ;;  %9527 = vst [vmem:[#allocation109_spill] sm:$0xff] %v6279_v58 }
  0xb7   : > { %1368 = vrot.lane.b32.xlu0 %v6256_v3, %s5467_s19  ;;  %9537 = vst [vmem:[#allocation119_spill] sm:$0xff] %v6320_v1 }
  0xb8   : > { %v6269_v60 = vpop.permute.xlu1 %1135 }
  0xb9   : > { %9524 = vst [vmem:[#allocation106_spill] sm:$0xff] %v6269_v60  ;;  %v6274_v25 = vpop.permute.xlu0 %1133  ;;  %v6295_v60 = vsel %vm1212_vm1, %v1262_v4, %v1264_v24  ;;  %v6336_v24 = vsel %vm1212_vm1, %v1268_v34, %v1270_v41 }
  0xba   : > { %9526 = vst [vmem:[#allocation108_spill] sm:$0xff] %v6274_v25  ;;  %1374 = vrot.lane.b32.xlu1 %v6263_v45, %s5467_s19  ;;  %9531 = vst [vmem:[#allocation113_spill] sm:$0xff] %v6295_v60 }
  0xbb   : > { %1372 = vrot.lane.b32.xlu0 %v6272_v19, %s5467_s19  ;;  %9541 = vst [vmem:[#allocation123_spill] sm:$0xff] %v6336_v24 }
  0xbc   : > { %v6285_v12 = vpop.permute.xlu1 %1139 }
  0xbd   : > { %9528 = vst [vmem:[#allocation110_spill] sm:$0xff] %v6285_v12  ;;  %v6290_v30 = vpop.permute.xlu0 %1137  ;;  %v6311_v12 = vsel %vm1212_vm1, %v1266_v26, %v1268_v34  ;;  %v6352_v34 = vsel %vm1212_vm1, %v1272_v54, %v1274_v61 }
  0xbe   : > { %9530 = vst [vmem:[#allocation112_spill] sm:$0xff] %v6290_v30  ;;  %1378 = vrot.lane.b32.xlu1 %v6279_v58, %s5467_s19  ;;  %9535 = vst [vmem:[#allocation117_spill] sm:$0xff] %v6311_v12 }
  0xbf   : > { %1376 = vrot.lane.b32.xlu0 %v6288_v27, %s5467_s19  ;;  %9545 = vst [vmem:[#allocation127_spill] sm:$0xff] %v6352_v34 }
  0xc0   : > { %v6301_v25 = vpop.permute.xlu1 %1143 }
  0xc1   : > { %9532 = vst [vmem:[#allocation114_spill] sm:$0xff] %v6301_v25  ;;  %v6306_v46 = vpop.permute.xlu0 %1141  ;;  %v6327_v25 = vsel %vm1212_vm1, %v1270_v41, %v1272_v54  ;;  %v6368_v54 = vsel %vm1212_vm1, %v1276_v33, %v1278_v13 }
  0xc2   : > { %9534 = vst [vmem:[#allocation116_spill] sm:$0xff] %v6306_v46  ;;  %1382 = vrot.lane.b32.xlu1 %v6295_v60, %s5467_s19  ;;  %9539 = vst [vmem:[#allocation121_spill] sm:$0xff] %v6327_v25 }
  0xc3   : > { %1380 = vrot.lane.b32.xlu0 %v6304_v43, %s5467_s19  ;;  %9549 = vst [vmem:[#allocation131_spill] sm:$0xff] %v6368_v54 }
  0xc4   : > { %v6317_v30 = vpop.permute.xlu1 %1147 }
  0xc5   : > { %9536 = vst [vmem:[#allocation118_spill] sm:$0xff] %v6317_v30  ;;  %v6322_v4 = vpop.permute.xlu0 %1145  ;;  %v6343_v30 = vsel %vm1212_vm1, %v1274_v61, %v1276_v33  ;;  %v6384_v33 = vsel %vm1212_vm1, %v1280_v62, %v1282_v0 }
  0xc6   : > { %9538 = vst [vmem:[#allocation120_spill] sm:$0xff] %v6322_v4  ;;  %1386 = vrot.lane.b32.xlu1 %v6311_v12, %s5467_s19  ;;  %9543 = vst [vmem:[#allocation125_spill] sm:$0xff] %v6343_v30  ;;  %v1324_v12 = vrot.slane %v5991_v51, 1 }
  0xc7   : > { %1384 = vrot.lane.b32.xlu0 %v6320_v1, %s5467_s19  ;;  %9553 = vst [vmem:[#allocation135_spill] sm:$0xff] %v6384_v33  ;;  %v1320_v1 = vrot.slane %v5972_v52, 1 }
  0xc8   : > { %v6333_v46 = vpop.permute.xlu1 %1151 }
  0xc9   : > { %9540 = vst [vmem:[#allocation122_spill] sm:$0xff] %v6333_v46  ;;  %v6338_v26 = vpop.permute.xlu0 %1149 }
  0xca   : > { %9542 = vst [vmem:[#allocation124_spill] sm:$0xff] %v6338_v26  ;;  %1390 = vrot.lane.b32.xlu1 %v6327_v25, %s5467_s19  ;;  %v6359_v26 = vsel %vm1212_vm1, %v1278_v13, %v1280_v62  ;;  %v6400_v62 = vsel %vm1212_vm1, %v1284_v35, %v1286_v56 }
  0xcb   : > { %1388 = vrot.lane.b32.xlu0 %v6336_v24, %s5467_s19  ;;  %9547 = vst [vmem:[#allocation129_spill] sm:$0xff] %v6359_v26  ;;  %9557 = vst [vmem:[#allocation139_spill] sm:$0xff] %v6400_v62  ;;  %v9587_v24 = vld [vmem:[#allocation56_spill] sm:$0xff] }
  0xcc   : > { %v6349_v4 = vpop.permute.xlu1 %1155  ;;  %v1316_v25 = vrot.slane %v9587_v24, 1 }
  0xcd   : > { %9544 = vst [vmem:[#allocation126_spill] sm:$0xff] %v6349_v4  ;;  %v6354_v41 = vpop.permute.xlu0 %1153 }
  0xce   : > { %9546 = vst [vmem:[#allocation128_spill] sm:$0xff] %v6354_v41  ;;  %1394 = vrot.lane.b32.xlu1 %v6343_v30, %s5467_s19  ;;  %v6375_v41 = vsel %vm1212_vm1, %v1282_v0, %v1284_v35  ;;  %v6416_v35 = vsel %vm1212_vm1, %v1288_v49, %v1290_v37 }
  0xcf   : > { %1392 = vrot.lane.b32.xlu0 %v6352_v34, %s5467_s19  ;;  %9551 = vst [vmem:[#allocation133_spill] sm:$0xff] %v6375_v41  ;;  %9561 = vst [vmem:[#allocation143_spill] sm:$0xff] %v6416_v35  ;;  %v9581_v34 = vld [vmem:[#allocation51_spill] sm:$0xff] }
  0xd0   : > { %v6365_v46 = vpop.permute.xlu1 %1159  ;;  %v1312_v30 = vrot.slane %v9581_v34, 1 }
  0xd1   : > { %9548 = vst [vmem:[#allocation130_spill] sm:$0xff] %v6365_v46  ;;  %v6370_v61 = vpop.permute.xlu0 %1157 }
  0xd2   : > { %9550 = vst [vmem:[#allocation132_spill] sm:$0xff] %v6370_v61  ;;  %1398 = vrot.lane.b32.xlu1 %v6359_v26, %s5467_s19  ;;  %v6391_v61 = vsel %vm1212_vm1, %v1286_v56, %v1288_v49  ;;  %v6432_v49 = vsel %vm1212_vm1, %v1292_v7, %v1294_v10 }
  0xd3   : > { %1396 = vrot.lane.b32.xlu0 %v6368_v54, %s5467_s19  ;;  %9555 = vst [vmem:[#allocation137_spill] sm:$0xff] %v6391_v61  ;;  %9565 = vst [vmem:[#allocation147_spill] sm:$0xff] %v6432_v49  ;;  %v9575_v54 = vld [vmem:[#allocation47_spill] sm:$0xff] }
  0xd4   : > { %v6381_v4 = vpop.permute.xlu1 %1163  ;;  %v1308_v26 = vrot.slane %v9575_v54, 1 }
  0xd5   : > { %9552 = vst [vmem:[#allocation134_spill] sm:$0xff] %v6381_v4  ;;  %v6386_v13 = vpop.permute.xlu0 %1161 }
  0xd6   : > { %9554 = vst [vmem:[#allocation136_spill] sm:$0xff] %v6386_v13  ;;  %1402 = vrot.lane.b32.xlu1 %v6375_v41, %s5467_s19  ;;  %v6407_v13 = vsel %vm1212_vm1, %v1290_v37, %v1292_v7 }
  0xd7   : > { %1400 = vrot.lane.b32.xlu0 %v6384_v33, %s5467_s19  ;;  %9559 = vst [vmem:[#allocation141_spill] sm:$0xff] %v6407_v13  ;;  %v9569_v33 = vld [vmem:[#allocation44_spill] sm:$0xff] }
  0xd8   : > { %v6397_v46 = vpop.permute.xlu1 %1167  ;;  %v1304_v41 = vrot.slane %v9569_v33, 1 }
  0xd9   : > { %9556 = vst [vmem:[#allocation138_spill] sm:$0xff] %v6397_v46  ;;  %v6402_v0 = vpop.permute.xlu0 %1165  ;;  %v1298_v46 = vrot.slane %v5858_v53, 1 }
  0xda   : > { %9558 = vst [vmem:[#allocation140_spill] sm:$0xff] %v6402_v0  ;;  %1406 = vrot.lane.b32.xlu1 %v6391_v61, %s5467_s19  ;;  %v6423_v0 = vsel %vm1212_vm1, %v1294_v10, %v1296_v17  ;;  %v1300_v61 = vrot.slane %v5871_v28, 1 }
  0xdb   : > { %1404 = vrot.lane.b32.xlu0 %v6400_v62, %s5467_s19  ;;  %9563 = vst [vmem:[#allocation145_spill] sm:$0xff] %v6423_v0  ;;  %v6448_v7 = vsel %vm1212_vm1, %v1296_v17, %v1298_v46 }
  0xdc   : > { %v6413_v4 = vpop.permute.xlu1 %1171  ;;  %9571 = vst [vmem:[#allocation44_spill] sm:$0xff] %v6448_v7 }
  0xdd   : > { %9560 = vst [vmem:[#allocation142_spill] sm:$0xff] %v6413_v4  ;;  %v6418_v56 = vpop.permute.xlu0 %1169  ;;  %v9568_v4 = vld [vmem:[#allocation40_spill] sm:$0xff] }
  0xde   : > { %9562 = vst [vmem:[#allocation144_spill] sm:$0xff] %v6418_v56  ;;  %1410 = vrot.lane.b32.xlu1 %v6407_v13, %s5467_s19  ;;  %v6439_v56 = vsel %vm1212_vm1, %v1298_v46, %v1300_v61  ;;  %v1302_v13 = vrot.slane %v9568_v4, 1 }
  0xdf   : > { %1408 = vrot.lane.b32.xlu0 %v6416_v35, %s5467_s19  ;;  %9567 = vst [vmem:[#allocation149_spill] sm:$0xff] %v6439_v56 }
  0xe0   : > { %v6429_v62 = vpop.permute.xlu1 %1175  ;;  %v6464_v46 = vsel %vm1212_vm1, %v1300_v61, %v1302_v13 }
  0xe1   : > { %9564 = vst [vmem:[#allocation146_spill] sm:$0xff] %v6429_v62  ;;  %v6434_v37 = vpop.permute.xlu0 %1173  ;;  %v9574_v62 = vld [vmem:[#allocation43_spill] sm:$0xff]  ;;  %9577 = vst [vmem:[#allocation47_spill] sm:$0xff] %v6464_v46 }
  0xe2   : > { %9566 = vst [vmem:[#allocation148_spill] sm:$0xff] %v6434_v37  ;;  %1414 = vrot.lane.b32.xlu1 %v6423_v0, %s5467_s19  ;;  %v6455_v37 = vsel %vm1212_vm1, %v1302_v13, %v1304_v41  ;;  %v1306_v0 = vrot.slane %v9574_v62, 1 }
  0xe3   : > { %1412 = vrot.lane.b32.xlu0 %v6432_v49, %s5467_s19  ;;  %9573 = vst [vmem:[#allocation151_spill] sm:$0xff] %v6455_v37 }
  0xe4   : > { %v6445_v35 = vpop.permute.xlu1 %1179  ;;  %v6480_v61 = vsel %vm1212_vm1, %v1304_v41, %v1306_v0 }
  0xe5   : > { %9570 = vst [vmem:[#allocation40_spill] sm:$0xff] %v6445_v35  ;;  %v6450_v10 = vpop.permute.xlu0 %1177  ;;  %v9580_v35 = vld [vmem:[#allocation48_spill] sm:$0xff]  ;;  %9583 = vst [vmem:[#allocation51_spill] sm:$0xff] %v6480_v61 }
  0xe6   : > { %9572 = vst [vmem:[#allocation150_spill] sm:$0xff] %v6450_v10  ;;  %1418 = vrot.lane.b32.xlu1 %v6439_v56, %s5467_s19  ;;  %v6471_v10 = vsel %vm1212_vm1, %v1306_v0, %v1308_v26  ;;  %v1310_v56 = vrot.slane %v9580_v35, 1 }
  0xe7   : > { %1416 = vrot.lane.b32.xlu0 %v6448_v7, %s5467_s19  ;;  %9579 = vst [vmem:[#allocation153_spill] sm:$0xff] %v6471_v10 }
  0xe8   : > { %v6461_v49 = vpop.permute.xlu1 %1183  ;;  %v6496_v41 = vsel %vm1212_vm1, %v1308_v26, %v1310_v56 }
  0xe9   : > { %9576 = vst [vmem:[#allocation43_spill] sm:$0xff] %v6461_v49  ;;  %v6466_v17 = vpop.permute.xlu0 %1181  ;;  %v9586_v49 = vld [vmem:[#allocation52_spill] sm:$0xff]  ;;  %9589 = vst [vmem:[#allocation56_spill] sm:$0xff] %v6496_v41 }
  0xea   : > { %9578 = vst [vmem:[#allocation152_spill] sm:$0xff] %v6466_v17  ;;  %1422 = vrot.lane.b32.xlu1 %v6455_v37, %s5467_s19  ;;  %v6487_v17 = vsel %vm1212_vm1, %v1310_v56, %v1312_v30  ;;  %v1314_v37 = vrot.slane %v9586_v49, 1 }
  0xeb   : > { %1420 = vrot.lane.b32.xlu0 %v6464_v46, %s5467_s19  ;;  %9585 = vst [vmem:[#allocation155_spill] sm:$0xff] %v6487_v17 }
  0xec   : > { %v6477_v7 = vpop.permute.xlu1 %1187  ;;  %v6512_v26 = vsel %vm1212_vm1, %v1312_v30, %v1314_v37 }
  0xed   : > { %9582 = vst [vmem:[#allocation48_spill] sm:$0xff] %v6477_v7  ;;  %v6482_v13 = vpop.permute.xlu0 %1185  ;;  %v9592_v7 = vld [vmem:[#allocation54_spill] sm:$0xff]  ;;  %9594 = vst [vmem:[#allocation158_spill] sm:$0xff] %v6512_v26 }
  0xee   : > { %9584 = vst [vmem:[#allocation154_spill] sm:$0xff] %v6482_v13  ;;  %1426 = vrot.lane.b32.xlu1 %v6471_v10, %s5467_s19  ;;  %v6503_v13 = vsel %vm1212_vm1, %v1314_v37, %v1316_v25  ;;  %v1318_v10 = vrot.slane %v9592_v7, 1 }
  0xef   : > { %1424 = vrot.lane.b32.xlu0 %v6480_v61, %s5467_s19  ;;  %9591 = vst [vmem:[#allocation157_spill] sm:$0xff] %v6503_v13 }
  0xf0   : > { %v6493_v46 = vpop.permute.xlu1 %1191  ;;  %v6528_v30 = vsel %vm1212_vm1, %v1316_v25, %v1318_v10 }
  0xf1   : > { %9588 = vst [vmem:[#allocation52_spill] sm:$0xff] %v6493_v46  ;;  %v6498_v0 = vpop.permute.xlu0 %1189  ;;  %v9597_v46 = vld [vmem:[#allocation59_spill] sm:$0xff]  ;;  %9599 = vst [vmem:[#allocation161_spill] sm:$0xff] %v6528_v30 }
  0xf2   : > { %9590 = vst [vmem:[#allocation156_spill] sm:$0xff] %v6498_v0  ;;  %1430 = vrot.lane.b32.xlu1 %v6487_v17, %s5467_s19  ;;  %v6519_v0 = vsel %vm1212_vm1, %v1318_v10, %v1320_v1  ;;  %v1322_v17 = vrot.slane %v9597_v46, 1 }
  0xf3   : > { %1428 = vrot.lane.b32.xlu0 %v6496_v41, %s5467_s19  ;;  %9596 = vst [vmem:[#allocation160_spill] sm:$0xff] %v6519_v0 }
  0xf4   : > { %v6509_v61 = vpop.permute.xlu1 %1195  ;;  %v6544_v25 = vsel %vm1212_vm1, %v1320_v1, %v1322_v17 }
  0xf5   : > { %9593 = vst [vmem:[#allocation54_spill] sm:$0xff] %v6509_v61  ;;  %v6514_v56 = vpop.permute.xlu0 %1193  ;;  %v1326_v61 = vrot.slane %v5998_v31, 1  ;;  %9603 = vst [vmem:[#allocation165_spill] sm:$0xff] %v6544_v25 }
  0xf6   : > { %9595 = vst [vmem:[#allocation159_spill] sm:$0xff] %v6514_v56  ;;  %1434 = vrot.lane.b32.xlu1 %v6503_v13, %s5467_s19  ;;  %v6535_v56 = vsel %vm1212_vm1, %v1322_v17, %v1324_v12  ;;  %v1328_v13 = vrot.slane %v6011_v23, 1 }
  0xf7   : > { %1432 = vrot.lane.b32.xlu0 %v6512_v26, %s5467_s19  ;;  %9601 = vst [vmem:[#allocation163_spill] sm:$0xff] %v6535_v56 }
  0xf8   : > { %v6525_v41 = vpop.permute.xlu1 %1199 }
  0xf9   : > { %9598 = vst [vmem:[#allocation59_spill] sm:$0xff] %v6525_v41  ;;  %v6530_v37 = vpop.permute.xlu0 %1197 }
  0xfa   : > { %9600 = vst [vmem:[#allocation162_spill] sm:$0xff] %v6530_v37  ;;  %1438 = vrot.lane.b32.xlu1 %v6519_v0, %s5467_s19  ;;  %v6551_v37 = vsel %vm1212_vm1, %v1326_v61, %v1328_v13 }
  0xfb   : > { %1436 = vrot.lane.b32.xlu0 %v6528_v30, %s5467_s19  ;;  %9605 = vst [vmem:[#allocation167_spill] sm:$0xff] %v6551_v37  ;;  %v6558_v30 = vsel %vm1212_vm1, %v1324_v12, %v1326_v61 }
  0xfc   : > { %v6541_v26 = vpop.permute.xlu1 %1203  ;;  %9607 = vst [vmem:[#allocation169_spill] sm:$0xff] %v6558_v30 }
  0xfd   : > { %9602 = vst [vmem:[#allocation164_spill] sm:$0xff] %v6541_v26  ;;  %v6546_v10 = vpop.permute.xlu0 %1201  ;;  %v6561_v26 = vrot.slane %v6030_v48, 1 }
  0xfe   : > { %9604 = vst [vmem:[#allocation166_spill] sm:$0xff] %v6546_v10  ;;  %1442 = vrot.lane.b32.xlu1 %v6535_v56, %s5467_s19 }
  0xff   : > { %1440 = vrot.lane.b32.xlu0 %v6544_v25, %s5467_s19  ;;  %9608 = vst [vmem:[#allocation170_spill] sm:$0xff] %v6561_v26  ;;  %v6573_v10 = vsel %vm1212_vm1, %v1328_v13, %v6561_v26  ;;  %v6634_v25 = vld [vmem:[%s5509_s17 + $0x60] sm:$0xff]  }
 0x100   : > { %v6555_v41 = vpop.permute.xlu1 %1207  ;;  %9611 = vst [vmem:[#allocation173_spill] sm:$0xff] %v6573_v10 }
 0x101   : > { %9606 = vst [vmem:[#allocation168_spill] sm:$0xff] %v6555_v41  ;;  %v6563_v1 = vpop.permute.xlu0 %1205 }
 0x102   : > { %9609 = vst [vmem:[#allocation171_spill] sm:$0xff] %v6563_v1  ;;  %1446 = vrot.lane.b32.xlu1 %v6551_v37, %s5467_s19 }
 0x103   : > { %1444 = vrot.lane.b32.xlu0 %v6558_v30, %s5467_s19 }
 0x104   : > { %v6569_v17 = vpop.permute.xlu1 %1334 }
 0x105   : > { %9610 = vst [vmem:[#allocation172_spill] sm:$0xff] %v6569_v17  ;;  %v6575_v41 = vpop.permute.xlu0 %1332  ;;  %v9768_v17 = vld [vmem:[#allocation60_spill] sm:$0xff] }
 0x106   : > { %9612 = vst [vmem:[#allocation174_spill] sm:$0xff] %v6575_v41  ;;  %1450 = vrot.lane.b32.xlu1 %v6561_v26, %s5467_s19  ;;  %v9767_v41 = vld [vmem:[#allocation58_spill] sm:$0xff] }
 0x107   : > { %1448 = vrot.lane.b32.xlu0 %v6573_v10, %s5467_s19 }
 0x108   : > { %v6581_v12 = vpop.permute.xlu1 %1338 }
 0x109   : > { %9613 = vst [vmem:[#allocation175_spill] sm:$0xff] %v6581_v12  ;;  %v6583_v61 = vpop.permute.xlu0 %1336  ;;  %v6763_v12 = vld [vmem:[%s5509_s17 + $0x138] sm:$0xff]  }
 0x10a   : > { %9614 = vst [vmem:[#allocation176_spill] sm:$0xff] %v6583_v61  ;;  %1464 = vrot.lane.b32.xlu1 %v6084_v32, %s5468_s20 }
 0x10b   : > { %1462 = vrot.lane.b32.xlu0 %v5513_v2, %s5468_s20 }
 0x10c   : > { %v6589_v13 = vpop.permute.xlu1 %1342 }
 0x10d   : > { %9615 = vst [vmem:[#allocation177_spill] sm:$0xff] %v6589_v13  ;;  %v6591_v1 = vpop.permute.xlu0 %1340  ;;  %v6735_v13 = vld [vmem:[%s5509_s17 + $0x118] sm:$0xff]  }
 0x10e   : > { %9616 = vst [vmem:[#allocation178_spill] sm:$0xff] %v6591_v1  ;;  %1468 = vrot.lane.b32.xlu1 %v6103_v11, %s5468_s20 }
 0x10f   : > { %1466 = vrot.lane.b32.xlu0 %v5528_v20, %s5468_s20 }
 0x110   : > { %v6597_v10 = vpop.permute.xlu1 %1346 }
 0x111   : > { %9617 = vst [vmem:[#allocation179_spill] sm:$0xff] %v6597_v10  ;;  %v6599_v26 = vpop.permute.xlu0 %1344 }
 0x112   : > { %9618 = vst [vmem:[#allocation180_spill] sm:$0xff] %v6599_v26  ;;  %1472 = vrot.lane.b32.xlu1 %v6126_v6, %s5468_s20  ;;  %v6618_v6 = vld [vmem:[%s5509_s17 + $0x58] sm:$0xff]   ;;  %v5358_v26 = vld [vmem:[%s5509_s17 + $0x90] sm:$0xff]  }
 0x113   : > { %1470 = vrot.lane.b32.xlu0 %v6109_v50, %s5468_s20 }
 0x114   : > { %v6605_v32 = vpop.permute.xlu1 %1350 }
 0x115   : > { %9619 = vst [vmem:[#allocation181_spill] sm:$0xff] %v6605_v32  ;;  %v6607_v30 = vpop.permute.xlu0 %1348  ;;  %v5357_v32 = vld [vmem:[%s5509_s17 + $0x98] sm:$0xff]  }
 0x116   : > { %9620 = vst [vmem:[#allocation182_spill] sm:$0xff] %v6607_v30  ;;  %1476 = vrot.lane.b32.xlu1 %v6148_v15, %s5468_s20 }
 0x117   : > { %1474 = vrot.lane.b32.xlu0 %v6130_v57, %s5468_s20  ;;  %v6629_v57 = vld [vmem:[%s5509_s17 + $0x68] sm:$0xff]  }
 0x118   : > { %v6613_v11 = vpop.permute.xlu1 %1354 }
 0x119   : > { %9621 = vst [vmem:[#allocation183_spill] sm:$0xff] %v6613_v11  ;;  %v6615_v37 = vpop.permute.xlu0 %1352 }
 0x11a   : > { %9622 = vst [vmem:[#allocation184_spill] sm:$0xff] %v6615_v37  ;;  %1480 = vrot.lane.b32.xlu1 %v6618_v6, %s5468_s20 }
 0x11b   : > { %1478 = vrot.lane.b32.xlu0 %v6152_v40, %s5468_s20 }
 0x11c   : > { %v6624_v50 = vpop.permute.xlu1 %1358 }
 0x11d   : > { %9623 = vst [vmem:[#allocation185_spill] sm:$0xff] %v6624_v50  ;;  %v6626_v15 = vpop.permute.xlu0 %1356  ;;  %v6643_v50 = vld [vmem:[%s5509_s17 + $0x78] sm:$0xff]  }
 0x11e   : > { %9624 = vst [vmem:[#allocation186_spill] sm:$0xff] %v6626_v15  ;;  %1484 = vrot.lane.b32.xlu1 %v6629_v57, %s5468_s20  ;;  %9627 = vst [vmem:[#allocation189_spill] sm:$0xff] %v6643_v50  ;;  %v6648_v15 = vld [vmem:[%s5509_s17 + $0x70] sm:$0xff]  }
 0x11f   : > { %1482 = vrot.lane.b32.xlu0 %v6634_v25, %s5468_s20  ;;  %9628 = vst [vmem:[#allocation190_spill] sm:$0xff] %v6648_v15 }
 0x120   : > { %v6638_v56 = vpop.permute.xlu1 %1362 }
 0x121   : > { %9625 = vst [vmem:[#allocation187_spill] sm:$0xff] %v6638_v56  ;;  %v6640_v40 = vpop.permute.xlu0 %1360  ;;  %v5355_v56 = vld [vmem:[%s5509_s17 + $0x88] sm:$0xff]  }
 0x122   : > { %9626 = vst [vmem:[#allocation188_spill] sm:$0xff] %v6640_v40  ;;  %1488 = vrot.lane.b32.xlu1 %v6643_v50, %s5468_s20  ;;  %v5356_v40 = vld [vmem:[%s5509_s17 + $0x80] sm:$0xff]   ;;  %v9760_v50 = vld [vmem:[#allocation53_spill] sm:$0xff] }
 0x123   : > { %1486 = vrot.lane.b32.xlu0 %v6648_v15, %s5468_s20 }
 0x124   : > { %v6652_v0 = vpop.permute.xlu1 %1366 }
 0x125   : > { %9629 = vst [vmem:[#allocation191_spill] sm:$0xff] %v6652_v0  ;;  %v6654_v11 = vpop.permute.xlu0 %1364 }
 0x126   : > { %9630 = vst [vmem:[#allocation192_spill] sm:$0xff] %v6654_v11  ;;  %1492 = vrot.lane.b32.xlu1 %v5355_v56, %s5468_s20  ;;  %v5359_v11 = vld [vmem:[%s5509_s17 + $0xa8] sm:$0xff]  }
 0x127   : > { %1490 = vrot.lane.b32.xlu0 %v5356_v40, %s5468_s20  ;;  %v5360_v40 = vld [vmem:[%s5509_s17 + $0xa0] sm:$0xff]  }
 0x128   : > { %v6660_v37 = vpop.permute.xlu1 %1370 }
 0x129   : > { %9631 = vst [vmem:[#allocation193_spill] sm:$0xff] %v6660_v37  ;;  %v6662_v30 = vpop.permute.xlu0 %1368 }
 0x12a   : > { %9632 = vst [vmem:[#allocation194_spill] sm:$0xff] %v6662_v30  ;;  %1496 = vrot.lane.b32.xlu1 %v5357_v32, %s5468_s20  ;;  %v5361_v30 = vld [vmem:[%s5509_s17 + $0xb8] sm:$0xff]  }
 0x12b   : > { %1494 = vrot.lane.b32.xlu0 %v5358_v26, %s5468_s20  ;;  %v5362_v26 = vld [vmem:[%s5509_s17 + $0xb0] sm:$0xff]  }
 0x12c   : > { %v6668_v0 = vpop.permute.xlu1 %1374 }
 0x12d   : > { %9633 = vst [vmem:[#allocation195_spill] sm:$0xff] %v6668_v0  ;;  %v6670_v56 = vpop.permute.xlu0 %1372 }
 0x12e   : > { %9634 = vst [vmem:[#allocation196_spill] sm:$0xff] %v6670_v56  ;;  %1500 = vrot.lane.b32.xlu1 %v5359_v11, %s5468_s20  ;;  %v5363_v56 = vld [vmem:[%s5509_s17 + $0xc8] sm:$0xff]  }
 0x12f   : > { %1498 = vrot.lane.b32.xlu0 %v5360_v40, %s5468_s20  ;;  %v5364_v40 = vld [vmem:[%s5509_s17 + $0xc0] sm:$0xff]  }
 0x130   : > { %v6676_v37 = vpop.permute.xlu1 %1378 }
 0x131   : > { %9635 = vst [vmem:[#allocation197_spill] sm:$0xff] %v6676_v37  ;;  %v6678_v32 = vpop.permute.xlu0 %1376 }
 0x132   : > { %9636 = vst [vmem:[#allocation198_spill] sm:$0xff] %v6678_v32  ;;  %1504 = vrot.lane.b32.xlu1 %v5361_v30, %s5468_s20  ;;  %v5365_v32 = vld [vmem:[%s5509_s17 + $0xd8] sm:$0xff]  }
 0x133   : > { %1502 = vrot.lane.b32.xlu0 %v5362_v26, %s5468_s20  ;;  %v5366_v26 = vld [vmem:[%s5509_s17 + $0xd0] sm:$0xff]  }
 0x134   : > { %v6684_v0 = vpop.permute.xlu1 %1382 }
 0x135   : > { %9637 = vst [vmem:[#allocation199_spill] sm:$0xff] %v6684_v0  ;;  %v6686_v11 = vpop.permute.xlu0 %1380 }
 0x136   : > { %9638 = vst [vmem:[#allocation200_spill] sm:$0xff] %v6686_v11  ;;  %1508 = vrot.lane.b32.xlu1 %v5363_v56, %s5468_s20  ;;  %v5367_v11 = vld [vmem:[%s5509_s17 + $0xe8] sm:$0xff]  }
 0x137   : > { %1506 = vrot.lane.b32.xlu0 %v5364_v40, %s5468_s20  ;;  %v5368_v40 = vld [vmem:[%s5509_s17 + $0xe0] sm:$0xff]  }
 0x138   : > { %v6692_v37 = vpop.permute.xlu1 %1386 }
 0x139   : > { %9639 = vst [vmem:[#allocation201_spill] sm:$0xff] %v6692_v37  ;;  %v6694_v30 = vpop.permute.xlu0 %1384 }
 0x13a   : > { %9640 = vst [vmem:[#allocation202_spill] sm:$0xff] %v6694_v30  ;;  %1512 = vrot.lane.b32.xlu1 %v5365_v32, %s5468_s20  ;;  %v6713_v30 = vld [vmem:[%s5509_s17 + $0xf8] sm:$0xff]  }
 0x13b   : > { %1510 = vrot.lane.b32.xlu0 %v5366_v26, %s5468_s20  ;;  %9645 = vst [vmem:[#allocation207_spill] sm:$0xff] %v6713_v30  ;;  %v6718_v26 = vld [vmem:[%s5509_s17 + $0xf0] sm:$0xff]  }
 0x13c   : > { %v6700_v0 = vpop.permute.xlu1 %1390  ;;  %9646 = vst [vmem:[#allocation208_spill] sm:$0xff] %v6718_v26 }
 0x13d   : > { %9641 = vst [vmem:[#allocation203_spill] sm:$0xff] %v6700_v0  ;;  %v6702_v56 = vpop.permute.xlu0 %1388  ;;  %v5371_v0 = vld [vmem:[%s5509_s17 + $0x108] sm:$0xff]  }
 0x13e   : > { %9642 = vst [vmem:[#allocation204_spill] sm:$0xff] %v6702_v56  ;;  %1516 = vrot.lane.b32.xlu1 %v5367_v11, %s5468_s20  ;;  %v5372_v56 = vld [vmem:[%s5509_s17 + $0x100] sm:$0xff]  }
 0x13f   : > { %1514 = vrot.lane.b32.xlu0 %v5368_v40, %s5468_s20 }
 0x140   : > { %v6708_v37 = vpop.permute.xlu1 %1394 }
 0x141   : > { %9643 = vst [vmem:[#allocation205_spill] sm:$0xff] %v6708_v37  ;;  %v6710_v32 = vpop.permute.xlu0 %1392  ;;  %v9712_v37 = vld [vmem:[#allocation22_spill] sm:$0xff] }
 0x142   : > { %9644 = vst [vmem:[#allocation206_spill] sm:$0xff] %v6710_v32  ;;  %1520 = vrot.lane.b32.xlu1 %v6713_v30, %s5468_s20  ;;  %v9752_v30 = vld [vmem:[#allocation45_spill] sm:$0xff] }
 0x143   : > { %1518 = vrot.lane.b32.xlu0 %v6718_v26, %s5468_s20 }
 0x144   : > { %v6722_v11 = vpop.permute.xlu1 %1398 }
 0x145   : > { %9647 = vst [vmem:[#allocation209_spill] sm:$0xff] %v6722_v11  ;;  %v6724_v40 = vpop.permute.xlu0 %1396  ;;  %v6740_v11 = vld [vmem:[%s5509_s17 + $0x110] sm:$0xff]  }
 0x146   : > { %9648 = vst [vmem:[#allocation210_spill] sm:$0xff] %v6724_v40  ;;  %1524 = vrot.lane.b32.xlu1 %v5371_v0, %s5468_s20 }
 0x147   : > { %1522 = vrot.lane.b32.xlu0 %v5372_v56, %s5468_s20  ;;  %v6749_v56 = vld [vmem:[%s5509_s17 + $0x128] sm:$0xff]  }
 0x148   : > { %v6730_v10 = vpop.permute.xlu1 %1402 }
 0x149   : > { %9649 = vst [vmem:[#allocation211_spill] sm:$0xff] %v6730_v10  ;;  %v6732_v1 = vpop.permute.xlu0 %1400 }
 0x14a   : > { %9650 = vst [vmem:[#allocation212_spill] sm:$0xff] %v6732_v1  ;;  %1528 = vrot.lane.b32.xlu1 %v6735_v13, %s5468_s20  ;;  %v6754_v1 = vld [vmem:[%s5509_s17 + $0x120] sm:$0xff]  }
 0x14b   : > { %1526 = vrot.lane.b32.xlu0 %v6740_v11, %s5468_s20 }
 0x14c   : > { %v6744_v0 = vpop.permute.xlu1 %1406 }
 0x14d   : > { %9651 = vst [vmem:[#allocation213_spill] sm:$0xff] %v6744_v0  ;;  %v6746_v40 = vpop.permute.xlu0 %1404 }
 0x14e   : > { %9652 = vst [vmem:[#allocation214_spill] sm:$0xff] %v6746_v40  ;;  %1532 = vrot.lane.b32.xlu1 %v6749_v56, %s5468_s20  ;;  %v6768_v40 = vld [vmem:[%s5509_s17 + $0x130] sm:$0xff]  }
 0x14f   : > { %1530 = vrot.lane.b32.xlu0 %v6754_v1, %s5468_s20 }
 0x150   : > { %v6758_v10 = vpop.permute.xlu1 %1410 }
 0x151   : > { %9653 = vst [vmem:[#allocation215_spill] sm:$0xff] %v6758_v10  ;;  %v6760_v61 = vpop.permute.xlu0 %1408  ;;  %v6779_v10 = vld [vmem:[%s5509_s17 + $0x140] sm:$0xff]  }
 0x152   : > { %9654 = vst [vmem:[#allocation216_spill] sm:$0xff] %v6760_v61  ;;  %1536 = vrot.lane.b32.xlu1 %v6763_v12, %s5468_s20 }
 0x153   : > { %1534 = vrot.lane.b32.xlu0 %v6768_v40, %s5468_s20 }
 0x154   : > { %v6772_v0 = vpop.permute.xlu1 %1414 }
 0x155   : > { %9655 = vst [vmem:[#allocation217_spill] sm:$0xff] %v6772_v0  ;;  %v6774_v2 = vpop.permute.xlu0 %1412 }
 0x156   : > { %9656 = vst [vmem:[#allocation218_spill] sm:$0xff] %v6774_v2  ;;  %1540 = vrot.lane.b32.xlu1 %v5836_v5, %s5468_s20 }
 0x157   : > { %1538 = vrot.lane.b32.xlu0 %v6779_v10, %s5468_s20 }
 0x158   : > { %v6783_v61 = vpop.permute.xlu1 %1418 }
 0x159   : > { %9657 = vst [vmem:[#allocation219_spill] sm:$0xff] %v6783_v61  ;;  %v6785_v32 = vpop.permute.xlu0 %1416 }
 0x15a   : > { %9658 = vst [vmem:[#allocation220_spill] sm:$0xff] %v6785_v32  ;;  %1544 = vrot.lane.b32.xlu1 %v5858_v53, %s5468_s20 }
 0x15b   : > { %1542 = vrot.lane.b32.xlu0 %v5851_v55, %s5468_s20 }
 0x15c   : > { %v6791_v0 = vpop.permute.xlu1 %1422 }
 0x15d   : > { %9659 = vst [vmem:[#allocation221_spill] sm:$0xff] %v6791_v0  ;;  %v6793_v2 = vpop.permute.xlu0 %1420  ;;  %v9696_v0 = vld [vmem:[#allocation14_spill] sm:$0xff] }
 0x15e   : > { %9660 = vst [vmem:[#allocation222_spill] sm:$0xff] %v6793_v2  ;;  %1548 = vrot.lane.b32.xlu1 %v9568_v4, %s5468_s20  ;;  %v9695_v2 = vld [vmem:[#allocation13_spill] sm:$0xff] }
 0x15f   : > { %1546 = vrot.lane.b32.xlu0 %v5871_v28, %s5468_s20 }
 0x160   : > { %v6799_v5 = vpop.permute.xlu1 %1426 }
 0x161   : > { %9661 = vst [vmem:[#allocation223_spill] sm:$0xff] %v6799_v5  ;;  %v6801_v61 = vpop.permute.xlu0 %1424 }
 0x162   : > { %9662 = vst [vmem:[#allocation224_spill] sm:$0xff] %v6801_v61  ;;  %1552 = vrot.lane.b32.xlu1 %v9574_v62, %s5468_s20  ;;  %v9692_v61 = vld [vmem:[#allocation12_spill] sm:$0xff] }
 0x163   : > { %1550 = vrot.lane.b32.xlu0 %v9569_v33, %s5468_s20 }
 0x164   : > { %v6807_v55 = vpop.permute.xlu1 %1430 }
 0x165   : > { %9663 = vst [vmem:[#allocation225_spill] sm:$0xff] %v6807_v55  ;;  %v6809_v53 = vpop.permute.xlu0 %1428  ;;  %v9691_v55 = vld [vmem:[#allocation11_spill] sm:$0xff] }
 0x166   : > { %9664 = vst [vmem:[#allocation226_spill] sm:$0xff] %v6809_v53  ;;  %1556 = vrot.lane.b32.xlu1 %v9580_v35, %s5468_s20 }
 0x167   : > { %1554 = vrot.lane.b32.xlu0 %v9575_v54, %s5468_s20 }
 0x168   : > { %v6815_v28 = vpop.permute.xlu1 %1434 }
 0x169   : > { %9665 = vst [vmem:[#allocation227_spill] sm:$0xff] %v6815_v28  ;;  %v6817_v4 = vpop.permute.xlu0 %1432  ;;  %v9687_v28 = vld [vmem:[#allocation9_spill] sm:$0xff] }
 0x16a   : > { %9666 = vst [vmem:[#allocation228_spill] sm:$0xff] %v6817_v4  ;;  %1560 = vrot.lane.b32.xlu1 %v9586_v49, %s5468_s20 }
 0x16b   : > { %1558 = vrot.lane.b32.xlu0 %v9581_v34, %s5468_s20 }
 0x16c   : > { %v6823_v33 = vpop.permute.xlu1 %1438 }
 0x16d   : > { %9667 = vst [vmem:[#allocation229_spill] sm:$0xff] %v6823_v33  ;;  %v6825_v62 = vpop.permute.xlu0 %1436 }
 0x16e   : > { %9668 = vst [vmem:[#allocation230_spill] sm:$0xff] %v6825_v62  ;;  %1564 = vrot.lane.b32.xlu1 %v9592_v7, %s5468_s20  ;;  %v6846_v7 = vld [vmem:[%s5509_s17 + $0x1e8] sm:$0xf] }
 0x16f   : > { %1562 = vrot.lane.b32.xlu0 %v9587_v24, %s5468_s20  ;;  %v297_v24 = vld [vmem:[%s5509_s17 + $0x1ec] sm:$0x7] }
 0x170   : > { %v6831_v54 = vpop.permute.xlu1 %1442  ;;  %v9684_v62 = vld [vmem:[#allocation8_spill] sm:$0xff] }
 0x171   : > { %9669 = vst [vmem:[#allocation231_spill] sm:$0xff] %v6831_v54  ;;  %v6833_v35 = vpop.permute.xlu0 %1440 }
 0x172   : > { %9670 = vst [vmem:[#allocation232_spill] sm:$0xff] %v6833_v35  ;;  %1568 = vrot.lane.b32.xlu1 %v9597_v46, %s5468_s20 }
 0x173   : > { %1566 = vrot.lane.b32.xlu0 %v5972_v52, %s5468_s20  ;;  %v4928_v52 = vcombine.low %v6846_v7, %v297_v24  ;;  %v9679_v24 = vld [vmem:[#allocation6_spill] sm:$0xff] }
 0x174   : > { %v6839_v34 = vpop.permute.xlu1 %1446 }
 0x175   : > { %9671 = vst [vmem:[#allocation233_spill] sm:$0xff] %v6839_v34  ;;  %v6841_v49 = vpop.permute.xlu0 %1444 }
 0x176   : > { %9672 = vst [vmem:[#allocation234_spill] sm:$0xff] %v6841_v49  ;;  %1572 = vrot.lane.b32.xlu1 %v5998_v31, %s5468_s20  ;;  %v6863_v31 = vld [vmem:[%s5509_s17 + $0x1e0] sm:$0xff]  }
 0x177   : > { %1570 = vrot.lane.b32.xlu0 %v5991_v51, %s5468_s20 }
 0x178   : > { %v6851_v35 = vpop.permute.xlu1 %1450 }
 0x179   : > { %9673 = vst [vmem:[#allocation235_spill] sm:$0xff] %v6851_v35  ;;  %v6853_v54 = vpop.permute.xlu0 %1448 }
 0x17a   : > { %9674 = vst [vmem:[#allocation236_spill] sm:$0xff] %v6853_v54  ;;  %1576 = vrot.lane.b32.xlu1 %v6030_v48, %s5468_s20 }
 0x17b   : > { %1574 = vrot.lane.b32.xlu0 %v6011_v23, %s5468_s20  ;;  %v9680_v23 = vld [vmem:[#allocation5_spill] sm:$0xff] }
 0x17c   : > { %v6860_v46 = vpop.permute.xlu1 %1464 }
 0x17d   : > { %9675 = vst [vmem:[#allocation237_spill] sm:$0xff] %v6860_v46  ;;  %v6865_v49 = vpop.permute.xlu0 %1462  ;;  %v9764_v46 = vld [vmem:[#allocation57_spill] sm:$0xff] }
 0x17e   : > { %9676 = vst [vmem:[#allocation238_spill] sm:$0xff] %v6865_v49  ;;  %1580 = vrot.lane.b32.xlu1 %v4928_v52, %s5468_s20  ;;  %v9683_v52 = vld [vmem:[#allocation7_spill] sm:$0xff] }
 0x17f   : > { %1578 = vrot.lane.b32.xlu0 %v6863_v31, %s5468_s20  ;;  %v9763_v49 = vld [vmem:[#allocation55_spill] sm:$0xff] }
 0x180   : > { %v6870_v51 = vpop.permute.xlu1 %1468 }
 0x181   : > { %9677 = vst [vmem:[#allocation239_spill] sm:$0xff] %v6870_v51  ;;  %v6872_v54 = vpop.permute.xlu0 %1466 }
 0x182   : > { %9678 = vst [vmem:[#allocation240_spill] sm:$0xff] %v6872_v54  ;;  %1603 = vrot.lane.b32.xlu1 %v9679_v24, %s5469_s21  ;;  %v9688_v24 = vld [vmem:[#allocation10_spill] sm:$0xff]  ;;  %v9708_v54 = vld [vmem:[#allocation20_spill] sm:$0xff] }
 0x183   : > { %1601 = vrot.lane.b32.xlu0 %v9680_v23, %s5469_s21 }
 0x184   : > { %v6878_v35 = vpop.permute.xlu1 %1472 }
 0x185   : > { %9681 = vst [vmem:[#allocation6_spill] sm:$0xff] %v6878_v35  ;;  %v6880_v34 = vpop.permute.xlu0 %1470 }
 0x186   : > { %9682 = vst [vmem:[#allocation5_spill] sm:$0xff] %v6880_v34  ;;  %1607 = vrot.lane.b32.xlu1 %v9683_v52, %s5469_s21  ;;  %v9704_v34 = vld [vmem:[#allocation18_spill] sm:$0xff] }
 0x187   : > { %1605 = vrot.lane.b32.xlu0 %v9684_v62, %s5469_s21 }
 0x188   : > { %v6886_v33 = vpop.permute.xlu1 %1476 }
 0x189   : > { %9685 = vst [vmem:[#allocation7_spill] sm:$0xff] %v6886_v33  ;;  %v6888_v4 = vpop.permute.xlu0 %1474 }
 0x18a   : > { %9686 = vst [vmem:[#allocation8_spill] sm:$0xff] %v6888_v4  ;;  %1611 = vrot.lane.b32.xlu1 %v9687_v28, %s5469_s21  ;;  %v9700_v4 = vld [vmem:[#allocation16_spill] sm:$0xff] }
 0x18b   : > { %1609 = vrot.lane.b32.xlu0 %v9688_v24, %s5469_s21 }
 0x18c   : > { %v6894_v23 = vpop.permute.xlu1 %1480 }
 0x18d   : > { %9689 = vst [vmem:[#allocation9_spill] sm:$0xff] %v6894_v23  ;;  %v6896_v53 = vpop.permute.xlu0 %1478 }
 0x18e   : > { %9690 = vst [vmem:[#allocation10_spill] sm:$0xff] %v6896_v53  ;;  %1615 = vrot.lane.b32.xlu1 %v9691_v55, %s5469_s21  ;;  %v9699_v53 = vld [vmem:[#allocation15_spill] sm:$0xff] }
 0x18f   : > { %1613 = vrot.lane.b32.xlu0 %v9692_v61, %s5469_s21 }
 0x190   : > { %v6902_v5 = vpop.permute.xlu1 %1484 }
 0x191   : > { %9693 = vst [vmem:[#allocation11_spill] sm:$0xff] %v6902_v5  ;;  %v6904_v48 = vpop.permute.xlu0 %1482 }
 0x192   : > { %9694 = vst [vmem:[#allocation12_spill] sm:$0xff] %v6904_v48  ;;  %1619 = vrot.lane.b32.xlu1 %v9695_v2, %s5469_s21  ;;  %v9703_v48 = vld [vmem:[#allocation17_spill] sm:$0xff] }
 0x193   : > { %1617 = vrot.lane.b32.xlu0 %v9696_v0, %s5469_s21 }
 0x194   : > { %v6910_v32 = vpop.permute.xlu1 %1488 }
 0x195   : > { %9697 = vst [vmem:[#allocation13_spill] sm:$0xff] %v6910_v32  ;;  %v6912_v23 = vpop.permute.xlu0 %1486 }
 0x196   : > { %9698 = vst [vmem:[#allocation14_spill] sm:$0xff] %v6912_v23  ;;  %1623 = vrot.lane.b32.xlu1 %v9699_v53, %s5469_s21  ;;  %v9707_v23 = vld [vmem:[#allocation19_spill] sm:$0xff] }
 0x197   : > { %1621 = vrot.lane.b32.xlu0 %v9700_v4, %s5469_s21 }
 0x198   : > { %v6918_v33 = vpop.permute.xlu1 %1492 }
 0x199   : > { %9701 = vst [vmem:[#allocation15_spill] sm:$0xff] %v6918_v33  ;;  %v6920_v5 = vpop.permute.xlu0 %1490 }
 0x19a   : > { %9702 = vst [vmem:[#allocation241_spill] sm:$0xff] %v6920_v5  ;;  %1627 = vrot.lane.b32.xlu1 %v9703_v48, %s5469_s21  ;;  %v9711_v5 = vld [vmem:[#allocation21_spill] sm:$0xff] }
 0x19b   : > { %1625 = vrot.lane.b32.xlu0 %v9704_v34, %s5469_s21  ;;  %v9756_v48 = vld [vmem:[#allocation49_spill] sm:$0xff] }
 0x19c   : > { %v6926_v35 = vpop.permute.xlu1 %1496 }
 0x19d   : > { %9705 = vst [vmem:[#allocation242_spill] sm:$0xff] %v6926_v35  ;;  %v6928_v32 = vpop.permute.xlu0 %1494 }
 0x19e   : > { %9706 = vst [vmem:[#allocation243_spill] sm:$0xff] %v6928_v32  ;;  %1631 = vrot.lane.b32.xlu1 %v9707_v23, %s5469_s21  ;;  %v9715_v32 = vld [vmem:[#allocation23_spill] sm:$0xff]  ;;  %v9716_v23 = vld [vmem:[#allocation24_spill] sm:$0xff] }
 0x19f   : > { %1629 = vrot.lane.b32.xlu0 %v9708_v54, %s5469_s21 }
 0x1a0   : > { %v6934_v51 = vpop.permute.xlu1 %1500 }
 0x1a1   : > { %9709 = vst [vmem:[#allocation244_spill] sm:$0xff] %v6934_v51  ;;  %v6936_v33 = vpop.permute.xlu0 %1498 }
 0x1a2   : > { %9710 = vst [vmem:[#allocation245_spill] sm:$0xff] %v6936_v33  ;;  %1635 = vrot.lane.b32.xlu1 %v9711_v5, %s5469_s21  ;;  %v9719_v33 = vld [vmem:[#allocation25_spill] sm:$0xff]  ;;  %v9720_v5 = vld [vmem:[#allocation26_spill] sm:$0xff] }
 0x1a3   : > { %1633 = vrot.lane.b32.xlu0 %v9712_v37, %s5469_s21 }
 0x1a4   : > { %v6942_v26 = vpop.permute.xlu1 %1504 }
 0x1a5   : > { %9713 = vst [vmem:[#allocation246_spill] sm:$0xff] %v6942_v26  ;;  %v6944_v35 = vpop.permute.xlu0 %1502 }
 0x1a6   : > { %9714 = vst [vmem:[#allocation247_spill] sm:$0xff] %v6944_v35  ;;  %1639 = vrot.lane.b32.xlu1 %v9715_v32, %s5469_s21  ;;  %v9723_v35 = vld [vmem:[#allocation27_spill] sm:$0xff]  ;;  %v9724_v32 = vld [vmem:[#allocation28_spill] sm:$0xff] }
 0x1a7   : > { %1637 = vrot.lane.b32.xlu0 %v9716_v23, %s5469_s21 }
 0x1a8   : > { %v6950_v54 = vpop.permute.xlu1 %1508 }
 0x1a9   : > { %9717 = vst [vmem:[#allocation248_spill] sm:$0xff] %v6950_v54  ;;  %v6952_v51 = vpop.permute.xlu0 %1506 }
 0x1aa   : > { %9718 = vst [vmem:[#allocation249_spill] sm:$0xff] %v6952_v51  ;;  %1643 = vrot.lane.b32.xlu1 %v9719_v33, %s5469_s21  ;;  %v9727_v51 = vld [vmem:[#allocation29_spill] sm:$0xff]  ;;  %v9728_v33 = vld [vmem:[#allocation30_spill] sm:$0xff] }
 0x1ab   : > { %1641 = vrot.lane.b32.xlu0 %v9720_v5, %s5469_s21 }
 0x1ac   : > { %v6958_v37 = vpop.permute.xlu1 %1512 }
 0x1ad   : > { %9721 = vst [vmem:[#allocation250_spill] sm:$0xff] %v6958_v37  ;;  %v6960_v26 = vpop.permute.xlu0 %1510 }
 0x1ae   : > { %9722 = vst [vmem:[#allocation251_spill] sm:$0xff] %v6960_v26  ;;  %1647 = vrot.lane.b32.xlu1 %v9723_v35, %s5469_s21  ;;  %v9731_v26 = vld [vmem:[#allocation31_spill] sm:$0xff]  ;;  %v9732_v35 = vld [vmem:[#allocation32_spill] sm:$0xff] }
 0x1af   : > { %1645 = vrot.lane.b32.xlu0 %v9724_v32, %s5469_s21 }
 0x1b0   : > { %v6966_v23 = vpop.permute.xlu1 %1516 }
 0x1b1   : > { %9725 = vst [vmem:[#allocation252_spill] sm:$0xff] %v6966_v23  ;;  %v6968_v54 = vpop.permute.xlu0 %1514 }
 0x1b2   : > { %9726 = vst [vmem:[#allocation253_spill] sm:$0xff] %v6968_v54  ;;  %1651 = vrot.lane.b32.xlu1 %v9727_v51, %s5469_s21  ;;  %v9735_v54 = vld [vmem:[#allocation33_spill] sm:$0xff]  ;;  %v9736_v51 = vld [vmem:[#allocation34_spill] sm:$0xff] }
 0x1b3   : > { %1649 = vrot.lane.b32.xlu0 %v9728_v33, %s5469_s21 }
 0x1b4   : > { %v6974_v5 = vpop.permute.xlu1 %1520 }
 0x1b5   : > { %9729 = vst [vmem:[#allocation254_spill] sm:$0xff] %v6974_v5  ;;  %v6976_v37 = vpop.permute.xlu0 %1518 }
 0x1b6   : > { %9730 = vst [vmem:[#allocation255_spill] sm:$0xff] %v6976_v37  ;;  %1655 = vrot.lane.b32.xlu1 %v9731_v26, %s5469_s21  ;;  %v9739_v37 = vld [vmem:[#allocation35_spill] sm:$0xff]  ;;  %v9740_v26 = vld [vmem:[#allocation36_spill] sm:$0xff] }
 0x1b7   : > { %1653 = vrot.lane.b32.xlu0 %v9732_v35, %s5469_s21 }
 0x1b8   : > { %v6982_v32 = vpop.permute.xlu1 %1524 }
 0x1b9   : > { %9733 = vst [vmem:[#allocation256_spill] sm:$0xff] %v6982_v32  ;;  %v6984_v23 = vpop.permute.xlu0 %1522 }
 0x1ba   : > { %9734 = vst [vmem:[#allocation257_spill] sm:$0xff] %v6984_v23  ;;  %1659 = vrot.lane.b32.xlu1 %v9735_v54, %s5469_s21  ;;  %v9743_v23 = vld [vmem:[#allocation37_spill] sm:$0xff]  ;;  %v9744_v54 = vld [vmem:[#allocation38_spill] sm:$0xff] }
 0x1bb   : > { %1657 = vrot.lane.b32.xlu0 %v9736_v51, %s5469_s21 }
 0x1bc   : > { %v6990_v33 = vpop.permute.xlu1 %1528 }
 0x1bd   : > { %9737 = vst [vmem:[#allocation258_spill] sm:$0xff] %v6990_v33  ;;  %v6992_v5 = vpop.permute.xlu0 %1526 }
 0x1be   : > { %9738 = vst [vmem:[#allocation259_spill] sm:$0xff] %v6992_v5  ;;  %1663 = vrot.lane.b32.xlu1 %v9739_v37, %s5469_s21  ;;  %v9747_v5 = vld [vmem:[#allocation39_spill] sm:$0xff]  ;;  %v9748_v37 = vld [vmem:[#allocation41_spill] sm:$0xff] }
 0x1bf   : > { %1661 = vrot.lane.b32.xlu0 %v9740_v26, %s5469_s21 }
 0x1c0   : > { %v6998_v35 = vpop.permute.xlu1 %1532 }
 0x1c1   : > { %9741 = vst [vmem:[#allocation260_spill] sm:$0xff] %v6998_v35  ;;  %v7000_v32 = vpop.permute.xlu0 %1530 }
 0x1c2   : > { %9742 = vst [vmem:[#allocation261_spill] sm:$0xff] %v7000_v32  ;;  %1667 = vrot.lane.b32.xlu1 %v9743_v23, %s5469_s21  ;;  %v9751_v32 = vld [vmem:[#allocation42_spill] sm:$0xff] }
 0x1c3   : > { %1665 = vrot.lane.b32.xlu0 %v9744_v54, %s5469_s21 }
 0x1c4   : > { %v7006_v51 = vpop.permute.xlu1 %1536 }
 0x1c5   : > { %9745 = vst [vmem:[#allocation37_spill] sm:$0xff] %v7006_v51  ;;  %v7008_v33 = vpop.permute.xlu0 %1534 }
 0x1c6   : > { %9746 = vst [vmem:[#allocation38_spill] sm:$0xff] %v7008_v33  ;;  %1671 = vrot.lane.b32.xlu1 %v9747_v5, %s5469_s21  ;;  %v9755_v33 = vld [vmem:[#allocation46_spill] sm:$0xff] }
 0x1c7   : > { %1669 = vrot.lane.b32.xlu0 %v9748_v37, %s5469_s21 }
 0x1c8   : > { %v7014_v26 = vpop.permute.xlu1 %1540 }
 0x1c9   : > { %9749 = vst [vmem:[#allocation39_spill] sm:$0xff] %v7014_v26  ;;  %v7016_v35 = vpop.permute.xlu0 %1538 }
 0x1ca   : > { %9750 = vst [vmem:[#allocation41_spill] sm:$0xff] %v7016_v35  ;;  %1675 = vrot.lane.b32.xlu1 %v9751_v32, %s5469_s21  ;;  %v9759_v35 = vld [vmem:[#allocation50_spill] sm:$0xff] }
 0x1cb   : > { %1673 = vrot.lane.b32.xlu0 %v9752_v30, %s5469_s21 }
 0x1cc   : > { %v7022_v34 = vpop.permute.xlu1 %1544 }
 0x1cd   : > { %9753 = vst [vmem:[#allocation42_spill] sm:$0xff] %v7022_v34  ;;  %v7024_v51 = vpop.permute.xlu0 %1542 }
 0x1ce   : > { %9754 = vst [vmem:[#allocation45_spill] sm:$0xff] %v7024_v51  ;;  %1679 = vrot.lane.b32.xlu1 %v9755_v33, %s5469_s21 }
 0x1cf   : > { %1677 = vrot.lane.b32.xlu0 %v9756_v48, %s5469_s21 }
 0x1d0   : > { %v7030_v15 = vpop.permute.xlu1 %1548 }
 0x1d1   : > { %9757 = vst [vmem:[#allocation46_spill] sm:$0xff] %v7030_v15  ;;  %v7032_v26 = vpop.permute.xlu0 %1546 }
 0x1d2   : > { %9758 = vst [vmem:[#allocation49_spill] sm:$0xff] %v7032_v26  ;;  %1683 = vrot.lane.b32.xlu1 %v9759_v35, %s5469_s21 }
 0x1d3   : > { %1681 = vrot.lane.b32.xlu0 %v9760_v50, %s5469_s21 }
 0x1d4   : > { %v7038_v34 = vpop.permute.xlu1 %1552 }
 0x1d5   : > { %9761 = vst [vmem:[#allocation262_spill] sm:$0xff] %v7038_v34  ;;  %v7040_v51 = vpop.permute.xlu0 %1550 }
 0x1d6   : > { %9762 = vst [vmem:[#allocation263_spill] sm:$0xff] %v7040_v51  ;;  %1687 = vrot.lane.b32.xlu1 %v9763_v49, %s5469_s21  ;;  %v9771_v51 = vld [vmem:[#allocation61_spill] sm:$0xff]  ;;  %v9772_v49 = vld [vmem:[#allocation62_spill] sm:$0xff] }
 0x1d7   : > { %1685 = vrot.lane.b32.xlu0 %v9764_v46, %s5469_s21 }
 0x1d8   : > { %v7046_v15 = vpop.permute.xlu1 %1556 }
 0x1d9   : > { %9765 = vst [vmem:[#allocation264_spill] sm:$0xff] %v7046_v15  ;;  %v7048_v26 = vpop.permute.xlu0 %1554 }
 0x1da   : > { %9766 = vst [vmem:[#allocation265_spill] sm:$0xff] %v7048_v26  ;;  %1691 = vrot.lane.b32.xlu1 %v9767_v41, %s5469_s21  ;;  %v298_v26 = vld [vmem:[%s5509_s17 + $0x1ec] sm:$0xf]  ;;  %v299_v41 = vld [vmem:[%s5509_s17 + $0x10] sm:$0xe] }
 0x1db   : > { %1689 = vrot.lane.b32.xlu0 %v9768_v17, %s5469_s21 }
 0x1dc   : > { %v7054_v50 = vpop.permute.xlu1 %1560 }
 0x1dd   : > { %9769 = vst [vmem:[#allocation266_spill] sm:$0xff] %v7054_v50  ;;  %v7056_v34 = vpop.permute.xlu0 %1558 }
 0x1de   : > { %9770 = vst [vmem:[#allocation267_spill] sm:$0xff] %v7056_v34  ;;  %1695 = vrot.lane.b32.xlu1 %v9771_v51, %s5469_s21  ;;  %v7074_v34 = vcombine.low %v6846_v7, %v298_v26 }
 0x1df   : > { %1693 = vrot.lane.b32.xlu0 %v9772_v49, %s5469_s21 }
 0x1e0   : > { %v7062_v46 = vpop.permute.xlu1 %1564  ;;  %9776 = vst [vmem:[#allocation271_spill] sm:$0xff] %v7074_v34  ;;  %v1594_v26 = vshll.u32 %v7074_v34, 16 }
 0x1e1   : > { %9773 = vst [vmem:[#allocation268_spill] sm:$0xff] %v7062_v46  ;;  %v7064_v15 = vpop.permute.xlu0 %1562  ;;  %v9778_v46 = vld [vmem:[#allocation67_spill] sm:$0xff] }
 0x1e2   : > { %9774 = vst [vmem:[#allocation269_spill] sm:$0xff] %v7064_v15  ;;  %1699 = vrot.lane.b32.xlu1 %v6014_v39, %s5469_s21  ;;  %v1586_v15 = vshll.u32 %v6863_v31, 16 }
 0x1e3   : > { %1697 = vrot.lane.b32.xlu0 %v6022_v22, %s5469_s21  ;;  %v1590_v22 = vshrl.u32 %v6863_v31, 16  ;;  %v5380_v31 = vld [vmem:[%s5509_s17 + $0x14] sm:$0xf] }
 0x1e4   : > { %v7071_v50 = vpop.permute.xlu1 %1568  ;;  %v1588_v7 = vrot.slane %v1586_v15, 1  ;;  %v9788_v15 = vld [vmem:[#allocation71_spill] sm:$0xff]  ;;  %v4930_v4 = vcombine.low %v299_v41, %v5380_v31  ;;  %v9794_v41 = vld [vmem:[#allocation76_spill] sm:$0xff] }
 0x1e5   : > { %9775 = vst [vmem:[#allocation270_spill] sm:$0xff] %v7071_v50  ;;  %v7076_v51 = vpop.permute.xlu0 %1566  ;;  %v9781_v50 = vld [vmem:[#allocation68_spill] sm:$0xff]  ;;  %v9798_v31 = vld [vmem:[#allocation83_spill] sm:$0xff] }
 0x1e6   : > { %9777 = vst [vmem:[#allocation272_spill] sm:$0xff] %v7076_v51  ;;  %1703 = vrot.lane.b32.xlu1 %v6028_v38, %s5469_s21  ;;  %v9782_v51 = vld [vmem:[#allocation69_spill] sm:$0xff] }
 0x1e7   : > { %1701 = vrot.lane.b32.xlu0 %v9778_v46, %s5469_s21  ;;  %v1598_v46 = vshrl.u32 %v7074_v34, 16  ;;  %v9792_v34 = vld [vmem:[#allocation74_spill] sm:$0xff] }
 0x1e8   : > { %v7083_v39 = vpop.permute.xlu1 %1572 }
 0x1e9   : > { %9779 = vst [vmem:[#allocation273_spill] sm:$0xff] %v7083_v39  ;;  %v7085_v49 = vpop.permute.xlu0 %1570  ;;  %v9785_v39 = vld [vmem:[#allocation70_spill] sm:$0xff] }
 0x1ea   : > { %9780 = vst [vmem:[#allocation274_spill] sm:$0xff] %v7085_v49  ;;  %1707 = vrot.lane.b32.xlu1 %v9781_v50, %s5469_s21  ;;  %v1596_v49 = vrot.slane %v1594_v26, 1  ;;  %v9786_v50 = vld [vmem:[#allocation72_spill] sm:$0xff] }
 0x1eb   : > { %1705 = vrot.lane.b32.xlu0 %v9782_v51, %s5469_s21  ;;  %v7103_v35 = vsel %vm609_vm0, %v9786_v50, %v1588_v7 }
 0x1ec   : > { %v7092_v38 = vpop.permute.xlu1 %1576  ;;  %9787 = vst [vmem:[#allocation72_spill] sm:$0xff] %v7103_v35  ;;  %v7114_v26 = vor.u32 %v1598_v46, %v1596_v49 }
 0x1ed   : > { %9783 = vst [vmem:[#allocation275_spill] sm:$0xff] %v7092_v38  ;;  %v7095_v17 = vpop.permute.xlu0 %1574  ;;  %v1592_v38 = vor.u32 %v1590_v22, %v1588_v7 }
 0x1ee   : > { %9784 = vst [vmem:[#allocation276_spill] sm:$0xff] %v7095_v17  ;;  %1711 = vrot.lane.b32.xlu1 %v9785_v39, %s5469_s21  ;;  %9791 = vst [vmem:[#allocation279_spill] sm:$0xff] %v7114_v26 }
 0x1ef   : > { %1709 = vrot.lane.b32.xlu0 %v9788_v15, %s5469_s21  ;;  %v7121_v39 = vsel %vm609_vm0, %v1592_v38, %v1596_v49  ;;  %v1724_v15 = vrot.slane %v4930_v4, 1  ;;  %v9795_v38 = vld [vmem:[#allocation79_spill] sm:$0xff] }
 0x1f0   : > { %v7107_v51 = vpop.permute.xlu1 %1580  ;;  %9793 = vst [vmem:[#allocation280_spill] sm:$0xff] %v7121_v39 }
 0x1f1   : > { %9789 = vst [vmem:[#allocation277_spill] sm:$0xff] %v7107_v51  ;;  %v7110_v17 = vpop.permute.xlu0 %1578  ;;  %v1725_v46 = vsel %vm1212_vm1, %v1724_v15, %v9794_v41 }
 0x1f2   : > { %9790 = vst [vmem:[#allocation278_spill] sm:$0xff] %v7110_v17  ;;  %1715 = vrot.lane.b32.xlu1 %v7103_v35, %s5469_s21  ;;  %v9799_v17 = vld [vmem:[#allocation85_spill] sm:$0xff] }
 0x1f3   : > { %1713 = vrot.lane.b32.xlu0 %v9792_v34, %s5469_s21 }
 0x1f4   : > { %v7118_v50 = vpop.permute.xlu1 %1603 }
 0x1f5   : > { %v7123_v51 = vpop.permute.xlu0 %1601 }
 0x1f6   : > { %1719 = vrot.lane.b32.xlu1 %v7114_v26, %s5469_s21 }
 0x1f7   : > { %1717 = vrot.lane.b32.xlu0 %v7121_v39, %s5469_s21 }
 0x1f8   : > { %v7129_v22 = vpop.permute.xlu1 %1607 }
 0x1f9   : > { %v7133_v7 = vpop.permute.xlu0 %1605 }
 0x1fa   : > { %1732 = vrot.lane.b32.xlu1 %v9795_v38, %s5470_s22 }
 0x1fb   : > { %1730 = vrot.lane.b32.xlu0 %v1725_v46, %s5470_s22 }
 0x1fc   : > { %v7138_v4 = vpop.permute.xlu1 %1611 }
 0x1fd   : > { %9796 = vst [vmem:[#allocation76_spill] sm:$0xff] %v7138_v4  ;;  %v7140_v49 = vpop.permute.xlu0 %1609 }
 0x1fe   : > { %9797 = vst [vmem:[#allocation79_spill] sm:$0xff] %v7140_v49  ;;  %1736 = vrot.lane.b32.xlu1 %v9798_v31, %s5470_s22 }
 0x1ff   : > { %1734 = vrot.lane.b32.xlu0 %v9799_v17, %s5470_s22 }
 0x200   : > { %v7146_v39 = vpop.permute.xlu1 %1615 }
 0x201   : > { %9800 = vst [vmem:[#allocation83_spill] sm:$0xff] %v7146_v39  ;;  %v7148_v15 = vpop.permute.xlu0 %1613 }
 0x202   : > { %9801 = vst [vmem:[#allocation85_spill] sm:$0xff] %v7148_v15  ;;  %1740 = vrot.lane.b32.xlu1 %v6145_v29, %s5470_s22  ;;  %v9838_v15 = vld [vmem:[#allocation137_spill] sm:$0xff] }
 0x203   : > { %1738 = vrot.lane.b32.xlu0 %v6160_v42, %s5470_s22 }
 0x204   : > { %v7154_v41 = vpop.permute.xlu1 %1619 }
 0x205   : > { %9802 = vst [vmem:[#allocation281_spill] sm:$0xff] %v7154_v41  ;;  %v7156_v46 = vpop.permute.xlu0 %1617  ;;  %v5471_v41 = vmov 65535  }
 0x206   : > { %9803 = vst [vmem:[#allocation282_spill] sm:$0xff] %v7156_v46  ;;  %1744 = vrot.lane.b32.xlu1 %v6167_v9, %s5470_s22  ;;  %v9834_v46 = vld [vmem:[#allocation133_spill] sm:$0xff] }
 0x207   : > { %1742 = vrot.lane.b32.xlu0 %v6176_v8, %s5470_s22 }
 0x208   : > { %v7162_v17 = vpop.permute.xlu1 %1623 }
 0x209   : > { %9804 = vst [vmem:[#allocation283_spill] sm:$0xff] %v7162_v17  ;;  %v7164_v38 = vpop.permute.xlu0 %1621 }
 0x20a   : > { %9805 = vst [vmem:[#allocation284_spill] sm:$0xff] %v7164_v38  ;;  %1748 = vrot.lane.b32.xlu1 %v6183_v44, %s5470_s22 }
 0x20b   : > { %1746 = vrot.lane.b32.xlu0 %v6192_v21, %s5470_s22 }
 0x20c   : > { %v7170_v26 = vpop.permute.xlu1 %1627 }
 0x20d   : > { %9806 = vst [vmem:[#allocation285_spill] sm:$0xff] %v7170_v26  ;;  %v7172_v34 = vpop.permute.xlu0 %1625 }
 0x20e   : > { %9807 = vst [vmem:[#allocation286_spill] sm:$0xff] %v7172_v34  ;;  %1752 = vrot.lane.b32.xlu1 %v6199_v47, %s5470_s22 }
 0x20f   : > { %1750 = vrot.lane.b32.xlu0 %v6208_v18, %s5470_s22 }
 0x210   : > { %v7178_v35 = vpop.permute.xlu1 %1631 }
 0x211   : > { %9808 = vst [vmem:[#allocation287_spill] sm:$0xff] %v7178_v35  ;;  %v7180_v17 = vpop.permute.xlu0 %1629 }
 0x212   : > { %9809 = vst [vmem:[#allocation288_spill] sm:$0xff] %v7180_v17  ;;  %1756 = vrot.lane.b32.xlu1 %v6215_v16, %s5470_s22 }
 0x213   : > { %1754 = vrot.lane.b32.xlu0 %v6224_v14, %s5470_s22 }
 0x214   : > { %v7186_v38 = vpop.permute.xlu1 %1635 }
 0x215   : > { %9810 = vst [vmem:[#allocation289_spill] sm:$0xff] %v7186_v38  ;;  %v7188_v26 = vpop.permute.xlu0 %1633 }
 0x216   : > { %9811 = vst [vmem:[#allocation290_spill] sm:$0xff] %v7188_v26  ;;  %1760 = vrot.lane.b32.xlu1 %v6231_v36, %s5470_s22 }
 0x217   : > { %1758 = vrot.lane.b32.xlu0 %v6240_v59, %s5470_s22 }
 0x218   : > { %v7194_v34 = vpop.permute.xlu1 %1639 }
 0x219   : > { %9812 = vst [vmem:[#allocation291_spill] sm:$0xff] %v7194_v34  ;;  %v7196_v35 = vpop.permute.xlu0 %1637 }
 0x21a   : > { %9813 = vst [vmem:[#allocation292_spill] sm:$0xff] %v7196_v35  ;;  %1764 = vrot.lane.b32.xlu1 %v6247_v63, %s5470_s22 }
 0x21b   : > { %1762 = vrot.lane.b32.xlu0 %v6256_v3, %s5470_s22  ;;  %v9839_v3 = vld [vmem:[#allocation139_spill] sm:$0xff] }
 0x21c   : > { %v7202_v17 = vpop.permute.xlu1 %1643 }
 0x21d   : > { %9814 = vst [vmem:[#allocation293_spill] sm:$0xff] %v7202_v17  ;;  %v7204_v38 = vpop.permute.xlu0 %1641 }
 0x21e   : > { %9815 = vst [vmem:[#allocation294_spill] sm:$0xff] %v7204_v38  ;;  %1768 = vrot.lane.b32.xlu1 %v6263_v45, %s5470_s22 }
 0x21f   : > { %1766 = vrot.lane.b32.xlu0 %v6272_v19, %s5470_s22 }
 0x220   : > { %v7210_v26 = vpop.permute.xlu1 %1647 }
 0x221   : > { %9816 = vst [vmem:[#allocation295_spill] sm:$0xff] %v7210_v26  ;;  %v7212_v34 = vpop.permute.xlu0 %1645 }
 0x222   : > { %9817 = vst [vmem:[#allocation296_spill] sm:$0xff] %v7212_v34  ;;  %1772 = vrot.lane.b32.xlu1 %v6279_v58, %s5470_s22  ;;  %v9822_v34 = vld [vmem:[#allocation117_spill] sm:$0xff]  ;;  %v9823_v58 = vld [vmem:[#allocation119_spill] sm:$0xff] }
 0x223   : > { %1770 = vrot.lane.b32.xlu0 %v6288_v27, %s5470_s22 }
 0x224   : > { %v7218_v35 = vpop.permute.xlu1 %1651 }
 0x225   : > { %9818 = vst [vmem:[#allocation297_spill] sm:$0xff] %v7218_v35  ;;  %v7220_v17 = vpop.permute.xlu0 %1649 }
 0x226   : > { %9819 = vst [vmem:[#allocation298_spill] sm:$0xff] %v7220_v17  ;;  %1776 = vrot.lane.b32.xlu1 %v6295_v60, %s5470_s22  ;;  %v9826_v17 = vld [vmem:[#allocation121_spill] sm:$0xff]  ;;  %v9827_v60 = vld [vmem:[#allocation123_spill] sm:$0xff] }
 0x227   : > { %1774 = vrot.lane.b32.xlu0 %v6304_v43, %s5470_s22 }
 0x228   : > { %v7226_v38 = vpop.permute.xlu1 %1655 }
 0x229   : > { %9820 = vst [vmem:[#allocation299_spill] sm:$0xff] %v7226_v38  ;;  %v7228_v26 = vpop.permute.xlu0 %1653 }
 0x22a   : > { %9821 = vst [vmem:[#allocation300_spill] sm:$0xff] %v7228_v26  ;;  %1780 = vrot.lane.b32.xlu1 %v9822_v34, %s5470_s22  ;;  %v9828_v26 = vld [vmem:[#allocation125_spill] sm:$0xff]  ;;  %v9829_v34 = vld [vmem:[#allocation127_spill] sm:$0xff] }
 0x22b   : > { %1778 = vrot.lane.b32.xlu0 %v9823_v58, %s5470_s22 }
 0x22c   : > { %v7234_v27 = vpop.permute.xlu1 %1659 }
 0x22d   : > { %9824 = vst [vmem:[#allocation301_spill] sm:$0xff] %v7234_v27  ;;  %v7236_v35 = vpop.permute.xlu0 %1657 }
 0x22e   : > { %9825 = vst [vmem:[#allocation302_spill] sm:$0xff] %v7236_v35  ;;  %1784 = vrot.lane.b32.xlu1 %v9826_v17, %s5470_s22  ;;  %v9830_v35 = vld [vmem:[#allocation129_spill] sm:$0xff]  ;;  %v9831_v17 = vld [vmem:[#allocation131_spill] sm:$0xff] }
 0x22f   : > { %1782 = vrot.lane.b32.xlu0 %v9827_v60, %s5470_s22 }
 0x230   : > { %v7242_v43 = vpop.permute.xlu1 %1663 }
 0x231   : > { %v7244_v38 = vpop.permute.xlu0 %1661 }
 0x232   : > { %1788 = vrot.lane.b32.xlu1 %v9828_v26, %s5470_s22  ;;  %v9835_v26 = vld [vmem:[#allocation135_spill] sm:$0xff] }
 0x233   : > { %1786 = vrot.lane.b32.xlu0 %v9829_v34, %s5470_s22 }
 0x234   : > { %v7250_v58 = vpop.permute.xlu1 %1667 }
 0x235   : > { %v7252_v27 = vpop.permute.xlu0 %1665 }
 0x236   : > { %1792 = vrot.lane.b32.xlu1 %v9830_v35, %s5470_s22  ;;  %v5336_v35 = vld [vmem:[%s9191_s1 + $0x8] sm:$0x3f]  }
 0x237   : > { %1790 = vrot.lane.b32.xlu0 %v9831_v17, %s5470_s22  ;;  %v3355_v17 = vsel %vm3353_vm2, 4294967295, %v5471_v41  ;;  %v5337_v41 = vld [vmem:[%s9191_s1] sm:$0xff]   ;;  %vm8466_vm2 = vmand %vm4413_vm14, %vm4416_vm15 }
 0x238   : > { %v7258_v60 = vpop.permute.xlu1 %1671  ;;  %v3356_v39 = vsel %vm3354_vm3, %v3355_v17, 0 }
 0x239   : > { %9832 = vst [vmem:[#allocation303_spill] sm:$0xff] %v7258_v60  ;;  %v7260_v45 = vpop.permute.xlu0 %1669  ;;  %v3358_v63 = vand.u32 %v5336_v35, %v3356_v39  ;;  %v9842_v60 = vld [vmem:[#allocation141_spill] sm:$0xff]  ;;  %v9843_v39 = vld [vmem:[#allocation143_spill] sm:$0xff] }
 0x23a   : > { %9833 = vst [vmem:[#allocation304_spill] sm:$0xff] %v7260_v45  ;;  %1796 = vrot.lane.b32.xlu1 %v9834_v46, %s5470_s22 }
 0x23b   : > { %1794 = vrot.lane.b32.xlu0 %v9835_v26, %s5470_s22  ;;  %5123 = vmatprep.subr.bf16.mxu0 %v3358_v63 }
 0x23c   : > { %v7266_v34 = vpop.permute.xlu1 %1675  ;;  %5247 = vmatprep.subr.bf16.mxu1 %v3358_v63  ;;  %5124 = vmatpush3.bf16.msra.mxu0 %v3358_v63 }
 0x23d   : > { %9836 = vst [vmem:[#allocation133_spill] sm:$0xff] %v7266_v34  ;;  %v7271_v19 = vpop.permute.xlu0 %1673  ;;  %5249 = vmatpush3.bf16.msra.mxu1 %v3358_v63  ;;  %5125 = vmatprep.subr.bf16.mxu0 %v5337_v41  ;;  %v5381_v63 = vld [vmem:[%s5509_s17 + $0x24] sm:$0xf] }
 0x23e   : > { %9837 = vst [vmem:[#allocation135_spill] sm:$0xff] %v7271_v19  ;;  %1800 = vrot.lane.b32.xlu1 %v9838_v15, %s5470_s22  ;;  %5248 = vmatprep.subr.bf16.mxu1 %v5337_v41  ;;  %v9847_v19 = vld [vmem:[#allocation147_spill] sm:$0xff] }
 0x23f   : > { %1798 = vrot.lane.b32.xlu0 %v9839_v3, %s5470_s22 }
 0x240   : > { %v7277_v34 = vpop.permute.xlu1 %1679  ;;  %5126 = vmatpush3.bf16.msra.mxu0 %v5337_v41 }
 0x241   : > { %9840 = vst [vmem:[#allocation137_spill] sm:$0xff] %v7277_v34  ;;  %v7279_v45 = vpop.permute.xlu0 %1677  ;;  %v305_v34 = vld [vmem:[%s5509_s17 + $0x20] sm:$0xe]  ;;  %5250 = vmatpush3.bf16.msra.mxu1 %v5337_v41 }
 0x242   : > { %9841 = vst [vmem:[#allocation139_spill] sm:$0xff] %v7279_v45  ;;  %1804 = vrot.lane.b32.xlu1 %v9842_v60, %s5470_s22  ;;  %v9846_v45 = vld [vmem:[#allocation145_spill] sm:$0xff]  ;;  %v4934_v4 = vcombine.low %v305_v34, %v5381_v63  ;;  %v9852_v63 = vld [vmem:[#allocation80_spill] sm:$0xff] }
 0x243   : > { %1802 = vrot.lane.b32.xlu0 %v9843_v39, %s5470_s22 }
 0x244   : > { %v7288_v35 = vpop.permute.xlu1 %1683  ;;  %v2122_v41 = vrot.slane %v4934_v4, 1 }
 0x245   : > { %9844 = vst [vmem:[#allocation141_spill] sm:$0xff] %v7288_v35  ;;  %v7290_v17 = vpop.permute.xlu0 %1681  ;;  %v7303_v35 = vld [vmem:[%s5509_s17 + $0x28] sm:$0xff]  }
 0x246   : > { %9845 = vst [vmem:[#allocation143_spill] sm:$0xff] %v7290_v17  ;;  %1808 = vrot.lane.b32.xlu1 %v9846_v45, %s5470_s22 }
 0x247   : > { %1806 = vrot.lane.b32.xlu0 %v9847_v19, %s5470_s22 }
 0x248   : > { %v7297_v49 = vpop.permute.xlu1 %1687 }
 0x249   : > { %9848 = vst [vmem:[#allocation145_spill] sm:$0xff] %v7297_v49  ;;  %v7300_v36 = vpop.permute.xlu0 %1685 }
 0x24a   : > { %9849 = vst [vmem:[#allocation147_spill] sm:$0xff] %v7300_v36  ;;  %1862 = vrot.lane.b32.xlu1 %v7303_v35, %s5472_s27  ;;  %v2123_v36 = vsel %vm1212_vm1, %v2122_v41, %v9852_v63  ;;  %v7355_v63 = vld [vmem:[%s5509_s17 + $0x38] sm:$0xff]  }
 0x24b   : > { %1860 = vrot.lane.b32.xlu0 %v5528_v20, %s5472_s27 }
 0x24c   : > { %v7309_v17 = vpop.permute.xlu1 %1691 }
 0x24d   : > { %v7311_v59 = vpop.permute.xlu0 %1689 }
 0x24e   : > { %9850 = vst [vmem:[#allocation305_spill] sm:$0xff] %v7311_v59  ;;  %2001 = vrot.lane.b32.xlu1 %v9683_v52, %s5473_s28 }
 0x24f   : > { %1999 = vrot.lane.b32.xlu0 %v9684_v62, %s5473_s28 }
 0x250   : > { %v7317_v34 = vpop.permute.xlu1 %1695 }
 0x251   : > { %9851 = vst [vmem:[#allocation306_spill] sm:$0xff] %v7317_v34  ;;  %v7321_v49 = vpop.permute.xlu0 %1693  ;;  %v9889_v34 = vld [vmem:[#allocation174_spill] sm:$0xff] }
 0x252   : > { %9853 = vst [vmem:[#allocation80_spill] sm:$0xff] %v7321_v49  ;;  %2130 = vrot.lane.b32.xlu1 %v9798_v31, %s5474_s29 }
 0x253   : > { %2128 = vrot.lane.b32.xlu0 %v2123_v36, %s5474_s29 }
 0x254   : > { %v7326_v4 = vpop.permute.xlu1 %1699 }
 0x255   : > { %9854 = vst [vmem:[#allocation307_spill] sm:$0xff] %v7326_v4  ;;  %v7328_v52 = vpop.permute.xlu0 %1697  ;;  %v9886_v4 = vld [vmem:[#allocation4_spill] sm:$0xff] }
 0x256   : > { %9855 = vst [vmem:[#allocation308_spill] sm:$0xff] %v7328_v52  ;;  %1922 = vrot.lane.b32.xlu1 %v6735_v13, %s5472_s27  ;;  %v9885_v52 = vld [vmem:[#allocation75_spill] sm:$0xff] }
 0x257   : > { %1920 = vrot.lane.b32.xlu0 %v6740_v11, %s5472_s27 }
 0x258   : > { %v7334_v62 = vpop.permute.xlu1 %1703 }
 0x259   : > { %9856 = vst [vmem:[#allocation309_spill] sm:$0xff] %v7334_v62  ;;  %v7336_v41 = vpop.permute.xlu0 %1701  ;;  %v7490_v62 = vld [vmem:[%s5509_s17 + $0x148] sm:$0xff]  }
 0x25a   : > { %9857 = vst [vmem:[#allocation310_spill] sm:$0xff] %v7336_v41  ;;  %2061 = vrot.lane.b32.xlu1 %v9743_v23, %s5473_s28 }
 0x25b   : > { %2059 = vrot.lane.b32.xlu0 %v9744_v54, %s5473_s28  ;;  %v7360_v54 = vld [vmem:[%s5509_s17 + $0x30] sm:$0xff]  }
 0x25c   : > { %v7342_v36 = vpop.permute.xlu1 %1707 }
 0x25d   : > { %9858 = vst [vmem:[#allocation311_spill] sm:$0xff] %v7342_v36  ;;  %v7344_v31 = vpop.permute.xlu0 %1705 }
 0x25e   : > { %9859 = vst [vmem:[#allocation312_spill] sm:$0xff] %v7344_v31  ;;  %2190 = vrot.lane.b32.xlu1 %v9834_v46, %s5474_s29 }
 0x25f   : > { %2188 = vrot.lane.b32.xlu0 %v9835_v26, %s5474_s29 }
 0x260   : > { %v7350_v13 = vpop.permute.xlu1 %1711 }
 0x261   : > { %9860 = vst [vmem:[#allocation313_spill] sm:$0xff] %v7350_v13  ;;  %v7352_v11 = vpop.permute.xlu0 %1709 }
 0x262   : > { %9861 = vst [vmem:[#allocation314_spill] sm:$0xff] %v7352_v11  ;;  %1866 = vrot.lane.b32.xlu1 %v7355_v63, %s5472_s27 }
 0x263   : > { %1864 = vrot.lane.b32.xlu0 %v7360_v54, %s5472_s27 }
 0x264   : > { %v7364_v23 = vpop.permute.xlu1 %1715 }
 0x265   : > { %9862 = vst [vmem:[#allocation315_spill] sm:$0xff] %v7364_v23  ;;  %v7366_v46 = vpop.permute.xlu0 %1713 }
 0x266   : > { %9863 = vst [vmem:[#allocation316_spill] sm:$0xff] %v7366_v46  ;;  %2005 = vrot.lane.b32.xlu1 %v9687_v28, %s5473_s28 }
 0x267   : > { %2003 = vrot.lane.b32.xlu0 %v9688_v24, %s5473_s28 }
 0x268   : > { %v7372_v26 = vpop.permute.xlu1 %1719 }
 0x269   : > { %9864 = vst [vmem:[#allocation317_spill] sm:$0xff] %v7372_v26  ;;  %v7374_v11 = vpop.permute.xlu0 %1717 }
 0x26a   : > { %9865 = vst [vmem:[#allocation318_spill] sm:$0xff] %v7374_v11  ;;  %2134 = vrot.lane.b32.xlu1 %v6145_v29, %s5474_s29  ;;  %v7409_v11 = vld [vmem:[%s5509_s17 + $0x48] sm:$0xff]  }
 0x26b   : > { %2132 = vrot.lane.b32.xlu0 %v6160_v42, %s5474_s29 }
 0x26c   : > { %v7380_v23 = vpop.permute.xlu1 %1732 }
 0x26d   : > { %v7382_v46 = vpop.permute.xlu0 %1730 }
 0x26e   : > { %1926 = vrot.lane.b32.xlu1 %v6749_v56, %s5472_s27 }
 0x26f   : > { %1924 = vrot.lane.b32.xlu0 %v6754_v1, %s5472_s27 }
 0x270   : > { %v7388_v28 = vpop.permute.xlu1 %1736 }
 0x271   : > { %v7390_v24 = vpop.permute.xlu0 %1734 }
 0x272   : > { %2065 = vrot.lane.b32.xlu1 %v9747_v5, %s5473_s28 }
 0x273   : > { %2063 = vrot.lane.b32.xlu0 %v9748_v37, %s5473_s28  ;;  %v7414_v37 = vld [vmem:[%s5509_s17 + $0x40] sm:$0xff]  }
 0x274   : > { %v7396_v29 = vpop.permute.xlu1 %1740 }
 0x275   : > { %v7398_v42 = vpop.permute.xlu0 %1738 }
 0x276   : > { %2194 = vrot.lane.b32.xlu1 %v9838_v15, %s5474_s29 }
 0x277   : > { %2192 = vrot.lane.b32.xlu0 %v9839_v3, %s5474_s29 }
 0x278   : > { %v7404_v1 = vpop.permute.xlu1 %1744 }
 0x279   : > { %v7406_v56 = vpop.permute.xlu0 %1742 }
 0x27a   : > { %1870 = vrot.lane.b32.xlu1 %v7409_v11, %s5472_s27 }
 0x27b   : > { %1868 = vrot.lane.b32.xlu0 %v7414_v37, %s5472_s27 }
 0x27c   : > { %v7418_v5 = vpop.permute.xlu1 %1748 }
 0x27d   : > { %v7420_v15 = vpop.permute.xlu0 %1746 }
 0x27e   : > { %2009 = vrot.lane.b32.xlu1 %v9691_v55, %s5473_s28 }
 0x27f   : > { %2007 = vrot.lane.b32.xlu0 %v9692_v61, %s5473_s28 }
 0x280   : > { %v7426_v3 = vpop.permute.xlu1 %1752 }
 0x281   : > { %v7428_v26 = vpop.permute.xlu0 %1750 }
 0x282   : > { %2138 = vrot.lane.b32.xlu1 %v6167_v9, %s5474_s29 }
 0x283   : > { %2136 = vrot.lane.b32.xlu0 %v6176_v8, %s5474_s29 }
 0x284   : > { %v7434_v13 = vpop.permute.xlu1 %1756 }
 0x285   : > { %v7436_v31 = vpop.permute.xlu0 %1754 }
 0x286   : > { %1930 = vrot.lane.b32.xlu1 %v6763_v12, %s5472_s27 }
 0x287   : > { %1928 = vrot.lane.b32.xlu0 %v6768_v40, %s5472_s27 }
 0x288   : > { %v7442_v61 = vpop.permute.xlu1 %1760 }
 0x289   : > { %v7444_v55 = vpop.permute.xlu0 %1758 }
 0x28a   : > { %2069 = vrot.lane.b32.xlu1 %v9751_v32, %s5473_s28  ;;  %v7465_v32 = vld [vmem:[%s5509_s17 + $0x50] sm:$0xff]  }
 0x28b   : > { %2067 = vrot.lane.b32.xlu0 %v9752_v30, %s5473_s28 }
 0x28c   : > { %v7450_v9 = vpop.permute.xlu1 %1764 }
 0x28d   : > { %9866 = vst [vmem:[#allocation319_spill] sm:$0xff] %v7450_v9  ;;  %v7452_v8 = vpop.permute.xlu0 %1762 }
 0x28e   : > { %9867 = vst [vmem:[#allocation320_spill] sm:$0xff] %v7452_v8  ;;  %2198 = vrot.lane.b32.xlu1 %v9842_v60, %s5474_s29  ;;  %v9890_v8 = vld [vmem:[#allocation237_spill] sm:$0xff] }
 0x28f   : > { %2196 = vrot.lane.b32.xlu0 %v9843_v39, %s5474_s29 }
 0x290   : > { %v7458_v12 = vpop.permute.xlu1 %1768 }
 0x291   : > { %9868 = vst [vmem:[#allocation321_spill] sm:$0xff] %v7458_v12  ;;  %v7460_v40 = vpop.permute.xlu0 %1766  ;;  %v9887_v12 = vld [vmem:[#allocation172_spill] sm:$0xff] }
 0x292   : > { %9869 = vst [vmem:[#allocation322_spill] sm:$0xff] %v7460_v40  ;;  %1874 = vrot.lane.b32.xlu1 %v6618_v6, %s5472_s27  ;;  %v9888_v40 = vld [vmem:[#allocation44_spill] sm:$0xff] }
 0x293   : > { %1872 = vrot.lane.b32.xlu0 %v7465_v32, %s5472_s27 }
 0x294   : > { %v7469_v30 = vpop.permute.xlu1 %1772 }
 0x295   : > { %9870 = vst [vmem:[#allocation323_spill] sm:$0xff] %v7469_v30  ;;  %v7471_v36 = vpop.permute.xlu0 %1770  ;;  %v9884_v30 = vld [vmem:[#allocation78_spill] sm:$0xff] }
 0x296   : > { %9871 = vst [vmem:[#allocation324_spill] sm:$0xff] %v7471_v36  ;;  %2013 = vrot.lane.b32.xlu1 %v9695_v2, %s5473_s28 }
 0x297   : > { %2011 = vrot.lane.b32.xlu0 %v9696_v0, %s5473_s28 }
 0x298   : > { %v7477_v60 = vpop.permute.xlu1 %1776 }
 0x299   : > { %9872 = vst [vmem:[#allocation325_spill] sm:$0xff] %v7477_v60  ;;  %v7479_v39 = vpop.permute.xlu0 %1774  ;;  %v9883_v60 = vld [vmem:[#allocation149_spill] sm:$0xff] }
 0x29a   : > { %9873 = vst [vmem:[#allocation326_spill] sm:$0xff] %v7479_v39  ;;  %2142 = vrot.lane.b32.xlu1 %v6183_v44, %s5474_s29  ;;  %v5391_v39 = vld [vmem:[%s5509_s17 + $0x8] sm:$0xff]  }
 0x29b   : > { %2140 = vrot.lane.b32.xlu0 %v6192_v21, %s5474_s29  ;;  %v2252_v36 = vsel %vm9420_vm4, %v5391_v39, %v9884_v30  ;;  %v9891_v30 = vld [vmem:[#allocation238_spill] sm:$0xff] }
 0x29c   : > { %v7485_v6 = vpop.permute.xlu1 %1780 }
 0x29d   : > { %9874 = vst [vmem:[#allocation327_spill] sm:$0xff] %v7485_v6  ;;  %v7487_v41 = vpop.permute.xlu0 %1778 }
 0x29e   : > { %9875 = vst [vmem:[#allocation328_spill] sm:$0xff] %v7487_v41  ;;  %1934 = vrot.lane.b32.xlu1 %v7490_v62, %s5472_s27 }
 0x29f   : > { %1932 = vrot.lane.b32.xlu0 %v6779_v10, %s5472_s27 }
 0x2a0   : > { %v7496_v2 = vpop.permute.xlu1 %1784 }
 0x2a1   : > { %9876 = vst [vmem:[#allocation329_spill] sm:$0xff] %v7496_v2  ;;  %v7498_v0 = vpop.permute.xlu0 %1782 }
 0x2a2   : > { %9877 = vst [vmem:[#allocation330_spill] sm:$0xff] %v7498_v0  ;;  %2073 = vrot.lane.b32.xlu1 %v9755_v33, %s5473_s28  ;;  %v9882_v0 = vld [vmem:[#allocation53_spill] sm:$0xff] }
 0x2a3   : > { %2071 = vrot.lane.b32.xlu0 %v9756_v48, %s5473_s28 }
 0x2a4   : > { %v7504_v44 = vpop.permute.xlu1 %1788 }
 0x2a5   : > { %9878 = vst [vmem:[#allocation331_spill] sm:$0xff] %v7504_v44  ;;  %v7506_v21 = vpop.permute.xlu0 %1786 }
 0x2a6   : > { %9879 = vst [vmem:[#allocation332_spill] sm:$0xff] %v7506_v21  ;;  %2202 = vrot.lane.b32.xlu1 %v9846_v45, %s5474_s29  ;;  %v9880_v45 = vld [vmem:[#allocation16_spill] sm:$0xff]  ;;  %v7541_v21 = vld [vmem:[%s5509_s17 + $0x158] sm:$0xff]  }
 0x2a7   : > { %2200 = vrot.lane.b32.xlu0 %v9847_v19, %s5474_s29 }
 0x2a8   : > { %v7512_v10 = vpop.permute.xlu1 %1792 }
 0x2a9   : > { %v7514_v2 = vpop.permute.xlu0 %1790 }
 0x2aa   : > { %1878 = vrot.lane.b32.xlu1 %v6629_v57, %s5472_s27 }
 0x2ab   : > { %1876 = vrot.lane.b32.xlu0 %v6634_v25, %s5472_s27 }
 0x2ac   : > { %v7520_v48 = vpop.permute.xlu1 %1796 }
 0x2ad   : > { %v7522_v33 = vpop.permute.xlu0 %1794 }
 0x2ae   : > { %2017 = vrot.lane.b32.xlu1 %v9699_v53, %s5473_s28  ;;  %v7546_v53 = vld [vmem:[%s5509_s17 + $0x150] sm:$0xff]  }
 0x2af   : > { %2015 = vrot.lane.b32.xlu0 %v9880_v45, %s5473_s28 }
 0x2b0   : > { %v7528_v19 = vpop.permute.xlu1 %1800 }
 0x2b1   : > { %v7530_v44 = vpop.permute.xlu0 %1798 }
 0x2b2   : > { %2146 = vrot.lane.b32.xlu1 %v6199_v47, %s5474_s29 }
 0x2b3   : > { %2144 = vrot.lane.b32.xlu0 %v6208_v18, %s5474_s29  ;;  %v9881_v18 = vld [vmem:[#allocation50_spill] sm:$0xff] }
 0x2b4   : > { %v7536_v25 = vpop.permute.xlu1 %1804 }
 0x2b5   : > { %v7538_v57 = vpop.permute.xlu0 %1802 }
 0x2b6   : > { %1938 = vrot.lane.b32.xlu1 %v7541_v21, %s5472_s27 }
 0x2b7   : > { %1936 = vrot.lane.b32.xlu0 %v7546_v53, %s5472_s27 }
 0x2b8   : > { %v7550_v45 = vpop.permute.xlu1 %1808 }
 0x2b9   : > { %v7552_v47 = vpop.permute.xlu0 %1806 }
 0x2ba   : > { %2077 = vrot.lane.b32.xlu1 %v9881_v18, %s5473_s28  ;;  %v2250_v18 = vsel %vm9420_vm4, %v9886_v4, %v9885_v52 }
 0x2bb   : > { %2075 = vrot.lane.b32.xlu0 %v9882_v0, %s5473_s28  ;;  %v2374_v0 = vsel %vm2370_vm5, %v2252_v36, %v9887_v12  ;;  %v2372_v9 = vsel %vm2370_vm5, %v2250_v18, %v9889_v34  ;;  %v9892_v36 = vld [vmem:[#allocation189_spill] sm:$0xff]  ;;  %v9893_v18 = vld [vmem:[#allocation190_spill] sm:$0xff] }
 0x2bc   : > { %v1863_v6 = vpop.permute.xlu1 %1862  ;;  %v2495_v59 = vsel %vm2491_vm6, %v2374_v0, %v9890_v8  ;;  %v2493_v39 = vsel %vm2491_vm6, %v2372_v9, %v9891_v30 }
 0x2bd   : > { %v1861_v41 = vpop.permute.xlu0 %1860  ;;  %v2616_v4 = vsel %vm2612_vm7, %v2495_v59, %v7118_v50  ;;  %v2614_v12 = vsel %vm2612_vm7, %v2493_v39, %v7123_v51  ;;  %v9894_v39 = vld [vmem:[#allocation17_spill] sm:$0xff] }
 0x2be   : > { %2206 = vrot.lane.b32.xlu1 %v9883_v60, %s5474_s29  ;;  %v2737_v34 = vsel %vm2733_vm8, %v2616_v4, %v7380_v23  ;;  %v2735_v8 = vsel %vm2733_vm8, %v2614_v12, %v7382_v46  ;;  %v9898_v12 = vld [vmem:[#allocation124_spill] sm:$0xff] }
 0x2bf   : > { %2204 = vrot.lane.b32.xlu0 %v9888_v40, %s5474_s29  ;;  %v2858_v9 = vsel %vm2854_vm9, %v2737_v34, %v1863_v6  ;;  %v2856_v50 = vsel %vm2854_vm9, %v2735_v8, %v1861_v41  ;;  %v9895_v6 = vld [vmem:[#allocation18_spill] sm:$0xff]  ;;  %v9899_v34 = vld [vmem:[#allocation208_spill] sm:$0xff] }
 0x2c0   : > { %v2002_v49 = vpop.permute.xlu1 %2001  ;;  %v9896_v41 = vld [vmem:[#allocation122_spill] sm:$0xff]  ;;  %v2310_v8 = vsel %vm9420_vm4, %v9899_v34, %v9898_v12 }
 0x2c1   : > { %v2000_v52 = vpop.permute.xlu0 %1999  ;;  %v2979_v0 = vsel %vm9419_vm10, %v2858_v9, %v2002_v49  ;;  %v9900_v9 = vld [vmem:[#allocation205_spill] sm:$0xff] }
 0x2c2   : > { %1882 = vrot.lane.b32.xlu1 %v9892_v36, %s5472_s27  ;;  %v2977_v51 = vsel %vm9419_vm10, %v2856_v50, %v2000_v52  ;;  %v9897_v52 = vld [vmem:[#allocation207_spill] sm:$0xff]  ;;  %v9901_v50 = vld [vmem:[#allocation206_spill] sm:$0xff] }
 0x2c3   : > { %1880 = vrot.lane.b32.xlu0 %v9893_v18, %s5472_s27  ;;  %v2312_v36 = vsel %vm9420_vm4, %v9897_v52, %v9896_v41 }
 0x2c4   : > { %v2131_v59 = vpop.permute.xlu1 %2130  ;;  %v2434_v18 = vsel %vm2370_vm5, %v2312_v36, %v9900_v9  ;;  %v5394_v9 = vld [vmem:[%s5509_s17 + $0x18] sm:$0xff]  }
 0x2c5   : > { %v3100_v30 = vsel %vm3096_vm11, %v2979_v0, %v2131_v59  ;;  %v2129_v23 = vpop.permute.xlu0 %2128  ;;  %v2432_v0 = vsel %vm2370_vm5, %v2310_v8, %v9901_v50  ;;  %v9904_v8 = vld [vmem:[#allocation55_spill] sm:$0xff]  ;;  %v9906_v50 = vld [vmem:[#allocation73_spill] sm:$0xff] }
 0x2c6   : > { %2021 = vrot.lane.b32.xlu1 %v9894_v39, %s5473_s28  ;;  %v3098_v46 = vsel %vm3096_vm11, %v2977_v51, %v2129_v23  ;;  %v9902_v51 = vld [vmem:[#allocation256_spill] sm:$0xff] }
 0x2c7   : > { %2019 = vrot.lane.b32.xlu0 %v9895_v6, %s5473_s28  ;;  %5127 = vmatprep.mubr.msk.bf16.mxu0 %vm3232_vm12, %v3098_v46 }
 0x2c8   : > { %v1923_v4 = vpop.permute.xlu1 %1922  ;;  %5128 = vmatmul.mubr.msk.bf16.vlgmr.msra.gmra.mxu0 %vm3232_vm12, %v3100_v30  ;;  %v9903_v30 = vld [vmem:[#allocation257_spill] sm:$0xff] }
 0x2c9   : > { %v1921_v49 = vpop.permute.xlu0 %1920  ;;  %v2553_v23 = vsel %vm2491_vm6, %v2432_v0, %v9903_v30  ;;  %v9907_v0 = vld [vmem:[#allocation3_spill] sm:$0xff] }
 0x2ca   : > { %1810 = vrot.lane.b32.xlu1 %v9888_v40, %s5470_s22  ;;  %v2555_v40 = vsel %vm2491_vm6, %v2434_v18, %v9902_v51  ;;  %v9905_v18 = vld [vmem:[#allocation77_spill] sm:$0xff]  ;;  %v2254_v51 = vsel %vm9420_vm4, %v9907_v0, %v9906_v50  ;;  %v7684_v0 = vld [vmem:[%s5509_s17 + $0x88] sm:$0xff]  }
 0x2cb   : > { %2148 = vrot.lane.b32.xlu0 %v6224_v14, %s5474_s29  ;;  %v2676_v39 = vsel %vm2612_vm7, %v2555_v40, %v7242_v43  ;;  %v2674_v14 = vsel %vm2612_vm7, %v2553_v23, %v7244_v38  ;;  %v9908_v40 = vld [vmem:[#allocation175_spill] sm:$0xff]  ;;  %v9909_v23 = vld [vmem:[#allocation57_spill] sm:$0xff] }
 0x2cc   : > { %v2062_v59 = vpop.permute.xlu1 %2061  ;;  %v2797_v6 = vsel %vm2733_vm8, %v2676_v39, %v7512_v10  ;;  %v2795_v41 = vsel %vm2733_vm8, %v2674_v14, %v7514_v2  ;;  %v7636_v10 = vld [vmem:[%s5509_s17 + $0x168] sm:$0xff]  }
 0x2cd   : > { %v2060_v46 = vpop.permute.xlu0 %2059  ;;  %v2918_v52 = vsel %vm2854_vm9, %v2797_v6, %v1923_v4  ;;  %v2916_v36 = vsel %vm2854_vm9, %v2795_v41, %v1921_v49  ;;  %v7642_v4 = vld [vmem:[%s5509_s17 + $0x160] sm:$0xff]  }
 0x2ce   : > { %1812 = vrot.lane.b32.xlu1 %v9883_v60, %s5470_s22  ;;  %v3039_v60 = vsel %vm9419_vm10, %v2918_v52, %v2062_v59  ;;  %v3037_v12 = vsel %vm9419_vm10, %v2916_v36, %v2060_v46  ;;  %v2256_v59 = vsel %vm9420_vm4, %v5394_v9, %v9905_v18  ;;  %v9910_v46 = vld [vmem:[#allocation176_spill] sm:$0xff]  ;;  %v9911_v6 = vld [vmem:[#allocation239_spill] sm:$0xff] }
 0x2cf   : > { %2150 = vrot.lane.b32.xlu0 %v6215_v16, %s5474_s29  ;;  %v2378_v30 = vsel %vm2370_vm5, %v2256_v59, %v9908_v40  ;;  %v2376_v14 = vsel %vm2370_vm5, %v2254_v51, %v9910_v46  ;;  %v9912_v52 = vld [vmem:[#allocation240_spill] sm:$0xff]  ;;  %v9914_v9 = vld [vmem:[#allocation47_spill] sm:$0xff] }
 0x2d0   : > { %v2191_v43 = vpop.permute.xlu1 %2190  ;;  %v2499_v41 = vsel %vm2491_vm6, %v2378_v30, %v9911_v6  ;;  %v9915_v40 = vld [vmem:[#allocation19_spill] sm:$0xff]  ;;  %v5397_v30 = vld [vmem:[%s5509_s17 + $0x108] sm:$0xff]  }
 0x2d1   : > { %v3160_v38 = vsel %vm3096_vm11, %v3039_v60, %v2191_v43  ;;  %v2189_v34 = vpop.permute.xlu0 %2188  ;;  %v2497_v43 = vsel %vm2491_vm6, %v2376_v14, %v9912_v52  ;;  %v2620_v36 = vsel %vm2612_vm7, %v2499_v41, %v7129_v22  ;;  %v5398_v46 = vld [vmem:[%s5509_s17 + $0x100] sm:$0xff]   ;;  %v9917_v14 = vld [vmem:[#allocation128_spill] sm:$0xff]  ;;  %v9918_v41 = vld [vmem:[#allocation209_spill] sm:$0xff] }
 0x2d2   : > { %1942 = vrot.lane.b32.xlu1 %v7636_v10, %s5472_s27  ;;  %v3158_v2 = vsel %vm3096_vm11, %v3037_v12, %v2189_v34  ;;  %v9913_v12 = vld [vmem:[#allocation151_spill] sm:$0xff]  ;;  %v2741_v34 = vsel %vm2733_vm8, %v2620_v36, %v7388_v28  ;;  %v2314_v6 = vsel %vm9420_vm4, %v5398_v46, %v9917_v14  ;;  %v7739_v46 = vld [vmem:[%s5509_s17 + $0x178] sm:$0xff]   ;;  %v9925_v14 = vld [vmem:[#allocation81_spill] sm:$0xff] }
 0x2d3   : > { %1940 = vrot.lane.b32.xlu0 %v7642_v4, %s5472_s27  ;;  %5187 = vmatprep.mubr.msk.bf16.mxu1 %vm3232_vm12, %v3158_v2 }
 0x2d4   : > { %v1867_v16 = vpop.permute.xlu1 %1866  ;;  %5188 = vmatmul.mubr.msk.bf16.vlgmr.msra.gmra.mxu1 %vm3232_vm12, %v3160_v38  ;;  %v2618_v38 = vsel %vm2612_vm7, %v2497_v43, %v7133_v7  ;;  %v9919_v43 = vld [vmem:[#allocation20_spill] sm:$0xff] }
 0x2d5   : > { %v1865_v49 = vpop.permute.xlu0 %1864  ;;  %v2739_v2 = vsel %vm2733_vm8, %v2618_v38, %v7390_v24 }
 0x2d6   : > { %2081 = vrot.lane.b32.xlu1 %v9904_v8, %s5473_s28  ;;  %v2862_v8 = vsel %vm2854_vm9, %v2741_v34, %v1867_v16  ;;  %v2860_v18 = vsel %vm2854_vm9, %v2739_v2, %v1865_v49  ;;  %v7690_v16 = vld [vmem:[%s5509_s17 + $0x80] sm:$0xff]   ;;  %v9921_v34 = vld [vmem:[#allocation258_spill] sm:$0xff] }
 0x2d7   : > { %2079 = vrot.lane.b32.xlu0 %v9909_v23, %s5473_s28  ;;  %v9916_v23 = vld [vmem:[#allocation126_spill] sm:$0xff] }
 0x2d8   : > { %v2006_v39 = vpop.permute.xlu1 %2005 }
 0x2d9   : > { %v2004_v60 = vpop.permute.xlu0 %2003  ;;  %v2983_v59 = vsel %vm9419_vm10, %v2862_v8, %v2006_v39  ;;  %v2316_v39 = vsel %vm9420_vm4, %v5397_v30, %v9916_v23  ;;  %v9922_v8 = vld [vmem:[#allocation259_spill] sm:$0xff] }
 0x2da   : > { %2210 = vrot.lane.b32.xlu1 %v9913_v12, %s5474_s29  ;;  %v2981_v7 = vsel %vm9419_vm10, %v2860_v18, %v2004_v60  ;;  %v2438_v52 = vsel %vm2370_vm5, %v2316_v39, %v9918_v41  ;;  %v9920_v60 = vld [vmem:[#allocation210_spill] sm:$0xff] }
 0x2db   : > { %2208 = vrot.lane.b32.xlu0 %v9914_v9, %s5474_s29  ;;  %v2436_v38 = vsel %vm2370_vm5, %v2314_v6, %v9920_v60  ;;  %v2559_v2 = vsel %vm2491_vm6, %v2438_v52, %v9921_v34  ;;  %v9926_v6 = vld [vmem:[#allocation82_spill] sm:$0xff]  ;;  %v9927_v52 = vld [vmem:[#allocation177_spill] sm:$0xff] }
 0x2dc   : > { %v2135_v22 = vpop.permute.xlu1 %2134  ;;  %v2680_v18 = vsel %vm2612_vm7, %v2559_v2, %v7250_v58  ;;  %v2258_v41 = vsel %vm9420_vm4, %v5528_v20, %v9926_v6  ;;  %v9929_v2 = vld [vmem:[#allocation6_spill] sm:$0xff] }
 0x2dd   : > { %v3104_v50 = vsel %vm3096_vm11, %v2983_v59, %v2135_v22  ;;  %v2133_v28 = vpop.permute.xlu0 %2132  ;;  %v2557_v22 = vsel %vm2491_vm6, %v2436_v38, %v9922_v8  ;;  %v9928_v38 = vld [vmem:[#allocation178_spill] sm:$0xff] }
 0x2de   : > { %1886 = vrot.lane.b32.xlu1 %v7684_v0, %s5472_s27  ;;  %v3102_v24 = vsel %vm3096_vm11, %v2981_v7, %v2133_v28  ;;  %v2678_v7 = vsel %vm2612_vm7, %v2557_v22, %v7252_v27  ;;  %v2380_v34 = vsel %vm2370_vm5, %v2258_v41, %v9928_v38  ;;  %v5402_v6 = vld [vmem:[%s5509_s17 + $0x118] sm:$0xff]  }
 0x2df   : > { %1884 = vrot.lane.b32.xlu0 %v7690_v16, %s5472_s27  ;;  %5131 = vmatprep.mubr.msk.bf16.mxu0 %vm3232_vm12, %v3102_v24  ;;  %v2799_v28 = vsel %vm2733_vm8, %v2678_v7, %v7522_v33  ;;  %v9932_v7 = vld [vmem:[#allocation58_spill] sm:$0xff] }
 0x2e0   : > { %v1927_v49 = vpop.permute.xlu1 %1926  ;;  %5132 = vmatmul.mubr.msk.bf16.gmra.mxu0 %vm3232_vm12, %v3104_v50  ;;  %v2801_v50 = vsel %vm2733_vm8, %v2680_v18, %v7520_v48  ;;  %v9931_v18 = vld [vmem:[#allocation76_spill] sm:$0xff]  ;;  %v9937_v41 = vld [vmem:[#allocation130_spill] sm:$0xff] }
 0x2e1   : > { %v1925_v51 = vpop.permute.xlu0 %1924  ;;  %v2922_v24 = vsel %vm2854_vm9, %v2801_v50, %v1927_v49  ;;  %v9924_v49 = vld [vmem:[#allocation97_spill] sm:$0xff]  ;;  %v9933_v50 = vld [vmem:[#allocation79_spill] sm:$0xff] }
 0x2e2   : > { %2025 = vrot.lane.b32.xlu1 %v9915_v40, %s5473_s28  ;;  %v9923_v40 = vld [vmem:[#allocation99_spill] sm:$0xff]  ;;  %v2920_v30 = vsel %vm2854_vm9, %v2799_v28, %v1925_v51 }
 0x2e3   : > { %2023 = vrot.lane.b32.xlu0 %v9919_v43, %s5473_s28 }
 0x2e4   : > { %v2066_v36 = vpop.permute.xlu1 %2065 }
 0x2e5   : > { %v2064_v59 = vpop.permute.xlu0 %2063 }
 0x2e6   : > { %1814 = vrot.lane.b32.xlu1 %v9914_v9, %s5470_s22  ;;  %v3043_v9 = vsel %vm9419_vm10, %v2922_v24, %v2066_v36  ;;  %v3041_v27 = vsel %vm9419_vm10, %v2920_v30, %v2064_v59  ;;  %v7752_v36 = vld [vmem:[%s5509_s17 + $0x170] sm:$0xff]   ;;  %v9934_v30 = vld [vmem:[#allocation60_spill] sm:$0xff] }
 0x2e7   : > { %2152 = vrot.lane.b32.xlu0 %v9923_v40, %s5474_s29 }
 0x2e8   : > { %v2195_v58 = vpop.permute.xlu1 %2194 }
 0x2e9   : > { %v3164_v23 = vsel %vm3096_vm11, %v3043_v9, %v2195_v58  ;;  %v2193_v48 = vpop.permute.xlu0 %2192 }
 0x2ea   : > { %1816 = vrot.lane.b32.xlu1 %v9913_v12, %s5470_s22  ;;  %v3162_v33 = vsel %vm3096_vm11, %v3041_v27, %v2193_v48  ;;  %v2260_v12 = vsel %vm9420_vm4, %v7303_v35, %v9925_v14  ;;  %v9930_v35 = vld [vmem:[#allocation5_spill] sm:$0xff] }
 0x2eb   : > { %2154 = vrot.lane.b32.xlu0 %v9924_v49, %s5474_s29  ;;  %5191 = vmatprep.mubr.msk.bf16.mxu1 %vm3232_vm12, %v3162_v33  ;;  %v2382_v43 = vsel %vm2370_vm5, %v2260_v12, %v9927_v52  ;;  %v2501_v22 = vsel %vm2491_vm6, %v2380_v34, %v9930_v35  ;;  %v7787_v12 = vld [vmem:[%s5509_s17 + $0x98] sm:$0xff]   ;;  %v2320_v52 = vsel %vm9420_vm4, %v5402_v6, %v9937_v41  ;;  %v9939_v34 = vld [vmem:[#allocation211_spill] sm:$0xff] }
 0x2ec   : > { %v1871_v39 = vpop.permute.xlu1 %1870  ;;  %5192 = vmatmul.mubr.msk.bf16.gmra.mxu1 %vm3232_vm12, %v3164_v23  ;;  %v2503_v8 = vsel %vm2491_vm6, %v2382_v43, %v9929_v2  ;;  %v2622_v28 = vsel %vm2612_vm7, %v2501_v22, %v9933_v50  ;;  %v5403_v43 = vld [vmem:[%s5509_s17 + $0x110] sm:$0xff]   ;;  %v2442_v2 = vsel %vm2370_vm5, %v2320_v52, %v9939_v34  ;;  %v9940_v22 = vld [vmem:[#allocation212_spill] sm:$0xff] }
 0x2ed   : > { %v1869_v51 = vpop.permute.xlu0 %1868  ;;  %v2624_v20 = vsel %vm2612_vm7, %v2503_v8, %v9931_v18  ;;  %v2743_v40 = vsel %vm2733_vm8, %v2622_v28, %v7398_v42  ;;  %v9935_v42 = vld [vmem:[#allocation153_spill] sm:$0xff]  ;;  %v9943_v28 = vld [vmem:[#allocation303_spill] sm:$0xff] }
 0x2ee   : > { %1946 = vrot.lane.b32.xlu1 %v7739_v46, %s5472_s27  ;;  %v2745_v24 = vsel %vm2733_vm8, %v2624_v20, %v7396_v29  ;;  %v2864_v27 = vsel %vm2854_vm9, %v2743_v40, %v1869_v51  ;;  %v7800_v8 = vld [vmem:[%s5509_s17 + $0x90] sm:$0xff]   ;;  %v9941_v20 = vld [vmem:[#allocation260_spill] sm:$0xff] }
 0x2ef   : > { %1944 = vrot.lane.b32.xlu0 %v7752_v36, %s5472_s27  ;;  %v2866_v58 = vsel %vm2854_vm9, %v2745_v24, %v1871_v39  ;;  %v9936_v39 = vld [vmem:[#allocation51_spill] sm:$0xff] }
 0x2f0   : > { %v2010_v60 = vpop.permute.xlu1 %2009 }
 0x2f1   : > { %v2008_v59 = vpop.permute.xlu0 %2007  ;;  %v2987_v23 = vsel %vm9419_vm10, %v2866_v58, %v2010_v60  ;;  %v9938_v60 = vld [vmem:[#allocation132_spill] sm:$0xff]  ;;  %v9944_v58 = vld [vmem:[#allocation21_spill] sm:$0xff] }
 0x2f2   : > { %2085 = vrot.lane.b32.xlu1 %v9932_v7, %s5473_s28  ;;  %v2985_v48 = vsel %vm9419_vm10, %v2864_v27, %v2008_v59  ;;  %v2318_v38 = vsel %vm9420_vm4, %v5403_v43, %v9938_v60  ;;  %v2563_v59 = vsel %vm2491_vm6, %v2442_v2, %v9941_v20  ;;  %v9942_v7 = vld [vmem:[#allocation261_spill] sm:$0xff]  ;;  %v9948_v60 = vld [vmem:[#allocation84_spill] sm:$0xff]  ;;  %v9950_v2 = vld [vmem:[#allocation179_spill] sm:$0xff] }
 0x2f3   : > { %2083 = vrot.lane.b32.xlu0 %v9934_v30, %s5473_s28  ;;  %v2440_v18 = vsel %vm2370_vm5, %v2318_v38, %v9940_v22  ;;  %v2684_v24 = vsel %vm2612_vm7, %v2563_v59, %v9943_v28  ;;  %v9945_v30 = vld [vmem:[#allocation304_spill] sm:$0xff]  ;;  %v2264_v38 = vsel %vm9420_vm4, %v7355_v63, %v9948_v60  ;;  %v9951_v22 = vld [vmem:[#allocation101_spill] sm:$0xff]  ;;  %v9955_v28 = vld [vmem:[#allocation83_spill] sm:$0xff] }
 0x2f4   : > { %v2139_v9 = vpop.permute.xlu1 %2138  ;;  %v2561_v50 = vsel %vm2491_vm6, %v2440_v18, %v9942_v7  ;;  %v2805_v27 = vsel %vm2733_vm8, %v2684_v24, %v7528_v19  ;;  %v9947_v19 = vld [vmem:[#allocation103_spill] sm:$0xff]  ;;  %v9952_v20 = vld [vmem:[#allocation180_spill] sm:$0xff]  ;;  %v9960_v60 = vld [vmem:[#allocation134_spill] sm:$0xff] }
 0x2f5   : > { %v3108_v29 = vsel %vm3096_vm11, %v2987_v23, %v2139_v9  ;;  %v2137_v33 = vpop.permute.xlu0 %2136  ;;  %v2682_v9 = vsel %vm2612_vm7, %v2561_v50, %v9945_v30  ;;  %v9954_v50 = vld [vmem:[#allocation8_spill] sm:$0xff] }
 0x2f6   : > { %2214 = vrot.lane.b32.xlu1 %v9935_v42, %s5474_s29  ;;  %v3106_v49 = vsel %vm3096_vm11, %v2985_v48, %v2137_v33  ;;  %v2803_v23 = vsel %vm2733_vm8, %v2682_v9, %v7530_v44 }
 0x2f7   : > { %2212 = vrot.lane.b32.xlu0 %v9936_v39, %s5474_s29  ;;  %5135 = vmatprep.mubr.msk.bf16.mxu0 %vm3232_vm12, %v3106_v49 }
 0x2f8   : > { %v1931_v51 = vpop.permute.xlu1 %1930  ;;  %5136 = vmatmul.mubr.msk.bf16.gmra.mxu0 %vm3232_vm12, %v3108_v29  ;;  %v9946_v29 = vld [vmem:[#allocation22_spill] sm:$0xff] }
 0x2f9   : > { %v1929_v14 = vpop.permute.xlu0 %1928  ;;  %v2926_v48 = vsel %vm2854_vm9, %v2805_v27, %v1931_v51 }
 0x2fa   : > { %1890 = vrot.lane.b32.xlu1 %v7787_v12, %s5472_s27  ;;  %v2924_v49 = vsel %vm2854_vm9, %v2803_v23, %v1929_v14 }
 0x2fb   : > { %1888 = vrot.lane.b32.xlu0 %v7800_v8, %s5472_s27 }
 0x2fc   : > { %v2070_v35 = vpop.permute.xlu1 %2069 }
 0x2fd   : > { %v2068_v40 = vpop.permute.xlu0 %2067  ;;  %v3047_v6 = vsel %vm9419_vm10, %v2926_v48, %v2070_v35  ;;  %v2386_v35 = vsel %vm2370_vm5, %v2264_v38, %v9950_v2  ;;  %v7867_v48 = vld [vmem:[%s5509_s17 + $0x180] sm:$0xff]  }
 0x2fe   : > { %2029 = vrot.lane.b32.xlu1 %v9944_v58, %s5473_s28  ;;  %v3045_v41 = vsel %vm9419_vm10, %v2924_v49, %v2068_v40  ;;  %v7855_v40 = vld [vmem:[%s5509_s17 + $0x188] sm:$0xff]   ;;  %v9956_v58 = vld [vmem:[#allocation85_spill] sm:$0xff] }
 0x2ff   : > { %2027 = vrot.lane.b32.xlu0 %v9946_v29, %s5473_s28 }
 0x300   : > { %v2199_v33 = vpop.permute.xlu1 %2198 }
 0x301   : > { %v3168_v52 = vsel %vm3096_vm11, %v3047_v6, %v2199_v33  ;;  %v2197_v43 = vpop.permute.xlu0 %2196 }
 0x302   : > { %1818 = vrot.lane.b32.xlu1 %v9936_v39, %s5470_s22  ;;  %v3166_v44 = vsel %vm3096_vm11, %v3045_v41, %v2197_v43  ;;  %v9949_v39 = vld [vmem:[#allocation86_spill] sm:$0xff] }
 0x303   : > { %2156 = vrot.lane.b32.xlu0 %v9947_v19, %s5474_s29  ;;  %5195 = vmatprep.mubr.msk.bf16.mxu1 %vm3232_vm12, %v3166_v44  ;;  %v2262_v34 = vsel %vm9420_vm4, %v7360_v54, %v9949_v39  ;;  %v9958_v43 = vld [vmem:[#allocation62_spill] sm:$0xff]  ;;  %v5408_v39 = vld [vmem:[%s5509_s17 + $0x120] sm:$0xff]  }
 0x304   : > { %v1875_v51 = vpop.permute.xlu1 %1874  ;;  %5196 = vmatmul.mubr.msk.bf16.gmra.mxu1 %vm3232_vm12, %v3168_v52  ;;  %v2384_v59 = vsel %vm2370_vm5, %v2262_v34, %v9952_v20  ;;  %v9961_v34 = vld [vmem:[#allocation136_spill] sm:$0xff] }
 0x305   : > { %v1873_v14 = vpop.permute.xlu0 %1872  ;;  %v2505_v63 = vsel %vm2491_vm6, %v2384_v59, %v9954_v50  ;;  %v2322_v2 = vsel %vm9420_vm4, %v5408_v39, %v9961_v34  ;;  %v9964_v59 = vld [vmem:[#allocation214_spill] sm:$0xff]  ;;  %v9972_v39 = vld [vmem:[#allocation88_spill] sm:$0xff] }
 0x306   : > { %1820 = vrot.lane.b32.xlu1 %v9935_v42, %s5470_s22  ;;  %v9953_v42 = vld [vmem:[#allocation7_spill] sm:$0xff]  ;;  %v2626_v30 = vsel %vm2612_vm7, %v2505_v63, %v9956_v58  ;;  %v9966_v63 = vld [vmem:[#allocation38_spill] sm:$0xff]  ;;  %v2266_v34 = vsel %vm9420_vm4, %v7414_v37, %v9972_v39 }
 0x307   : > { %2158 = vrot.lane.b32.xlu0 %v9951_v22, %s5474_s29  ;;  %v2507_v7 = vsel %vm2491_vm6, %v2386_v35, %v9953_v42  ;;  %v2747_v27 = vsel %vm2733_vm8, %v2626_v30, %v7406_v56  ;;  %v9957_v56 = vld [vmem:[#allocation61_spill] sm:$0xff]  ;;  %v2444_v42 = vsel %vm2370_vm5, %v2322_v2, %v9964_v59  ;;  %v7903_v30 = vld [vmem:[%s5509_s17 + $0xa8] sm:$0xff]   ;;  %v9975_v59 = vld [vmem:[#allocation182_spill] sm:$0xff] }
 0x308   : > { %v2014_v18 = vpop.permute.xlu1 %2013  ;;  %v2628_v24 = vsel %vm2612_vm7, %v2507_v7, %v9955_v28  ;;  %v2868_v33 = vsel %vm2854_vm9, %v2747_v27, %v1873_v14  ;;  %v5407_v14 = vld [vmem:[%s5509_s17 + $0x128] sm:$0xff]   ;;  %v9962_v35 = vld [vmem:[#allocation213_spill] sm:$0xff]  ;;  %v2565_v28 = vsel %vm2491_vm6, %v2444_v42, %v9966_v63  ;;  %v2388_v42 = vsel %vm2370_vm5, %v2266_v34, %v9975_v59  ;;  %v9984_v39 = vld [vmem:[#allocation215_spill] sm:$0xff] }
 0x309   : > { %v2012_v54 = vpop.permute.xlu0 %2011  ;;  %v2749_v9 = vsel %vm2733_vm8, %v2628_v24, %v7404_v1  ;;  %v2324_v38 = vsel %vm9420_vm4, %v5407_v14, %v9960_v60  ;;  %v9965_v7 = vld [vmem:[#allocation37_spill] sm:$0xff]  ;;  %v9971_v60 = vld [vmem:[#allocation87_spill] sm:$0xff] }
 0x30a   : > { %1950 = vrot.lane.b32.xlu1 %v7855_v40, %s5472_s27  ;;  %v2870_v23 = vsel %vm2854_vm9, %v2749_v9, %v1875_v51  ;;  %v2989_v6 = vsel %vm9419_vm10, %v2868_v33, %v2012_v54  ;;  %v9959_v51 = vld [vmem:[#allocation155_spill] sm:$0xff]  ;;  %v2446_v22 = vsel %vm2370_vm5, %v2324_v38, %v9962_v35  ;;  %v9967_v24 = vld [vmem:[#allocation133_spill] sm:$0xff]  ;;  %v2268_v38 = vsel %vm9420_vm4, %v7409_v11, %v9971_v60  ;;  %v9983_v60 = vld [vmem:[#allocation140_spill] sm:$0xff] }
 0x30b   : > { %1948 = vrot.lane.b32.xlu0 %v7867_v48, %s5472_s27  ;;  %v2991_v49 = vsel %vm9419_vm10, %v2870_v23, %v2014_v18  ;;  %v9963_v18 = vld [vmem:[#allocation56_spill] sm:$0xff]  ;;  %v2567_v50 = vsel %vm2491_vm6, %v2446_v22, %v9965_v7  ;;  %v9968_v9 = vld [vmem:[#allocation135_spill] sm:$0xff]  ;;  %v9973_v2 = vld [vmem:[#allocation181_spill] sm:$0xff] }
 0x30c   : > { %v2143_v29 = vpop.permute.xlu1 %2142  ;;  %v2688_v54 = vsel %vm2612_vm7, %v2567_v50, %v9967_v24  ;;  %v2686_v27 = vsel %vm2612_vm7, %v2565_v28, %v9968_v9  ;;  %v2390_v35 = vsel %vm2370_vm5, %v2268_v38, %v9973_v2  ;;  %v9974_v22 = vld [vmem:[#allocation107_spill] sm:$0xff]  ;;  %v9976_v7 = vld [vmem:[#allocation9_spill] sm:$0xff]  ;;  %v9977_v50 = vld [vmem:[#allocation10_spill] sm:$0xff] }
 0x30d   : > { %v3112_v1 = vsel %vm3096_vm11, %v2991_v49, %v2143_v29  ;;  %v2141_v41 = vpop.permute.xlu0 %2140  ;;  %v2809_v23 = vsel %vm2733_vm8, %v2688_v54, %v7536_v25  ;;  %v2807_v29 = vsel %vm2733_vm8, %v2686_v27, %v7538_v57  ;;  %v7915_v49 = vld [vmem:[%s5509_s17 + $0xa0] sm:$0xff]   ;;  %v2509_v11 = vsel %vm2491_vm6, %v2388_v42, %v9977_v50  ;;  %v9978_v63 = vld [vmem:[#allocation281_spill] sm:$0xff]  ;;  %v9979_v24 = vld [vmem:[#allocation282_spill] sm:$0xff] }
 0x30e   : > { %2089 = vrot.lane.b32.xlu1 %v9957_v56, %s5473_s28  ;;  %v3110_v52 = vsel %vm3096_vm11, %v2989_v6, %v2141_v41  ;;  %v2630_v54 = vsel %vm2612_vm7, %v2509_v11, %v9979_v24  ;;  %v9985_v2 = vld [vmem:[#allocation64_spill] sm:$0xff]  ;;  %v9987_v59 = vld [vmem:[#allocation39_spill] sm:$0xff]  ;;  %v9989_v50 = vld [vmem:[#allocation137_spill] sm:$0xff] }
 0x30f   : > { %2087 = vrot.lane.b32.xlu0 %v9958_v43, %s5473_s28  ;;  %5139 = vmatprep.mubr.msk.bf16.mxu0 %vm3232_vm12, %v3110_v52  ;;  %v9969_v43 = vld [vmem:[#allocation23_spill] sm:$0xff]  ;;  %v2751_v9 = vsel %vm2733_vm8, %v2630_v54, %v7420_v15 }
 0x310   : > { %v1935_v44 = vpop.permute.xlu1 %1934  ;;  %5140 = vmatmul.mubr.msk.bf16.gmra.mxu0 %vm3232_vm12, %v3112_v1 }
 0x311   : > { %v1933_v19 = vpop.permute.xlu0 %1932  ;;  %v2930_v33 = vsel %vm2854_vm9, %v2809_v23, %v1935_v44  ;;  %v9970_v44 = vld [vmem:[#allocation24_spill] sm:$0xff]  ;;  %v9980_v23 = vld [vmem:[#allocation105_spill] sm:$0xff] }
 0x312   : > { %2218 = vrot.lane.b32.xlu1 %v9959_v51, %s5474_s29  ;;  %v2928_v1 = vsel %vm2854_vm9, %v2807_v29, %v1933_v19 }
 0x313   : > { %2216 = vrot.lane.b32.xlu0 %v9963_v18, %s5474_s29 }
 0x314   : > { %v2074_v20 = vpop.permute.xlu1 %2073 }
 0x315   : > { %v2072_v58 = vpop.permute.xlu0 %2071  ;;  %v3051_v41 = vsel %vm9419_vm10, %v2930_v33, %v2074_v20 }
 0x316   : > { %1894 = vrot.lane.b32.xlu1 %v7903_v30, %s5472_s27  ;;  %v3049_v56 = vsel %vm9419_vm10, %v2928_v1, %v2072_v58 }
 0x317   : > { %1892 = vrot.lane.b32.xlu0 %v7915_v49, %s5472_s27 }
 0x318   : > { %v2203_v6 = vpop.permute.xlu1 %2202 }
 0x319   : > { %v3172_v52 = vsel %vm3096_vm11, %v3051_v41, %v2203_v6  ;;  %v2201_v25 = vpop.permute.xlu0 %2200  ;;  %v7966_v41 = vld [vmem:[%s5509_s17 + $0x198] sm:$0xff]  }
 0x31a   : > { %2033 = vrot.lane.b32.xlu1 %v9969_v43, %s5473_s28  ;;  %v3170_v57 = vsel %vm3096_vm11, %v3049_v56, %v2201_v25  ;;  %v7972_v56 = vld [vmem:[%s5509_s17 + $0x190] sm:$0xff]   ;;  %v9981_v43 = vld [vmem:[#allocation63_spill] sm:$0xff] }
 0x31b   : > { %2031 = vrot.lane.b32.xlu0 %v9970_v44, %s5473_s28  ;;  %5199 = vmatprep.mubr.msk.bf16.mxu1 %vm3232_vm12, %v3170_v57  ;;  %v5413_v57 = vld [vmem:[%s5509_s17 + $0x138] sm:$0xff]  }
 0x31c   : > { %v1879_v14 = vpop.permute.xlu1 %1878  ;;  %5200 = vmatmul.mubr.msk.bf16.gmra.mxu1 %vm3232_vm12, %v3172_v52  ;;  %v9982_v44 = vld [vmem:[#allocation138_spill] sm:$0xff] }
 0x31d   : > { %v1877_v19 = vpop.permute.xlu0 %1876 }
 0x31e   : > { %1822 = vrot.lane.b32.xlu1 %v9963_v18, %s5470_s22  ;;  %v2511_v18 = vsel %vm2491_vm6, %v2390_v35, %v9976_v7  ;;  %v2872_v33 = vsel %vm2854_vm9, %v2751_v9, %v1877_v19  ;;  %v5414_v19 = vld [vmem:[%s5509_s17 + $0x130] sm:$0xff]  }
 0x31f   : > { %2160 = vrot.lane.b32.xlu0 %v9974_v22, %s5474_s29  ;;  %v2632_v37 = vsel %vm2612_vm7, %v2511_v18, %v9978_v63  ;;  %v2326_v38 = vsel %vm9420_vm4, %v5414_v19, %v9983_v60  ;;  %v9986_v22 = vld [vmem:[#allocation216_spill] sm:$0xff]  ;;  %v9988_v7 = vld [vmem:[#allocation41_spill] sm:$0xff] }
 0x320   : > { %v2018_v20 = vpop.permute.xlu1 %2017  ;;  %v2753_v58 = vsel %vm2733_vm8, %v2632_v37, %v7418_v5  ;;  %v9990_v37 = vld [vmem:[#allocation157_spill] sm:$0xff]  ;;  %v9996_v19 = vld [vmem:[#allocation184_spill] sm:$0xff] }
 0x321   : > { %v2016_v28 = vpop.permute.xlu0 %2015  ;;  %v2874_v27 = vsel %vm2854_vm9, %v2753_v58, %v1879_v14  ;;  %v2328_v14 = vsel %vm9420_vm4, %v5413_v57, %v9982_v44  ;;  %v9995_v44 = vld [vmem:[#allocation26_spill] sm:$0xff] }
 0x322   : > { %1824 = vrot.lane.b32.xlu1 %v9959_v51, %s5470_s22  ;;  %v2995_v51 = vsel %vm9419_vm10, %v2874_v27, %v2018_v20  ;;  %v2993_v6 = vsel %vm9419_vm10, %v2872_v33, %v2016_v28  ;;  %v2450_v34 = vsel %vm2370_vm5, %v2328_v14, %v9984_v39  ;;  %v2448_v20 = vsel %vm2370_vm5, %v2326_v38, %v9986_v22  ;;  %v9991_v28 = vld [vmem:[#allocation139_spill] sm:$0xff]  ;;  %v9992_v27 = vld [vmem:[#allocation158_spill] sm:$0xff]  ;;  %v9997_v38 = vld [vmem:[#allocation12_spill] sm:$0xff] }
 0x323   : > { %2162 = vrot.lane.b32.xlu0 %v9980_v23, %s5474_s29  ;;  %v2571_v42 = vsel %vm2491_vm6, %v2450_v34, %v9987_v59  ;;  %v2569_v18 = vsel %vm2491_vm6, %v2448_v20, %v9988_v7  ;;  %v5417_v22 = vld [vmem:[%s5509_s17 + $0x58] sm:$0xff]   ;;  %v9999_v20 = vld [vmem:[#allocation89_spill] sm:$0xff] }
 0x324   : > { %v2147_v29 = vpop.permute.xlu1 %2146  ;;  %v2692_v11 = vsel %vm2612_vm7, %v2571_v42, %v9989_v50  ;;  %v2690_v24 = vsel %vm2612_vm7, %v2569_v18, %v9991_v28  ;;  %v10000_v42 = vld [vmem:[#allocation111_spill] sm:$0xff] }
 0x325   : > { %v3116_v1 = vsel %vm3096_vm11, %v2995_v51, %v2147_v29  ;;  %v2145_v5 = vpop.permute.xlu0 %2144  ;;  %v2813_v54 = vsel %vm2733_vm8, %v2692_v11, %v7550_v45  ;;  %v2811_v58 = vsel %vm2733_vm8, %v2690_v24, %v7552_v47  ;;  %v5416_v47 = vld [vmem:[%s5509_s17 + $0xb0] sm:$0xff]   ;;  %v10001_v18 = vld [vmem:[#allocation183_spill] sm:$0xff] }
 0x326   : > { %1954 = vrot.lane.b32.xlu1 %v7966_v41, %s5472_s27  ;;  %v3114_v15 = vsel %vm3096_vm11, %v2993_v6, %v2145_v5  ;;  %v5415_v5 = vld [vmem:[%s5509_s17 + $0xb8] sm:$0xff]  }
 0x327   : > { %1952 = vrot.lane.b32.xlu0 %v7972_v56, %s5472_s27  ;;  %5143 = vmatprep.mubr.msk.bf16.mxu0 %vm3232_vm12, %v3114_v15 }
 0x328   : > { %v1939_v52 = vpop.permute.xlu1 %1938  ;;  %5144 = vmatmul.mubr.msk.bf16.gmra.mxu0 %vm3232_vm12, %v3116_v1 }
 0x329   : > { %v1937_v25 = vpop.permute.xlu0 %1936  ;;  %v2934_v9 = vsel %vm2854_vm9, %v2813_v54, %v1939_v52 }
 0x32a   : > { %2093 = vrot.lane.b32.xlu1 %v9981_v43, %s5473_s28  ;;  %v2932_v29 = vsel %vm2854_vm9, %v2811_v58, %v1937_v25  ;;  %v9993_v25 = vld [vmem:[#allocation25_spill] sm:$0xff]  ;;  %v9994_v43 = vld [vmem:[#allocation90_spill] sm:$0xff] }
 0x32b   : > { %2091 = vrot.lane.b32.xlu0 %v9985_v2, %s5473_s28  ;;  %v2270_v57 = vsel %vm9420_vm4, %v7465_v32, %v9994_v43  ;;  %v9998_v2 = vld [vmem:[#allocation284_spill] sm:$0xff]  ;;  %v2272_v32 = vsel %vm9420_vm4, %v5417_v22, %v9999_v20  ;;  %v10013_v22 = vld [vmem:[#allocation141_spill] sm:$0xff] }
 0x32c   : > { %v2078_v35 = vpop.permute.xlu1 %2077  ;;  %v2392_v60 = vsel %vm2370_vm5, %v2270_v57, %v9996_v19  ;;  %v2394_v50 = vsel %vm2370_vm5, %v2272_v32, %v10001_v18  ;;  %v10007_v43 = vld [vmem:[#allocation144_spill] sm:$0xff]  ;;  %v10009_v19 = vld [vmem:[#allocation67_spill] sm:$0xff] }
 0x32d   : > { %v2076_v63 = vpop.permute.xlu0 %2075  ;;  %v3055_v33 = vsel %vm9419_vm10, %v2934_v9, %v2078_v35  ;;  %v2513_v39 = vsel %vm2491_vm6, %v2392_v60, %v9997_v38  ;;  %v10010_v38 = vld [vmem:[#allocation218_spill] sm:$0xff] }
 0x32e   : > { %2222 = vrot.lane.b32.xlu1 %v9990_v37, %s5474_s29  ;;  %v3053_v51 = vsel %vm9419_vm10, %v2932_v29, %v2076_v63  ;;  %v2634_v35 = vsel %vm2612_vm7, %v2513_v39, %v9998_v2  ;;  %v10002_v63 = vld [vmem:[#allocation11_spill] sm:$0xff] }
 0x32f   : > { %2220 = vrot.lane.b32.xlu0 %v9992_v27, %s5474_s29  ;;  %v2755_v59 = vsel %vm2733_vm8, %v2634_v35, %v7428_v26  ;;  %v2515_v28 = vsel %vm2491_vm6, %v2394_v50, %v10002_v63  ;;  %v10003_v26 = vld [vmem:[#allocation283_spill] sm:$0xff]  ;;  %v10012_v35 = vld [vmem:[#allocation45_spill] sm:$0xff] }
 0x330   : > { %v2207_v23 = vpop.permute.xlu1 %2206  ;;  %v2636_v58 = vsel %vm2612_vm7, %v2515_v28, %v10003_v26  ;;  %v10016_v28 = vld [vmem:[#allocation161_spill] sm:$0xff] }
 0x331   : > { %v3176_v6 = vsel %vm3096_vm11, %v3055_v33, %v2207_v23  ;;  %v2205_v1 = vpop.permute.xlu0 %2204  ;;  %v10004_v23 = vld [vmem:[#allocation109_spill] sm:$0xff] }
 0x332   : > { %1898 = vrot.lane.b32.xlu1 %v5415_v5, %s5472_s27  ;;  %v3174_v45 = vsel %vm3096_vm11, %v3053_v51, %v2205_v1  ;;  %v5419_v5 = vld [vmem:[%s5509_s17 + $0x1a0] sm:$0xff]  }
 0x333   : > { %1896 = vrot.lane.b32.xlu0 %v5416_v47, %s5472_s27  ;;  %5203 = vmatprep.mubr.msk.bf16.mxu1 %vm3232_vm12, %v3174_v45  ;;  %v10005_v47 = vld [vmem:[#allocation65_spill] sm:$0xff] }
 0x334   : > { %v1883_v15 = vpop.permute.xlu1 %1882  ;;  %5204 = vmatmul.mubr.msk.bf16.gmra.mxu1 %vm3232_vm12, %v3176_v6  ;;  %v5418_v6 = vld [vmem:[%s5509_s17 + $0x1a8] sm:$0xff]  }
 0x335   : > { %v1881_v52 = vpop.permute.xlu0 %1880 }
 0x336   : > { %2037 = vrot.lane.b32.xlu1 %v9993_v25, %s5473_s28  ;;  %v2876_v11 = vsel %vm2854_vm9, %v2755_v59, %v1881_v52  ;;  %v10006_v52 = vld [vmem:[#allocation142_spill] sm:$0xff]  ;;  %v5420_v25 = vld [vmem:[%s5509_s17 + $0x140] sm:$0xff]   ;;  %v10014_v59 = vld [vmem:[#allocation160_spill] sm:$0xff] }
 0x337   : > { %2035 = vrot.lane.b32.xlu0 %v9995_v44, %s5473_s28  ;;  %v2330_v57 = vsel %vm9420_vm4, %v5420_v25, %v10007_v43  ;;  %v10008_v44 = vld [vmem:[#allocation217_spill] sm:$0xff] }
 0x338   : > { %v2022_v14 = vpop.permute.xlu1 %2021  ;;  %v2452_v39 = vsel %vm2370_vm5, %v2330_v57, %v10010_v38  ;;  %v10022_v57 = vld [vmem:[#allocation286_spill] sm:$0xff] }
 0x339   : > { %v2020_v34 = vpop.permute.xlu0 %2019 }
 0x33a   : > { %1826 = vrot.lane.b32.xlu1 %v9992_v27, %s5470_s22  ;;  %v2997_v24 = vsel %vm9419_vm10, %v2876_v11, %v2020_v34  ;;  %v2757_v27 = vsel %vm2733_vm8, %v2636_v58, %v7426_v3  ;;  %v10011_v34 = vld [vmem:[#allocation42_spill] sm:$0xff] }
 0x33b   : > { %2164 = vrot.lane.b32.xlu0 %v10000_v42, %s5474_s29  ;;  %v2878_v33 = vsel %vm2854_vm9, %v2757_v27, %v1883_v15  ;;  %v2332_v15 = vsel %vm9420_vm4, %v7490_v62, %v10006_v52  ;;  %v2573_v62 = vsel %vm2491_vm6, %v2452_v39, %v10012_v35  ;;  %v10015_v42 = vld [vmem:[#allocation143_spill] sm:$0xff] }
 0x33c   : > { %v1811_v7 = vpop.permute.xlu1 %1810  ;;  %v2999_v51 = vsel %vm9419_vm10, %v2878_v33, %v2022_v14  ;;  %v2454_v14 = vsel %vm2370_vm5, %v2332_v15, %v10008_v44  ;;  %v2694_v18 = vsel %vm2612_vm7, %v2573_v62, %v10015_v42  ;;  %v10021_v15 = vld [vmem:[#allocation14_spill] sm:$0xff]  ;;  %v10024_v39 = vld [vmem:[#allocation115_spill] sm:$0xff] }
 0x33d   : > { %v2149_v54 = vpop.permute.xlu0 %2148  ;;  %v2575_v2 = vsel %vm2491_vm6, %v2454_v14, %v10011_v34  ;;  %v2815_v11 = vsel %vm2733_vm8, %v2694_v18, %v1811_v7  ;;  %v5424_v14 = vld [vmem:[%s5509_s17 + $0x68] sm:$0xff]  }
 0x33e   : > { %1828 = vrot.lane.b32.xlu1 %v9990_v37, %s5470_s22  ;;  %v3118_v9 = vsel %vm3096_vm11, %v2997_v24, %v2149_v54  ;;  %v2696_v20 = vsel %vm2612_vm7, %v2575_v2, %v10013_v22  ;;  %v10025_v2 = vld [vmem:[#allocation185_spill] sm:$0xff] }
 0x33f   : > { %2166 = vrot.lane.b32.xlu0 %v10004_v23, %s5474_s29  ;;  %5147 = vmatprep.mubr.msk.bf16.mxu0 %vm3232_vm12, %v3118_v9  ;;  %v5421_v23 = vld [vmem:[%s5509_s17 + $0xc8] sm:$0xff]   ;;  %v10026_v22 = vld [vmem:[#allocation13_spill] sm:$0xff] }
 0x340   : > { %v1813_v29 = vpop.permute.xlu1 %1812 }
 0x341   : > { %v2151_v37 = vpop.permute.xlu0 %2150  ;;  %v2817_v50 = vsel %vm2733_vm8, %v2696_v20, %v1813_v29  ;;  %v5422_v29 = vld [vmem:[%s5509_s17 + $0xc0] sm:$0xff]  }
 0x342   : > { %1958 = vrot.lane.b32.xlu1 %v5418_v6, %s5472_s27  ;;  %v3120_v1 = vsel %vm3096_vm11, %v2999_v51, %v2151_v37  ;;  %v10017_v37 = vld [vmem:[#allocation27_spill] sm:$0xff] }
 0x343   : > { %1956 = vrot.lane.b32.xlu0 %v5419_v5, %s5472_s27  ;;  %5148 = vmatmul.mubr.msk.bf16.gmra.mxu0 %vm3232_vm12, %v3120_v1  ;;  %v5423_v6 = vld [vmem:[%s5509_s17 + $0x60] sm:$0xff]   ;;  %v10018_v1 = vld [vmem:[#allocation92_spill] sm:$0xff] }
 0x344   : > { %v1943_v3 = vpop.permute.xlu1 %1942  ;;  %v2274_v5 = vsel %vm9420_vm4, %v5423_v6, %v10018_v1  ;;  %v10033_v1 = vld [vmem:[#allocation69_spill] sm:$0xff] }
 0x345   : > { %v1941_v45 = vpop.permute.xlu0 %1940  ;;  %v2938_v63 = vsel %vm2854_vm9, %v2817_v50, %v1943_v3  ;;  %v10019_v3 = vld [vmem:[#allocation28_spill] sm:$0xff] }
 0x346   : > { %2097 = vrot.lane.b32.xlu1 %v10005_v47, %s5473_s28  ;;  %v2936_v54 = vsel %vm2854_vm9, %v2815_v11, %v1941_v45  ;;  %v10020_v47 = vld [vmem:[#allocation186_spill] sm:$0xff] }
 0x347   : > { %2095 = vrot.lane.b32.xlu0 %v10009_v19, %s5473_s28  ;;  %v2396_v52 = vsel %vm2370_vm5, %v2274_v5, %v10020_v47  ;;  %v10023_v19 = vld [vmem:[#allocation91_spill] sm:$0xff]  ;;  %v10035_v47 = vld [vmem:[#allocation46_spill] sm:$0xff] }
 0x348   : > { %v2082_v60 = vpop.permute.xlu1 %2081  ;;  %v2517_v25 = vsel %vm2491_vm6, %v2396_v52, %v10021_v15  ;;  %v10036_v15 = vld [vmem:[#allocation49_spill] sm:$0xff] }
 0x349   : > { %v2080_v32 = vpop.permute.xlu0 %2079  ;;  %v3059_v26 = vsel %vm9419_vm10, %v2938_v63, %v2082_v60  ;;  %v2638_v44 = vsel %vm2612_vm7, %v2517_v25, %v10022_v57  ;;  %v2276_v60 = vsel %vm9420_vm4, %v5424_v14, %v10023_v19  ;;  %v10028_v63 = vld [vmem:[#allocation113_spill] sm:$0xff]  ;;  %v10038_v57 = vld [vmem:[#allocation163_spill] sm:$0xff] }
 0x34a   : > { %2226 = vrot.lane.b32.xlu1 %v10014_v59, %s5474_s29  ;;  %v3057_v58 = vsel %vm9419_vm10, %v2936_v54, %v2080_v32  ;;  %v2759_v38 = vsel %vm2733_vm8, %v2638_v44, %v7436_v31  ;;  %v2398_v35 = vsel %vm2370_vm5, %v2276_v60, %v10025_v2  ;;  %v10027_v31 = vld [vmem:[#allocation285_spill] sm:$0xff]  ;;  %v10039_v44 = vld [vmem:[#allocation147_spill] sm:$0xff] }
 0x34b   : > { %2224 = vrot.lane.b32.xlu0 %v10016_v28, %s5474_s29  ;;  %v2519_v20 = vsel %vm2491_vm6, %v2398_v35, %v10026_v22  ;;  %v10037_v25 = vld [vmem:[#allocation145_spill] sm:$0xff] }
 0x34c   : > { %v2211_v24 = vpop.permute.xlu1 %2210  ;;  %v2640_v18 = vsel %vm2612_vm7, %v2519_v20, %v10027_v31  ;;  %v5428_v31 = vld [vmem:[%s5509_s17 + $0xd0] sm:$0xff]  }
 0x34d   : > { %v3180_v9 = vsel %vm3096_vm11, %v3059_v26, %v2211_v24  ;;  %v2209_v27 = vpop.permute.xlu0 %2208  ;;  %v2761_v11 = vsel %vm2733_vm8, %v2640_v18, %v7434_v13 }
 0x34e   : > { %1902 = vrot.lane.b32.xlu1 %v5421_v23, %s5472_s27  ;;  %v3178_v7 = vsel %vm3096_vm11, %v3057_v58, %v2209_v27  ;;  %v10029_v23 = vld [vmem:[#allocation68_spill] sm:$0xff] }
 0x34f   : > { %1900 = vrot.lane.b32.xlu0 %v5422_v29, %s5472_s27  ;;  %5207 = vmatprep.mubr.msk.bf16.mxu1 %vm3232_vm12, %v3178_v7  ;;  %v10030_v7 = vld [vmem:[#allocation146_spill] sm:$0xff] }
 0x350   : > { %v1887_v33 = vpop.permute.xlu1 %1886  ;;  %5208 = vmatmul.mubr.msk.bf16.gmra.mxu1 %vm3232_vm12, %v3180_v9  ;;  %v5426_v9 = vld [vmem:[%s5509_s17 + $0x1b0] sm:$0xff]   ;;  %v2336_v29 = vsel %vm9420_vm4, %v7541_v21, %v10030_v7 }
 0x351   : > { %v1885_v51 = vpop.permute.xlu0 %1884  ;;  %v2882_v24 = vsel %vm2854_vm9, %v2761_v11, %v1887_v33  ;;  %v10031_v33 = vld [vmem:[#allocation148_spill] sm:$0xff]  ;;  %v10041_v11 = vld [vmem:[#allocation29_spill] sm:$0xff] }
 0x352   : > { %2041 = vrot.lane.b32.xlu1 %v10017_v37, %s5473_s28  ;;  %v2880_v62 = vsel %vm2854_vm9, %v2759_v38, %v1885_v51  ;;  %v2334_v51 = vsel %vm9420_vm4, %v7546_v53, %v10031_v33  ;;  %v10032_v37 = vld [vmem:[#allocation219_spill] sm:$0xff]  ;;  %v10047_v33 = vld [vmem:[#allocation93_spill] sm:$0xff] }
 0x353   : > { %2039 = vrot.lane.b32.xlu0 %v10019_v3, %s5473_s28  ;;  %v2458_v6 = vsel %vm2370_vm5, %v2336_v29, %v10032_v37  ;;  %v10034_v3 = vld [vmem:[#allocation220_spill] sm:$0xff]  ;;  %v5430_v29 = vld [vmem:[%s5509_s17 + $0x78] sm:$0xff]  }
 0x354   : > { %v2026_v45 = vpop.permute.xlu1 %2025  ;;  %v2579_v52 = vsel %vm2491_vm6, %v2458_v6, %v10035_v47  ;;  %v10048_v6 = vld [vmem:[#allocation119_spill] sm:$0xff] }
 0x355   : > { %v2024_v43 = vpop.permute.xlu0 %2023  ;;  %v3003_v54 = vsel %vm9419_vm10, %v2882_v24, %v2026_v45  ;;  %v2456_v45 = vsel %vm2370_vm5, %v2334_v51, %v10034_v3  ;;  %v2700_v53 = vsel %vm2612_vm7, %v2579_v52, %v10037_v25  ;;  %v2280_v51 = vsel %vm9420_vm4, %v5430_v29, %v10047_v33  ;;  %v10050_v47 = vld [vmem:[#allocation15_spill] sm:$0xff] }
 0x356   : > { %1830 = vrot.lane.b32.xlu1 %v10016_v28, %s5470_s22  ;;  %v3001_v32 = vsel %vm9419_vm10, %v2880_v62, %v2024_v43  ;;  %v2577_v21 = vsel %vm2491_vm6, %v2456_v45, %v10036_v15 }
 0x357   : > { %2168 = vrot.lane.b32.xlu0 %v10024_v39, %s5474_s29  ;;  %v2698_v14 = vsel %vm2612_vm7, %v2577_v21, %v10039_v44  ;;  %v10040_v39 = vld [vmem:[#allocation165_spill] sm:$0xff] }
 0x358   : > { %v1815_v34 = vpop.permute.xlu1 %1814  ;;  %v10052_v44 = vld [vmem:[#allocation117_spill] sm:$0xff] }
 0x359   : > { %v2153_v42 = vpop.permute.xlu0 %2152  ;;  %v2819_v60 = vsel %vm2733_vm8, %v2698_v14, %v1815_v34 }
 0x35a   : > { %1832 = vrot.lane.b32.xlu1 %v10014_v59, %s5470_s22  ;;  %v3122_v50 = vsel %vm3096_vm11, %v3001_v32, %v2153_v42  ;;  %v5425_v59 = vld [vmem:[%s5509_s17 + $0x1b8] sm:$0xff]  }
 0x35b   : > { %2170 = vrot.lane.b32.xlu0 %v10028_v63, %s5474_s29  ;;  %5151 = vmatprep.mubr.msk.bf16.mxu0 %vm3232_vm12, %v3122_v50  ;;  %v5427_v42 = vld [vmem:[%s5509_s17 + $0xd8] sm:$0xff]   ;;  %v5429_v63 = vld [vmem:[%s5509_s17 + $0x70] sm:$0xff]  }
 0x35c   : > { %v1817_v28 = vpop.permute.xlu1 %1816 }
 0x35d   : > { %v2155_v26 = vpop.permute.xlu0 %2154  ;;  %v2821_v19 = vsel %vm2733_vm8, %v2700_v53, %v1817_v28  ;;  %v10042_v28 = vld [vmem:[#allocation94_spill] sm:$0xff] }
 0x35e   : > { %1962 = vrot.lane.b32.xlu1 %v5425_v59, %s5472_s27  ;;  %v3124_v58 = vsel %vm3096_vm11, %v3003_v54, %v2155_v26  ;;  %v2278_v24 = vsel %vm9420_vm4, %v5429_v63, %v10042_v28  ;;  %v10043_v54 = vld [vmem:[#allocation30_spill] sm:$0xff]  ;;  %v10044_v59 = vld [vmem:[#allocation188_spill] sm:$0xff] }
 0x35f   : > { %1960 = vrot.lane.b32.xlu0 %v5426_v9, %s5472_s27  ;;  %5152 = vmatmul.mubr.msk.bf16.gmra.mxu0 %vm3232_vm12, %v3124_v58  ;;  %v2400_v58 = vsel %vm2370_vm5, %v2278_v24, %v10044_v59  ;;  %v10045_v9 = vld [vmem:[#allocation241_spill] sm:$0xff]  ;;  %v10059_v28 = vld [vmem:[#allocation262_spill] sm:$0xff]  ;;  %v10061_v59 = vld [vmem:[#allocation167_spill] sm:$0xff] }
 0x360   : > { %v1947_v13 = vpop.permute.xlu1 %1946 }
 0x361   : > { %v1945_v27 = vpop.permute.xlu0 %1944  ;;  %v2942_v38 = vsel %vm2854_vm9, %v2821_v19, %v1947_v13  ;;  %v2521_v13 = vsel %vm2491_vm6, %v2400_v58, %v10045_v9  ;;  %v10062_v58 = vld [vmem:[#allocation305_spill] sm:$0xff] }
 0x362   : > { %2101 = vrot.lane.b32.xlu1 %v10029_v23, %s5473_s28  ;;  %v2940_v35 = vsel %vm2854_vm9, %v2819_v60, %v1945_v27  ;;  %v10046_v23 = vld [vmem:[#allocation288_spill] sm:$0xff] }
 0x363   : > { %2099 = vrot.lane.b32.xlu0 %v10033_v1, %s5473_s28  ;;  %v2642_v7 = vsel %vm2612_vm7, %v2521_v13, %v10046_v23 }
 0x364   : > { %v2086_v5 = vpop.permute.xlu1 %2085  ;;  %v2763_v37 = vsel %vm2733_vm8, %v2642_v7, %v7444_v55  ;;  %v10051_v55 = vld [vmem:[#allocation287_spill] sm:$0xff]  ;;  %v10063_v7 = vld [vmem:[#allocation169_spill] sm:$0xff] }
 0x365   : > { %v2084_v43 = vpop.permute.xlu0 %2083  ;;  %v3063_v62 = vsel %vm9419_vm10, %v2942_v38, %v2086_v5  ;;  %v10049_v5 = vld [vmem:[#allocation187_spill] sm:$0xff] }
 0x366   : > { %2230 = vrot.lane.b32.xlu1 %v10038_v57, %s5474_s29  ;;  %v3061_v22 = vsel %vm9419_vm10, %v2940_v35, %v2084_v43  ;;  %v2402_v3 = vsel %vm2370_vm5, %v2280_v51, %v10049_v5  ;;  %v5433_v5 = vld [vmem:[%s5509_s17 + $0xe8] sm:$0xff]  }
 0x367   : > { %2228 = vrot.lane.b32.xlu0 %v10040_v39, %s5474_s29  ;;  %v2523_v52 = vsel %vm2491_vm6, %v2402_v3, %v10050_v47  ;;  %v5434_v3 = vld [vmem:[%s5509_s17 + $0xe0] sm:$0xff]  }
 0x368   : > { %v2215_v2 = vpop.permute.xlu1 %2214  ;;  %v2644_v25 = vsel %vm2612_vm7, %v2523_v52, %v10051_v55  ;;  %v10065_v55 = vld [vmem:[#allocation96_spill] sm:$0xff] }
 0x369   : > { %v3184_v20 = vsel %vm3096_vm11, %v3063_v62, %v2215_v2  ;;  %v2213_v32 = vpop.permute.xlu0 %2212  ;;  %v2765_v43 = vsel %vm2733_vm8, %v2644_v25, %v7442_v61  ;;  %v5432_v2 = vld [vmem:[%s5509_s17 + $0x1c0] sm:$0xff]   ;;  %v10053_v62 = vld [vmem:[#allocation70_spill] sm:$0xff]  ;;  %v2282_v25 = vsel %vm9420_vm4, %v7690_v16, %v10065_v55 }
 0x36a   : > { %1906 = vrot.lane.b32.xlu1 %v5427_v42, %s5472_s27  ;;  %v3182_v34 = vsel %vm3096_vm11, %v3061_v22, %v2213_v32  ;;  %v10054_v22 = vld [vmem:[#allocation40_spill] sm:$0xff]  ;;  %v10055_v32 = vld [vmem:[#allocation150_spill] sm:$0xff]  ;;  %v10083_v55 = vld [vmem:[#allocation223_spill] sm:$0xff] }
 0x36b   : > { %1904 = vrot.lane.b32.xlu0 %v5428_v31, %s5472_s27  ;;  %5211 = vmatprep.mubr.msk.bf16.mxu1 %vm3232_vm12, %v3182_v34  ;;  %v2338_v42 = vsel %vm9420_vm4, %v7642_v4, %v10055_v32  ;;  %v10056_v34 = vld [vmem:[#allocation221_spill] sm:$0xff]  ;;  %v10069_v16 = vld [vmem:[#allocation290_spill] sm:$0xff] }
 0x36c   : > { %v1891_v18 = vpop.permute.xlu1 %1890  ;;  %5212 = vmatmul.mubr.msk.bf16.gmra.mxu1 %vm3232_vm12, %v3184_v20  ;;  %v2340_v20 = vsel %vm9420_vm4, %v7636_v10, %v10054_v22 }
 0x36d   : > { %v1889_v50 = vpop.permute.xlu0 %1888  ;;  %v2886_v19 = vsel %vm2854_vm9, %v2765_v43, %v1891_v18  ;;  %v2462_v31 = vsel %vm2370_vm5, %v2340_v20, %v10056_v34  ;;  %v10057_v18 = vld [vmem:[#allocation71_spill] sm:$0xff] }
 0x36e   : > { %2045 = vrot.lane.b32.xlu1 %v10041_v11, %s5473_s28  ;;  %v2884_v45 = vsel %vm2854_vm9, %v2763_v37, %v1889_v50  ;;  %v10058_v11 = vld [vmem:[#allocation222_spill] sm:$0xff]  ;;  %v2583_v24 = vsel %vm2491_vm6, %v2462_v31, %v10059_v28  ;;  %v10072_v20 = vld [vmem:[#allocation123_spill] sm:$0xff] }
 0x36f   : > { %2043 = vrot.lane.b32.xlu0 %v10043_v54, %s5473_s28  ;;  %v2460_v63 = vsel %vm2370_vm5, %v2338_v42, %v10058_v11  ;;  %v10060_v54 = vld [vmem:[#allocation263_spill] sm:$0xff]  ;;  %v2704_v4 = vsel %vm2612_vm7, %v2583_v24, %v7309_v17 }
 0x370   : > { %v2030_v26 = vpop.permute.xlu1 %2029  ;;  %v2581_v10 = vsel %vm2491_vm6, %v2460_v63, %v10060_v54  ;;  %v10073_v42 = vld [vmem:[#allocation191_spill] sm:$0xff]  ;;  %v10075_v63 = vld [vmem:[#allocation289_spill] sm:$0xff] }
 0x371   : > { %v2028_v27 = vpop.permute.xlu0 %2027  ;;  %v3007_v60 = vsel %vm9419_vm10, %v2886_v19, %v2030_v26  ;;  %v2702_v9 = vsel %vm2612_vm7, %v2581_v10, %v10062_v58  ;;  %v10076_v54 = vld [vmem:[#allocation319_spill] sm:$0xff] }
 0x372   : > { %1834 = vrot.lane.b32.xlu1 %v10040_v39, %s5470_s22  ;;  %v3005_v15 = vsel %vm9419_vm10, %v2884_v45, %v2028_v27 }
 0x373   : > { %2172 = vrot.lane.b32.xlu0 %v10048_v6, %s5474_s29 }
 0x374   : > { %v1819_v1 = vpop.permute.xlu1 %1818 }
 0x375   : > { %v2157_v21 = vpop.permute.xlu0 %2156  ;;  %v2823_v27 = vsel %vm2733_vm8, %v2702_v9, %v1819_v1 }
 0x376   : > { %1836 = vrot.lane.b32.xlu1 %v10038_v57, %s5470_s22  ;;  %v3126_v53 = vsel %vm3096_vm11, %v3005_v15, %v2157_v21  ;;  %v5431_v57 = vld [vmem:[%s5509_s17 + $0x1c8] sm:$0xff]   ;;  %v10064_v15 = vld [vmem:[#allocation31_spill] sm:$0xff] }
 0x377   : > { %2174 = vrot.lane.b32.xlu0 %v10052_v44, %s5474_s29  ;;  %5155 = vmatprep.mubr.msk.bf16.mxu0 %vm3232_vm12, %v3126_v53  ;;  %v10066_v53 = vld [vmem:[#allocation32_spill] sm:$0xff] }
 0x378   : > { %v1821_v14 = vpop.permute.xlu1 %1820  ;;  %v10067_v44 = vld [vmem:[#allocation192_spill] sm:$0xff] }
 0x379   : > { %v2159_v38 = vpop.permute.xlu0 %2158  ;;  %v2825_v13 = vsel %vm2733_vm8, %v2704_v4, %v1821_v14  ;;  %v2404_v14 = vsel %vm2370_vm5, %v2282_v25, %v10067_v44  ;;  %v10077_v4 = vld [vmem:[#allocation121_spill] sm:$0xff] }
 0x37a   : > { %1966 = vrot.lane.b32.xlu1 %v5431_v57, %s5472_s27  ;;  %v3128_v39 = vsel %vm3096_vm11, %v3007_v60, %v2159_v38  ;;  %v10068_v60 = vld [vmem:[#allocation243_spill] sm:$0xff] }
 0x37b   : > { %1964 = vrot.lane.b32.xlu0 %v5432_v2, %s5472_s27  ;;  %5156 = vmatmul.mubr.msk.bf16.gmra.mxu0 %vm3232_vm12, %v3128_v39  ;;  %v2525_v38 = vsel %vm2491_vm6, %v2404_v14, %v10068_v60  ;;  %v10086_v14 = vld [vmem:[#allocation264_spill] sm:$0xff]  ;;  %v10087_v60 = vld [vmem:[#allocation265_spill] sm:$0xff] }
 0x37c   : > { %v1951_v61 = vpop.permute.xlu1 %1950  ;;  %v2646_v39 = vsel %vm2612_vm7, %v2525_v38, %v10069_v16 }
 0x37d   : > { %v1949_v35 = vpop.permute.xlu0 %1948  ;;  %v2946_v23 = vsel %vm2854_vm9, %v2825_v13, %v1951_v61  ;;  %v10070_v61 = vld [vmem:[#allocation95_spill] sm:$0xff] }
 0x37e   : > { %2105 = vrot.lane.b32.xlu1 %v10053_v62, %s5473_s28  ;;  %v2944_v17 = vsel %vm2854_vm9, %v2823_v27, %v1949_v35  ;;  %v2284_v35 = vsel %vm9420_vm4, %v7684_v0, %v10070_v61  ;;  %v10071_v62 = vld [vmem:[#allocation320_spill] sm:$0xff]  ;;  %v10078_v27 = vld [vmem:[#allocation66_spill] sm:$0xff] }
 0x37f   : > { %2103 = vrot.lane.b32.xlu0 %v10057_v18, %s5473_s28  ;;  %v2767_v22 = vsel %vm2733_vm8, %v2646_v39, %v10071_v62  ;;  %v2406_v34 = vsel %vm2370_vm5, %v2284_v35, %v10073_v42  ;;  %v10074_v18 = vld [vmem:[#allocation242_spill] sm:$0xff]  ;;  %v10089_v39 = vld [vmem:[#allocation80_spill] sm:$0xff] }
 0x380   : > { %v2090_v50 = vpop.permute.xlu1 %2089 }
 0x381   : > { %v2088_v26 = vpop.permute.xlu0 %2087  ;;  %v3067_v33 = vsel %vm9419_vm10, %v2946_v23, %v2090_v50  ;;  %v2527_v50 = vsel %vm2491_vm6, %v2406_v34, %v10074_v18 }
 0x382   : > { %2234 = vrot.lane.b32.xlu1 %v10061_v59, %s5474_s29  ;;  %v3065_v51 = vsel %vm9419_vm10, %v2944_v17, %v2088_v26  ;;  %v2648_v28 = vsel %vm2612_vm7, %v2527_v50, %v10075_v63 }
 0x383   : > { %2232 = vrot.lane.b32.xlu0 %v10063_v7, %s5474_s29  ;;  %v2769_v10 = vsel %vm2733_vm8, %v2648_v28, %v10076_v54  ;;  %v5438_v28 = vld [vmem:[%s5509_s17 + $0xf0] sm:$0xff]  }
 0x384   : > { %v2219_v29 = vpop.permute.xlu1 %2218 }
 0x385   : > { %v3188_v37 = vsel %vm3096_vm11, %v3067_v33, %v2219_v29  ;;  %v2217_v6 = vpop.permute.xlu0 %2216  ;;  %v8327_v29 = vld [vmem:[%s5509_s17 + $0x1e0] sm:$0xff]   ;;  %v5436_v33 = vld [vmem:[%s5509_s17 + $0x1d0] sm:$0xff]  }
 0x386   : > { %1910 = vrot.lane.b32.xlu1 %v5433_v5, %s5472_s27  ;;  %v3186_v1 = vsel %vm3096_vm11, %v3065_v51, %v2217_v6  ;;  %v1726_v17 = vrot.slane %v8327_v29, 1  ;;  %v10079_v5 = vld [vmem:[#allocation72_spill] sm:$0xff] }
 0x387   : > { %1908 = vrot.lane.b32.xlu0 %v5434_v3, %s5472_s27  ;;  %5215 = vmatprep.mubr.msk.bf16.mxu1 %vm3232_vm12, %v3186_v1  ;;  %v10080_v1 = vld [vmem:[#allocation43_spill] sm:$0xff] }
 0x388   : > { %v1895_v45 = vpop.permute.xlu1 %1894  ;;  %v5129_v47 = vpop.f32.mrf.mxu0  ;;  %5216 = vmatmul.mubr.msk.bf16.gmra.mxu1 %vm3232_vm12, %v3188_v37  ;;  %v2344_v3 = vsel %vm9420_vm4, %v7739_v46, %v10080_v1  ;;  %v10096_v1 = vld [vmem:[#allocation292_spill] sm:$0xff] }
 0x389   : > { %3876 = vst.msk [vmem:[#allocation2 + $0x10] sm:$0xff] %vm3873_vm13, %v5129_v47  ;;  %v1893_v52 = vpop.permute.xlu0 %1892  ;;  %v2890_v58 = vsel %vm2854_vm9, %v2769_v10, %v1895_v45  ;;  %v10081_v47 = vld [vmem:[#allocation170_spill] sm:$0xff]  ;;  %v2466_v25 = vsel %vm2370_vm5, %v2344_v3, %v10083_v55 }
 0x38a   : > { %2049 = vrot.lane.b32.xlu1 %v10064_v15, %s5473_s28  ;;  %v3394_v21 = vpop.f32.mrf.mxu0  ;;  %v2888_v31 = vsel %vm2854_vm9, %v2767_v22, %v1893_v52  ;;  %v8344_v52 = vsel %vm1212_vm1, %v10081_v47, %v1726_v17  ;;  %v10082_v15 = vld [vmem:[#allocation152_spill] sm:$0xff]  ;;  %v10090_v22 = vld [vmem:[#allocation173_spill] sm:$0xff]  ;;  %v10098_v55 = vld [vmem:[#allocation322_spill] sm:$0xff] }
 0x38b   : > { %3874 = vst.msk [vmem:[#allocation2] sm:$0xff] %vm3873_vm13, %v3394_v21  ;;  %2047 = vrot.lane.b32.xlu0 %v10066_v53, %s5473_s28  ;;  %v2342_v21 = vsel %vm9420_vm4, %v7752_v36, %v10082_v15  ;;  %v10084_v53 = vld [vmem:[#allocation74_spill] sm:$0xff] }
 0x38c   : > { %v2034_v43 = vpop.permute.xlu1 %2033  ;;  %v5130_v19 = vpop.f32.mrf.mxu0  ;;  %v10097_v15 = vld [vmem:[#allocation98_spill] sm:$0xff] }
 0x38d   : > { %3877 = vst.msk [vmem:[#allocation2 + $0x18] sm:$0xff] %vm3873_vm13, %v5130_v19  ;;  %v2032_v57 = vpop.permute.xlu0 %2031  ;;  %v2587_v19 = vsel %vm2491_vm6, %v2466_v25, %v10086_v14 }
 0x38e   : > { %1838 = vrot.lane.b32.xlu1 %v10063_v7, %s5470_s22  ;;  %v3397_v2 = vpop.f32.mrf.mxu0  ;;  %v3009_v11 = vsel %vm9419_vm10, %v2888_v31, %v2032_v57  ;;  %v10088_v57 = vld [vmem:[#allocation306_spill] sm:$0xff] }
 0x38f   : > { %3875 = vst.msk [vmem:[#allocation2 + $0x8] sm:$0xff] %vm3873_vm13, %v3397_v2  ;;  %2176 = vrot.lane.b32.xlu0 %v10072_v20, %s5474_s29  ;;  %v2708_v36 = vsel %vm2612_vm7, %v2587_v19, %v10088_v57  ;;  %v10101_v57 = vld [vmem:[#allocation244_spill] sm:$0xff] }
 0x390   : > { %v1823_v32 = vpop.permute.xlu1 %1822 }
 0x391   : > { %v2161_v0 = vpop.permute.xlu0 %2160 }
 0x392   : > { %1840 = vrot.lane.b32.xlu1 %v10061_v59, %s5470_s22  ;;  %v3130_v24 = vsel %vm3096_vm11, %v3009_v11, %v2161_v0  ;;  %v3011_v59 = vsel %vm9419_vm10, %v2890_v58, %v2034_v43  ;;  %v10085_v43 = vld [vmem:[#allocation224_spill] sm:$0xff]  ;;  %v8388_v58 = vld [vmem:[%s5509_s17 + $0x1f0] sm:$0xff]  }
 0x393   : > { %2178 = vrot.lane.b32.xlu0 %v10077_v4, %s5474_s29  ;;  %5159 = vmatprep.mubr.msk.bf16.mxu0 %vm3232_vm12, %v3130_v24  ;;  %v2464_v44 = vsel %vm2370_vm5, %v2342_v21, %v10085_v43  ;;  %v10091_v4 = vld [vmem:[#allocation33_spill] sm:$0xff]  ;;  %v1984_v47 = vshll.u32 %v8388_v58, 16  ;;  %v2288_v21 = vsel %vm9420_vm4, %v7787_v12, %v10097_v15 }
 0x394   : > { %v1825_v26 = vpop.permute.xlu1 %1824  ;;  %v5189_v9 = vpop.f32.mrf.mxu1  ;;  %v2585_v38 = vsel %vm2491_vm6, %v2464_v44, %v10087_v60  ;;  %v10100_v44 = vld [vmem:[#allocation193_spill] sm:$0xff] }
 0x395   : > { %3936 = vst.msk [vmem:[#allocation2 + $0x1f0] sm:$0xff] %vm3873_vm13, %v5189_v9  ;;  %v2163_v13 = vpop.permute.xlu0 %2162  ;;  %v2706_v2 = vsel %vm2612_vm7, %v2585_v38, %v10089_v39  ;;  %v2829_v61 = vsel %vm2733_vm8, %v2708_v36, %v1825_v26  ;;  %v10092_v9 = vld [vmem:[#allocation100_spill] sm:$0xff]  ;;  %v2410_v14 = vsel %vm2370_vm5, %v2288_v21, %v10100_v44 }
 0x396   : > { %1970 = vrot.lane.b32.xlu1 %v10078_v27, %s5472_s27  ;;  %v3132_v23 = vsel %vm3096_vm11, %v3011_v59, %v2163_v13  ;;  %v3634_v7 = vpop.f32.mrf.mxu1  ;;  %v2827_v35 = vsel %vm2733_vm8, %v2706_v2, %v1823_v32  ;;  %v5437_v32 = vld [vmem:[%s5509_s17 + $0xf8] sm:$0xff]   ;;  %v2286_v59 = vsel %vm9420_vm4, %v7800_v8, %v10092_v9  ;;  %v3996_v3 = vld [vmem:[#allocation2] ss:$2 sm:$0xff]  ;;  %v2531_v36 = vsel %vm2491_vm6, %v2410_v14, %v10101_v57 }
 0x397   : > { %3934 = vst.msk [vmem:[#allocation2 + $0x1e0] sm:$0xff] %vm3873_vm13, %v3634_v7  ;;  %1968 = vrot.lane.b32.xlu0 %v5436_v33, %s5472_s27  ;;  %5160 = vmatmul.mubr.msk.bf16.gmra.mxu0 %vm3232_vm12, %v3132_v23  ;;  %v10093_v13 = vld [vmem:[#allocation34_spill] sm:$0xff] }
 0x398   : > { %v1955_v51 = vpop.permute.xlu1 %1954  ;;  %v5190_v37 = vpop.f32.mrf.mxu1  ;;  %v10094_v23 = vld [vmem:[#allocation194_spill] sm:$0xff] }
 0x399   : > { %3937 = vst.msk [vmem:[#allocation2 + $0x1f8] sm:$0xff] %vm3873_vm13, %v5190_v37  ;;  %v1953_v6 = vpop.permute.xlu0 %1952  ;;  %v2950_v62 = vsel %vm2854_vm9, %v2829_v61, %v1955_v51  ;;  %v2408_v7 = vsel %vm2370_vm5, %v2286_v59, %v10094_v23  ;;  %v3998_v33 = vld [vmem:[#allocation2 + $0x10] ss:$2 sm:$0xff]  ;;  %v4058_v51 = vld [vmem:[#allocation2 + $0x11] ss:$2 sm:$0xff]  ;;  %v10105_v59 = vld [vmem:[#allocation271_spill] sm:$0xff] }
 0x39a   : > { %2109 = vrot.lane.b32.xlu1 %v10079_v5, %s5473_s28  ;;  %v3637_v45 = vpop.f32.mrf.mxu1  ;;  %v2948_v42 = vsel %vm2854_vm9, %v2827_v35, %v1953_v6  ;;  %v10095_v37 = vld [vmem:[#allocation245_spill] sm:$0xff]  ;;  %v10102_v35 = vld [vmem:[#allocation291_spill] sm:$0xff]  ;;  %v10114_v57 = vld [vmem:[#allocation266_spill] sm:$0xff] }
 0x39b   : > { %3935 = vst.msk [vmem:[#allocation2 + $0x1e8] sm:$0xff] %vm3873_vm13, %v3637_v45  ;;  %2107 = vrot.lane.b32.xlu0 %v10084_v53, %s5473_s28  ;;  %v2529_v6 = vsel %vm2491_vm6, %v2408_v7, %v10095_v37  ;;  %v4056_v45 = vld [vmem:[#allocation2 + $0x1] ss:$2 sm:$0xff]  ;;  %v4116_v53 = vmax.f32 %v3998_v33, %v4058_v51  ;;  %v8456_v33 = vrot.slane %v10105_v59, 1  ;;  %v2124_v51 = vrot.slane %v8388_v58, 1 }
 0x39c   : > { %v2094_v46 = vpop.permute.xlu1 %2093  ;;  %v2650_v8 = vsel %vm2612_vm7, %v2529_v6, %v10096_v1  ;;  %v4115_v12 = vmax.f32 %v3996_v3, %v4056_v45  ;;  %v10106_v23 = vld [vmem:[#allocation279_spill] sm:$0xff] }
 0x39d   : > { %v2092_v16 = vpop.permute.xlu0 %2091  ;;  %v3071_v34 = vsel %vm9419_vm10, %v2950_v62, %v2094_v46  ;;  %v2771_v25 = vsel %vm2733_vm8, %v2650_v8, %v10098_v55  ;;  %v10099_v46 = vld [vmem:[#allocation127_spill] sm:$0xff]  ;;  %v2652_v62 = vsel %vm2612_vm7, %v2531_v36, %v10102_v35  ;;  %v2125_v21 = vsel %vm1212_vm1, %v8456_v33, %v2124_v51  ;;  %v10110_v55 = vld [vmem:[#allocation154_spill] sm:$0xff] }
 0x39e   : > { %2238 = vrot.lane.b32.xlu1 %v8344_v52, %s5474_s29  ;;  %v3069_v18 = vsel %vm9419_vm10, %v2948_v42, %v2092_v16  ;;  %v8423_v16 = vld [vmem:[%s9192_s2] ss:$0 sm:$0xff]  ;;  %v4418_v1 = vld [vmem:[%s8444_s8 + $0x4] sm:$0xf] }
 0x39f   : > { %2236 = vrot.lane.b32.xlu0 %v10090_v22, %s5474_s29 }
 0x3a0   : > { %v2223_v20 = vpop.permute.xlu1 %2222  ;;  %v5133_v31 = vpop.f32.mrf.mxu0 }
 0x3a1   : > { %3880 = vst.msk [vmem:[#allocation2 + $0x30] sm:$0xff] %vm3873_vm13, %v5133_v31  ;;  %v3192_v50 = vsel %vm3096_vm11, %v3071_v34, %v2223_v20  ;;  %v2221_v11 = vpop.permute.xlu0 %2220  ;;  %v8432_v31 = vrot.slane %v1984_v47, 1  ;;  %v10109_v47 = vld [vmem:[#allocation48_spill] sm:$0xff] }
 0x3a2   : > { %1914 = vrot.lane.b32.xlu1 %v5437_v32, %s5472_s27  ;;  %v3190_v0 = vsel %vm3096_vm11, %v3069_v18, %v2221_v11  ;;  %v3410_v63 = vpop.f32.mrf.mxu0  ;;  %v10103_v18 = vld [vmem:[#allocation321_spill] sm:$0xff]  ;;  %v2348_v15 = vsel %vm9420_vm4, %v7855_v40, %v10109_v47 }
 0x3a3   : > { %3878 = vst.msk [vmem:[#allocation2 + $0x20] sm:$0xff] %vm3873_vm13, %v3410_v63  ;;  %1912 = vrot.lane.b32.xlu0 %v5438_v28, %s5472_s27  ;;  %5219 = vmatprep.mubr.msk.bf16.mxu1 %vm3232_vm12, %v3190_v0  ;;  %v10104_v0 = vld [vmem:[#allocation125_spill] sm:$0xff]  ;;  %v1987_v7 = vsel %vm609_vm0, %v10106_v23, %v8432_v31  ;;  %v10119_v23 = vld [vmem:[#allocation104_spill] sm:$0xff] }
 0x3a4   : > { %v1899_v24 = vpop.permute.xlu1 %1898  ;;  %v5134_v54 = vpop.f32.mrf.mxu0  ;;  %5220 = vmatmul.mubr.msk.bf16.gmra.mxu1 %vm3232_vm12, %v3192_v50  ;;  %v2773_v50 = vsel %vm2733_vm8, %v2652_v62, %v10103_v18 }
 0x3a5   : > { %3881 = vst.msk [vmem:[#allocation2 + $0x38] sm:$0xff] %vm3873_vm13, %v5134_v54  ;;  %v1897_v10 = vpop.permute.xlu0 %1896  ;;  %v2894_v63 = vsel %vm2854_vm9, %v2773_v50, %v1899_v24 }
 0x3a6   : > { %2053 = vrot.lane.b32.xlu1 %v10091_v4, %s5473_s28  ;;  %v3413_v26 = vpop.f32.mrf.mxu0  ;;  %v2892_v60 = vsel %vm2854_vm9, %v2771_v25, %v1897_v10  ;;  %v2346_v25 = vsel %vm9420_vm4, %v7867_v48, %v10110_v55  ;;  %v1729_v48 = vsel %vm1212_vm1, %v1726_v17, %v8456_v33  ;;  %v10124_v55 = vld [vmem:[#allocation294_spill] sm:$0xff] }
 0x3a7   : > { %3879 = vst.msk [vmem:[#allocation2 + $0x28] sm:$0xff] %vm3873_vm13, %v3413_v26  ;;  %2051 = vrot.lane.b32.xlu0 %v10093_v13, %s5473_s28 }
 0x3a8   : > { %v2038_v27 = vpop.permute.xlu1 %2037 }
 0x3a9   : > { %v2036_v5 = vpop.permute.xlu0 %2035  ;;  %v3015_v26 = vsel %vm9419_vm10, %v2894_v63, %v2038_v27  ;;  %v5439_v63 = vld [vmem:[%s5509_s17 + $0x108] sm:$0xff]  }
 0x3aa   : > { %1842 = vrot.lane.b32.xlu1 %v10090_v22, %s5470_s22  ;;  %v3013_v2 = vsel %vm9419_vm10, %v2892_v60, %v2036_v5  ;;  %v10113_v60 = vld [vmem:[#allocation226_spill] sm:$0xff] }
 0x3ab   : > { %2180 = vrot.lane.b32.xlu0 %v10099_v46, %s5474_s29 }
 0x3ac   : > { %v8412_v43 = vpop.permute.xlu1 %1826  ;;  %v4148_v19 = vld [vmem:[#allocation2 + $0x30] ss:$2 sm:$0xff]  ;;  %v5193_v38 = vpop.f32.mrf.mxu1  ;;  %v4238_v22 = vld [vmem:[#allocation2 + $0x31] ss:$2 sm:$0xff] }
 0x3ad   : > { %v4206_v39 = vmax.f32 %v4116_v53, %v4148_v19  ;;  %3940 = vst.msk [vmem:[#allocation2 + $0x210] sm:$0xff] %vm3873_vm13, %v5193_v38  ;;  %v2165_v61 = vpop.permute.xlu0 %2164  ;;  %v10111_v53 = vld [vmem:[#allocation225_spill] sm:$0xff]  ;;  %v10112_v19 = vld [vmem:[#allocation280_spill] sm:$0xff]  ;;  %v2468_v38 = vsel %vm2370_vm5, %v2346_v25, %v10113_v60  ;;  %v10127_v60 = vld [vmem:[#allocation131_spill] sm:$0xff] }
 0x3ae   : > { %1844 = vrot.lane.b32.xlu1 %v8344_v52, %s5470_s22  ;;  %v4146_v20 = vld [vmem:[#allocation2 + $0x20] ss:$2 sm:$0xff]  ;;  %v3134_v42 = vsel %vm3096_vm11, %v3013_v2, %v2165_v61  ;;  %v3650_v34 = vpop.f32.mrf.mxu1  ;;  %v4236_v28 = vld [vmem:[#allocation2 + $0x21] ss:$2 sm:$0xff]  ;;  %v2470_v46 = vsel %vm2370_vm5, %v2348_v15, %v10111_v53 }
 0x3af   : > { %v4296_v11 = vmax.f32 %v4206_v39, %v4238_v22  ;;  %v4205_v32 = vmax.f32 %v4115_v12, %v4146_v20  ;;  %3938 = vst.msk [vmem:[#allocation2 + $0x200] sm:$0xff] %vm3873_vm13, %v3650_v34  ;;  %2182 = vrot.lane.b32.xlu0 %v10104_v0, %s5474_s29  ;;  %5163 = vmatprep.mubr.msk.bf16.mxu0 %vm3232_vm12, %v3134_v42  ;;  %v10115_v39 = vld [vmem:[#allocation267_spill] sm:$0xff]  ;;  %v10117_v22 = vld [vmem:[#allocation308_spill] sm:$0xff] }
 0x3b0   : > { %v1829_v52 = vpop.permute.xlu1 %1828  ;;  %v5194_v54 = vpop.f32.mrf.mxu1  ;;  %v2591_v36 = vsel %vm2491_vm6, %v2470_v46, %v10114_v57  ;;  %v2589_v2 = vsel %vm2491_vm6, %v2468_v38, %v10115_v39  ;;  %v10116_v61 = vld [vmem:[#allocation307_spill] sm:$0xff]  ;;  %v303_v46 = vld [vmem:[%s5509_s17 + $0x1fc] sm:$0x7] }
 0x3b1   : > { %v4332_v10 = vadd.f32 %v8423_v16, %v4296_v11  ;;  %v4295_v4 = vmax.f32 %v4205_v32, %v4236_v28  ;;  %3941 = vst.msk [vmem:[#allocation2 + $0x218] sm:$0xff] %vm3873_vm13, %v5194_v54  ;;  %v2167_v9 = vpop.permute.xlu0 %2166  ;;  %v2712_v35 = vsel %vm2612_vm7, %v2591_v36, %v10116_v61  ;;  %v2710_v20 = vsel %vm2612_vm7, %v2589_v2, %v10117_v22  ;;  %v10128_v57 = vld [vmem:[#allocation246_spill] sm:$0xff]  ;;  %v10129_v22 = vld [vmem:[#allocation293_spill] sm:$0xff] }
 0x3b2   : > { %1974 = vrot.lane.b32.xlu1 %v10105_v59, %s5472_s27  ;;  %v3136_v24 = vsel %vm3096_vm11, %v3015_v26, %v2167_v9  ;;  %v3653_v13 = vpop.f32.mrf.mxu1  ;;  %v2831_v42 = vsel %vm2733_vm8, %v2710_v20, %v8412_v43  ;;  %v5440_v26 = vld [vmem:[%s5509_s17 + $0x100] sm:$0xff]  }
 0x3b3   : > { %v4362_v27 = vmax.f32 %v4332_v10, 0.0  ;;  %v4331_v37 = vadd.f32 %v8423_v16, %v4295_v4  ;;  %3939 = vst.msk [vmem:[#allocation2 + $0x208] sm:$0xff] %vm3873_vm13, %v3653_v13  ;;  %1972 = vrot.lane.b32.xlu0 %v8327_v29, %s5472_s27  ;;  %5164 = vmatmul.mubr.msk.bf16.gmra.mxu0 %vm3232_vm12, %v3136_v24  ;;  %v2833_v29 = vsel %vm2733_vm8, %v2712_v35, %v1829_v52  ;;  %v302_v10 = vld [vmem:[%s5509_s17 + $0x1f8] sm:$0xf]  ;;  %v304_v4 = vld [vmem:[%s5509_s17 + $0x1fc] sm:$0xf] }
 0x3b4   : > { %v1959_v6 = vpop.permute.xlu1 %1958  ;;  %v10118_v24 = vld [vmem:[#allocation35_spill] sm:$0xff]  ;;  %v8530_v13 = vcombine.low %v302_v10, %v304_v4  ;;  %v4932_v61 = vcombine.low %v302_v10, %v303_v46 }
 0x3b5   : > { %v5032_v8 = vpack.c.bf16 %v4362_v27, %v4362_v27  ;;  %v4361_v3 = vmax.f32 %v4331_v37, 0.0  ;;  %v1957_v45 = vpop.permute.xlu0 %1956  ;;  %v2954_v34 = vsel %vm2854_vm9, %v2833_v29, %v1959_v6  ;;  %v10120_v27 = vld [vmem:[#allocation36_spill] sm:$0xff] }
 0x3b6   : > { %2113 = vrot.lane.b32.xlu1 %v1987_v7, %s5473_s28  ;;  %v2952_v50 = vsel %vm2854_vm9, %v2831_v42, %v1957_v45  ;;  %v2290_v7 = vsel %vm9420_vm4, %v7915_v49, %v10119_v23  ;;  %v10121_v6 = vld [vmem:[#allocation196_spill] sm:$0xff]  ;;  %v1992_v15 = vshll.u32 %v8530_v13, 16  ;;  %v10130_v42 = vld [vmem:[#allocation323_spill] sm:$0xff] }
 0x3b7   : > { %v4419_v44 = vsel %vm8466_vm2, %v5032_v8, %v4418_v1  ;;  %v5031_v14 = vpack.c.bf16 %v4361_v3, %v4361_v3  ;;  %2111 = vrot.lane.b32.xlu0 %v10112_v19, %s5473_s28  ;;  %v2412_v1 = vsel %vm2370_vm5, %v2290_v7, %v10121_v6  ;;  %v10122_v3 = vld [vmem:[#allocation247_spill] sm:$0xff]  ;;  %v10126_v19 = vld [vmem:[#allocation324_spill] sm:$0xff] }
 0x3b8   : > { %v2098_v40 = vpop.permute.xlu1 %2097  ;;  %4420 = vst [vmem:[%s8444_s8 + $0x4] sm:$0xf] %v4419_v44  ;;  %v5137_v12 = vpop.f32.mrf.mxu0  ;;  %v2533_v45 = vsel %vm2491_vm6, %v2412_v1, %v10122_v3  ;;  %v10125_v44 = vld [vmem:[#allocation195_spill] sm:$0xff]  ;;  %v1994_v35 = vrot.slane %v1992_v15, 1 }
 0x3b9   : > { %4414 = vst.msk [vmem:[%s8444_s8] sm:$0xf] %vm4413_vm14, %v5031_v14  ;;  %v2096_v62 = vpop.permute.xlu0 %2095  ;;  %v3075_v11 = vsel %vm9419_vm10, %v2954_v34, %v2098_v40  ;;  %v2654_v25 = vsel %vm2612_vm7, %v2533_v45, %v10124_v55  ;;  %v10133_v45 = vld [vmem:[#allocation156_spill] sm:$0xff]  ;;  %v10134_v15 = vld [vmem:[#allocation227_spill] sm:$0xff] }
 0x3ba   : > { %3884 = vst.msk [vmem:[#allocation2 + $0x50] sm:$0xff] %vm3873_vm13, %v5137_v12  ;;  %2242 = vrot.lane.b32.xlu1 %v2125_v21, %s5474_s29  ;;  %v3426_v17 = vpop.f32.mrf.mxu0  ;;  %v3073_v0 = vsel %vm9419_vm10, %v2952_v50, %v2096_v62  ;;  %v10123_v21 = vld [vmem:[#allocation102_spill] sm:$0xff]  ;;  %v2775_v40 = vsel %vm2733_vm8, %v2654_v25, %v10126_v19  ;;  %v1996_v62 = vshrl.u32 %v8530_v13, 16  ;;  %v10135_v25 = vld [vmem:[#allocation228_spill] sm:$0xff]  ;;  %v10137_v19 = vld [vmem:[#allocation269_spill] sm:$0xff] }
 0x3bb   : > { %3882 = vst.msk [vmem:[#allocation2 + $0x40] sm:$0xff] %vm3873_vm13, %v3426_v17  ;;  %2240 = vrot.lane.b32.xlu0 %v1729_v48, %s5474_s29  ;;  %v2292_v49 = vsel %vm9420_vm4, %v7903_v30, %v10123_v21  ;;  %v4030_v50 = vld [vmem:[#allocation2 + $0x210] ss:$2 sm:$0xff] }
 0x3bc   : > { %v2227_v18 = vpop.permute.xlu1 %2226  ;;  %v5138_v32 = vpop.f32.mrf.mxu0  ;;  %v2414_v14 = vsel %vm2370_vm5, %v2292_v49, %v10125_v44 }
 0x3bd   : > { %3885 = vst.msk [vmem:[#allocation2 + $0x58] sm:$0xff] %vm3873_vm13, %v5138_v32  ;;  %v3196_v43 = vsel %vm3096_vm11, %v3075_v11, %v2227_v18  ;;  %v2225_v52 = vpop.permute.xlu0 %2224  ;;  %v2535_v30 = vsel %vm2491_vm6, %v2414_v14, %v10128_v57  ;;  %v10131_v18 = vld [vmem:[#allocation129_spill] sm:$0xff] }
 0x3be   : > { %1918 = vrot.lane.b32.xlu1 %v5439_v63, %s5472_s27  ;;  %v3194_v28 = vsel %vm3096_vm11, %v3073_v0, %v2225_v52  ;;  %v3429_v54 = vpop.f32.mrf.mxu0  ;;  %v2656_v20 = vsel %vm2612_vm7, %v2535_v30, %v10129_v22  ;;  %v4090_v11 = vld [vmem:[#allocation2 + $0x211] ss:$2 sm:$0xff]  ;;  %v1998_v63 = vor.u32 %v1996_v62, %v1994_v35 }
 0x3bf   : > { %3883 = vst.msk [vmem:[#allocation2 + $0x48] sm:$0xff] %vm3873_vm13, %v3429_v54  ;;  %1916 = vrot.lane.b32.xlu0 %v5440_v26, %s5472_s27  ;;  %5223 = vmatprep.mubr.msk.bf16.mxu1 %vm3232_vm12, %v3194_v28  ;;  %v2777_v34 = vsel %vm2733_vm8, %v2656_v20, %v10130_v42  ;;  %v4028_v28 = vld [vmem:[#allocation2 + $0x200] ss:$2 sm:$0xff]  ;;  %v4088_v54 = vld [vmem:[#allocation2 + $0x201] ss:$2 sm:$0xff]  ;;  %v4132_v4 = vmax.f32 %v4030_v50, %v4090_v11 }
 0x3c0   : > { %v1903_v9 = vpop.permute.xlu1 %1902  ;;  %5224 = vmatmul.mubr.msk.bf16.gmra.mxu1 %vm3232_vm12, %v3196_v43  ;;  %v4131_v23 = vmax.f32 %v4028_v28, %v4088_v54 }
 0x3c1   : > { %v1901_v59 = vpop.permute.xlu0 %1900  ;;  %v2898_v32 = vsel %vm2854_vm9, %v2777_v34, %v1903_v9 }
 0x3c2   : > { %2057 = vrot.lane.b32.xlu1 %v10118_v24, %s5473_s28  ;;  %v2896_v36 = vsel %vm2854_vm9, %v2775_v40, %v1901_v59  ;;  %v2126_v24 = vrot.slane %v8530_v13, 1 }
 0x3c3   : > { %2055 = vrot.lane.b32.xlu0 %v10120_v27, %s5473_s28 }
 0x3c4   : > { %v2042_v37 = vpop.permute.xlu1 %2041  ;;  %v5197_v8 = vpop.f32.mrf.mxu1  ;;  %v4002_v20 = vld [vmem:[#allocation2 + $0x50] ss:$2 sm:$0xff] }
 0x3c5   : > { %3944 = vst.msk [vmem:[#allocation2 + $0x230] sm:$0xff] %vm3873_vm13, %v5197_v8  ;;  %v2040_v47 = vpop.permute.xlu0 %2039  ;;  %v3019_v43 = vsel %vm9419_vm10, %v2898_v32, %v2042_v37  ;;  %v10132_v37 = vld [vmem:[#allocation52_spill] sm:$0xff] }
 0x3c6   : > { %1846 = vrot.lane.b32.xlu1 %v1729_v48, %s5470_s22  ;;  %v3666_v53 = vpop.f32.mrf.mxu1  ;;  %v1988_v48 = vshrl.u32 %v8388_v58, 16  ;;  %v3017_v39 = vsel %vm9419_vm10, %v2896_v36, %v2040_v47  ;;  %v2352_v6 = vsel %vm9420_vm4, %v7966_v41, %v10132_v37  ;;  %v2350_v47 = vsel %vm9420_vm4, %v7972_v56, %v10133_v45  ;;  %v4000_v32 = vld [vmem:[#allocation2 + $0x40] ss:$2 sm:$0xff] }
 0x3c7   : > { %3942 = vst.msk [vmem:[#allocation2 + $0x220] sm:$0xff] %vm3873_vm13, %v3666_v53  ;;  %2184 = vrot.lane.b32.xlu0 %v10127_v60, %s5474_s29  ;;  %v2474_v13 = vsel %vm2370_vm5, %v2352_v6, %v10134_v15  ;;  %v2472_v41 = vsel %vm2370_vm5, %v2350_v47, %v10135_v25  ;;  %v10136_v53 = vld [vmem:[#allocation268_spill] sm:$0xff]  ;;  %v2127_v56 = vsel %vm1212_vm1, %v2124_v51, %v2126_v24  ;;  %v10138_v60 = vld [vmem:[#allocation309_spill] sm:$0xff]  ;;  %v5442_v25 = vld [vmem:[%s5509_s17 + $0xb8] sm:$0xff]   ;;  %vm4451_vm1 = vsmask.f32 7950 }
 0x3c8   : > { %v8557_v38 = vpop.permute.xlu1 %1830  ;;  %v5198_v12 = vpop.f32.mrf.mxu1  ;;  %v1990_v0 = vor.u32 %v1988_v48, %v8432_v31  ;;  %v2595_v46 = vsel %vm2491_vm6, %v2474_v13, %v10136_v53  ;;  %v2593_v40 = vsel %vm2491_vm6, %v2472_v41, %v10137_v19  ;;  %v10139_v48 = vld [vmem:[#allocation310_spill] sm:$0xff]  ;;  %v10142_v15 = vld [vmem:[#allocation249_spill] sm:$0xff] }
 0x3c9   : > { %3945 = vst.msk [vmem:[#allocation2 + $0x238] sm:$0xff] %vm3873_vm13, %v5198_v12  ;;  %v2169_v2 = vpop.permute.xlu0 %2168  ;;  %v2716_v57 = vsel %vm2612_vm7, %v2595_v46, %v10138_v60  ;;  %v10143_v41 = vld [vmem:[#allocation106_spill] sm:$0xff]  ;;  %v10144_v46 = vld [vmem:[#allocation296_spill] sm:$0xff] }
 0x3ca   : > { %1848 = vrot.lane.b32.xlu1 %v8456_v33, %s5470_s22  ;;  %v3138_v29 = vsel %vm3096_vm11, %v3017_v39, %v2169_v2  ;;  %v3669_v17 = vpop.f32.mrf.mxu1  ;;  %v1995_v31 = vsel %vm609_vm0, %v1990_v0, %v1994_v35  ;;  %v4060_v0 = vld [vmem:[#allocation2 + $0x41] ss:$2 sm:$0xff]  ;;  %v2296_v53 = vsel %vm9420_vm4, %v5442_v25, %v10143_v41  ;;  %vm4450_vm0 = vcmask 257027   ;;  %v10158_v41 = vld [vmem:[#allocation270_spill] sm:$0xff] }
 0x3cb   : > { %3943 = vst.msk [vmem:[#allocation2 + $0x228] sm:$0xff] %vm3873_vm13, %v3669_v17  ;;  %2186 = vrot.lane.b32.xlu0 %v10131_v18, %s5474_s29  ;;  %5167 = vmatprep.mubr.msk.bf16.mxu0 %vm3232_vm12, %v3138_v29  ;;  %v4062_v29 = vld [vmem:[#allocation2 + $0x51] ss:$2 sm:$0xff]  ;;  %v4649_v17 = vld [vmem:[%s8444_s8 + $0x40] sm:$0xf]  ;;  %vm8674_vm3 = vmand %vm4450_vm0, %vm4451_vm1 }
 0x3cc   : > { %v1833_v33 = vpop.permute.xlu1 %1832 }
 0x3cd   : > { %v2171_v52 = vpop.permute.xlu0 %2170  ;;  %v2837_v51 = vsel %vm2733_vm8, %v2716_v57, %v1833_v33 }
 0x3ce   : > { %1978 = vrot.lane.b32.xlu1 %v4932_v61, %s5472_s27  ;;  %v3140_v10 = vsel %vm3096_vm11, %v3019_v43, %v2171_v52  ;;  %v4118_v52 = vmax.f32 %v4002_v20, %v4062_v29 }
 0x3cf   : > { %1976 = vrot.lane.b32.xlu0 %v8388_v58, %s5472_s27  ;;  %5168 = vmatmul.mubr.msk.bf16.gmra.mxu0 %vm3232_vm12, %v3140_v10  ;;  %v2714_v58 = vsel %vm2612_vm7, %v2593_v40, %v10139_v48  ;;  %v10146_v40 = vld [vmem:[#allocation326_spill] sm:$0xff] }
 0x3d0   : > { %v1963_v26 = vpop.permute.xlu1 %1962  ;;  %v4180_v9 = vld [vmem:[#allocation2 + $0x230] ss:$2 sm:$0xff]  ;;  %v5141_v59 = vpop.f32.mrf.mxu0  ;;  %v4270_v1 = vld [vmem:[#allocation2 + $0x231] ss:$2 sm:$0xff]  ;;  %v2835_v61 = vsel %vm2733_vm8, %v2714_v58, %v8557_v38 }
 0x3d1   : > { %v4222_v7 = vmax.f32 %v4132_v4, %v4180_v9  ;;  %3888 = vst.msk [vmem:[#allocation2 + $0x70] sm:$0xff] %vm3873_vm13, %v5141_v59  ;;  %v1961_v27 = vpop.permute.xlu0 %1960  ;;  %v2958_v62 = vsel %vm2854_vm9, %v2837_v51, %v1963_v26  ;;  %v4117_v26 = vmax.f32 %v4000_v32, %v4060_v0  ;;  %v10148_v51 = vld [vmem:[#allocation295_spill] sm:$0xff] }
 0x3d2   : > { %2117 = vrot.lane.b32.xlu1 %v1998_v63, %s5473_s28  ;;  %v4178_v8 = vld [vmem:[#allocation2 + $0x220] ss:$2 sm:$0xff]  ;;  %v3442_v3 = vpop.f32.mrf.mxu0  ;;  %v4268_v44 = vld [vmem:[#allocation2 + $0x221] ss:$2 sm:$0xff]  ;;  %v2956_v42 = vsel %vm2854_vm9, %v2835_v61, %v1961_v27 }
 0x3d3   : > { %v4312_v21 = vmax.f32 %v4222_v7, %v4270_v1  ;;  %v4221_v49 = vmax.f32 %v4131_v23, %v4178_v8  ;;  %3886 = vst.msk [vmem:[#allocation2 + $0x60] sm:$0xff] %vm3873_vm13, %v3442_v3  ;;  %2115 = vrot.lane.b32.xlu0 %v1995_v31, %s5473_s28  ;;  %v5441_v23 = vld [vmem:[%s5509_s17 + $0xb0] sm:$0xff]   ;;  %v10140_v7 = vld [vmem:[#allocation108_spill] sm:$0xff]  ;;  %v10141_v8 = vld [vmem:[#allocation198_spill] sm:$0xff] }
 0x3d4   : > { %v2102_v55 = vpop.permute.xlu1 %2101  ;;  %v5142_v14 = vpop.f32.mrf.mxu0  ;;  %v2294_v27 = vsel %vm9420_vm4, %v5441_v23, %v10140_v7 }
 0x3d5   : > { %v4348_v30 = vadd.f32 %v8423_v16, %v4312_v21  ;;  %v4311_v36 = vmax.f32 %v4221_v49, %v4268_v44  ;;  %3889 = vst.msk [vmem:[#allocation2 + $0x78] sm:$0xff] %vm3873_vm13, %v5142_v14  ;;  %v2100_v12 = vpop.permute.xlu0 %2099  ;;  %v3079_v34 = vsel %vm9419_vm10, %v2958_v62, %v2102_v55  ;;  %v2416_v3 = vsel %vm2370_vm5, %v2294_v27, %v10141_v8  ;;  %v5443_v27 = vld [vmem:[%s5509_s17 + $0x1a8] sm:$0xff]  }
 0x3d6   : > { %2246 = vrot.lane.b32.xlu1 %v2126_v24, %s5474_s29  ;;  %v3445_v39 = vpop.f32.mrf.mxu0  ;;  %v3077_v38 = vsel %vm9419_vm10, %v2956_v42, %v2100_v12  ;;  %v2537_v13 = vsel %vm2491_vm6, %v2416_v3, %v10142_v15  ;;  %v10147_v12 = vld [vmem:[#allocation248_spill] sm:$0xff]  ;;  %v5444_v3 = vld [vmem:[%s5509_s17 + $0x1a0] sm:$0xff]   ;;  %v10156_v15 = vld [vmem:[#allocation229_spill] sm:$0xff] }
 0x3d7   : > { %v4378_v2 = vmax.f32 %v4348_v30, 0.0  ;;  %v4347_v35 = vadd.f32 %v8423_v16, %v4311_v36  ;;  %3887 = vst.msk [vmem:[#allocation2 + $0x68] sm:$0xff] %vm3873_vm13, %v3445_v39  ;;  %2244 = vrot.lane.b32.xlu0 %v2127_v56, %s5474_s29  ;;  %v2658_v44 = vsel %vm2612_vm7, %v2537_v13, %v10144_v46  ;;  %v10145_v56 = vld [vmem:[#allocation197_spill] sm:$0xff]  ;;  %v10159_v46 = vld [vmem:[#allocation272_spill] sm:$0xff] }
 0x3d8   : > { %v2231_v22 = vpop.permute.xlu1 %2230  ;;  %v2418_v19 = vsel %vm2370_vm5, %v2296_v53, %v10145_v56  ;;  %v2779_v60 = vsel %vm2733_vm8, %v2658_v44, %v10146_v40 }
 0x3d9   : > { %v5048_v18 = vpack.c.bf16 %v4378_v2, %v4378_v2  ;;  %v4377_v33 = vmax.f32 %v4347_v35, 0.0  ;;  %v3200_v50 = vsel %vm3096_vm11, %v3079_v34, %v2231_v22  ;;  %v2229_v11 = vpop.permute.xlu0 %2228  ;;  %v2539_v48 = vsel %vm2491_vm6, %v2418_v19, %v10147_v12  ;;  %v10149_v22 = vld [vmem:[#allocation325_spill] sm:$0xff] }
 0x3da   : > { %v3198_v43 = vsel %vm3096_vm11, %v3077_v38, %v2229_v11  ;;  %v2660_v39 = vsel %vm2612_vm7, %v2539_v48, %v10148_v51 }
 0x3db   : > { %v4650_v63 = vsel %vm8466_vm2, %v5048_v18, %v4649_v17  ;;  %v5047_v28 = vpack.c.bf16 %v4377_v33, %v4377_v33  ;;  %5227 = vmatprep.mubr.msk.bf16.mxu1 %vm3232_vm12, %v3198_v43  ;;  %v2781_v20 = vsel %vm2733_vm8, %v2660_v39, %v10149_v22  ;;  %vm4426_vm2 = vsmask.f32 7440 }
 0x3dc   : > { %v1907_v54 = vpop.permute.xlu1 %1906  ;;  %4651 = vst [vmem:[%s8444_s8 + $0x40] sm:$0xf] %v4650_v63  ;;  %v4152_v10 = vld [vmem:[#allocation2 + $0x70] ss:$2 sm:$0xff]  ;;  %v5201_v4 = vpop.f32.mrf.mxu1  ;;  %5228 = vmatmul.mubr.msk.bf16.gmra.mxu1 %vm3232_vm12, %v3200_v50  ;;  %v4242_v31 = vld [vmem:[#allocation2 + $0x71] ss:$2 sm:$0xff]  ;;  %vm8690_vm1 = vmor %vm4416_vm15, %vm4426_vm2 }
 0x3dd   : > { %4648 = vst.msk [vmem:[%s8444_s8 + $0x3c] sm:$0xf] %vm4413_vm14, %v5047_v28  ;;  %v4208_v9 = vmax.f32 %v4118_v52, %v4152_v10  ;;  %v1905_v59 = vpop.permute.xlu0 %1904  ;;  %v2902_v18 = vsel %vm2854_vm9, %v2781_v20, %v1907_v54  ;;  %vm10162_vm15 = vcmask 171008  }
 0x3de   : > { %3948 = vst.msk [vmem:[#allocation2 + $0x250] sm:$0xff] %vm3873_vm13, %v5201_v4  ;;  %v4150_v5 = vld [vmem:[#allocation2 + $0x60] ss:$2 sm:$0xff]  ;;  %v3682_v24 = vpop.f32.mrf.mxu1  ;;  %v4240_v45 = vld [vmem:[#allocation2 + $0x61] ss:$2 sm:$0xff]  ;;  %v2900_v58 = vsel %vm2854_vm9, %v2779_v60, %v1905_v59  ;;  %vm10163_vm2 = vmmov %vm10162_vm15 }
 0x3df   : > { %v4298_v37 = vmax.f32 %v4208_v9, %v4242_v31  ;;  %v4207_v6 = vmax.f32 %v4117_v26, %v4150_v5  ;;  %3946 = vst.msk [vmem:[#allocation2 + $0x240] sm:$0xff] %vm3873_vm13, %v3682_v24  ;;  %v4453_v59 = vld [vmem:[%s8444_s8 + $0x4] sm:$0x8]  ;;  %v10161_v60 = vld [vmem:[#allocation312_spill] sm:$0xff] }
 0x3e0   : > { %v2046_v1 = vpop.permute.xlu1 %2045  ;;  %v5202_v47 = vpop.f32.mrf.mxu1 }
 0x3e1   : > { %v4334_v21 = vadd.f32 %v8423_v16, %v4298_v37  ;;  %v4297_v49 = vmax.f32 %v4207_v6, %v4240_v45  ;;  %3949 = vst.msk [vmem:[#allocation2 + $0x258] sm:$0xff] %vm3873_vm13, %v5202_v47  ;;  %v2044_v55 = vpop.permute.xlu0 %2043  ;;  %v3023_v38 = vsel %vm9419_vm10, %v2902_v18, %v2046_v1  ;;  %v10152_v37 = vld [vmem:[#allocation54_spill] sm:$0xff]  ;;  %v10155_v45 = vld [vmem:[#allocation159_spill] sm:$0xff]  ;;  %v10164_v18 = vld [vmem:[#allocation112_spill] sm:$0xff] }
 0x3e2   : > { %v3685_v14 = vpop.f32.mrf.mxu1  ;;  %v3021_v35 = vsel %vm9419_vm10, %v2900_v58, %v2044_v55  ;;  %vm4457_vm10 = vcmask 256000   ;;  %v2356_v6 = vsel %vm9420_vm4, %v5443_v27, %v10152_v37  ;;  %v2354_v47 = vsel %vm9420_vm4, %v5444_v3, %v10155_v45  ;;  %v10157_v55 = vld [vmem:[#allocation230_spill] sm:$0xff]  ;;  %v10170_v27 = vld [vmem:[#allocation199_spill] sm:$0xff] }
 0x3e3   : > { %v4364_v57 = vmax.f32 %v4334_v21, 0.0  ;;  %v4333_v30 = vadd.f32 %v8423_v16, %v4297_v49  ;;  %3947 = vst.msk [vmem:[#allocation2 + $0x248] sm:$0xff] %vm3873_vm13, %v3685_v14  ;;  %v2478_v13 = vsel %vm2370_vm5, %v2356_v6, %v10156_v15  ;;  %v2476_v25 = vsel %vm2370_vm5, %v2354_v47, %v10157_v55  ;;  %v10160_v14 = vld [vmem:[#allocation311_spill] sm:$0xff]  ;;  %v10171_v3 = vld [vmem:[#allocation250_spill] sm:$0xff] }
 0x3e4   : > { %v8657_v36 = vpop.permute.xlu1 %1834  ;;  %v2599_v53 = vsel %vm2491_vm6, %v2478_v13, %v10158_v41  ;;  %v2597_v44 = vsel %vm2491_vm6, %v2476_v25, %v10159_v46  ;;  %v10174_v46 = vld [vmem:[#allocation327_spill] sm:$0xff] }
 0x3e5   : > { %v5034_v2 = vpack.c.bf16 %v4364_v57, %v4364_v57  ;;  %v4363_v61 = vmax.f32 %v4333_v30, 0.0  ;;  %v2173_v62 = vpop.permute.xlu0 %2172  ;;  %v2720_v56 = vsel %vm2612_vm7, %v2599_v53, %v10160_v14  ;;  %v2718_v57 = vsel %vm2612_vm7, %v2597_v44, %v10161_v60 }
 0x3e6   : > { %v3142_v29 = vsel %vm3096_vm11, %v3021_v35, %v2173_v62  ;;  %v2839_v12 = vsel %vm2733_vm8, %v2718_v57, %v8657_v36 }
 0x3e7   : > { %v4438_v17 = vshll.u32 %v5034_v2, 16  ;;  %v4442_v42 = vshrl.u32 %v5034_v2, 16  ;;  %v5033_v34 = vpack.c.bf16 %v4363_v61, %v4363_v61  ;;  %5171 = vmatprep.mubr.msk.bf16.mxu0 %vm3232_vm12, %v3142_v29 }
 0x3e8   : > { %v1837_v33 = vpop.permute.xlu1 %1836  ;;  %v5145_v50 = vpop.f32.mrf.mxu0 }
 0x3e9   : > { %v4440_v11 = vrot.slane %v4438_v17, 5  ;;  %v4444_v32 = vrot.slane %v4442_v42, 4  ;;  %v4429_v0 = vshll.u32 %v5033_v34, 16  ;;  %v4432_v43 = vshrl.u32 %v5033_v34, 16  ;;  %3892 = vst.msk [vmem:[#allocation2 + $0x90] sm:$0xff] %vm3873_vm13, %v5145_v50  ;;  %v2175_v52 = vpop.permute.xlu0 %2174  ;;  %v5445_v34 = vld [vmem:[%s5509_s17 + $0xc0] sm:$0xff]  }
 0x3ea   : > { %v3144_v28 = vsel %vm3096_vm11, %v3023_v38, %v2175_v52  ;;  %v3458_v54 = vpop.f32.mrf.mxu0  ;;  %v2841_v30 = vsel %vm2733_vm8, %v2720_v56, %v1837_v33  ;;  %v2298_v33 = vsel %vm9420_vm4, %v5445_v34, %v10164_v18  ;;  %v10165_v50 = vld [vmem:[#allocation200_spill] sm:$0xff]  ;;  %v10177_v34 = vld [vmem:[#allocation231_spill] sm:$0xff] }
 0x3eb   : > { %v4445_v10 = vor.u32 %v4444_v32, %v4440_v11  ;;  %v4431_v4 = vrot.slane %v4429_v0, 5  ;;  %v4434_v26 = vrot.slane %v4432_v43, 4  ;;  %3890 = vst.msk [vmem:[#allocation2 + $0x80] sm:$0xff] %vm3873_vm13, %v3458_v54  ;;  %5172 = vmatmul.mubr.msk.bf16.gmra.mxu0 %vm3232_vm12, %v3144_v28  ;;  %v4034_v32 = vld [vmem:[#allocation2 + $0x250] ss:$2 sm:$0xff]  ;;  %v10166_v43 = vld [vmem:[#allocation251_spill] sm:$0xff] }
 0x3ec   : > { %v1967_v9 = vpop.permute.xlu1 %1966  ;;  %v5146_v31 = vpop.f32.mrf.mxu0  ;;  %v4094_v0 = vld [vmem:[#allocation2 + $0x251] ss:$2 sm:$0xff] }
 0x3ed   : > { %v4446_v5 = vrot.slane %v4445_v10, 4  ;;  %v4435_v24 = vor.u32 %v4434_v26, %v4431_v4  ;;  %v4454_v23 = vsel %vm8674_vm3, %v4431_v4, %v4453_v59  ;;  %3893 = vst.msk [vmem:[#allocation2 + $0x98] sm:$0xff] %vm3873_vm13, %v5146_v31  ;;  %v1965_v7 = vpop.permute.xlu0 %1964  ;;  %v2962_v48 = vsel %vm2854_vm9, %v2841_v30, %v1967_v9  ;;  %v10167_v54 = vld [vmem:[#allocation298_spill] sm:$0xff]  ;;  %v4032_v4 = vld [vmem:[#allocation2 + $0x240] ss:$2 sm:$0xff] }
 0x3ee   : > { %4455 = vst [vmem:[%s8444_s8 + $0x4] sm:$0x8] %v4454_v23  ;;  %v3461_v8 = vpop.f32.mrf.mxu0  ;;  %v2960_v51 = vsel %vm2854_vm9, %v2839_v12, %v1965_v7  ;;  %v4092_v26 = vld [vmem:[#allocation2 + $0x241] ss:$2 sm:$0xff]  ;;  %v10168_v59 = vld [vmem:[#allocation110_spill] sm:$0xff]  ;;  %v4134_v23 = vmax.f32 %v4034_v32, %v4094_v0 }
 0x3ef   : > { %4458 = vst.msk [vmem:[%s8444_s8 + $0xc] sm:$0x7] %vm4457_vm10, %v4446_v5  ;;  %v4436_v21 = vrot.slane %v4435_v24, 4  ;;  %v5446_v9 = vld [vmem:[%s5509_s17 + $0xc8] sm:$0xff]   ;;  %v4133_v47 = vmax.f32 %v4032_v4, %v4092_v26 }
 0x3f0   : > { %3891 = vst.msk [vmem:[#allocation2 + $0x88] sm:$0xff] %vm3873_vm13, %v3461_v8  ;;  %v2106_v49 = vpop.permute.xlu1 %2105  ;;  %v2300_v31 = vsel %vm9420_vm4, %v5446_v9, %v10168_v59  ;;  %v10169_v5 = vld [vmem:[#allocation328_spill] sm:$0xff] }
 0x3f1   : > { %v4441_v19 = vsel %vm8690_vm1, %v4436_v21, %v4440_v11  ;;  %v2104_v40 = vpop.permute.xlu0 %2103  ;;  %v3083_v39 = vsel %vm10162_vm15, %v2962_v48, %v2106_v49  ;;  %v2420_v11 = vsel %vm2370_vm5, %v2298_v33, %v10165_v50  ;;  %v2422_v37 = vsel %vm2370_vm5, %v2300_v31, %v10170_v27  ;;  %vm10172_vm15 = vmmov %vm10163_vm2  ;;  %v10173_v49 = vld [vmem:[#allocation297_spill] sm:$0xff]  ;;  %v10178_v33 = vld [vmem:[#allocation232_spill] sm:$0xff] }
 0x3f2   : > { %4456 = vst.msk [vmem:[%s8444_s8 + $0x8] sm:$0xf] %vm4413_vm14, %v4441_v19  ;;  %v3081_v61 = vsel %vm10163_vm2, %v2960_v51, %v2104_v40  ;;  %v2541_v52 = vsel %vm2491_vm6, %v2420_v11, %v10166_v43  ;;  %v2543_v45 = vsel %vm2491_vm6, %v2422_v37, %v10171_v3  ;;  %v10179_v43 = vld [vmem:[#allocation273_spill] sm:$0xff] }
 0x3f3   : > { %v2662_v10 = vsel %vm2612_vm7, %v2541_v52, %v10167_v54  ;;  %v2664_v55 = vsel %vm2612_vm7, %v2543_v45, %v10173_v49 }
 0x3f4   : > { %v2235_v58 = vpop.permute.xlu1 %2234  ;;  %v5205_v2 = vpop.f32.mrf.mxu1  ;;  %v2783_v24 = vsel %vm2733_vm8, %v2662_v10, %v10169_v5  ;;  %v2785_v44 = vsel %vm2733_vm8, %v2664_v55, %v10174_v46  ;;  %v10181_v10 = vld [vmem:[#allocation313_spill] sm:$0xff] }
 0x3f5   : > { %3952 = vst.msk [vmem:[#allocation2 + $0x270] sm:$0xff] %vm3873_vm13, %v5205_v2  ;;  %v3204_v35 = vsel %vm3096_vm11, %v3083_v39, %v2235_v58  ;;  %v2233_v62 = vpop.permute.xlu0 %2232  ;;  %v4006_v26 = vld [vmem:[#allocation2 + $0x90] ss:$2 sm:$0xff]  ;;  %v4066_v9 = vld [vmem:[#allocation2 + $0x91] ss:$2 sm:$0xff] }
 0x3f6   : > { %v3202_v22 = vsel %vm3096_vm11, %v3081_v61, %v2233_v62  ;;  %v3698_v20 = vpop.f32.mrf.mxu1 }
 0x3f7   : > { %3950 = vst.msk [vmem:[#allocation2 + $0x260] sm:$0xff] %vm3873_vm13, %v3698_v20  ;;  %5231 = vmatprep.mubr.msk.bf16.mxu1 %vm3232_vm12, %v3202_v22  ;;  %v5447_v22 = vld [vmem:[%s5509_s17 + $0x1b8] sm:$0xff]   ;;  %v10175_v20 = vld [vmem:[#allocation59_spill] sm:$0xff] }
 0x3f8   : > { %v1911_v36 = vpop.permute.xlu1 %1910  ;;  %v5206_v29 = vpop.f32.mrf.mxu1  ;;  %5232 = vmatmul.mubr.msk.bf16.gmra.mxu1 %vm3232_vm12, %v3204_v35  ;;  %v4004_v37 = vld [vmem:[#allocation2 + $0x80] ss:$2 sm:$0xff] }
 0x3f9   : > { %3953 = vst.msk [vmem:[#allocation2 + $0x278] sm:$0xff] %vm3873_vm13, %v5206_v29  ;;  %v1909_v17 = vpop.permute.xlu0 %1908  ;;  %v2906_v60 = vsel %vm2854_vm9, %v2785_v44, %v1911_v36  ;;  %v2360_v36 = vsel %vm9420_vm4, %v5447_v22, %v10175_v20  ;;  %v5448_v29 = vld [vmem:[%s5509_s17 + $0x1b0] sm:$0xff]  }
 0x3fa   : > { %v3701_v42 = vpop.f32.mrf.mxu1  ;;  %v2904_v8 = vsel %vm2854_vm9, %v2783_v24, %v1909_v17  ;;  %v10176_v17 = vld [vmem:[#allocation162_spill] sm:$0xff]  ;;  %v2482_v18 = vsel %vm2370_vm5, %v2360_v36, %v10177_v34 }
 0x3fb   : > { %3951 = vst.msk [vmem:[#allocation2 + $0x268] sm:$0xff] %vm3873_vm13, %v3701_v42  ;;  %v2358_v42 = vsel %vm9420_vm4, %v5448_v29, %v10176_v17  ;;  %v2603_v52 = vsel %vm2491_vm6, %v2482_v18, %v10179_v43  ;;  %v10185_v43 = vld [vmem:[#allocation202_spill] sm:$0xff] }
 0x3fc   : > { %v2050_v38 = vpop.permute.xlu1 %2049  ;;  %v2724_v4 = vsel %vm2612_vm7, %v2603_v52, %v10181_v10 }
 0x3fd   : > { %v2048_v28 = vpop.permute.xlu0 %2047  ;;  %v3027_v48 = vsel %vm10163_vm2, %v2906_v60, %v2050_v38  ;;  %v2480_v38 = vsel %vm2370_vm5, %v2358_v42, %v10178_v33  ;;  %v5449_v33 = vld [vmem:[%s5509_s17 + $0xd0] sm:$0xff]  }
 0x3fe   : > { %v3025_v13 = vsel %vm10172_vm15, %v2904_v8, %v2048_v28  ;;  %v10180_v28 = vld [vmem:[#allocation274_spill] sm:$0xff]  ;;  %v4064_v8 = vld [vmem:[#allocation2 + $0x81] ss:$2 sm:$0xff]  ;;  %vm10183_vm15 = vmmov %vm10163_vm2 }
 0x3ff   : > { %v2601_v54 = vsel %vm2491_vm6, %v2480_v38, %v10180_v28  ;;  %v10184_v38 = vld [vmem:[#allocation116_spill] sm:$0xff]  ;;  %v10186_v28 = vld [vmem:[#allocation253_spill] sm:$0xff] }
 0x400   : > { %v8746_v7 = vpop.permute.xlu1 %1838  ;;  %v4184_v6 = vld [vmem:[#allocation2 + $0x270] ss:$2 sm:$0xff]  ;;  %v4274_v25 = vld [vmem:[#allocation2 + $0x271] ss:$2 sm:$0xff] }
 0x401   : > { %v4224_v15 = vmax.f32 %v4134_v23, %v4184_v6  ;;  %v2177_v21 = vpop.permute.xlu0 %2176  ;;  %v10182_v23 = vld [vmem:[#allocation314_spill] sm:$0xff] }
 0x402   : > { %v4182_v41 = vld [vmem:[#allocation2 + $0x260] ss:$2 sm:$0xff]  ;;  %v3146_v53 = vsel %vm3096_vm11, %v3025_v13, %v2177_v21  ;;  %v4272_v57 = vld [vmem:[#allocation2 + $0x261] ss:$2 sm:$0xff]  ;;  %v2722_v27 = vsel %vm2612_vm7, %v2601_v54, %v10182_v23  ;;  %v4120_v21 = vmax.f32 %v4006_v26, %v4066_v9 }
 0x403   : > { %v4314_v14 = vmax.f32 %v4224_v15, %v4274_v25  ;;  %v4223_v56 = vmax.f32 %v4133_v47, %v4182_v41  ;;  %v5149_v19 = vpop.f32.mrf.mxu0  ;;  %5175 = vmatprep.mubr.msk.bf16.mxu0 %vm3232_vm12, %v3146_v53  ;;  %v2843_v49 = vsel %vm2733_vm8, %v2722_v27, %v8746_v7  ;;  %v10187_v26 = vld [vmem:[#allocation300_spill] sm:$0xff]  ;;  %v10189_v27 = vld [vmem:[#allocation330_spill] sm:$0xff] }
 0x404   : > { %v1841_v40 = vpop.permute.xlu1 %1840  ;;  %3896 = vst.msk [vmem:[#allocation2 + $0xb0] sm:$0xff] %vm3873_vm13, %v5149_v19  ;;  %v4679_v19 = vld [vmem:[%s8444_s8 + $0x40] sm:$0x8] }
 0x405   : > { %v4350_v30 = vadd.f32 %v8423_v16, %v4314_v14  ;;  %v4313_v12 = vmax.f32 %v4223_v56, %v4272_v57  ;;  %v3474_v58 = vpop.f32.mrf.mxu0  ;;  %v2179_v51 = vpop.permute.xlu0 %2178  ;;  %v2845_v6 = vsel %vm2733_vm8, %v2724_v4, %v1841_v40  ;;  %v4119_v56 = vmax.f32 %v4004_v37, %v4064_v8  ;;  %v4481_v8 = vld [vmem:[%s8444_s8 + $0x14] sm:$0x7] }
 0x406   : > { %3894 = vst.msk [vmem:[#allocation2 + $0xa0] sm:$0xff] %vm3873_vm13, %v3474_v58  ;;  %v3148_v39 = vsel %vm3096_vm11, %v3027_v48, %v2179_v51 }
 0x407   : > { %v4380_v2 = vmax.f32 %v4350_v30, 0.0  ;;  %v4349_v61 = vadd.f32 %v8423_v16, %v4313_v12  ;;  %v5150_v35 = vpop.f32.mrf.mxu0  ;;  %5176 = vmatmul.mubr.msk.bf16.gmra.mxu0 %vm3232_vm12, %v3148_v39 }
 0x408   : > { %v1971_v62 = vpop.permute.xlu1 %1970  ;;  %3897 = vst.msk [vmem:[#allocation2 + $0xb8] sm:$0xff] %vm3873_vm13, %v5150_v35 }
 0x409   : > { %v5050_v50 = vpack.c.bf16 %v4380_v2, %v4380_v2  ;;  %v4379_v11 = vmax.f32 %v4349_v61, 0.0  ;;  %v3477_v32 = vpop.f32.mrf.mxu0  ;;  %v1969_v0 = vpop.permute.xlu0 %1968  ;;  %v2966_v55 = vsel %vm2854_vm9, %v2845_v6, %v1971_v62 }
 0x40a   : > { %3895 = vst.msk [vmem:[#allocation2 + $0xa8] sm:$0xff] %vm3873_vm13, %v3477_v32  ;;  %v2964_v44 = vsel %vm2854_vm9, %v2843_v49, %v1969_v0  ;;  %v10193_v49 = vld [vmem:[#allocation252_spill] sm:$0xff] }
 0x40b   : > { %v4667_v59 = vshll.u32 %v5050_v50, 16  ;;  %v4671_v31 = vshrl.u32 %v5050_v50, 16  ;;  %v5049_v5 = vpack.c.bf16 %v4379_v11, %v4379_v11  ;;  %v2302_v50 = vsel %vm9420_vm4, %v5449_v33, %v10184_v38  ;;  %v10205_v33 = vld [vmem:[#allocation234_spill] sm:$0xff] }
 0x40c   : > { %v2110_v24 = vpop.permute.xlu1 %2109  ;;  %v2424_v52 = vsel %vm2370_vm5, %v2302_v50, %v10185_v43  ;;  %v10206_v50 = vld [vmem:[#allocation275_spill] sm:$0xff] }
 0x40d   : > { %v4669_v3 = vrot.slane %v4667_v59, 5  ;;  %v4673_v45 = vrot.slane %v4671_v31, 4  ;;  %v4658_v47 = vshll.u32 %v5049_v5, 16  ;;  %v4661_v15 = vshrl.u32 %v5049_v5, 16  ;;  %v2108_v13 = vpop.permute.xlu0 %2107  ;;  %v5450_v5 = vld [vmem:[%s5509_s17 + $0xd8] sm:$0xff]   ;;  %v10208_v43 = vld [vmem:[#allocation315_spill] sm:$0xff] }
 0x40e   : > { %v3087_v60 = vsel %vm10183_vm15, %v2966_v55, %v2110_v24  ;;  %v3085_v57 = vsel %vm10163_vm2, %v2964_v44, %v2108_v13  ;;  %v2545_v54 = vsel %vm2491_vm6, %v2424_v52, %v10186_v28  ;;  %vm4465_vm15 = vcmask 1046532   ;;  %v10188_v24 = vld [vmem:[#allocation114_spill] sm:$0xff]  ;;  %v10209_v28 = vld [vmem:[#allocation316_spill] sm:$0xff] }
 0x40f   : > { %v4674_v25 = vor.u32 %v4673_v45, %v4669_v3  ;;  %v4660_v41 = vrot.slane %v4658_v47, 5  ;;  %v4663_v53 = vrot.slane %v4661_v15, 4  ;;  %v4156_v46 = vld [vmem:[#allocation2 + $0xb0] ss:$2 sm:$0xff]  ;;  %v4246_v58 = vld [vmem:[#allocation2 + $0xb1] ss:$2 sm:$0xff]  ;;  %v2666_v9 = vsel %vm2612_vm7, %v2545_v54, %v10187_v26 }
 0x410   : > { %v2239_v14 = vpop.permute.xlu1 %2238  ;;  %v4210_v40 = vmax.f32 %v4120_v21, %v4156_v46  ;;  %v5209_v30 = vpop.f32.mrf.mxu1  ;;  %v2304_v23 = vsel %vm9420_vm4, %v5450_v5, %v10188_v24  ;;  %v2787_v37 = vsel %vm2733_vm8, %v2666_v9, %v10189_v27  ;;  %v10192_v45 = vld [vmem:[#allocation201_spill] sm:$0xff]  ;;  %v10197_v46 = vld [vmem:[#allocation299_spill] sm:$0xff] }
 0x411   : > { %v4675_v7 = vrot.slane %v4674_v25, 4  ;;  %v4664_v12 = vor.u32 %v4663_v53, %v4660_v41  ;;  %v4680_v48 = vsel %vm8674_vm3, %v4660_v41, %v4679_v19  ;;  %v4154_v51 = vld [vmem:[#allocation2 + $0xa0] ss:$2 sm:$0xff]  ;;  %3956 = vst.msk [vmem:[#allocation2 + $0x290] sm:$0xff] %vm3873_vm13, %v5209_v30  ;;  %v3208_v39 = vsel %vm3096_vm11, %v3087_v60, %v2239_v14  ;;  %v2237_v2 = vpop.permute.xlu0 %2236  ;;  %v4244_v63 = vld [vmem:[#allocation2 + $0xa1] ss:$2 sm:$0xff] }
 0x412   : > { %4681 = vst [vmem:[%s8444_s8 + $0x40] sm:$0x8] %v4680_v48  ;;  %v4300_v61 = vmax.f32 %v4210_v40, %v4246_v58  ;;  %v4209_v35 = vmax.f32 %v4119_v56, %v4154_v51  ;;  %v3206_v62 = vsel %vm3096_vm11, %v3085_v57, %v2237_v2  ;;  %v3714_v22 = vpop.f32.mrf.mxu1  ;;  %vm4479_vm3 = vsmask.f32 2304  ;;  %v10198_v40 = vld [vmem:[#allocation329_spill] sm:$0xff] }
 0x413   : > { %4683 = vst.msk [vmem:[%s8444_s8 + $0x48] sm:$0x7] %vm4457_vm10, %v4675_v7  ;;  %v4665_v20 = vrot.slane %v4664_v12, 4  ;;  %5235 = vmatprep.mubr.msk.bf16.mxu1 %vm3232_vm12, %v3206_v62  ;;  %vm8831_vm2 = vmand %vm4457_vm10, %vm4479_vm3  ;;  %v2426_v47 = vsel %vm2370_vm5, %v2304_v23, %v10192_v45  ;;  %vm10196_vm10 = vcmask 171008  }
 0x414   : > { %3954 = vst.msk [vmem:[#allocation2 + $0x280] sm:$0xff] %vm3873_vm13, %v3714_v22  ;;  %v1915_v36 = vpop.permute.xlu1 %1914  ;;  %v4336_v29 = vadd.f32 %v8423_v16, %v4300_v61  ;;  %v4299_v17 = vmax.f32 %v4209_v35, %v4244_v63  ;;  %v5210_v42 = vpop.f32.mrf.mxu1  ;;  %5236 = vmatmul.mubr.msk.bf16.gmra.mxu1 %vm3232_vm12, %v3208_v39  ;;  %v2547_v55 = vsel %vm2491_vm6, %v2426_v47, %v10193_v49  ;;  %v5451_v22 = vld [vmem:[%s5509_s17 + $0x1c8] sm:$0xff]  }
 0x415   : > { %v4670_v34 = vsel %vm8690_vm1, %v4665_v20, %v4669_v3  ;;  %3957 = vst.msk [vmem:[#allocation2 + $0x298] sm:$0xff] %vm3873_vm13, %v5210_v42  ;;  %v1913_v18 = vpop.permute.xlu0 %1912  ;;  %vm4464_vm1 = vcmask 1042432   ;;  %v2668_v44 = vsel %vm2612_vm7, %v2547_v55, %v10197_v46  ;;  %v10200_v20 = vld [vmem:[#allocation164_spill] sm:$0xff]  ;;  %v10204_v42 = vld [vmem:[#allocation233_spill] sm:$0xff] }
 0x416   : > { %4682 = vst.msk [vmem:[%s8444_s8 + $0x44] sm:$0xf] %vm4413_vm14, %v4670_v34  ;;  %v4366_v11 = vmax.f32 %v4336_v29, 0.0  ;;  %v4335_v32 = vadd.f32 %v8423_v16, %v4299_v17  ;;  %v3717_v0 = vpop.f32.mrf.mxu1  ;;  %v2908_v21 = vsel %vm2854_vm9, %v2787_v37, %v1913_v18  ;;  %vm8841_vm4 = vmor %vm4464_vm1, %vm4465_vm15  ;;  %v2789_v60 = vsel %vm2733_vm8, %v2668_v44, %v10198_v40  ;;  %v10202_v29 = vld [vmem:[#allocation166_spill] sm:$0xff]  ;;  %v10212_v55 = vld [vmem:[#allocation204_spill] sm:$0xff] }
 0x417   : > { %3955 = vst.msk [vmem:[#allocation2 + $0x288] sm:$0xff] %vm3873_vm13, %v3717_v0  ;;  %v2910_v12 = vsel %vm2854_vm9, %v2789_v60, %v1915_v36  ;;  %vm10199_vm1 = vmmov %vm10196_vm10  ;;  %vm10201_vm15 = vcmask 23552   ;;  %v5452_v36 = vld [vmem:[%s5509_s17 + $0x1c0] sm:$0xff]  }
 0x418   : > { %v2054_v1 = vpop.permute.xlu1 %2053  ;;  %v5036_v10 = vpack.c.bf16 %v4366_v11, %v4366_v11  ;;  %v4365_v4 = vmax.f32 %v4335_v32, 0.0  ;;  %v2364_v63 = vsel %vm10201_vm15, %v5451_v22, %v10200_v20  ;;  %v10207_v32 = vld [vmem:[#allocation276_spill] sm:$0xff]  ;;  %v10213_v44 = vld [vmem:[#allocation255_spill] sm:$0xff]  ;;  %v10219_v22 = vld [vmem:[#allocation254_spill] sm:$0xff] }
 0x419   : > { %v2052_v59 = vpop.permute.xlu0 %2051  ;;  %v3031_v48 = vsel %vm10199_vm1, %v2910_v12, %v2054_v1  ;;  %v2486_v34 = vsel %vm2370_vm5, %v2364_v63, %v10204_v42  ;;  %v10220_v42 = vld [vmem:[#allocation301_spill] sm:$0xff] }
 0x41a   : > { %v4469_v31 = vrot.slane %v5036_v10, 5  ;;  %v5035_v16 = vpack.c.bf16 %v4365_v4, %v4365_v4  ;;  %v3029_v41 = vsel %vm10196_vm10, %v2908_v21, %v2052_v59  ;;  %vm10203_vm10 = vmmov %vm10201_vm15  ;;  %v2607_v11 = vsel %vm2491_vm6, %v2486_v34, %v10206_v50  ;;  %v291_v50 = vld [vmem:[%s5509_s17 + $0x1dc] sm:$0x7] }
 0x41b   : > { %v2362_v17 = vsel %vm10203_vm10, %v5452_v36, %v10202_v29  ;;  %v2728_v52 = vsel %vm2612_vm7, %v2607_v11, %v10208_v43  ;;  %vm10210_vm15 = vmmov %vm10199_vm1  ;;  %v10221_v11 = vld [vmem:[#allocation331_spill] sm:$0xff] }
 0x41c   : > { %v1843_v3 = vpop.permute.xlu1 %1842  ;;  %v4471_v15 = vrot.slane %v4469_v31, 4  ;;  %v4467_v13 = vrot.slane %v5035_v16, 5  ;;  %v2484_v38 = vsel %vm2370_vm5, %v2362_v17, %v10205_v33  ;;  %v4098_v46 = vld [vmem:[#allocation2 + $0x291] ss:$2 sm:$0xff] }
 0x41d   : > { %v2181_v53 = vpop.permute.xlu0 %2180  ;;  %v2605_v0 = vsel %vm2491_vm6, %v2484_v38, %v10207_v32 }
 0x41e   : > { %v4482_v14 = vsel %vm8831_vm2, %v4471_v15, %v4481_v8  ;;  %v4468_v56 = vrot.slane %v4467_v13, 4  ;;  %4476 = vst.msk [vmem:[%s8444_s8 + $0xc] sm:$0x8] %vm4450_vm0, %v4467_v13  ;;  %v3150_v19 = vsel %vm3096_vm11, %v3029_v41, %v2181_v53  ;;  %v2726_v54 = vsel %vm2612_vm7, %v2605_v0, %v10209_v28  ;;  %v5453_v15 = vld [vmem:[%s5509_s17 + $0xe0] sm:$0xff]   ;;  %v10211_v13 = vld [vmem:[#allocation120_spill] sm:$0xff] }
 0x41f   : > { %4483 = vst [vmem:[%s8444_s8 + $0x14] sm:$0x7] %v4482_v14  ;;  %v5153_v57 = vpop.f32.mrf.mxu0  ;;  %5179 = vmatprep.mubr.msk.bf16.mxu0 %vm3232_vm12, %v3150_v19  ;;  %v2847_v4 = vsel %vm2733_vm8, %v2726_v54, %v1843_v3  ;;  %v2306_v21 = vsel %vm10203_vm10, %v5453_v15, %v10211_v13  ;;  %v4038_v53 = vld [vmem:[#allocation2 + $0x290] ss:$2 sm:$0xff]  ;;  %v4036_v60 = vld [vmem:[#allocation2 + $0x280] ss:$2 sm:$0xff] }
 0x420   : > { %v1845_v30 = vpop.permute.xlu1 %1844  ;;  %v4470_v7 = vsel %vm8841_vm4, %v4468_v56, %v4469_v31  ;;  %3900 = vst.msk [vmem:[#allocation2 + $0xd0] sm:$0xff] %vm3873_vm13, %v5153_v57  ;;  %v2428_v41 = vsel %vm2370_vm5, %v2306_v21, %v10212_v55  ;;  %v10214_v19 = vld [vmem:[#allocation302_spill] sm:$0xff]  ;;  %v4096_v57 = vld [vmem:[#allocation2 + $0x281] ss:$2 sm:$0xff] }
 0x421   : > { %4477 = vst.msk [vmem:[%s8444_s8 + $0x10] sm:$0xf] %vm4413_vm14, %v4470_v7  ;;  %v3490_v58 = vpop.f32.mrf.mxu0  ;;  %v2183_v51 = vpop.permute.xlu0 %2182  ;;  %v2849_v10 = vsel %vm2733_vm8, %v2728_v52, %v1845_v30  ;;  %v2549_v14 = vsel %vm2491_vm6, %v2428_v41, %v10213_v44  ;;  %v5454_v30 = vld [vmem:[%s5509_s17 + $0xe8] sm:$0xff]   ;;  %v10215_v7 = vld [vmem:[#allocation118_spill] sm:$0xff]  ;;  %v4135_v63 = vmax.f32 %v4036_v60, %v4096_v57  ;;  %v10224_v55 = vld [vmem:[#allocation171_spill] sm:$0xff] }
 0x422   : > { %3898 = vst.msk [vmem:[#allocation2 + $0xc0] sm:$0xff] %vm3873_vm13, %v3490_v58  ;;  %v3152_v39 = vsel %vm3096_vm11, %v3031_v48, %v2183_v51  ;;  %v2670_v40 = vsel %vm2612_vm7, %v2549_v14, %v10214_v19  ;;  %v10217_v48 = vld [vmem:[#allocation332_spill] sm:$0xff]  ;;  %v4136_v51 = vmax.f32 %v4038_v53, %v4098_v46  ;;  %v10226_v53 = vld [vmem:[#allocation235_spill] sm:$0xff] }
 0x423   : > { %v5154_v2 = vpop.f32.mrf.mxu0  ;;  %5180 = vmatmul.mubr.msk.bf16.gmra.mxu0 %vm3232_vm12, %v3152_v39  ;;  %v2791_v58 = vsel %vm2733_vm8, %v2670_v40, %v10217_v48  ;;  %v10223_v13 = vld [vmem:[#allocation168_spill] sm:$0xff]  ;;  %v10229_v48 = vld [vmem:[#allocation278_spill] sm:$0xff] }
 0x424   : > { %v1975_v61 = vpop.permute.xlu1 %1974  ;;  %3901 = vst.msk [vmem:[#allocation2 + $0xd8] sm:$0xff] %vm3873_vm13, %v5154_v2  ;;  %v10218_v2 = vld [vmem:[#allocation203_spill] sm:$0xff]  ;;  %v10227_v60 = vld [vmem:[#allocation236_spill] sm:$0xff] }
 0x425   : > { %v3493_v35 = vpop.f32.mrf.mxu0  ;;  %v1973_v62 = vpop.permute.xlu0 %1972  ;;  %v2970_v26 = vsel %vm2854_vm9, %v2849_v10, %v1975_v61  ;;  %v8935_v10 = vld [vmem:[%s9192_s2] ss:$0 sm:$0xff] }
 0x426   : > { %3899 = vst.msk [vmem:[#allocation2 + $0xc8] sm:$0xff] %vm3873_vm13, %v3493_v35  ;;  %v2968_v59 = vsel %vm2854_vm9, %v2847_v4, %v1973_v62 }
 0x428   : > { %v2114_v18 = vpop.permute.xlu1 %2113 }
 0x429   : > { %v2112_v1 = vpop.permute.xlu0 %2111  ;;  %v3091_v31 = vsel %vm10199_vm1, %v2970_v26, %v2114_v18  ;;  %vm10216_vm1 = vmmov %vm10203_vm10 }
 0x42a   : > { %v3089_v5 = vsel %vm10210_vm15, %v2968_v59, %v2112_v1  ;;  %v2308_v12 = vsel %vm10216_vm1, %v5454_v30, %v10215_v7  ;;  %vm10222_vm10 = vmmov %vm10210_vm15  ;;  %v10228_v30 = vld [vmem:[#allocation277_spill] sm:$0xff] }
 0x42b   : > { %v2430_v61 = vsel %vm2370_vm5, %v2308_v12, %v10218_v2  ;;  %v4010_v44 = vld [vmem:[#allocation2 + $0xd0] ss:$2 sm:$0xff]  ;;  %v4070_v14 = vld [vmem:[#allocation2 + $0xd1] ss:$2 sm:$0xff] }
 0x42c   : > { %v2243_v9 = vpop.permute.xlu1 %2242  ;;  %v5213_v16 = vpop.f32.mrf.mxu1  ;;  %v2551_v20 = vsel %vm2491_vm6, %v2430_v61, %v10219_v22  ;;  %v4699_v12 = vld [vmem:[%s8444_s8 + $0x50] sm:$0x7] }
 0x42d   : > { %3960 = vst.msk [vmem:[#allocation2 + $0x2b0] sm:$0xff] %vm3873_vm13, %v5213_v16  ;;  %v3212_v24 = vsel %vm3096_vm11, %v3091_v31, %v2243_v9  ;;  %v2241_v23 = vpop.permute.xlu0 %2240  ;;  %v2672_v34 = vsel %vm2612_vm7, %v2551_v20, %v10220_v42  ;;  %v5456_v16 = vld [vmem:[%s5509_s17 + $0x1d8] sm:$0xf]  ;;  %v4008_v61 = vld [vmem:[#allocation2 + $0xc0] ss:$2 sm:$0xff] }
 0x42e   : > { %v3210_v27 = vsel %vm3096_vm11, %v3089_v5, %v2241_v23  ;;  %v3730_v37 = vpop.f32.mrf.mxu1  ;;  %v2793_v32 = vsel %vm2733_vm8, %v2672_v34, %v10221_v11  ;;  %v4924_v5 = vcombine.low %v5456_v16, %v291_v50 }
 0x42f   : > { %3958 = vst.msk [vmem:[#allocation2 + $0x2a0] sm:$0xff] %vm3873_vm13, %v3730_v37  ;;  %5239 = vmatprep.mubr.msk.bf16.mxu1 %vm3232_vm12, %v3210_v27 }
 0x430   : > { %v1919_v8 = vpop.permute.xlu1 %1918  ;;  %v5214_v3 = vpop.f32.mrf.mxu1  ;;  %5240 = vmatmul.mubr.msk.bf16.gmra.mxu1 %vm3232_vm12, %v3212_v24  ;;  %v2369_v21 = vsel %vm10216_vm1, %v4924_v5, %v10223_v13 }
 0x431   : > { %3961 = vst.msk [vmem:[#allocation2 + $0x2b8] sm:$0xff] %vm3873_vm13, %v5214_v3  ;;  %v1917_v45 = vpop.permute.xlu0 %1916  ;;  %v2914_v28 = vsel %vm2854_vm9, %v2793_v32, %v1919_v8  ;;  %v2490_v46 = vsel %vm2370_vm5, %v2369_v21, %v10226_v53 }
 0x432   : > { %v3733_v47 = vpop.f32.mrf.mxu1  ;;  %v2912_v62 = vsel %vm2854_vm9, %v2791_v58, %v1917_v45  ;;  %v2611_v7 = vsel %vm2491_vm6, %v2490_v46, %v10228_v30 }
 0x433   : > { %3959 = vst.msk [vmem:[#allocation2 + $0x2a8] sm:$0xff] %vm3873_vm13, %v3733_v47 }
 0x434   : > { %v2058_v49 = vpop.permute.xlu1 %2057 }
 0x435   : > { %v2056_v56 = vpop.permute.xlu0 %2055  ;;  %v3035_v9 = vsel %vm10222_vm10, %v2914_v28, %v2058_v49  ;;  %v5457_v49 = vld [vmem:[%s5509_s17 + $0x1d0] sm:$0xff]  }
 0x436   : > { %v3033_v29 = vsel %vm10210_vm15, %v2912_v62, %v2056_v56  ;;  %vm10225_vm15 = vmmov %vm10216_vm1 }
 0x437   : > { %v2366_v41 = vsel %vm10225_vm15, %v5457_v49, %v10224_v55  ;;  %vm4576_vm15 = vcmask 257025  }
 0x438   : > { %v8915_v39 = vpop.permute.xlu1 %1846  ;;  %v4188_v35 = vld [vmem:[#allocation2 + $0x2b0] ss:$2 sm:$0xff]  ;;  %v4278_v18 = vld [vmem:[#allocation2 + $0x2b1] ss:$2 sm:$0xff]  ;;  %v2488_v57 = vsel %vm2370_vm5, %v2366_v41, %v10227_v60  ;;  %vm10232_vm5 = vmmov %vm10222_vm10 }
 0x439   : > { %v4226_v36 = vmax.f32 %v4136_v51, %v4188_v35  ;;  %v2185_v17 = vpop.permute.xlu0 %2184  ;;  %v2609_v58 = vsel %vm2491_vm6, %v2488_v57, %v10229_v48  ;;  %v10230_v51 = vld [vmem:[#allocation317_spill] sm:$0xff]  ;;  %v4068_v35 = vld [vmem:[#allocation2 + $0xc1] ss:$2 sm:$0xff]  ;;  %vm10233_vm6 = vmmov %vm10232_vm5 }
 0x43a   : > { %v4186_v33 = vld [vmem:[#allocation2 + $0x2a0] ss:$2 sm:$0xff]  ;;  %v3154_v38 = vsel %vm3096_vm11, %v3033_v29, %v2185_v17  ;;  %v4276_v54 = vld [vmem:[#allocation2 + $0x2a1] ss:$2 sm:$0xff]  ;;  %v2732_v2 = vsel %vm2612_vm7, %v2611_v7, %v10230_v51  ;;  %v4122_v29 = vmax.f32 %v4010_v44, %v4070_v14  ;;  %v4121_v11 = vmax.f32 %v4008_v61, %v4068_v35  ;;  %v4516_v57 = vld [vmem:[%s8444_s8 + $0x14] sm:$0xc] }
 0x43b   : > { %v4316_v0 = vmax.f32 %v4226_v36, %v4278_v18  ;;  %v4225_v43 = vmax.f32 %v4135_v63, %v4186_v33  ;;  %v5157_v52 = vpop.f32.mrf.mxu0  ;;  %5183 = vmatprep.mubr.msk.bf16.mxu0 %vm3232_vm12, %v3154_v38  ;;  %v10231_v63 = vld [vmem:[#allocation318_spill] sm:$0xff] }
 0x43c   : > { %v1849_v1 = vpop.permute.xlu1 %1848  ;;  %3904 = vst.msk [vmem:[#allocation2 + $0xf0] sm:$0xff] %vm3873_vm13, %v5157_v52  ;;  %v2730_v36 = vsel %vm2612_vm7, %v2609_v58, %v10231_v63  ;;  %vm4514_vm7 = vsmask.f32 7946 }
 0x43d   : > { %v4352_v4 = vadd.f32 %v8935_v10, %v4316_v0  ;;  %v4315_v26 = vmax.f32 %v4225_v43, %v4276_v54  ;;  %v3506_v59 = vpop.f32.mrf.mxu0  ;;  %v2187_v31 = vpop.permute.xlu0 %2186  ;;  %v2853_v17 = vsel %vm2733_vm8, %v2732_v2, %v1849_v1  ;;  %v2851_v18 = vsel %vm2733_vm8, %v2730_v36, %v8915_v39 }
 0x43e   : > { %3902 = vst.msk [vmem:[#allocation2 + $0xe0] sm:$0xff] %vm3873_vm13, %v3506_v59  ;;  %v3156_v24 = vsel %vm3096_vm11, %v3035_v9, %v2187_v31  ;;  %vm4489_vm8 = vsmask.f32 6416 }
 0x43f   : > { %v4382_v23 = vmax.f32 %v4352_v4, 0.0  ;;  %v4351_v27 = vadd.f32 %v8935_v10, %v4315_v26  ;;  %v5158_v37 = vpop.f32.mrf.mxu0  ;;  %5184 = vmatmul.mubr.msk.bf16.gmra.mxu0 %vm3232_vm12, %v3156_v24 }
 0x440   : > { %v1979_v8 = vpop.permute.xlu1 %1978  ;;  %3905 = vst.msk [vmem:[#allocation2 + $0xf8] sm:$0xff] %vm3873_vm13, %v5158_v37 }
 0x441   : > { %v5052_v3 = vpack.c.bf16 %v4382_v23, %v4382_v23  ;;  %v4381_v45 = vmax.f32 %v4351_v27, 0.0  ;;  %v3509_v47 = vpop.f32.mrf.mxu0  ;;  %v1977_v15 = vpop.permute.xlu0 %1976  ;;  %v2974_v38 = vsel %vm2854_vm9, %v2853_v17, %v1979_v8 }
 0x442   : > { %3903 = vst.msk [vmem:[#allocation2 + $0xe8] sm:$0xff] %vm3873_vm13, %v3509_v47  ;;  %v2972_v0 = vsel %vm2854_vm9, %v2851_v18, %v1977_v15  ;;  %vm4520_vm9 = vcmask 254976  }
 0x443   : > { %v4691_v56 = vrot.slane %v5052_v3, 5  ;;  %v5051_v19 = vpack.c.bf16 %v4381_v45, %v4381_v45 }
 0x444   : > { %v2118_v40 = vpop.permute.xlu1 %2117 }
 0x445   : > { %v4693_v62 = vrot.slane %v4691_v56, 4  ;;  %v4689_v22 = vrot.slane %v5051_v19, 5  ;;  %v2116_v20 = vpop.permute.xlu0 %2115  ;;  %v3095_v43 = vsel %vm10232_vm5, %v2974_v38, %v2118_v40  ;;  %vm4577_vm5 = vsmask.f32 7942 }
 0x446   : > { %v3093_v39 = vsel %vm10233_vm6, %v2972_v0, %v2116_v20  ;;  %vm4552_vm6 = vsmask.f32 5392 }
 0x447   : > { %v4700_v42 = vsel %vm8831_vm2, %v4693_v62, %v4699_v12  ;;  %v4690_v34 = vrot.slane %v4689_v22, 4  ;;  %4697 = vst.msk [vmem:[%s8444_s8 + $0x48] sm:$0x8] %vm4450_vm0, %v4689_v22  ;;  %v4160_v33 = vld [vmem:[#allocation2 + $0xf0] ss:$2 sm:$0xff]  ;;  %vm4528_vm2 = vcmask 1045508  }
 0x448   : > { %v2247_v50 = vpop.permute.xlu1 %2246  ;;  %4701 = vst [vmem:[%s8444_s8 + $0x50] sm:$0x7] %v4700_v42  ;;  %v4212_v32 = vmax.f32 %v4122_v29, %v4160_v33  ;;  %v5217_v6 = vpop.f32.mrf.mxu1  ;;  %v4250_v1 = vld [vmem:[#allocation2 + $0xf1] ss:$2 sm:$0xff]  ;;  %vm4542_vm0 = vsmask.f32 1280 }
 0x449   : > { %v4692_v52 = vsel %vm8841_vm4, %v4690_v34, %v4691_v56  ;;  %v4158_v28 = vld [vmem:[#allocation2 + $0xe0] ss:$2 sm:$0xff]  ;;  %3964 = vst.msk [vmem:[#allocation2 + $0x2d0] sm:$0xff] %vm3873_vm13, %v5217_v6  ;;  %v3216_v54 = vsel %vm3096_vm11, %v3095_v43, %v2247_v50  ;;  %v2245_v4 = vpop.permute.xlu0 %2244  ;;  %v4248_v16 = vld [vmem:[#allocation2 + $0xe1] ss:$2 sm:$0xff]  ;;  %vm4513_vm4 = vcmask 257026   ;;  %vm9042_vm10 = vmand %vm4520_vm9, %vm4542_vm0 }
 0x44a   : > { %4698 = vst.msk [vmem:[%s8444_s8 + $0x4c] sm:$0xf] %vm4413_vm14, %v4692_v52  ;;  %v4302_v26 = vmax.f32 %v4212_v32, %v4250_v1  ;;  %v4211_v9 = vmax.f32 %v4121_v11, %v4158_v28  ;;  %v3214_v59 = vsel %vm3096_vm11, %v3093_v39, %v2245_v4  ;;  %v3746_v31 = vpop.f32.mrf.mxu1  ;;  %vm8991_vm11 = vmand %vm4513_vm4, %vm4514_vm7 }
 0x44b   : > { %3962 = vst.msk [vmem:[#allocation2 + $0x2c0] sm:$0xff] %vm3873_vm13, %v3746_v31  ;;  %5243 = vmatprep.mubr.msk.bf16.mxu1 %vm3232_vm12, %v3214_v59  ;;  %vm9091_vm7 = vmand %vm4576_vm15, %vm4577_vm5 }
 0x44c   : > { %v4338_v25 = vadd.f32 %v8935_v10, %v4302_v26  ;;  %v4301_v5 = vmax.f32 %v4211_v9, %v4248_v16  ;;  %v5218_v24 = vpop.f32.mrf.mxu1  ;;  %5244 = vmatmul.mubr.msk.bf16.gmra.mxu1 %vm3232_vm12, %v3216_v54  ;;  %vm8997_vm12 = vmor %vm4479_vm3, %vm4489_vm8  ;;  %vm4527_vm3 = vcmask 1041408  }
 0x44d   : > { %3965 = vst.msk [vmem:[#allocation2 + $0x2d8] sm:$0xff] %vm3873_vm13, %v5218_v24  ;;  %vm9047_vm1 = vmor %vm4527_vm3, %vm4528_vm2  ;;  %vm3993_vm2 = vcmask 259072  }
 0x44e   : > { %v4368_v23 = vmax.f32 %v4338_v25, 0.0  ;;  %v4337_v27 = vadd.f32 %v8935_v10, %v4301_v5  ;;  %v3749_v37 = vpop.f32.mrf.mxu1  ;;  %vm9097_vm8 = vmor %vm4542_vm0, %vm4552_vm6 }
 0x44f   : > { %3963 = vst.msk [vmem:[#allocation2 + $0x2c8] sm:$0xff] %vm3873_vm13, %v3749_v37 }
 0x450   : > { %v5038_v8 = vpack.c.bf16 %v4368_v23, %v4368_v23  ;;  %v4367_v3 = vmax.f32 %v4337_v27, 0.0 }
 0x452   : > { %v4501_v45 = vshrl.u32 %v5038_v8, 16  ;;  %v4504_v47 = vshll.u32 %v5038_v8, 16  ;;  %v5037_v15 = vpack.c.bf16 %v4367_v3, %v4367_v3 }
 0x454   : > { %v4503_v13 = vrot.slane %v4501_v45, 5  ;;  %v4506_v21 = vrot.slane %v4504_v47, 6  ;;  %v4492_v49 = vshrl.u32 %v5037_v15, 16  ;;  %v4495_v55 = vshll.u32 %v5037_v15, 16  ;;  %v4042_v62 = vld [vmem:[#allocation2 + $0x2d0] ss:$2 sm:$0xff] }
 0x455   : > { %v4102_v22 = vld [vmem:[#allocation2 + $0x2d1] ss:$2 sm:$0xff] }
 0x456   : > { %v4507_v41 = vor.u32 %v4506_v21, %v4503_v13  ;;  %v4494_v53 = vrot.slane %v4492_v49, 5  ;;  %v4497_v46 = vrot.slane %v4495_v55, 6  ;;  %v4040_v20 = vld [vmem:[#allocation2 + $0x2c0] ss:$2 sm:$0xff]  ;;  %v4100_v63 = vld [vmem:[#allocation2 + $0x2c1] ss:$2 sm:$0xff]  ;;  %v4138_v36 = vmax.f32 %v4042_v62, %v4102_v22 }
 0x457   : > { %v5161_v44 = vpop.f32.mrf.mxu0  ;;  %v4137_v17 = vmax.f32 %v4040_v20, %v4100_v63  ;;  %v4544_v20 = vld [vmem:[%s8444_s8 + $0x24] sm:$0x3] }
 0x458   : > { %v4509_v56 = vrot.slane %v4507_v41, 4  ;;  %v4498_v19 = vor.u32 %v4497_v46, %v4494_v53  ;;  %3908 = vst.msk [vmem:[#allocation2 + $0x110] sm:$0xff] %vm3873_vm13, %v5161_v44 }
 0x459   : > { %v3522_v60 = vpop.f32.mrf.mxu0 }
 0x45a   : > { %4521 = vst.msk [vmem:[%s8444_s8 + $0x1c] sm:$0x3] %vm4520_vm9, %v4509_v56  ;;  %v4499_v30 = vrot.slane %v4498_v19, 4  ;;  %v4517_v7 = vsel %vm8991_vm11, %v4498_v19, %v4516_v57  ;;  %v4729_v56 = vld [vmem:[%s8444_s8 + $0x50] sm:$0xc] }
 0x45b   : > { %3906 = vst.msk [vmem:[#allocation2 + $0x100] sm:$0xff] %vm3873_vm13, %v3522_v60  ;;  %v5162_v12 = vpop.f32.mrf.mxu0  ;;  %4518 = vst [vmem:[%s8444_s8 + $0x14] sm:$0xc] %v4517_v7 }
 0x45c   : > { %v4508_v48 = vsel %vm8997_vm12, %v4499_v30, %v4507_v41  ;;  %3909 = vst.msk [vmem:[#allocation2 + $0x118] sm:$0xff] %vm3873_vm13, %v5162_v12 }
 0x45d   : > { %4519 = vst.msk [vmem:[%s8444_s8 + $0x18] sm:$0xf] %vm4413_vm14, %v4508_v48  ;;  %v3525_v58 = vpop.f32.mrf.mxu0 }
 0x45e   : > { %3907 = vst.msk [vmem:[#allocation2 + $0x108] sm:$0xff] %vm3873_vm13, %v3525_v58 }
 0x463   : > { %v4014_v4 = vld [vmem:[#allocation2 + $0x110] ss:$2 sm:$0xff]  ;;  %v4074_v26 = vld [vmem:[#allocation2 + $0x111] ss:$2 sm:$0xff] }
 0x464   : > { %v5221_v51 = vpop.f32.mrf.mxu1  ;;  %v4124_v37 = vmax.f32 %v4014_v4, %v4074_v26 }
 0x465   : > { %3968 = vst.msk [vmem:[#allocation2 + $0x2f0] sm:$0xff] %vm3873_vm13, %v5221_v51  ;;  %v4012_v16 = vld [vmem:[#allocation2 + $0x100] ss:$2 sm:$0xff]  ;;  %v4072_v25 = vld [vmem:[#allocation2 + $0x101] ss:$2 sm:$0xff] }
 0x466   : > { %v3762_v2 = vpop.f32.mrf.mxu1  ;;  %v4123_v15 = vmax.f32 %v4012_v16, %v4072_v25 }
 0x467   : > { %3966 = vst.msk [vmem:[#allocation2 + $0x2e0] sm:$0xff] %vm3873_vm13, %v3762_v2 }
 0x468   : > { %v5222_v61 = vpop.f32.mrf.mxu1 }
 0x469   : > { %3969 = vst.msk [vmem:[#allocation2 + $0x2f8] sm:$0xff] %vm3873_vm13, %v5222_v61 }
 0x46a   : > { %v3765_v35 = vpop.f32.mrf.mxu1 }
 0x46b   : > { %3967 = vst.msk [vmem:[#allocation2 + $0x2e8] sm:$0xff] %vm3873_vm13, %v3765_v35 }
 0x470   : > { %v4192_v29 = vld [vmem:[#allocation2 + $0x2f0] ss:$2 sm:$0xff]  ;;  %v4282_v34 = vld [vmem:[#allocation2 + $0x2f1] ss:$2 sm:$0xff] }
 0x471   : > { %v4228_v42 = vmax.f32 %v4138_v36, %v4192_v29 }
 0x472   : > { %v4190_v18 = vld [vmem:[#allocation2 + $0x2e0] ss:$2 sm:$0xff]  ;;  %v4280_v11 = vld [vmem:[#allocation2 + $0x2e1] ss:$2 sm:$0xff] }
 0x473   : > { %v4318_v33 = vmax.f32 %v4228_v42, %v4282_v34  ;;  %v4227_v38 = vmax.f32 %v4137_v17, %v4190_v18  ;;  %v5165_v50 = vpop.f32.mrf.mxu0 }
 0x474   : > { %3912 = vst.msk [vmem:[#allocation2 + $0x130] sm:$0xff] %vm3873_vm13, %v5165_v50 }
 0x475   : > { %v4354_v32 = vadd.f32 %v8935_v10, %v4318_v33  ;;  %v4317_v0 = vmax.f32 %v4227_v38, %v4280_v11  ;;  %v3538_v43 = vpop.f32.mrf.mxu0 }
 0x476   : > { %3910 = vst.msk [vmem:[#allocation2 + $0x120] sm:$0xff] %vm3873_vm13, %v3538_v43 }
 0x477   : > { %v4384_v6 = vmax.f32 %v4354_v32, 0.0  ;;  %v4353_v52 = vadd.f32 %v8935_v10, %v4317_v0  ;;  %v5166_v1 = vpop.f32.mrf.mxu0 }
 0x478   : > { %3913 = vst.msk [vmem:[#allocation2 + $0x138] sm:$0xff] %vm3873_vm13, %v5166_v1 }
 0x479   : > { %v5054_v28 = vpack.c.bf16 %v4384_v6, %v4384_v6  ;;  %v4383_v39 = vmax.f32 %v4353_v52, 0.0  ;;  %v3541_v54 = vpop.f32.mrf.mxu0 }
 0x47a   : > { %3911 = vst.msk [vmem:[#allocation2 + $0x128] sm:$0xff] %vm3873_vm13, %v3541_v54 }
 0x47b   : > { %v4717_v9 = vshrl.u32 %v5054_v28, 16  ;;  %v4720_v59 = vshll.u32 %v5054_v28, 16  ;;  %v5053_v31 = vpack.c.bf16 %v4383_v39, %v4383_v39 }
 0x47d   : > { %v4719_v5 = vrot.slane %v4717_v9, 5  ;;  %v4722_v24 = vrot.slane %v4720_v59, 6  ;;  %v4708_v23 = vshrl.u32 %v5053_v31, 16  ;;  %v4711_v27 = vshll.u32 %v5053_v31, 16 }
 0x47f   : > { %v4723_v8 = vor.u32 %v4722_v24, %v4719_v5  ;;  %v4710_v3 = vrot.slane %v4708_v23, 5  ;;  %v4713_v45 = vrot.slane %v4711_v27, 6  ;;  %v4164_v47 = vld [vmem:[#allocation2 + $0x130] ss:$2 sm:$0xff]  ;;  %v4254_v41 = vld [vmem:[#allocation2 + $0x131] ss:$2 sm:$0xff] }
 0x480   : > { %v4214_v13 = vmax.f32 %v4124_v37, %v4164_v47  ;;  %v5225_v21 = vpop.f32.mrf.mxu1 }
 0x481   : > { %v4725_v49 = vrot.slane %v4723_v8, 4  ;;  %v4714_v55 = vor.u32 %v4713_v45, %v4710_v3  ;;  %v4162_v53 = vld [vmem:[#allocation2 + $0x120] ss:$2 sm:$0xff]  ;;  %3972 = vst.msk [vmem:[#allocation2 + $0x310] sm:$0xff] %vm3873_vm13, %v5225_v21  ;;  %v4252_v57 = vld [vmem:[#allocation2 + $0x121] ss:$2 sm:$0xff] }
 0x482   : > { %v4304_v46 = vmax.f32 %v4214_v13, %v4254_v41  ;;  %v4213_v44 = vmax.f32 %v4123_v15, %v4162_v53  ;;  %v3778_v19 = vpop.f32.mrf.mxu1  ;;  %v4749_v41 = vld [vmem:[%s8444_s8 + $0x60] sm:$0x3] }
 0x483   : > { %4733 = vst.msk [vmem:[%s8444_s8 + $0x58] sm:$0x3] %vm4520_vm9, %v4725_v49  ;;  %v4715_v60 = vrot.slane %v4714_v55, 4  ;;  %v4730_v30 = vsel %vm8991_vm11, %v4714_v55, %v4729_v56  ;;  %vm4605_vm9 = vsmask.f32 256  ;;  %vm4590_vm11 = vcmask 1040384  }
 0x484   : > { %3970 = vst.msk [vmem:[#allocation2 + $0x300] sm:$0xff] %vm3873_vm13, %v3778_v19  ;;  %v4340_v7 = vadd.f32 %v8935_v10, %v4304_v46  ;;  %v4303_v12 = vmax.f32 %v4213_v44, %v4252_v57  ;;  %4731 = vst [vmem:[%s8444_s8 + $0x50] sm:$0xc] %v4730_v30  ;;  %v5226_v48 = vpop.f32.mrf.mxu1 }
 0x485   : > { %v4724_v58 = vsel %vm8997_vm12, %v4715_v60, %v4723_v8  ;;  %3973 = vst.msk [vmem:[#allocation2 + $0x318] sm:$0xff] %vm3873_vm13, %v5226_v48  ;;  %vm4591_vm12 = vcmask 1044484  }
 0x486   : > { %4732 = vst.msk [vmem:[%s8444_s8 + $0x54] sm:$0xf] %vm4413_vm14, %v4724_v58  ;;  %v4370_v51 = vmax.f32 %v4340_v7, 0.0  ;;  %v4339_v2 = vadd.f32 %v8935_v10, %v4303_v12  ;;  %v3781_v14 = vpop.f32.mrf.mxu1  ;;  %vm9147_vm3 = vmor %vm4590_vm11, %vm4591_vm12 }
 0x487   : > { %3971 = vst.msk [vmem:[#allocation2 + $0x308] sm:$0xff] %vm3873_vm13, %v3781_v14 }
 0x488   : > { %v5040_v61 = vpack.c.bf16 %v4370_v51, %v4370_v51  ;;  %v4369_v35 = vmax.f32 %v4339_v2, 0.0 }
 0x48a   : > { %v4532_v62 = vrot.slane %v5040_v61, 6  ;;  %v5039_v40 = vpack.c.bf16 %v4369_v35, %v4369_v35 }
 0x48c   : > { %v4534_v63 = vrot.slane %v4532_v62, 4  ;;  %v4530_v36 = vrot.slane %v5039_v40, 6  ;;  %v4046_v6 = vld [vmem:[#allocation2 + $0x310] ss:$2 sm:$0xff]  ;;  %v4106_v52 = vld [vmem:[#allocation2 + $0x311] ss:$2 sm:$0xff] }
 0x48d   : > { %v4140_v39 = vmax.f32 %v4046_v6, %v4106_v52 }
 0x48e   : > { %v4545_v17 = vsel %vm9042_vm10, %v4534_v63, %v4544_v20  ;;  %v4531_v42 = vrot.slane %v4530_v36, 4  ;;  %4539 = vst.msk [vmem:[%s8444_s8 + $0x1c] sm:$0xc] %vm4513_vm4, %v4530_v36  ;;  %v4044_v1 = vld [vmem:[#allocation2 + $0x300] ss:$2 sm:$0xff] }
 0x48f   : > { %4546 = vst [vmem:[%s8444_s8 + $0x24] sm:$0x3] %v4545_v17  ;;  %v5169_v34 = vpop.f32.mrf.mxu0  ;;  %v4104_v28 = vld [vmem:[#allocation2 + $0x301] ss:$2 sm:$0xff] }
 0x490   : > { %v4533_v18 = vsel %vm9047_vm1, %v4531_v42, %v4532_v62  ;;  %3916 = vst.msk [vmem:[#allocation2 + $0x150] sm:$0xff] %vm3873_vm13, %v5169_v34  ;;  %v4139_v4 = vmax.f32 %v4044_v1, %v4104_v28 }
 0x491   : > { %4540 = vst.msk [vmem:[%s8444_s8 + $0x20] sm:$0xf] %vm4413_vm14, %v4533_v18  ;;  %v3554_v33 = vpop.f32.mrf.mxu0 }
 0x492   : > { %3914 = vst.msk [vmem:[#allocation2 + $0x140] sm:$0xff] %vm3873_vm13, %v3554_v33 }
 0x493   : > { %v5170_v38 = vpop.f32.mrf.mxu0 }
 0x494   : > { %3917 = vst.msk [vmem:[#allocation2 + $0x158] sm:$0xff] %vm3873_vm13, %v5170_v38 }
 0x495   : > { %v3557_v50 = vpop.f32.mrf.mxu0 }
 0x496   : > { %3915 = vst.msk [vmem:[#allocation2 + $0x148] sm:$0xff] %vm3873_vm13, %v3557_v50 }
 0x49b   : > { %v4018_v13 = vld [vmem:[#allocation2 + $0x150] ss:$2 sm:$0xff]  ;;  %v4078_v21 = vld [vmem:[#allocation2 + $0x151] ss:$2 sm:$0xff] }
 0x49c   : > { %v5229_v11 = vpop.f32.mrf.mxu1  ;;  %v4126_v19 = vmax.f32 %v4018_v13, %v4078_v21 }
 0x49d   : > { %3976 = vst.msk [vmem:[#allocation2 + $0x330] sm:$0xff] %vm3873_vm13, %v5229_v11  ;;  %v4016_v53 = vld [vmem:[#allocation2 + $0x140] ss:$2 sm:$0xff]  ;;  %v4076_v46 = vld [vmem:[#allocation2 + $0x141] ss:$2 sm:$0xff] }
 0x49e   : > { %v3794_v32 = vpop.f32.mrf.mxu1  ;;  %v4125_v7 = vmax.f32 %v4016_v53, %v4076_v46 }
 0x49f   : > { %3974 = vst.msk [vmem:[#allocation2 + $0x320] sm:$0xff] %vm3873_vm13, %v3794_v32 }
 0x4a0   : > { %v5230_v0 = vpop.f32.mrf.mxu1 }
 0x4a1   : > { %3977 = vst.msk [vmem:[#allocation2 + $0x338] sm:$0xff] %vm3873_vm13, %v5230_v0 }
 0x4a2   : > { %v3797_v43 = vpop.f32.mrf.mxu1 }
 0x4a3   : > { %3975 = vst.msk [vmem:[#allocation2 + $0x328] sm:$0xff] %vm3873_vm13, %v3797_v43 }
 0x4a8   : > { %v4196_v54 = vld [vmem:[#allocation2 + $0x330] ss:$2 sm:$0xff]  ;;  %v4286_v9 = vld [vmem:[#allocation2 + $0x331] ss:$2 sm:$0xff] }
 0x4a9   : > { %v4230_v26 = vmax.f32 %v4140_v39, %v4196_v54 }
 0x4aa   : > { %v4194_v59 = vld [vmem:[#allocation2 + $0x320] ss:$2 sm:$0xff]  ;;  %v4284_v5 = vld [vmem:[#allocation2 + $0x321] ss:$2 sm:$0xff] }
 0x4ab   : > { %v4320_v31 = vmax.f32 %v4230_v26, %v4286_v9  ;;  %v4229_v16 = vmax.f32 %v4139_v4, %v4194_v59  ;;  %v5173_v25 = vpop.f32.mrf.mxu0  ;;  %v4579_v26 = vld [vmem:[%s8444_s8 + $0x24] sm:$0xe] }
 0x4ac   : > { %3920 = vst.msk [vmem:[#allocation2 + $0x170] sm:$0xff] %vm3873_vm13, %v5173_v25 }
 0x4ad   : > { %v4356_v24 = vadd.f32 %v8935_v10, %v4320_v31  ;;  %v4319_v23 = vmax.f32 %v4229_v16, %v4284_v5  ;;  %v3570_v27 = vpop.f32.mrf.mxu0 }
 0x4ae   : > { %3918 = vst.msk [vmem:[#allocation2 + $0x160] sm:$0xff] %vm3873_vm13, %v3570_v27 }
 0x4af   : > { %v4386_v37 = vmax.f32 %v4356_v24, 0.0  ;;  %v4355_v8 = vadd.f32 %v8935_v10, %v4319_v23  ;;  %v5174_v3 = vpop.f32.mrf.mxu0 }
 0x4b0   : > { %3921 = vst.msk [vmem:[#allocation2 + $0x178] sm:$0xff] %vm3873_vm13, %v5174_v3 }
 0x4b1   : > { %v5056_v45 = vpack.c.bf16 %v4386_v37, %v4386_v37  ;;  %v4385_v47 = vmax.f32 %v4355_v8, 0.0  ;;  %v3573_v15 = vpop.f32.mrf.mxu0 }
 0x4b2   : > { %3919 = vst.msk [vmem:[#allocation2 + $0x168] sm:$0xff] %vm3873_vm13, %v3573_v15 }
 0x4b3   : > { %v4741_v49 = vrot.slane %v5056_v45, 6  ;;  %v5055_v55 = vpack.c.bf16 %v4385_v47, %v4385_v47 }
 0x4b5   : > { %v4743_v44 = vrot.slane %v4741_v49, 4  ;;  %v4739_v56 = vrot.slane %v5055_v55, 6 }
 0x4b7   : > { %v4750_v60 = vsel %vm9042_vm10, %v4743_v44, %v4749_v41  ;;  %v4740_v57 = vrot.slane %v4739_v56, 4  ;;  %4747 = vst.msk [vmem:[%s8444_s8 + $0x58] sm:$0xc] %vm4513_vm4, %v4739_v56  ;;  %v4168_v30 = vld [vmem:[#allocation2 + $0x170] ss:$2 sm:$0xff]  ;;  %vm4583_vm4 = vcmask 253952  }
 0x4b8   : > { %4751 = vst [vmem:[%s8444_s8 + $0x60] sm:$0x3] %v4750_v60  ;;  %v4216_v12 = vmax.f32 %v4126_v19, %v4168_v30  ;;  %v5233_v48 = vpop.f32.mrf.mxu1  ;;  %v4258_v51 = vld [vmem:[#allocation2 + $0x171] ss:$2 sm:$0xff]  ;;  %vm9142_vm0 = vmand %vm4583_vm4, %vm4605_vm9  ;;  %vm4615_vm10 = vsmask.f32 4368 }
 0x4b9   : > { %v4742_v58 = vsel %vm9047_vm1, %v4740_v57, %v4741_v49  ;;  %v4166_v2 = vld [vmem:[#allocation2 + $0x160] ss:$2 sm:$0xff]  ;;  %3980 = vst.msk [vmem:[#allocation2 + $0x350] sm:$0xff] %vm3873_vm13, %v5233_v48  ;;  %v4256_v62 = vld [vmem:[#allocation2 + $0x161] ss:$2 sm:$0xff] }
 0x4ba   : > { %4748 = vst.msk [vmem:[%s8444_s8 + $0x5c] sm:$0xf] %vm4413_vm14, %v4742_v58  ;;  %v4306_v14 = vmax.f32 %v4216_v12, %v4258_v51  ;;  %v4215_v61 = vmax.f32 %v4125_v7, %v4166_v2  ;;  %v3810_v35 = vpop.f32.mrf.mxu1  ;;  %vm4635_vm1 = vsmask.f32 7938 }
 0x4bb   : > { %3978 = vst.msk [vmem:[#allocation2 + $0x340] sm:$0xff] %vm3873_vm13, %v3810_v35  ;;  %vm4636_vm5 = vmand %vm4413_vm14, %vm4635_vm1 }
 0x4bc   : > { %v4342_v40 = vadd.f32 %v8935_v10, %v4306_v14  ;;  %v4305_v22 = vmax.f32 %v4215_v61, %v4256_v62  ;;  %v5234_v20 = vpop.f32.mrf.mxu1 }
 0x4bd   : > { %3981 = vst.msk [vmem:[#allocation2 + $0x358] sm:$0xff] %vm3873_vm13, %v5234_v20 }
 0x4be   : > { %v4372_v63 = vmax.f32 %v4342_v40, 0.0  ;;  %v4341_v36 = vadd.f32 %v8935_v10, %v4305_v22  ;;  %v3813_v29 = vpop.f32.mrf.mxu1 }
 0x4bf   : > { %3979 = vst.msk [vmem:[#allocation2 + $0x348] sm:$0xff] %vm3873_vm13, %v3813_v29 }
 0x4c0   : > { %v5042_v17 = vpack.c.bf16 %v4372_v63, %v4372_v63  ;;  %v4371_v42 = vmax.f32 %v4341_v36, 0.0 }
 0x4c2   : > { %v4564_v34 = vshrl.u32 %v5042_v17, 16  ;;  %v4567_v18 = vshll.u32 %v5042_v17, 16  ;;  %v5041_v33 = vpack.c.bf16 %v4371_v42, %v4371_v42 }
 0x4c4   : > { %v4566_v38 = vrot.slane %v4564_v34, 6  ;;  %v4569_v50 = vrot.slane %v4567_v18, 7  ;;  %v4555_v11 = vshrl.u32 %v5041_v33, 16  ;;  %v4558_v32 = vshll.u32 %v5041_v33, 16  ;;  %v4050_v37 = vld [vmem:[#allocation2 + $0x350] ss:$2 sm:$0xff] }
 0x4c5   : > { %v4110_v8 = vld [vmem:[#allocation2 + $0x351] ss:$2 sm:$0xff] }
 0x4c6   : > { %v4570_v0 = vor.u32 %v4569_v50, %v4566_v38  ;;  %v4557_v43 = vrot.slane %v4555_v11, 6  ;;  %v4560_v6 = vrot.slane %v4558_v32, 7  ;;  %v4048_v3 = vld [vmem:[#allocation2 + $0x340] ss:$2 sm:$0xff]  ;;  %v4108_v45 = vld [vmem:[#allocation2 + $0x341] ss:$2 sm:$0xff]  ;;  %v4142_v47 = vmax.f32 %v4050_v37, %v4110_v8 }
 0x4c7   : > { %v5177_v52 = vpop.f32.mrf.mxu0  ;;  %v4141_v13 = vmax.f32 %v4048_v3, %v4108_v45  ;;  %v4607_v3 = vld [vmem:[%s8444_s8 + $0x34] sm:$0x1] }
 0x4c8   : > { %v4572_v28 = vrot.slane %v4570_v0, 4  ;;  %v4561_v39 = vor.u32 %v4560_v6, %v4557_v43  ;;  %3924 = vst.msk [vmem:[#allocation2 + $0x190] sm:$0xff] %vm3873_vm13, %v5177_v52 }
 0x4c9   : > { %v3586_v4 = vpop.f32.mrf.mxu0 }
 0x4ca   : > { %4584 = vst.msk [vmem:[%s8444_s8 + $0x2c] sm:$0x1] %vm4583_vm4, %v4572_v28  ;;  %v4562_v9 = vrot.slane %v4561_v39, 4  ;;  %v4580_v59 = vsel %vm9091_vm7, %v4561_v39, %v4579_v26  ;;  %v4779_v28 = vld [vmem:[%s8444_s8 + $0x60] sm:$0xe] }
 0x4cb   : > { %3922 = vst.msk [vmem:[#allocation2 + $0x180] sm:$0xff] %vm3873_vm13, %v3586_v4  ;;  %v5178_v31 = vpop.f32.mrf.mxu0  ;;  %4581 = vst [vmem:[%s8444_s8 + $0x24] sm:$0xe] %v4580_v59 }
 0x4cc   : > { %v4571_v16 = vsel %vm9097_vm8, %v4562_v9, %v4570_v0  ;;  %3925 = vst.msk [vmem:[#allocation2 + $0x198] sm:$0xff] %vm3873_vm13, %v5178_v31 }
 0x4cd   : > { %4582 = vst.msk [vmem:[%s8444_s8 + $0x28] sm:$0xf] %vm4413_vm14, %v4571_v16  ;;  %v3589_v25 = vpop.f32.mrf.mxu0 }
 0x4ce   : > { %3923 = vst.msk [vmem:[#allocation2 + $0x188] sm:$0xff] %vm3873_vm13, %v3589_v25 }
 0x4d3   : > { %v4022_v51 = vld [vmem:[#allocation2 + $0x190] ss:$2 sm:$0xff]  ;;  %v4082_v2 = vld [vmem:[#allocation2 + $0x191] ss:$2 sm:$0xff] }
 0x4d4   : > { %v5237_v5 = vpop.f32.mrf.mxu1  ;;  %v4128_v29 = vmax.f32 %v4022_v51, %v4082_v2  ;;  %v4266_v51 = vld [vmem:[#allocation2 + $0x1f1] ss:$2 sm:$0xff]  ;;  %v4174_v2 = vld [vmem:[#allocation2 + $0x1e0] ss:$2 sm:$0xff] }
 0x4d5   : > { %3984 = vst.msk [vmem:[#allocation2 + $0x370] sm:$0xff] %vm3873_vm13, %v5237_v5  ;;  %v4020_v62 = vld [vmem:[#allocation2 + $0x180] ss:$2 sm:$0xff]  ;;  %v4080_v40 = vld [vmem:[#allocation2 + $0x181] ss:$2 sm:$0xff] }
 0x4d6   : > { %v3826_v24 = vpop.f32.mrf.mxu1  ;;  %v4127_v33 = vmax.f32 %v4020_v62, %v4080_v40  ;;  %v4264_v62 = vld [vmem:[#allocation2 + $0x1e1] ss:$2 sm:$0xff] }
 0x4d7   : > { %3982 = vst.msk [vmem:[#allocation2 + $0x360] sm:$0xff] %vm3873_vm13, %v3826_v24 }
 0x4d8   : > { %v5238_v23 = vpop.f32.mrf.mxu1 }
 0x4d9   : > { %3985 = vst.msk [vmem:[#allocation2 + $0x378] sm:$0xff] %vm3873_vm13, %v5238_v23 }
 0x4da   : > { %v3829_v27 = vpop.f32.mrf.mxu1 }
 0x4db   : > { %3983 = vst.msk [vmem:[#allocation2 + $0x368] sm:$0xff] %vm3873_vm13, %v3829_v27 }
 0x4e0   : > { %v4200_v15 = vld [vmem:[#allocation2 + $0x370] ss:$2 sm:$0xff]  ;;  %v4290_v49 = vld [vmem:[#allocation2 + $0x371] ss:$2 sm:$0xff] }
 0x4e1   : > { %v4232_v21 = vmax.f32 %v4142_v47, %v4200_v15 }
 0x4e2   : > { %v4198_v55 = vld [vmem:[#allocation2 + $0x360] ss:$2 sm:$0xff]  ;;  %v4288_v44 = vld [vmem:[#allocation2 + $0x361] ss:$2 sm:$0xff] }
 0x4e3   : > { %v4322_v41 = vmax.f32 %v4232_v21, %v4290_v49  ;;  %v4231_v53 = vmax.f32 %v4141_v13, %v4198_v55  ;;  %v5181_v46 = vpop.f32.mrf.mxu0 }
 0x4e4   : > { %3928 = vst.msk [vmem:[#allocation2 + $0x1b0] sm:$0xff] %vm3873_vm13, %v5181_v46 }
 0x4e5   : > { %v4358_v56 = vadd.f32 %v8935_v10, %v4322_v41  ;;  %v4321_v19 = vmax.f32 %v4231_v53, %v4288_v44  ;;  %v3602_v60 = vpop.f32.mrf.mxu0 }
 0x4e6   : > { %3926 = vst.msk [vmem:[#allocation2 + $0x1a0] sm:$0xff] %vm3873_vm13, %v3602_v60 }
 0x4e7   : > { %v4388_v57 = vmax.f32 %v4358_v56, 0.0  ;;  %v4357_v30 = vadd.f32 %v8935_v10, %v4321_v19  ;;  %v5182_v7 = vpop.f32.mrf.mxu0 }
 0x4e8   : > { %3929 = vst.msk [vmem:[#allocation2 + $0x1b8] sm:$0xff] %vm3873_vm13, %v5182_v7 }
 0x4e9   : > { %v5058_v12 = vpack.c.bf16 %v4388_v57, %v4388_v57  ;;  %v4387_v48 = vmax.f32 %v4357_v30, 0.0  ;;  %v3605_v58 = vpop.f32.mrf.mxu0  ;;  %v4176_v57 = vld [vmem:[#allocation2 + $0x1f0] ss:$2 sm:$0xff] }
 0x4ea   : > { %3927 = vst.msk [vmem:[#allocation2 + $0x1a8] sm:$0xff] %vm3873_vm13, %v3605_v58 }
 0x4eb   : > { %v4767_v14 = vshrl.u32 %v5058_v12, 16  ;;  %v4770_v61 = vshll.u32 %v5058_v12, 16  ;;  %v5057_v35 = vpack.c.bf16 %v4387_v48, %v4387_v48 }
 0x4ed   : > { %v4769_v22 = vrot.slane %v4767_v14, 6  ;;  %v4772_v20 = vrot.slane %v4770_v61, 7  ;;  %v4758_v63 = vshrl.u32 %v5057_v35, 16  ;;  %v4761_v36 = vshll.u32 %v5057_v35, 16 }
 0x4ef   : > { %v4773_v17 = vor.u32 %v4772_v20, %v4769_v22  ;;  %v4760_v42 = vrot.slane %v4758_v63, 6  ;;  %v4763_v34 = vrot.slane %v4761_v36, 7  ;;  %v4172_v18 = vld [vmem:[#allocation2 + $0x1b0] ss:$2 sm:$0xff]  ;;  %v4262_v0 = vld [vmem:[#allocation2 + $0x1b1] ss:$2 sm:$0xff] }
 0x4f0   : > { %v4218_v38 = vmax.f32 %v4128_v29, %v4172_v18  ;;  %v5241_v50 = vpop.f32.mrf.mxu1 }
 0x4f1   : > { %v4775_v11 = vrot.slane %v4773_v17, 4  ;;  %v4764_v32 = vor.u32 %v4763_v34, %v4760_v42  ;;  %v4170_v43 = vld [vmem:[#allocation2 + $0x1a0] ss:$2 sm:$0xff]  ;;  %3988 = vst.msk [vmem:[#allocation2 + $0x390] sm:$0xff] %vm3873_vm13, %v5241_v50  ;;  %v4260_v26 = vld [vmem:[#allocation2 + $0x1a1] ss:$2 sm:$0xff] }
 0x4f2   : > { %v4308_v6 = vmax.f32 %v4218_v38, %v4262_v0  ;;  %v4217_v52 = vmax.f32 %v4127_v33, %v4170_v43  ;;  %v3842_v39 = vpop.f32.mrf.mxu1 }
 0x4f3   : > { %4783 = vst.msk [vmem:[%s8444_s8 + $0x68] sm:$0x1] %vm4583_vm4, %v4775_v11  ;;  %v4765_v4 = vrot.slane %v4764_v32, 4  ;;  %v4780_v9 = vsel %vm9091_vm7, %v4764_v32, %v4779_v28 }
 0x4f4   : > { %3986 = vst.msk [vmem:[#allocation2 + $0x380] sm:$0xff] %vm3873_vm13, %v3842_v39  ;;  %v4344_v59 = vadd.f32 %v8935_v10, %v4308_v6  ;;  %v4307_v31 = vmax.f32 %v4217_v52, %v4260_v26  ;;  %4781 = vst [vmem:[%s8444_s8 + $0x60] sm:$0xe] %v4780_v9  ;;  %v5242_v16 = vpop.f32.mrf.mxu1 }
 0x4f5   : > { %v4774_v25 = vsel %vm9097_vm8, %v4765_v4, %v4773_v17  ;;  %3989 = vst.msk [vmem:[#allocation2 + $0x398] sm:$0xff] %vm3873_vm13, %v5242_v16 }
 0x4f6   : > { %4782 = vst.msk [vmem:[%s8444_s8 + $0x64] sm:$0xf] %vm4413_vm14, %v4774_v25  ;;  %v4374_v5 = vmax.f32 %v4344_v59, 0.0  ;;  %v4343_v24 = vadd.f32 %v8935_v10, %v4307_v31  ;;  %v3845_v1 = vpop.f32.mrf.mxu1 }
 0x4f7   : > { %3987 = vst.msk [vmem:[#allocation2 + $0x388] sm:$0xff] %vm3873_vm13, %v3845_v1 }
 0x4f8   : > { %v5044_v23 = vpack.c.bf16 %v4374_v5, %v4374_v5  ;;  %v4373_v27 = vmax.f32 %v4343_v24, 0.0 }
 0x4fa   : > { %v4595_v37 = vrot.slane %v5044_v23, 7  ;;  %v5043_v54 = vpack.c.bf16 %v4373_v27, %v4373_v27 }
 0x4fc   : > { %v4597_v45 = vrot.slane %v4595_v37, 4  ;;  %v4593_v47 = vrot.slane %v5043_v54, 7  ;;  %v4054_v63 = vld [vmem:[#allocation2 + $0x390] ss:$2 sm:$0xff]  ;;  %v4114_v36 = vld [vmem:[#allocation2 + $0x391] ss:$2 sm:$0xff] }
 0x4fd   : > { %v4144_v38 = vmax.f32 %v4054_v63, %v4114_v36 }
 0x4fe   : > { %v4608_v13 = vsel %vm9142_vm0, %v4597_v45, %v4607_v3  ;;  %v4594_v21 = vrot.slane %v4593_v47, 4  ;;  %4602 = vst.msk [vmem:[%s8444_s8 + $0x2c] sm:$0xe] %vm4576_vm15, %v4593_v47  ;;  %v4052_v42 = vld [vmem:[#allocation2 + $0x380] ss:$2 sm:$0xff] }
 0x4ff   : > { %4609 = vst [vmem:[%s8444_s8 + $0x34] sm:$0x1] %v4608_v13  ;;  %v5185_v49 = vpop.f32.mrf.mxu0  ;;  %v4112_v34 = vld [vmem:[#allocation2 + $0x381] ss:$2 sm:$0xff] }
 0x500   : > { %v4596_v55 = vsel %vm9147_vm3, %v4594_v21, %v4595_v37  ;;  %3932 = vst.msk [vmem:[#allocation2 + $0x1d0] sm:$0xff] %vm3873_vm13, %v5185_v49  ;;  %v4143_v0 = vmax.f32 %v4052_v42, %v4112_v34 }
 0x501   : > { %4603 = vst.msk [vmem:[%s8444_s8 + $0x30] sm:$0xf] %vm4413_vm14, %v4596_v55  ;;  %v3618_v41 = vpop.f32.mrf.mxu0  ;;  %v4799_v55 = vld [vmem:[%s8444_s8 + $0x70] sm:$0x1] }
 0x502   : > { %3930 = vst.msk [vmem:[#allocation2 + $0x1c0] sm:$0xff] %vm3873_vm13, %v3618_v41 }
 0x503   : > { %v5186_v53 = vpop.f32.mrf.mxu0 }
 0x504   : > { %3933 = vst.msk [vmem:[#allocation2 + $0x1d8] sm:$0xff] %vm3873_vm13, %v5186_v53 }
 0x505   : > { %v3621_v46 = vpop.f32.mrf.mxu0 }
 0x506   : > { %3931 = vst.msk [vmem:[#allocation2 + $0x1c8] sm:$0xff] %vm3873_vm13, %v3621_v46  ;;  %v4637_v27 = vld [vmem:[%s8444_s8 + $0x34] sm:$0xf] }
 0x50b   : > { %v4026_v44 = vld [vmem:[#allocation2 + $0x1d0] ss:$2 sm:$0xff]  ;;  %v4086_v56 = vld [vmem:[#allocation2 + $0x1d1] ss:$2 sm:$0xff] }
 0x50c   : > { %v4130_v19 = vmax.f32 %v4026_v44, %v4086_v56  ;;  %v5245_v60 = vpop.f32.mrf.mxu1 }
 0x50d   : > { %v4024_v30 = vld [vmem:[#allocation2 + $0x1c0] ss:$2 sm:$0xff]  ;;  %v4084_v7 = vld [vmem:[#allocation2 + $0x1c1] ss:$2 sm:$0xff]  ;;  %3992 = vst.msk [vmem:[#allocation2 + $0x3b0] sm:$0xff] %vm3873_vm13, %v5245_v60 }
 0x50e   : > { %v4220_v12 = vmax.f32 %v4130_v19, %v4176_v57  ;;  %v4129_v48 = vmax.f32 %v4024_v30, %v4084_v7  ;;  %v3858_v58 = vpop.f32.mrf.mxu1 }
 0x50f   : > { %3990 = vst.msk [vmem:[#allocation2 + $0x3a0] sm:$0xff] %vm3873_vm13, %v3858_v58 }
 0x510   : > { %v4310_v14 = vmax.f32 %v4220_v12, %v4266_v51  ;;  %v4219_v61 = vmax.f32 %v4129_v48, %v4174_v2  ;;  %v5246_v35 = vpop.f32.mrf.mxu1 }
 0x511   : > { %3994 = vst.msk [vmem:[#allocation2 + $0x3b8] sm:$0x3f] %vm3993_vm2, %v5246_v35 }
 0x512   : > { %v4346_v40 = vadd.f32 %v8935_v10, %v4310_v14  ;;  %v4309_v22 = vmax.f32 %v4219_v61, %v4264_v62  ;;  %v3861_v20 = vpop.f32.mrf.mxu1 }
 0x513   : > { %3991 = vst.msk [vmem:[#allocation2 + $0x3a8] sm:$0xff] %vm3873_vm13, %v3861_v20  ;;  %vm4616_vm13 = vmor %vm4605_vm9, %vm4615_vm10 }
 0x514   : > { %v4376_v29 = vmax.f32 %v4346_v40, 0.0  ;;  %v4345_v17 = vadd.f32 %v8935_v10, %v4309_v22 }
 0x516   : > { %v5046_v18 = vpack.c.bf16 %v4376_v29, %v4376_v29  ;;  %v4375_v33 = vmax.f32 %v4345_v17, 0.0 }
 0x518   : > { %v4626_v50 = vshrl.u32 %v5046_v18, 16  ;;  %v5045_v11 = vpack.c.bf16 %v4375_v33, %v4375_v33  ;;  %v4204_v32 = vld [vmem:[#allocation2 + $0x3b0] ss:$2 sm:$0xff]  ;;  %v4294_v28 = vld [vmem:[#allocation2 + $0x3b1] ss:$2 sm:$0xff]  ;;  %v4629_v9 = vshll.u32 %v5046_v18, 16 }
 0x519   : > { %v4234_v43 = vmax.f32 %v4144_v38, %v4204_v32 }
 0x51a   : > { %v4628_v6 = vrot.slane %v4626_v50, 7  ;;  %v4618_v52 = vshrl.u32 %v5045_v11, 16  ;;  %v4202_v39 = vld [vmem:[#allocation2 + $0x3a0] ss:$2 sm:$0xff]  ;;  %v4621_v31 = vshll.u32 %v5045_v11, 16 }
 0x51b   : > { %v4324_v4 = vmax.f32 %v4234_v43, %v4294_v28  ;;  %v4233_v26 = vmax.f32 %v4143_v0, %v4202_v39  ;;  %v4292_v16 = vld [vmem:[#allocation2 + $0x3a1] ss:$2 sm:$0xff] }
 0x51c   : > { %v4620_v59 = vrot.slane %v4618_v52, 7  ;;  %v4631_v24 = vor.u32 %v4629_v9, %v4628_v6 }
 0x51d   : > { %v4360_v25 = vadd.f32 %v8935_v10, %v4324_v4  ;;  %v4323_v5 = vmax.f32 %v4233_v26, %v4292_v16 }
 0x51e   : > { %v4623_v1 = vor.u32 %v4621_v31, %v4620_v59  ;;  %v4624_v23 = vrot.slane %v4620_v59, 4 }
 0x51f   : > { %v4390_v37 = vmax.f32 %v4360_v25, 0.0  ;;  %v4359_v54 = vadd.f32 %v8935_v10, %v4323_v5 }
 0x520   : > { %v4632_v3 = vsel %vm4616_vm13, %v4624_v23, %v4631_v24  ;;  %v4638_v45 = vsel %vm4636_vm5, %v4623_v1, %v4637_v27 }
 0x521   : > { %4639 = vst [vmem:[%s8444_s8 + $0x34] sm:$0xf] %v4638_v45  ;;  %4640 = vst.msk [vmem:[%s8444_s8 + $0x38] sm:$0xf] %vm4413_vm14, %v4632_v3  ;;  %v5060_v47 = vpack.c.bf16 %v4390_v37, %v4390_v37  ;;  %v4389_v13 = vmax.f32 %v4359_v54, 0.0 }
 0x523   : > { %v4791_v21 = vrot.slane %v5060_v47, 7  ;;  %v5059_v49 = vpack.c.bf16 %v4389_v13, %v4389_v13 }
 0x525   : > { %v4793_v41 = vrot.slane %v4791_v21, 4  ;;  %v4789_v53 = vrot.slane %v5059_v49, 7 }
 0x527   : > { %v4800_v46 = vsel %vm9142_vm0, %v4793_v41, %v4799_v55  ;;  %v4790_v44 = vrot.slane %v4789_v53, 4  ;;  %4797 = vst.msk [vmem:[%s8444_s8 + $0x68] sm:$0xe] %vm4576_vm15, %v4789_v53 }
 0x528   : > { %4801 = vst [vmem:[%s8444_s8 + $0x70] sm:$0x1] %v4800_v46 }
 0x529   : > { %v4792_v10 = vsel %vm9147_vm3, %v4790_v44, %v4791_v21 }
 0x52a   : > { %4798 = vst.msk [vmem:[%s8444_s8 + $0x6c] sm:$0xf] %vm4413_vm14, %v4792_v10 }
 0x52b PF: > { %s13_s12 = sadd.s32 1, %s5464_s12  }
 0x52c   : > { %p10_p4 = scmp.ge.s32.totalorder %s13_s12, 4  }
 0x52e   :  { %12 = sbr.rel (!%p10_p4) target bundleno = 1 (0x1), region = 181 }

</bundles_post_ra>
